<compile_context>
chip_gen: v7x
topology: tpu7x:2x2x1
jax: 0.10.0
libtpu: 0.0.40
codegen_flags: <defaults>
</compile_context>

<pallas_src>
import functools

import jax
import jax.numpy as jnp
from jax.experimental import pallas as pl
from jax.experimental.pallas import tpu as pltpu


# ----------------------------------------------------------------------------
# Pallas kernel: one ConvLSTM layer over the full sequence.
#   grid = (B, T), T innermost (sequential recurrence), B parallel.
# Inputs  (per grid step):
#   x_ref     : (H, W, Cin)        current frame for this batch element
#   w_ref     : (9*Ct, 4*Ch)       3x3 taps folded into K, gate order [i,f,o,c]
#   b_ref     : (1, 4*Ch)
# Output (per grid step):
#   h_seq_ref : (H, W, Ch)         h_t for this (b, t)
# Scratch (persistent across grid steps):
#   xh_ref    : (H+2, W+2, Ct)     zero-padded concat(x_t, h_{t-1})  (f32)
#   c_ref     : (H*W, Ch)          cell state                        (f32)
#   patch_ref : (H*W, 9*Ct)        im2col patch                      (mxu dtype)
# ----------------------------------------------------------------------------
def _convlstm_layer_kernel(x_ref, w_ref, b_ref, h_seq_ref,
                           xh_ref, c_ref, patch_ref,
                           *, cin, ch, H, W):
    ct = cin + ch
    t = pl.program_id(1)

    # t == 0: reset recurrent state for this batch element.  This also zeroes
    # the 1-pixel border of the padded concat buffer; only the interior is
    # written afterwards, so the border stays zero for every timestep.
    @pl.when(t == 0)
    def _():
        xh_ref[...] = jnp.zeros_like(xh_ref)
        c_ref[...] = jnp.zeros_like(c_ref)

    # In-kernel concat: current frame -> channels [0, cin) of the padded
    # buffer interior; channels [cin, ct) already hold h_{t-1} (written at the
    # end of the previous grid step, zeros at t == 0).
    xh_ref[1:H + 1, 1:W + 1, 0:cin] = x_ref[...].astype(jnp.float32)

    # im2col: fold the 3x3 taps into the contraction depth so the whole conv
    # becomes a single fat-K matmul instead of nine thin K=ct matmuls.
    for dy in range(3):
        for dx in range(3):
            tap = dy * 3 + dx
            patch_ref[:, tap * ct:(tap + 1) * ct] = (
                xh_ref[dy:dy + H, dx:dx + W, :]
                .reshape(H * W, ct)
                .astype(patch_ref.dtype))

    gates = jnp.dot(patch_ref[...], w_ref[...],
                    preferred_element_type=jnp.float32)
    gates = gates + b_ref[...].astype(jnp.float32)

    # Gate order matches the PyTorch module's torch.split: [i, f, o, c].
    i_g = jax.nn.sigmoid(gates[:, 0 * ch:1 * ch])
    f_g = jax.nn.sigmoid(gates[:, 1 * ch:2 * ch])
    o_g = jax.nn.sigmoid(gates[:, 2 * ch:3 * ch])
    g_g = jnp.tanh(gates[:, 3 * ch:4 * ch])

    c_t = f_g * c_ref[...] + i_g * g_g          # f32 cell state, stays in VMEM
    h_t = o_g * jnp.tanh(c_t)

    c_ref[...] = c_t
    h3 = h_t.reshape(H, W, ch)
    xh_ref[1:H + 1, 1:W + 1, cin:ct] = h3        # h_t feeds step t+1's conv
    h_seq_ref[...] = h3.astype(h_seq_ref.dtype)


def convlstm_layer(x_seq, w_hwio, bias, hidden_channels,
                   *, mxu_dtype=jnp.float32):
    """Run one ConvLSTM layer over a full sequence.

    x_seq : (T, B, H, W, Cin) activations (NHWC per frame).
    w_hwio: (3, 3, Cin + Ch, 4*Ch) conv weights, HWIO, gate order [i, f, o, c].
    bias  : (1, 4*Ch).
    Returns h_seq: (T, B, H, W, Ch).
    """
    T, B, H, W, cin = x_seq.shape
    ch = hidden_channels
    ct = cin + ch
    c4 = 4 * ch

    w2 = w_hwio.reshape(9 * ct, c4).astype(mxu_dtype)   # fold 3x3 taps into K
    b2 = bias.reshape(1, c4)

    kernel = functools.partial(_convlstm_layer_kernel,
                               cin=cin, ch=ch, H=H, W=W)

    h_seq = pl.pallas_call(
        kernel,
        out_shape=jax.ShapeDtypeStruct((T, B, H, W, ch), x_seq.dtype),
        grid=(B, T),
        in_specs=[
            # per-(b, t) input frame
            pl.BlockSpec((None, None, H, W, cin),
                         lambda b, t: (t, b, 0, 0, 0)),
            # weights / bias: constant index_map -> VMEM-resident for the grid
            pl.BlockSpec((9 * ct, c4), lambda b, t: (0, 0)),
            pl.BlockSpec((1, c4), lambda b, t: (0, 0)),
        ],
        out_specs=pl.BlockSpec((None, None, H, W, ch),
                               lambda b, t: (t, b, 0, 0, 0)),
        scratch_shapes=[
            pltpu.VMEM((H + 2, W + 2, ct), jnp.float32),  # padded concat(x, h)
            pltpu.VMEM((H * W, ch), jnp.float32),         # cell state (f32)
            pltpu.VMEM((H * W, 9 * ct), mxu_dtype),       # im2col patch
        ],
        compiler_params=pltpu.CompilerParams(
            dimension_semantics=("parallel", "arbitrary"),
            vmem_limit_bytes=32 * 1024 * 1024,
        ),
    )(x_seq, w2, b2)
    return h_seq


# ----------------------------------------------------------------------------
# Encoder wrapper (parameter setup + layer stacking = glue).
# ----------------------------------------------------------------------------
def init_params(key, in_channels, network_hidden_channels):
    all_in = [in_channels, *network_hidden_channels[:-1]]
    params = []
    for li, (cin, ch) in enumerate(zip(all_in, network_hidden_channels)):
        kw, kb = jax.random.split(jax.random.fold_in(key, li))
        ctot = cin + ch
        w = 0.1 * jax.random.normal(kw, (3, 3, ctot, 4 * ch), dtype=jnp.float32)
        b = 0.05 * jax.random.normal(kb, (1, 4 * ch), dtype=jnp.float32)
        params.append((w, b))
    return params


def convlstm_encoder_forward(params, network_hidden_channels, x,
                             *, mxu_dtype=jnp.float32):
    """x: (B, T, C_in, H, W), like the PyTorch module.

    Returns the last layer's final hidden state h, shape (B, hidden[-1], H, W).
    """
    # NCHW-over-time -> (T, B, H, W, C), one transpose for the whole sequence.
    feat = jnp.transpose(x, (1, 0, 3, 4, 2))
    for (w, b), ch in zip(params, network_hidden_channels):
        feat = convlstm_layer(feat, w, b, ch, mxu_dtype=mxu_dtype)
    h_last = feat[-1]                            # (B, H, W, Ch_last) at t=T-1
    return jnp.transpose(h_last, (0, 3, 1, 2))   # back to NCHW


# ----------------------------------------------------------------------------
# Pure-JAX reference (for correctness checking only).
# ----------------------------------------------------------------------------
def _ref_cell(x_in, h_prev, c_prev, w, b):
    xh = jnp.concatenate([x_in, h_prev], axis=-1)
    out = jax.lax.conv_general_dilated(
        xh, w, window_strides=(1, 1), padding="SAME",
        dimension_numbers=("NHWC", "HWIO", "NHWC"),
        precision=jax.lax.Precision.HIGHEST,
    ) + b.reshape(1, 1, 1, -1)
    ch = h_prev.shape[-1]
    i = jax.nn.sigmoid(out[..., :ch])
    f = jax.nn.sigmoid(out[..., ch:2 * ch])
    o = jax.nn.sigmoid(out[..., 2 * ch:3 * ch])
    g = jnp.tanh(out[..., 3 * ch:])
    c_t = f * c_prev + i * g
    h_t = o * jnp.tanh(c_t)
    return h_t, c_t


def _ref_forward(params, hidden, x):
    B, T, _, H, W = x.shape
    states = [None] * len(hidden)
    for t in range(T):
        for i in range(len(hidden)):
            x_in = jnp.transpose(x[:, t], (0, 2, 3, 1)) if i == 0 else states[i - 1][0]
            if t == 0:
                h_prev = jnp.zeros((B, H, W, hidden[i]), x.dtype)
                c_prev = jnp.zeros((B, H, W, hidden[i]), x.dtype)
            else:
                h_prev, c_prev = states[i]
            states[i] = _ref_cell(x_in, h_prev, c_prev, *params[i])
    return jnp.transpose(states[-1][0], (0, 3, 1, 2))


if __name__ == "__main__":
    B, T, C_IN, H, W = 2, 8, 4, 16, 16
    HIDDEN = [16, 32]

    key = jax.random.PRNGKey(0)
    k_x, k_p = jax.random.split(key)
    x = jax.random.normal(k_x, (B, T, C_IN, H, W), dtype=jnp.float32)
    params = init_params(k_p, C_IN, HIDDEN)

    fwd = jax.jit(functools.partial(convlstm_encoder_forward, params, HIDDEN))
    out = jax.block_until_ready(fwd(x))
    assert out.shape == (B, HIDDEN[-1], H, W), out.shape

    ref = jax.block_until_ready(_ref_forward(params, HIDDEN, x))
    if not jnp.allclose(out, ref, rtol=1e-3, atol=1e-3):
        err = float(jnp.max(jnp.abs(out - ref)))
        raise AssertionError(
            f"Pallas ConvLSTM output mismatch vs JAX reference (max abs err {err})")

    print("KERNEL_OK")
</pallas_src>

<mosaic_0001>
module attributes {stable_mosaic.version = 11 : i64} {
  func.func @_convlstm_layer_kernel(%arg0: i32, %arg1: i32, %arg2: memref<1x1x16x16x4xf32, #tpu.memory_space<vmem>>, %arg3: memref<180x64xf32, #tpu.memory_space<vmem>>, %arg4: memref<1x64xf32, #tpu.memory_space<vmem>>, %arg5: memref<1x1x16x16x16xf32, #tpu.memory_space<vmem>>, %arg6: memref<18x18x20xf32, #tpu.memory_space<vmem>>, %arg7: memref<256x16xf32, #tpu.memory_space<vmem>>, %arg8: memref<256x180xf32, #tpu.memory_space<vmem>>) attributes {dimension_semantics = [#tpu.dimension_semantics<parallel>, #tpu.dimension_semantics<arbitrary>], iteration_bounds = array<i64: 2, 8>, scalar_prefetch = 0 : i64, scratch_operands = 3 : i64, tpu.core_type = #tpu.core_type<tc>, window_params = [{transform_indices = @transform_0, window_bounds = array<i64: 1, 1, 16, 16, 4>}, {pipeline_mode = #tpu.pipeline_mode<synchronous>, transform_indices = @transform_1, window_bounds = array<i64: 180, 64>}, {pipeline_mode = #tpu.pipeline_mode<synchronous>, transform_indices = @transform_2, window_bounds = array<i64: 1, 64>}, {transform_indices = @transform_3, window_bounds = array<i64: 1, 1, 16, 16, 16>}]} {
    %c0_i32 = arith.constant 0 : i32
    %0 = arith.cmpi eq, %arg1, %c0_i32 : i32
    %1 = arith.extui %0 : i1 to i32
    %c0_i32_0 = arith.constant 0 : i32
    %2 = arith.cmpi ne, %1, %c0_i32_0 : i32
    scf.if %2 {
      %cst_63 = arith.constant 0.000000e+00 : f32
      %71 = vector.broadcast %cst_63 : f32 to vector<18x18x20xf32>
      %c0_64 = arith.constant 0 : index
      %c0_65 = arith.constant 0 : index
      %c0_66 = arith.constant 0 : index
      %72 = vector.load %arg6[%c0_64, %c0_65, %c0_66] : memref<18x18x20xf32, #tpu.memory_space<vmem>>, vector<18x18x20xf32>
      tpu.vector_store %arg6[%c0_64, %c0_65, %c0_66], %71 {strides = array<i32>} : memref<18x18x20xf32, #tpu.memory_space<vmem>>, vector<18x18x20xf32>,
      %cst_67 = arith.constant 0.000000e+00 : f32
      %73 = vector.broadcast %cst_67 : f32 to vector<256x16xf32>
      %c0_68 = arith.constant 0 : index
      %c0_69 = arith.constant 0 : index
      %74 = vector.load %arg7[%c0_68, %c0_69] : memref<256x16xf32, #tpu.memory_space<vmem>>, vector<256x16xf32>
      tpu.vector_store %arg7[%c0_68, %c0_69], %73 {strides = array<i32>} : memref<256x16xf32, #tpu.memory_space<vmem>>, vector<256x16xf32>,
    } else {
    }
    %c0 = arith.constant 0 : index
    %c0_1 = arith.constant 0 : index
    %c0_2 = arith.constant 0 : index
    %c0_3 = arith.constant 0 : index
    %c0_4 = arith.constant 0 : index
    %3 = vector.load %arg2[%c0, %c0_1, %c0_2, %c0_3, %c0_4] : memref<1x1x16x16x4xf32, #tpu.memory_space<vmem>>, vector<1x1x16x16x4xf32>
    %4 = vector.shape_cast %3 : vector<1x1x16x16x4xf32> to vector<16x16x4xf32>
    %c1 = arith.constant 1 : index
    %c1_5 = arith.constant 1 : index
    %c0_6 = arith.constant 0 : index
    %5 = vector.load %arg6[%c1, %c1_5, %c0_6] : memref<18x18x20xf32, #tpu.memory_space<vmem>>, vector<16x16x4xf32>
    tpu.vector_store %arg6[%c1, %c1_5, %c0_6], %4 {strides = array<i32>} : memref<18x18x20xf32, #tpu.memory_space<vmem>>, vector<16x16x4xf32>,
    %c0_7 = arith.constant 0 : index
    %c0_8 = arith.constant 0 : index
    %c0_9 = arith.constant 0 : index
    %6 = vector.load %arg6[%c0_7, %c0_8, %c0_9] : memref<18x18x20xf32, #tpu.memory_space<vmem>>, vector<16x16x20xf32>
    %7 = vector.shape_cast %6 : vector<16x16x20xf32> to vector<256x20xf32>
    %c0_10 = arith.constant 0 : index
    %c0_11 = arith.constant 0 : index
    %8 = vector.load %arg8[%c0_10, %c0_11] : memref<256x180xf32, #tpu.memory_space<vmem>>, vector<256x20xf32>
    tpu.vector_store %arg8[%c0_10, %c0_11], %7 {strides = array<i32>} : memref<256x180xf32, #tpu.memory_space<vmem>>, vector<256x20xf32>,
    %c0_12 = arith.constant 0 : index
    %c1_13 = arith.constant 1 : index
    %c0_14 = arith.constant 0 : index
    %9 = vector.load %arg6[%c0_12, %c1_13, %c0_14] : memref<18x18x20xf32, #tpu.memory_space<vmem>>, vector<16x16x20xf32>
    %10 = vector.shape_cast %9 : vector<16x16x20xf32> to vector<256x20xf32>
    %c0_15 = arith.constant 0 : index
    %c20 = arith.constant 20 : index
    %11 = vector.load %arg8[%c0_15, %c20] : memref<256x180xf32, #tpu.memory_space<vmem>>, vector<256x20xf32>
    tpu.vector_store %arg8[%c0_15, %c20], %10 {strides = array<i32>} : memref<256x180xf32, #tpu.memory_space<vmem>>, vector<256x20xf32>,
    %c0_16 = arith.constant 0 : index
    %c2 = arith.constant 2 : index
    %c0_17 = arith.constant 0 : index
    %12 = vector.load %arg6[%c0_16, %c2, %c0_17] : memref<18x18x20xf32, #tpu.memory_space<vmem>>, vector<16x16x20xf32>
    %13 = vector.shape_cast %12 : vector<16x16x20xf32> to vector<256x20xf32>
    %c0_18 = arith.constant 0 : index
    %c40 = arith.constant 40 : index
    %14 = vector.load %arg8[%c0_18, %c40] : memref<256x180xf32, #tpu.memory_space<vmem>>, vector<256x20xf32>
    tpu.vector_store %arg8[%c0_18, %c40], %13 {strides = array<i32>} : memref<256x180xf32, #tpu.memory_space<vmem>>, vector<256x20xf32>,
    %c1_19 = arith.constant 1 : index
    %c0_20 = arith.constant 0 : index
    %c0_21 = arith.constant 0 : index
    %15 = vector.load %arg6[%c1_19, %c0_20, %c0_21] : memref<18x18x20xf32, #tpu.memory_space<vmem>>, vector<16x16x20xf32>
    %16 = vector.shape_cast %15 : vector<16x16x20xf32> to vector<256x20xf32>
    %c0_22 = arith.constant 0 : index
    %c60 = arith.constant 60 : index
    %17 = vector.load %arg8[%c0_22, %c60] : memref<256x180xf32, #tpu.memory_space<vmem>>, vector<256x20xf32>
    tpu.vector_store %arg8[%c0_22, %c60], %16 {strides = array<i32>} : memref<256x180xf32, #tpu.memory_space<vmem>>, vector<256x20xf32>,
    %c1_23 = arith.constant 1 : index
    %c1_24 = arith.constant 1 : index
    %c0_25 = arith.constant 0 : index
    %18 = vector.load %arg6[%c1_23, %c1_24, %c0_25] : memref<18x18x20xf32, #tpu.memory_space<vmem>>, vector<16x16x20xf32>
    %19 = vector.shape_cast %18 : vector<16x16x20xf32> to vector<256x20xf32>
    %c0_26 = arith.constant 0 : index
    %c80 = arith.constant 80 : index
    %20 = vector.load %arg8[%c0_26, %c80] : memref<256x180xf32, #tpu.memory_space<vmem>>, vector<256x20xf32>
    tpu.vector_store %arg8[%c0_26, %c80], %19 {strides = array<i32>} : memref<256x180xf32, #tpu.memory_space<vmem>>, vector<256x20xf32>,
    %c1_27 = arith.constant 1 : index
    %c2_28 = arith.constant 2 : index
    %c0_29 = arith.constant 0 : index
    %21 = vector.load %arg6[%c1_27, %c2_28, %c0_29] : memref<18x18x20xf32, #tpu.memory_space<vmem>>, vector<16x16x20xf32>
    %22 = vector.shape_cast %21 : vector<16x16x20xf32> to vector<256x20xf32>
    %c0_30 = arith.constant 0 : index
    %c100 = arith.constant 100 : index
    %23 = vector.load %arg8[%c0_30, %c100] : memref<256x180xf32, #tpu.memory_space<vmem>>, vector<256x20xf32>
    tpu.vector_store %arg8[%c0_30, %c100], %22 {strides = array<i32>} : memref<256x180xf32, #tpu.memory_space<vmem>>, vector<256x20xf32>,
    %c2_31 = arith.constant 2 : index
    %c0_32 = arith.constant 0 : index
    %c0_33 = arith.constant 0 : index
    %24 = vector.load %arg6[%c2_31, %c0_32, %c0_33] : memref<18x18x20xf32, #tpu.memory_space<vmem>>, vector<16x16x20xf32>
    %25 = vector.shape_cast %24 : vector<16x16x20xf32> to vector<256x20xf32>
    %c0_34 = arith.constant 0 : index
    %c120 = arith.constant 120 : index
    %26 = vector.load %arg8[%c0_34, %c120] : memref<256x180xf32, #tpu.memory_space<vmem>>, vector<256x20xf32>
    tpu.vector_store %arg8[%c0_34, %c120], %25 {strides = array<i32>} : memref<256x180xf32, #tpu.memory_space<vmem>>, vector<256x20xf32>,
    %c2_35 = arith.constant 2 : index
    %c1_36 = arith.constant 1 : index
    %c0_37 = arith.constant 0 : index
    %27 = vector.load %arg6[%c2_35, %c1_36, %c0_37] : memref<18x18x20xf32, #tpu.memory_space<vmem>>, vector<16x16x20xf32>
    %28 = vector.shape_cast %27 : vector<16x16x20xf32> to vector<256x20xf32>
    %c0_38 = arith.constant 0 : index
    %c140 = arith.constant 140 : index
    %29 = vector.load %arg8[%c0_38, %c140] : memref<256x180xf32, #tpu.memory_space<vmem>>, vector<256x20xf32>
    tpu.vector_store %arg8[%c0_38, %c140], %28 {strides = array<i32>} : memref<256x180xf32, #tpu.memory_space<vmem>>, vector<256x20xf32>,
    %c2_39 = arith.constant 2 : index
    %c2_40 = arith.constant 2 : index
    %c0_41 = arith.constant 0 : index
    %30 = vector.load %arg6[%c2_39, %c2_40, %c0_41] : memref<18x18x20xf32, #tpu.memory_space<vmem>>, vector<16x16x20xf32>
    %31 = vector.shape_cast %30 : vector<16x16x20xf32> to vector<256x20xf32>
    %c0_42 = arith.constant 0 : index
    %c160 = arith.constant 160 : index
    %32 = vector.load %arg8[%c0_42, %c160] : memref<256x180xf32, #tpu.memory_space<vmem>>, vector<256x20xf32>
    tpu.vector_store %arg8[%c0_42, %c160], %31 {strides = array<i32>} : memref<256x180xf32, #tpu.memory_space<vmem>>, vector<256x20xf32>,
    %c0_43 = arith.constant 0 : index
    %c0_44 = arith.constant 0 : index
    %33 = vector.load %arg8[%c0_43, %c0_44] : memref<256x180xf32, #tpu.memory_space<vmem>>, vector<256x180xf32>
    %c0_45 = arith.constant 0 : index
    %c0_46 = arith.constant 0 : index
    %34 = vector.load %arg3[%c0_45, %c0_46] : memref<180x64xf32, #tpu.memory_space<vmem>>, vector<180x64xf32>
    %cst = arith.constant dense<0.000000e+00> : vector<256x64xf32>
    %35 = tpu.matmul %33, %34, %cst {dimension_numbers = #tpu.dot_dimension_numbers<[1], [0], [0], [1], [0, 0, 1, 1], [], []>} : vector<256x180xf32>, vector<180x64xf32>, vector<256x64xf32> -> vector<256x64xf32>
    %c0_47 = arith.constant 0 : index
    %c0_48 = arith.constant 0 : index
    %36 = vector.load %arg4[%c0_47, %c0_48] : memref<1x64xf32, #tpu.memory_space<vmem>>, vector<1x64xf32>
    %37 = vector.broadcast %36 : vector<1x64xf32> to vector<256x64xf32>
    %38 = arith.addf %35, %37 : vector<256x64xf32>
    %39 = vector.extract_strided_slice %38 {offsets = [0, 0], sizes = [256, 16], strides = [1, 1]} : vector<256x64xf32> to vector<256x16xf32>
    %40 = arith.negf %39 : vector<256x16xf32>
    %41 = math.exp %40 : vector<256x16xf32>
    %cst_49 = arith.constant 1.000000e+00 : f32
    %42 = vector.broadcast %cst_49 : f32 to vector<256x16xf32>
    %43 = arith.addf %42, %41 : vector<256x16xf32>
    %44 = arith.divf %42, %43 : vector<256x16xf32>
    %45 = vector.extract_strided_slice %38 {offsets = [0, 16], sizes = [256, 16], strides = [1, 1]} : vector<256x64xf32> to vector<256x16xf32>
    %46 = arith.negf %45 : vector<256x16xf32>
    %47 = math.exp %46 : vector<256x16xf32>
    %cst_50 = arith.constant 1.000000e+00 : f32
    %48 = vector.broadcast %cst_50 : f32 to vector<256x16xf32>
    %49 = arith.addf %48, %47 : vector<256x16xf32>
    %50 = arith.divf %48, %49 : vector<256x16xf32>
    %51 = vector.extract_strided_slice %38 {offsets = [0, 32], sizes = [256, 16], strides = [1, 1]} : vector<256x64xf32> to vector<256x16xf32>
    %52 = arith.negf %51 : vector<256x16xf32>
    %53 = math.exp %52 : vector<256x16xf32>
    %cst_51 = arith.constant 1.000000e+00 : f32
    %54 = vector.broadcast %cst_51 : f32 to vector<256x16xf32>
    %55 = arith.addf %54, %53 : vector<256x16xf32>
    %56 = arith.divf %54, %55 : vector<256x16xf32>
    %57 = vector.extract_strided_slice %38 {offsets = [0, 48], sizes = [256, 16], strides = [1, 1]} : vector<256x64xf32> to vector<256x16xf32>
    %58 = math.tanh %57 : vector<256x16xf32>
    %c0_52 = arith.constant 0 : index
    %c0_53 = arith.constant 0 : index
    %59 = vector.load %arg7[%c0_52, %c0_53] : memref<256x16xf32, #tpu.memory_space<vmem>>, vector<256x16xf32>
    %60 = arith.mulf %50, %59 : vector<256x16xf32>
    %61 = arith.mulf %44, %58 : vector<256x16xf32>
    %62 = arith.addf %60, %61 : vector<256x16xf32>
    %63 = math.tanh %62 : vector<256x16xf32>
    %64 = arith.mulf %56, %63 : vector<256x16xf32>
    %c0_54 = arith.constant 0 : index
    %c0_55 = arith.constant 0 : index
    %65 = vector.load %arg7[%c0_54, %c0_55] : memref<256x16xf32, #tpu.memory_space<vmem>>, vector<256x16xf32>
    tpu.vector_store %arg7[%c0_54, %c0_55], %62 {strides = array<i32>} : memref<256x16xf32, #tpu.memory_space<vmem>>, vector<256x16xf32>,
    %66 = vector.shape_cast %64 : vector<256x16xf32> to vector<16x16x16xf32>
    %c1_56 = arith.constant 1 : index
    %c1_57 = arith.constant 1 : index
    %c4 = arith.constant 4 : index
    %67 = vector.load %arg6[%c1_56, %c1_57, %c4] : memref<18x18x20xf32, #tpu.memory_space<vmem>>, vector<16x16x16xf32>
    tpu.vector_store %arg6[%c1_56, %c1_57, %c4], %66 {strides = array<i32>} : memref<18x18x20xf32, #tpu.memory_space<vmem>>, vector<16x16x16xf32>,
    %c0_58 = arith.constant 0 : index
    %c0_59 = arith.constant 0 : index
    %c0_60 = arith.constant 0 : index
    %c0_61 = arith.constant 0 : index
    %c0_62 = arith.constant 0 : index
    %68 = vector.load %arg5[%c0_58, %c0_59, %c0_60, %c0_61, %c0_62] : memref<1x1x16x16x16xf32, #tpu.memory_space<vmem>>, vector<1x1x16x16x16xf32>
    %69 = vector.shape_cast %68 : vector<1x1x16x16x16xf32> to vector<16x16x16xf32>
    %70 = vector.shape_cast %66 : vector<16x16x16xf32> to vector<1x1x16x16x16xf32>
    tpu.vector_store %arg5[%c0_58, %c0_59, %c0_60, %c0_61, %c0_62], %70 {strides = array<i32>} : memref<1x1x16x16x16xf32, #tpu.memory_space<vmem>>, vector<1x1x16x16x16xf32>,
    return
  }
  func.func @transform_0(%arg0: i32, %arg1: i32) -> (i32, i32, i32, i32, i32) {
    %c0_i32 = arith.constant 0 : i32
    %c0_i32_0 = arith.constant 0 : i32
    %c0_i32_1 = arith.constant 0 : i32
    %c0_i32_2 = arith.constant 0 : i32
    return %arg1, %arg0, %c0_i32, %c0_i32_0, %c0_i32_1 : i32, i32, i32, i32, i32
  }
  func.func @transform_1(%arg0: i32, %arg1: i32) -> (i32, i32) {
    %c0_i32 = arith.constant 0 : i32
    %c0_i32_0 = arith.constant 0 : i32
    %c0_i32_1 = arith.constant 0 : i32
    return %c0_i32, %c0_i32_0 : i32, i32
  }
  func.func @transform_2(%arg0: i32, %arg1: i32) -> (i32, i32) {
    %c0_i32 = arith.constant 0 : i32
    %c0_i32_0 = arith.constant 0 : i32
    %c0_i32_1 = arith.constant 0 : i32
    return %c0_i32, %c0_i32_0 : i32, i32
  }
  func.func @transform_3(%arg0: i32, %arg1: i32) -> (i32, i32, i32, i32, i32) {
    %c0_i32 = arith.constant 0 : i32
    %c0_i32_0 = arith.constant 0 : i32
    %c0_i32_1 = arith.constant 0 : i32
    %c0_i32_2 = arith.constant 0 : i32
    return %arg1, %arg0, %c0_i32, %c0_i32_0, %c0_i32_1 : i32, i32, i32, i32, i32
  }
}

module attributes {stable_mosaic.version = 11 : i64} {
  func.func @_convlstm_layer_kernel(%arg0: i32, %arg1: i32, %arg2: memref<1x1x16x16x16xf32, #tpu.memory_space<vmem>>, %arg3: memref<432x128xf32, #tpu.memory_space<vmem>>, %arg4: memref<1x128xf32, #tpu.memory_space<vmem>>, %arg5: memref<1x1x16x16x32xf32, #tpu.memory_space<vmem>>, %arg6: memref<18x18x48xf32, #tpu.memory_space<vmem>>, %arg7: memref<256x32xf32, #tpu.memory_space<vmem>>, %arg8: memref<256x432xf32, #tpu.memory_space<vmem>>) attributes {dimension_semantics = [#tpu.dimension_semantics<parallel>, #tpu.dimension_semantics<arbitrary>], iteration_bounds = array<i64: 2, 8>, scalar_prefetch = 0 : i64, scratch_operands = 3 : i64, tpu.core_type = #tpu.core_type<tc>, window_params = [{transform_indices = @transform_0, window_bounds = array<i64: 1, 1, 16, 16, 16>}, {pipeline_mode = #tpu.pipeline_mode<synchronous>, transform_indices = @transform_1, window_bounds = array<i64: 432, 128>}, {pipeline_mode = #tpu.pipeline_mode<synchronous>, transform_indices = @transform_2, window_bounds = array<i64: 1, 128>}, {transform_indices = @transform_3, window_bounds = array<i64: 1, 1, 16, 16, 32>}]} {
    %c0_i32 = arith.constant 0 : i32
    %0 = arith.cmpi eq, %arg1, %c0_i32 : i32
    %1 = arith.extui %0 : i1 to i32
    %c0_i32_0 = arith.constant 0 : i32
    %2 = arith.cmpi ne, %1, %c0_i32_0 : i32
    scf.if %2 {
      %cst_63 = arith.constant 0.000000e+00 : f32
      %71 = vector.broadcast %cst_63 : f32 to vector<18x18x48xf32>
      %c0_64 = arith.constant 0 : index
      %c0_65 = arith.constant 0 : index
      %c0_66 = arith.constant 0 : index
      %72 = vector.load %arg6[%c0_64, %c0_65, %c0_66] : memref<18x18x48xf32, #tpu.memory_space<vmem>>, vector<18x18x48xf32>
      tpu.vector_store %arg6[%c0_64, %c0_65, %c0_66], %71 {strides = array<i32>} : memref<18x18x48xf32, #tpu.memory_space<vmem>>, vector<18x18x48xf32>,
      %cst_67 = arith.constant 0.000000e+00 : f32
      %73 = vector.broadcast %cst_67 : f32 to vector<256x32xf32>
      %c0_68 = arith.constant 0 : index
      %c0_69 = arith.constant 0 : index
      %74 = vector.load %arg7[%c0_68, %c0_69] : memref<256x32xf32, #tpu.memory_space<vmem>>, vector<256x32xf32>
      tpu.vector_store %arg7[%c0_68, %c0_69], %73 {strides = array<i32>} : memref<256x32xf32, #tpu.memory_space<vmem>>, vector<256x32xf32>,
    } else {
    }
    %c0 = arith.constant 0 : index
    %c0_1 = arith.constant 0 : index
    %c0_2 = arith.constant 0 : index
    %c0_3 = arith.constant 0 : index
    %c0_4 = arith.constant 0 : index
    %3 = vector.load %arg2[%c0, %c0_1, %c0_2, %c0_3, %c0_4] : memref<1x1x16x16x16xf32, #tpu.memory_space<vmem>>, vector<1x1x16x16x16xf32>
    %4 = vector.shape_cast %3 : vector<1x1x16x16x16xf32> to vector<16x16x16xf32>
    %c1 = arith.constant 1 : index
    %c1_5 = arith.constant 1 : index
    %c0_6 = arith.constant 0 : index
    %5 = vector.load %arg6[%c1, %c1_5, %c0_6] : memref<18x18x48xf32, #tpu.memory_space<vmem>>, vector<16x16x16xf32>
    tpu.vector_store %arg6[%c1, %c1_5, %c0_6], %4 {strides = array<i32>} : memref<18x18x48xf32, #tpu.memory_space<vmem>>, vector<16x16x16xf32>,
    %c0_7 = arith.constant 0 : index
    %c0_8 = arith.constant 0 : index
    %c0_9 = arith.constant 0 : index
    %6 = vector.load %arg6[%c0_7, %c0_8, %c0_9] : memref<18x18x48xf32, #tpu.memory_space<vmem>>, vector<16x16x48xf32>
    %7 = vector.shape_cast %6 : vector<16x16x48xf32> to vector<256x48xf32>
    %c0_10 = arith.constant 0 : index
    %c0_11 = arith.constant 0 : index
    %8 = vector.load %arg8[%c0_10, %c0_11] : memref<256x432xf32, #tpu.memory_space<vmem>>, vector<256x48xf32>
    tpu.vector_store %arg8[%c0_10, %c0_11], %7 {strides = array<i32>} : memref<256x432xf32, #tpu.memory_space<vmem>>, vector<256x48xf32>,
    %c0_12 = arith.constant 0 : index
    %c1_13 = arith.constant 1 : index
    %c0_14 = arith.constant 0 : index
    %9 = vector.load %arg6[%c0_12, %c1_13, %c0_14] : memref<18x18x48xf32, #tpu.memory_space<vmem>>, vector<16x16x48xf32>
    %10 = vector.shape_cast %9 : vector<16x16x48xf32> to vector<256x48xf32>
    %c0_15 = arith.constant 0 : index
    %c48 = arith.constant 48 : index
    %11 = vector.load %arg8[%c0_15, %c48] : memref<256x432xf32, #tpu.memory_space<vmem>>, vector<256x48xf32>
    tpu.vector_store %arg8[%c0_15, %c48], %10 {strides = array<i32>} : memref<256x432xf32, #tpu.memory_space<vmem>>, vector<256x48xf32>,
    %c0_16 = arith.constant 0 : index
    %c2 = arith.constant 2 : index
    %c0_17 = arith.constant 0 : index
    %12 = vector.load %arg6[%c0_16, %c2, %c0_17] : memref<18x18x48xf32, #tpu.memory_space<vmem>>, vector<16x16x48xf32>
    %13 = vector.shape_cast %12 : vector<16x16x48xf32> to vector<256x48xf32>
    %c0_18 = arith.constant 0 : index
    %c96 = arith.constant 96 : index
    %14 = vector.load %arg8[%c0_18, %c96] : memref<256x432xf32, #tpu.memory_space<vmem>>, vector<256x48xf32>
    tpu.vector_store %arg8[%c0_18, %c96], %13 {strides = array<i32>} : memref<256x432xf32, #tpu.memory_space<vmem>>, vector<256x48xf32>,
    %c1_19 = arith.constant 1 : index
    %c0_20 = arith.constant 0 : index
    %c0_21 = arith.constant 0 : index
    %15 = vector.load %arg6[%c1_19, %c0_20, %c0_21] : memref<18x18x48xf32, #tpu.memory_space<vmem>>, vector<16x16x48xf32>
    %16 = vector.shape_cast %15 : vector<16x16x48xf32> to vector<256x48xf32>
    %c0_22 = arith.constant 0 : index
    %c144 = arith.constant 144 : index
    %17 = vector.load %arg8[%c0_22, %c144] : memref<256x432xf32, #tpu.memory_space<vmem>>, vector<256x48xf32>
    tpu.vector_store %arg8[%c0_22, %c144], %16 {strides = array<i32>} : memref<256x432xf32, #tpu.memory_space<vmem>>, vector<256x48xf32>,
    %c1_23 = arith.constant 1 : index
    %c1_24 = arith.constant 1 : index
    %c0_25 = arith.constant 0 : index
    %18 = vector.load %arg6[%c1_23, %c1_24, %c0_25] : memref<18x18x48xf32, #tpu.memory_space<vmem>>, vector<16x16x48xf32>
    %19 = vector.shape_cast %18 : vector<16x16x48xf32> to vector<256x48xf32>
    %c0_26 = arith.constant 0 : index
    %c192 = arith.constant 192 : index
    %20 = vector.load %arg8[%c0_26, %c192] : memref<256x432xf32, #tpu.memory_space<vmem>>, vector<256x48xf32>
    tpu.vector_store %arg8[%c0_26, %c192], %19 {strides = array<i32>} : memref<256x432xf32, #tpu.memory_space<vmem>>, vector<256x48xf32>,
    %c1_27 = arith.constant 1 : index
    %c2_28 = arith.constant 2 : index
    %c0_29 = arith.constant 0 : index
    %21 = vector.load %arg6[%c1_27, %c2_28, %c0_29] : memref<18x18x48xf32, #tpu.memory_space<vmem>>, vector<16x16x48xf32>
    %22 = vector.shape_cast %21 : vector<16x16x48xf32> to vector<256x48xf32>
    %c0_30 = arith.constant 0 : index
    %c240 = arith.constant 240 : index
    %23 = vector.load %arg8[%c0_30, %c240] : memref<256x432xf32, #tpu.memory_space<vmem>>, vector<256x48xf32>
    tpu.vector_store %arg8[%c0_30, %c240], %22 {strides = array<i32>} : memref<256x432xf32, #tpu.memory_space<vmem>>, vector<256x48xf32>,
    %c2_31 = arith.constant 2 : index
    %c0_32 = arith.constant 0 : index
    %c0_33 = arith.constant 0 : index
    %24 = vector.load %arg6[%c2_31, %c0_32, %c0_33] : memref<18x18x48xf32, #tpu.memory_space<vmem>>, vector<16x16x48xf32>
    %25 = vector.shape_cast %24 : vector<16x16x48xf32> to vector<256x48xf32>
    %c0_34 = arith.constant 0 : index
    %c288 = arith.constant 288 : index
    %26 = vector.load %arg8[%c0_34, %c288] : memref<256x432xf32, #tpu.memory_space<vmem>>, vector<256x48xf32>
    tpu.vector_store %arg8[%c0_34, %c288], %25 {strides = array<i32>} : memref<256x432xf32, #tpu.memory_space<vmem>>, vector<256x48xf32>,
    %c2_35 = arith.constant 2 : index
    %c1_36 = arith.constant 1 : index
    %c0_37 = arith.constant 0 : index
    %27 = vector.load %arg6[%c2_35, %c1_36, %c0_37] : memref<18x18x48xf32, #tpu.memory_space<vmem>>, vector<16x16x48xf32>
    %28 = vector.shape_cast %27 : vector<16x16x48xf32> to vector<256x48xf32>
    %c0_38 = arith.constant 0 : index
    %c336 = arith.constant 336 : index
    %29 = vector.load %arg8[%c0_38, %c336] : memref<256x432xf32, #tpu.memory_space<vmem>>, vector<256x48xf32>
    tpu.vector_store %arg8[%c0_38, %c336], %28 {strides = array<i32>} : memref<256x432xf32, #tpu.memory_space<vmem>>, vector<256x48xf32>,
    %c2_39 = arith.constant 2 : index
    %c2_40 = arith.constant 2 : index
    %c0_41 = arith.constant 0 : index
    %30 = vector.load %arg6[%c2_39, %c2_40, %c0_41] : memref<18x18x48xf32, #tpu.memory_space<vmem>>, vector<16x16x48xf32>
    %31 = vector.shape_cast %30 : vector<16x16x48xf32> to vector<256x48xf32>
    %c0_42 = arith.constant 0 : index
    %c384 = arith.constant 384 : index
    %32 = vector.load %arg8[%c0_42, %c384] : memref<256x432xf32, #tpu.memory_space<vmem>>, vector<256x48xf32>
    tpu.vector_store %arg8[%c0_42, %c384], %31 {strides = array<i32>} : memref<256x432xf32, #tpu.memory_space<vmem>>, vector<256x48xf32>,
    %c0_43 = arith.constant 0 : index
    %c0_44 = arith.constant 0 : index
    %33 = vector.load %arg8[%c0_43, %c0_44] : memref<256x432xf32, #tpu.memory_space<vmem>>, vector<256x432xf32>
    %c0_45 = arith.constant 0 : index
    %c0_46 = arith.constant 0 : index
    %34 = vector.load %arg3[%c0_45, %c0_46] : memref<432x128xf32, #tpu.memory_space<vmem>>, vector<432x128xf32>
    %cst = arith.constant dense<0.000000e+00> : vector<256x128xf32>
    %35 = tpu.matmul %33, %34, %cst {dimension_numbers = #tpu.dot_dimension_numbers<[1], [0], [0], [1], [0, 0, 1, 1], [], []>} : vector<256x432xf32>, vector<432x128xf32>, vector<256x128xf32> -> vector<256x128xf32>
    %c0_47 = arith.constant 0 : index
    %c0_48 = arith.constant 0 : index
    %36 = vector.load %arg4[%c0_47, %c0_48] : memref<1x128xf32, #tpu.memory_space<vmem>>, vector<1x128xf32>
    %37 = vector.broadcast %36 : vector<1x128xf32> to vector<256x128xf32>
    %38 = arith.addf %35, %37 : vector<256x128xf32>
    %39 = vector.extract_strided_slice %38 {offsets = [0, 0], sizes = [256, 32], strides = [1, 1]} : vector<256x128xf32> to vector<256x32xf32>
    %40 = arith.negf %39 : vector<256x32xf32>
    %41 = math.exp %40 : vector<256x32xf32>
    %cst_49 = arith.constant 1.000000e+00 : f32
    %42 = vector.broadcast %cst_49 : f32 to vector<256x32xf32>
    %43 = arith.addf %42, %41 : vector<256x32xf32>
    %44 = arith.divf %42, %43 : vector<256x32xf32>
    %45 = vector.extract_strided_slice %38 {offsets = [0, 32], sizes = [256, 32], strides = [1, 1]} : vector<256x128xf32> to vector<256x32xf32>
    %46 = arith.negf %45 : vector<256x32xf32>
    %47 = math.exp %46 : vector<256x32xf32>
    %cst_50 = arith.constant 1.000000e+00 : f32
    %48 = vector.broadcast %cst_50 : f32 to vector<256x32xf32>
    %49 = arith.addf %48, %47 : vector<256x32xf32>
    %50 = arith.divf %48, %49 : vector<256x32xf32>
    %51 = vector.extract_strided_slice %38 {offsets = [0, 64], sizes = [256, 32], strides = [1, 1]} : vector<256x128xf32> to vector<256x32xf32>
    %52 = arith.negf %51 : vector<256x32xf32>
    %53 = math.exp %52 : vector<256x32xf32>
    %cst_51 = arith.constant 1.000000e+00 : f32
    %54 = vector.broadcast %cst_51 : f32 to vector<256x32xf32>
    %55 = arith.addf %54, %53 : vector<256x32xf32>
    %56 = arith.divf %54, %55 : vector<256x32xf32>
    %57 = vector.extract_strided_slice %38 {offsets = [0, 96], sizes = [256, 32], strides = [1, 1]} : vector<256x128xf32> to vector<256x32xf32>
    %58 = math.tanh %57 : vector<256x32xf32>
    %c0_52 = arith.constant 0 : index
    %c0_53 = arith.constant 0 : index
    %59 = vector.load %arg7[%c0_52, %c0_53] : memref<256x32xf32, #tpu.memory_space<vmem>>, vector<256x32xf32>
    %60 = arith.mulf %50, %59 : vector<256x32xf32>
    %61 = arith.mulf %44, %58 : vector<256x32xf32>
    %62 = arith.addf %60, %61 : vector<256x32xf32>
    %63 = math.tanh %62 : vector<256x32xf32>
    %64 = arith.mulf %56, %63 : vector<256x32xf32>
    %c0_54 = arith.constant 0 : index
    %c0_55 = arith.constant 0 : index
    %65 = vector.load %arg7[%c0_54, %c0_55] : memref<256x32xf32, #tpu.memory_space<vmem>>, vector<256x32xf32>
    tpu.vector_store %arg7[%c0_54, %c0_55], %62 {strides = array<i32>} : memref<256x32xf32, #tpu.memory_space<vmem>>, vector<256x32xf32>,
    %66 = vector.shape_cast %64 : vector<256x32xf32> to vector<16x16x32xf32>
    %c1_56 = arith.constant 1 : index
    %c1_57 = arith.constant 1 : index
    %c16 = arith.constant 16 : index
    %67 = vector.load %arg6[%c1_56, %c1_57, %c16] : memref<18x18x48xf32, #tpu.memory_space<vmem>>, vector<16x16x32xf32>
    tpu.vector_store %arg6[%c1_56, %c1_57, %c16], %66 {strides = array<i32>} : memref<18x18x48xf32, #tpu.memory_space<vmem>>, vector<16x16x32xf32>,
    %c0_58 = arith.constant 0 : index
    %c0_59 = arith.constant 0 : index
    %c0_60 = arith.constant 0 : index
    %c0_61 = arith.constant 0 : index
    %c0_62 = arith.constant 0 : index
    %68 = vector.load %arg5[%c0_58, %c0_59, %c0_60, %c0_61, %c0_62] : memref<1x1x16x16x32xf32, #tpu.memory_space<vmem>>, vector<1x1x16x16x32xf32>
    %69 = vector.shape_cast %68 : vector<1x1x16x16x32xf32> to vector<16x16x32xf32>
    %70 = vector.shape_cast %66 : vector<16x16x32xf32> to vector<1x1x16x16x32xf32>
    tpu.vector_store %arg5[%c0_58, %c0_59, %c0_60, %c0_61, %c0_62], %70 {strides = array<i32>} : memref<1x1x16x16x32xf32, #tpu.memory_space<vmem>>, vector<1x1x16x16x32xf32>,
    return
  }
  func.func @transform_0(%arg0: i32, %arg1: i32) -> (i32, i32, i32, i32, i32) {
    %c0_i32 = arith.constant 0 : i32
    %c0_i32_0 = arith.constant 0 : i32
    %c0_i32_1 = arith.constant 0 : i32
    %c0_i32_2 = arith.constant 0 : i32
    return %arg1, %arg0, %c0_i32, %c0_i32_0, %c0_i32_1 : i32, i32, i32, i32, i32
  }
  func.func @transform_1(%arg0: i32, %arg1: i32) -> (i32, i32) {
    %c0_i32 = arith.constant 0 : i32
    %c0_i32_0 = arith.constant 0 : i32
    %c0_i32_1 = arith.constant 0 : i32
    return %c0_i32, %c0_i32_0 : i32, i32
  }
  func.func @transform_2(%arg0: i32, %arg1: i32) -> (i32, i32) {
    %c0_i32 = arith.constant 0 : i32
    %c0_i32_0 = arith.constant 0 : i32
    %c0_i32_1 = arith.constant 0 : i32
    return %c0_i32, %c0_i32_0 : i32, i32
  }
  func.func @transform_3(%arg0: i32, %arg1: i32) -> (i32, i32, i32, i32, i32) {
    %c0_i32 = arith.constant 0 : i32
    %c0_i32_0 = arith.constant 0 : i32
    %c0_i32_1 = arith.constant 0 : i32
    %c0_i32_2 = arith.constant 0 : i32
    return %arg1, %arg0, %c0_i32, %c0_i32_0, %c0_i32_1 : i32, i32, i32, i32, i32
  }
}

</mosaic_0001>

<bundles_post_ra>
// kernel: convlstm_encoder_forward.2
= control target key start
LH: loop header
LB: loop body
LE: loop exit
PB: predicated region body
PF: predicated region fallthrough
CT: control target
= control target key end

     0   :  { %s4423_s12 = smov 0   ;;  %s4425_s13 = smov 0   ;;  %s6868_s0 = inlined_call_operand.vmem [shape: f32[8,2,16,16,4], index: 0, kind: input, shape index: {}]   ;;  %s6869_s1 = inlined_call_operand.vmem [shape: f32[180,64], index: 1, kind: input, shape index: {}]   ;;  %s6870_s2 = inlined_call_operand.vmem [shape: f32[1,64], index: 2, kind: input, shape index: {}]   ;;  %s6871_s3 = inlined_call_operand.vmem [shape: f32[8,2,16,16,16], index: 3, kind: output, shape index: {}]  }
   0x1   :  { %s4427_s14 = smov 0   ;;  %s4429_s15 = smov 0  }
   0x2   :  { %s4431_s16 = smov 0  }
   0x3 LB: > { %s22_s17 = sadd.s32 1, %s4379_s14  ;;  %s25_s18 = sadd.s32 1, %s4383_s15  ;;  %s4387_s16 = sphi %s4431_s16, %s13_s16   ;;  %s4383_s15 = sphi %s4429_s15, %s7018_s15   ;;  %s4379_s14 = sphi %s4427_s14, %s7017_s14   ;;  %s4375_s13 = sphi %s4425_s13, %s7016_s13   ;;  %s4371_s12 = sphi %s4423_s12, %s7015_s12  }
   0x4   : > { %p23_p0 = scmp.ge.s32.totalorder %s22_s17, 8  ;;  %p3906_p1 = scmp.ge.s32.totalorder %s4387_s16, 1 }
   0x5   : > { %p157_p2 = scmp.lt.s32.totalorder %s4387_s16, 17 }
   0x6   : > { %s7020_s17 = smov (%p23_p0, %s22_s17), 0  ;;  %s7022_s18 = smov (!%p23_p0, %s25_s18), %s4383_s15 }
   0x7   : > { %p158_p3 = pnand %p3906_p1, %p157_p2  ;;  %p27_p4 = scmp.ge.s32.totalorder %s7022_s18, 2 }
   0x9   : > { %s7024_s18 = smov (%p27_p4, %s7022_s18), 0  ;;  %161 = sbr.rel (%p158_p3) target bundleno = 1511 (0x5e7), region = 32 }
  0x10   : > { %p189_p5 = scmp.lt.s32.totalorder %s4371_s12, 7  ;;  %p191_p6 = scmp.lt.s32.totalorder %s4375_s13, 1 }
  0x11   : > { %p3913_p7 = scmp.ne.s32.totalorder %s4371_s12, 0 }
  0x12   : > { %s190_s19 = scalar_select %p189_p5, %s4371_s12, 7 }
  0x13   : > { %s7026_s13 = smov (!%p191_p6, %s4375_s13), 1  ;;  %210 = sbr.rel (%p3913_p7) target bundleno = 64 (0x40), region = 36 }
  0x14   : > { %s3908_s20 = sshll.u32 %s190_s19, 6  ;;  %s3907_s21 = sshll.u32 %s7026_s13, 5  ;;  %vm211_vm0 = vcmask (!%p3913_p7), 162816   ;;  %vm214_vm1 = vcmask (!%p3913_p7), 156672   ;;  %vm267_vm2 = vcmask (!%p3913_p7), 130048   ;;  %v4389_v0 = vmov (!%p3913_p7), 0.0  }
  0x15   : > { %s195_s22 = sadd.s32 %s3908_s20, %s3907_s21  ;;  %212 = vst.msk [vmem:[#allocation2] sm:$0xff] (!%p3913_p7), %vm211_vm0, %v4389_v0  ;;  %213 = vst.msk [vmem:[#allocation2 + $0x8] sm:$0xff] (!%p3913_p7), %vm211_vm0, %v4389_v0 }
  0x16   : > { %s3909_s23 = sshll.u32 %s195_s22, 3  ;;  %216 = vst.msk [vmem:[#allocation2 + $0x18] sm:$0xff] (!%p3913_p7), %vm211_vm0, %v4389_v0  ;;  %217 = vst.msk [vmem:[#allocation2 + $0x20] sm:$0xff] (!%p3913_p7), %vm211_vm0, %v4389_v0 }
  0x17   : > { %s4456_s26 = scalar_lea.vmem %s6868_s0, %s3909_s23  ;;  %s4461_s29 = scalar_lea.vmem %s6871_s3, %s3909_s23  ;;  %219 = vst.msk [vmem:[#allocation2 + $0x30] sm:$0xff] (!%p3913_p7), %vm211_vm0, %v4389_v0  ;;  %220 = vst.msk [vmem:[#allocation2 + $0x38] sm:$0xff] (!%p3913_p7), %vm211_vm0, %v4389_v0 }
  0x18   : > { %222 = vst.msk [vmem:[#allocation2 + $0x48] sm:$0xff] (!%p3913_p7), %vm211_vm0, %v4389_v0  ;;  %223 = vst.msk [vmem:[#allocation2 + $0x50] sm:$0xff] (!%p3913_p7), %vm211_vm0, %v4389_v0 }
  0x19   : > { %225 = vst.msk [vmem:[#allocation2 + $0x60] sm:$0xff] (!%p3913_p7), %vm211_vm0, %v4389_v0  ;;  %226 = vst.msk [vmem:[#allocation2 + $0x68] sm:$0xff] (!%p3913_p7), %vm211_vm0, %v4389_v0 }
  0x1a   : > { %228 = vst.msk [vmem:[#allocation2 + $0x78] sm:$0xff] %vm211_vm0, %v4389_v0  ;;  %229 = vst.msk [vmem:[#allocation2 + $0x80] sm:$0xff] %vm211_vm0, %v4389_v0 }
  0x1b   : > { %231 = vst.msk [vmem:[#allocation2 + $0x90] sm:$0xff] %vm211_vm0, %v4389_v0  ;;  %232 = vst.msk [vmem:[#allocation2 + $0x98] sm:$0xff] %vm211_vm0, %v4389_v0 }
  0x1c   : > { %234 = vst.msk [vmem:[#allocation2 + $0xa8] sm:$0xff] %vm211_vm0, %v4389_v0  ;;  %235 = vst.msk [vmem:[#allocation2 + $0xb0] sm:$0xff] %vm211_vm0, %v4389_v0 }
  0x1d   : > { %237 = vst.msk [vmem:[#allocation2 + $0xc0] sm:$0xff] %vm211_vm0, %v4389_v0  ;;  %238 = vst.msk [vmem:[#allocation2 + $0xc8] sm:$0xff] %vm211_vm0, %v4389_v0 }
  0x1e   : > { %240 = vst.msk [vmem:[#allocation2 + $0xd8] sm:$0xff] %vm211_vm0, %v4389_v0  ;;  %241 = vst.msk [vmem:[#allocation2 + $0xe0] sm:$0xff] %vm211_vm0, %v4389_v0 }
  0x1f   : > { %243 = vst.msk [vmem:[#allocation2 + $0xf0] sm:$0xff] %vm211_vm0, %v4389_v0  ;;  %244 = vst.msk [vmem:[#allocation2 + $0xf8] sm:$0xff] %vm211_vm0, %v4389_v0 }
  0x20   : > { %246 = vst.msk [vmem:[#allocation2 + $0x108] sm:$0xff] %vm211_vm0, %v4389_v0  ;;  %247 = vst.msk [vmem:[#allocation2 + $0x110] sm:$0xff] %vm211_vm0, %v4389_v0 }
  0x21   : > { %249 = vst.msk [vmem:[#allocation2 + $0x120] sm:$0xff] %vm211_vm0, %v4389_v0  ;;  %250 = vst.msk [vmem:[#allocation2 + $0x128] sm:$0xff] %vm211_vm0, %v4389_v0 }
  0x22   : > { %252 = vst.msk [vmem:[#allocation2 + $0x138] sm:$0xff] %vm211_vm0, %v4389_v0  ;;  %253 = vst.msk [vmem:[#allocation2 + $0x140] sm:$0xff] %vm211_vm0, %v4389_v0 }
  0x23   : > { %255 = vst.msk [vmem:[#allocation2 + $0x150] sm:$0xff] %vm211_vm0, %v4389_v0  ;;  %256 = vst.msk [vmem:[#allocation2 + $0x158] sm:$0xff] %vm211_vm0, %v4389_v0 }
  0x24   : > { %258 = vst.msk [vmem:[#allocation2 + $0x168] sm:$0xff] %vm211_vm0, %v4389_v0  ;;  %259 = vst.msk [vmem:[#allocation2 + $0x170] sm:$0xff] %vm211_vm0, %v4389_v0 }
  0x25   : > { %261 = vst.msk [vmem:[#allocation2 + $0x180] sm:$0xff] %vm211_vm0, %v4389_v0  ;;  %262 = vst.msk [vmem:[#allocation2 + $0x188] sm:$0xff] %vm211_vm0, %v4389_v0 }
  0x26   : > { %264 = vst.msk [vmem:[#allocation2 + $0x198] sm:$0xff] %vm211_vm0, %v4389_v0  ;;  %265 = vst.msk [vmem:[#allocation2 + $0x1a0] sm:$0xff] %vm211_vm0, %v4389_v0 }
  0x27   : > { %215 = vst.msk [vmem:[#allocation2 + $0x10] sm:$0x3] %vm214_vm1, %v4389_v0  ;;  %218 = vst.msk [vmem:[#allocation2 + $0x28] sm:$0x3] %vm214_vm1, %v4389_v0 }
  0x28   : > { %221 = vst.msk [vmem:[#allocation2 + $0x40] sm:$0x3] %vm214_vm1, %v4389_v0  ;;  %224 = vst.msk [vmem:[#allocation2 + $0x58] sm:$0x3] %vm214_vm1, %v4389_v0 }
  0x29   : > { %227 = vst.msk [vmem:[#allocation2 + $0x70] sm:$0x3] %vm214_vm1, %v4389_v0  ;;  %230 = vst.msk [vmem:[#allocation2 + $0x88] sm:$0x3] %vm214_vm1, %v4389_v0 }
  0x2a   : > { %233 = vst.msk [vmem:[#allocation2 + $0xa0] sm:$0x3] %vm214_vm1, %v4389_v0  ;;  %236 = vst.msk [vmem:[#allocation2 + $0xb8] sm:$0x3] %vm214_vm1, %v4389_v0 }
  0x2b   : > { %239 = vst.msk [vmem:[#allocation2 + $0xd0] sm:$0x3] %vm214_vm1, %v4389_v0  ;;  %242 = vst.msk [vmem:[#allocation2 + $0xe8] sm:$0x3] %vm214_vm1, %v4389_v0 }
  0x2c   : > { %245 = vst.msk [vmem:[#allocation2 + $0x100] sm:$0x3] %vm214_vm1, %v4389_v0  ;;  %248 = vst.msk [vmem:[#allocation2 + $0x118] sm:$0x3] %vm214_vm1, %v4389_v0 }
  0x2d   : > { %251 = vst.msk [vmem:[#allocation2 + $0x130] sm:$0x3] %vm214_vm1, %v4389_v0  ;;  %254 = vst.msk [vmem:[#allocation2 + $0x148] sm:$0x3] %vm214_vm1, %v4389_v0 }
  0x2e   : > { %257 = vst.msk [vmem:[#allocation2 + $0x160] sm:$0x3] %vm214_vm1, %v4389_v0  ;;  %260 = vst.msk [vmem:[#allocation2 + $0x178] sm:$0x3] %vm214_vm1, %v4389_v0 }
  0x2f   : > { %263 = vst.msk [vmem:[#allocation2 + $0x190] sm:$0x3] %vm214_vm1, %v4389_v0  ;;  %266 = vst.msk [vmem:[#allocation2 + $0x1a8] sm:$0x3] %vm214_vm1, %v4389_v0 }
  0x30   : > { %268 = vst.msk [vmem:[#allocation3] sm:$0xff] %vm267_vm2, %v4389_v0  ;;  %269 = vst.msk [vmem:[#allocation3 + $0x8] sm:$0xff] %vm267_vm2, %v4389_v0 }
  0x31   : > { %270 = vst.msk [vmem:[#allocation3 + $0x10] sm:$0xff] %vm267_vm2, %v4389_v0  ;;  %271 = vst.msk [vmem:[#allocation3 + $0x18] sm:$0xff] %vm267_vm2, %v4389_v0 }
  0x32   : > { %272 = vst.msk [vmem:[#allocation3 + $0x20] sm:$0xff] %vm267_vm2, %v4389_v0  ;;  %273 = vst.msk [vmem:[#allocation3 + $0x28] sm:$0xff] %vm267_vm2, %v4389_v0 }
  0x33   : > { %274 = vst.msk [vmem:[#allocation3 + $0x30] sm:$0xff] %vm267_vm2, %v4389_v0  ;;  %275 = vst.msk [vmem:[#allocation3 + $0x38] sm:$0xff] %vm267_vm2, %v4389_v0 }
  0x34   : > { %276 = vst.msk [vmem:[#allocation3 + $0x40] sm:$0xff] %vm267_vm2, %v4389_v0  ;;  %277 = vst.msk [vmem:[#allocation3 + $0x48] sm:$0xff] %vm267_vm2, %v4389_v0 }
  0x35   : > { %278 = vst.msk [vmem:[#allocation3 + $0x50] sm:$0xff] %vm267_vm2, %v4389_v0  ;;  %279 = vst.msk [vmem:[#allocation3 + $0x58] sm:$0xff] %vm267_vm2, %v4389_v0 }
  0x36   : > { %280 = vst.msk [vmem:[#allocation3 + $0x60] sm:$0xff] %vm267_vm2, %v4389_v0  ;;  %281 = vst.msk [vmem:[#allocation3 + $0x68] sm:$0xff] %vm267_vm2, %v4389_v0 }
  0x37   : > { %282 = vst.msk [vmem:[#allocation3 + $0x70] sm:$0xff] %vm267_vm2, %v4389_v0  ;;  %283 = vst.msk [vmem:[#allocation3 + $0x78] sm:$0xff] %vm267_vm2, %v4389_v0 }
  0x38   : > { %284 = vst.msk [vmem:[#allocation3 + $0x80] sm:$0xff] %vm267_vm2, %v4389_v0  ;;  %285 = vst.msk [vmem:[#allocation3 + $0x88] sm:$0xff] %vm267_vm2, %v4389_v0 }
  0x39   : > { %286 = vst.msk [vmem:[#allocation3 + $0x90] sm:$0xff] %vm267_vm2, %v4389_v0  ;;  %287 = vst.msk [vmem:[#allocation3 + $0x98] sm:$0xff] %vm267_vm2, %v4389_v0 }
  0x3a   : > { %288 = vst.msk [vmem:[#allocation3 + $0xa0] sm:$0xff] %vm267_vm2, %v4389_v0  ;;  %289 = vst.msk [vmem:[#allocation3 + $0xa8] sm:$0xff] %vm267_vm2, %v4389_v0 }
  0x3b   : > { %290 = vst.msk [vmem:[#allocation3 + $0xb0] sm:$0xff] %vm267_vm2, %v4389_v0  ;;  %291 = vst.msk [vmem:[#allocation3 + $0xb8] sm:$0xff] %vm267_vm2, %v4389_v0 }
  0x3c   : > { %292 = vst.msk [vmem:[#allocation3 + $0xc0] sm:$0xff] %vm267_vm2, %v4389_v0  ;;  %293 = vst.msk [vmem:[#allocation3 + $0xc8] sm:$0xff] %vm267_vm2, %v4389_v0 }
  0x3d   : > { %294 = vst.msk [vmem:[#allocation3 + $0xd0] sm:$0xff] %vm267_vm2, %v4389_v0  ;;  %295 = vst.msk [vmem:[#allocation3 + $0xd8] sm:$0xff] %vm267_vm2, %v4389_v0 }
  0x3e   : > { %296 = vst.msk [vmem:[#allocation3 + $0xe0] sm:$0xff] %vm267_vm2, %v4389_v0  ;;  %297 = vst.msk [vmem:[#allocation3 + $0xe8] sm:$0xff] %vm267_vm2, %v4389_v0 }
  0x3f   : > { %298 = vst.msk [vmem:[#allocation3 + $0xf0] sm:$0xff] %vm267_vm2, %v4389_v0  ;;  %299 = vst.msk [vmem:[#allocation3 + $0xf8] sm:$0xff] %vm267_vm2, %v4389_v0 }
  0x40 PF: > { %v302_v3 = vld [vmem:[%s4456_s26 + $0x10] sm:$0xff]  ;;  %vm333_vm3 = vcmask 31744   ;;  %s4390_s30 = smov 20   ;;  %v300_v4 = vld [vmem:[%s4456_s26] sm:$0xff]  ;;  %v301_v6 = vld [vmem:[%s4456_s26 + $0x8] sm:$0xff]  ;;  %vm398_vm4 = vcmask 162816  }
  0x41   : > { %336 = vst.msk [vmem:[#allocation2 + $0x31] sm:$0xff] %vm333_vm3, %v302_v3  ;;  %v304_v5 = vld [vmem:[%s4456_s26 + $0x20] sm:$0xff]  ;;  %334 = vst.msk [vmem:[#allocation2 + $0x19] sm:$0xff] %vm333_vm3, %v300_v4  ;;  %v306_v7 = vld [vmem:[%s4456_s26 + $0x30] sm:$0xff]  ;;  %s4391_s4 = smov 40   ;;  %vm591_vm5 = vcmask 326816  }
  0x42   : > { %v431_v1 = vld [vmem:[#allocation2 + $0x1] sm:$0xff]  ;;  %v432_v2 = vld [vmem:[#allocation2 + $0x9] sm:$0xff]  ;;  %338 = vst.msk [vmem:[#allocation2 + $0x49] sm:$0xff] %vm333_vm3, %v304_v5  ;;  %335 = vst.msk [vmem:[#allocation2 + $0x21] sm:$0xff] %vm333_vm3, %v301_v6  ;;  %s4392_s5 = smov 60   ;;  %vm784_vm6 = vcmask 490816  }
  0x43   : > { %495 = vrot.lane.b32.xlu0 %v431_v1, %s4390_s30  ;;  %v303_v8 = vld [vmem:[%s4456_s26 + $0x18] sm:$0xff]  ;;  %v308_v9 = vld [vmem:[%s4456_s26 + $0x40] sm:$0xff]  ;;  %340 = vst.msk [vmem:[#allocation2 + $0x61] sm:$0xff] %vm333_vm3, %v306_v7  ;;  %v305_v10 = vld [vmem:[%s4456_s26 + $0x28] sm:$0xff]  ;;  %s4393_s6 = smov 80   ;;  %vm977_vm7 = vcmask 654816  }
  0x44   : > { %337 = vst.msk [vmem:[#allocation2 + $0x39] sm:$0xff] %vm333_vm3, %v303_v8  ;;  %342 = vst.msk [vmem:[#allocation2 + $0x79] sm:$0xff] %vm333_vm3, %v308_v9  ;;  %v310_v11 = vld [vmem:[%s4456_s26 + $0x50] sm:$0xff]  ;;  %v307_v12 = vld [vmem:[%s4456_s26 + $0x38] sm:$0xff]  ;;  %s4394_s7 = smov 100   ;;  %vm1170_vm8 = vcmask 818816  }
  0x45   : > { %339 = vst.msk [vmem:[#allocation2 + $0x51] sm:$0xff] %vm333_vm3, %v305_v10  ;;  %344 = vst.msk [vmem:[#allocation2 + $0x91] sm:$0xff] %vm333_vm3, %v310_v11  ;;  %v312_v13 = vld [vmem:[%s4456_s26 + $0x60] sm:$0xff]  ;;  %v309_v14 = vld [vmem:[%s4456_s26 + $0x48] sm:$0xff]  ;;  %s4396_s21 = smov 120   ;;  %vm2200_vm9 = vcmask 1043456  }
  0x46   : > { %341 = vst.msk [vmem:[#allocation2 + $0x69] sm:$0xff] %vm333_vm3, %v307_v12  ;;  %v314_v15 = vld [vmem:[%s4456_s26 + $0x70] sm:$0xff]  ;;  %346 = vst.msk [vmem:[#allocation2 + $0xa9] sm:$0xff] %vm333_vm3, %v312_v13  ;;  %v311_v16 = vld [vmem:[%s4456_s26 + $0x58] sm:$0xff]  ;;  %s4398_s24 = smov 12   ;;  %s4399_s25 = smov 32  }
  0x47   : > { %497 = vrot.lane.b32.xlu0 %v432_v2, %s4390_s30  ;;  %343 = vst.msk [vmem:[#allocation2 + $0x81] sm:$0xff] %vm333_vm3, %v309_v14  ;;  %348 = vst.msk [vmem:[#allocation2 + $0xc1] sm:$0xff] %vm333_vm3, %v314_v15  ;;  %v316_v17 = vld [vmem:[%s4456_s26 + $0x80] sm:$0xff]  ;;  %v313_v18 = vld [vmem:[%s4456_s26 + $0x68] sm:$0xff]  ;;  %vm1363_vm10 = vcmask 982816   ;;  %vm1557_vm11 = vcmask 1048512  }
  0x48   : > { %345 = vst.msk [vmem:[#allocation2 + $0x99] sm:$0xff] %vm333_vm3, %v311_v16  ;;  %350 = vst.msk [vmem:[#allocation2 + $0xd9] sm:$0xff] %vm333_vm3, %v316_v17  ;;  %v318_v19 = vld [vmem:[%s4456_s26 + $0x90] sm:$0xff]  ;;  %v315_v20 = vld [vmem:[%s4456_s26 + $0x78] sm:$0xff]  ;;  %vm1559_vm12 = vcmask 97280   ;;  %vm1783_vm13 = vcmask 261216  }
  0x49   : > { %347 = vst.msk [vmem:[#allocation2 + $0xb1] sm:$0xff] %vm333_vm3, %v313_v18  ;;  %v320_v21 = vld [vmem:[%s4456_s26 + $0xa0] sm:$0xff]  ;;  %352 = vst.msk [vmem:[#allocation2 + $0xf1] sm:$0xff] %vm333_vm3, %v318_v19  ;;  %v317_v22 = vld [vmem:[%s4456_s26 + $0x88] sm:$0xff]  ;;  %vm1976_vm14 = vcmask 425216   ;;  %vm2103_vm15 = vcmask 424960  }
  0x4a   : > { %349 = vst.msk [vmem:[#allocation2 + $0xc9] sm:$0xff] %vm333_vm3, %v315_v20  ;;  %354 = vst.msk [vmem:[#allocation2 + $0x109] sm:$0xff] %vm333_vm3, %v320_v21  ;;  %v322_v23 = vld [vmem:[%s4456_s26 + $0xb0] sm:$0xff]  ;;  %v319_v24 = vld [vmem:[%s4456_s26 + $0x98] sm:$0xff]  ;;  %vm3485_vm0 = vcmask 130048   ;;  %s4402_s28 = smov 96  }
  0x4b   : > { %v4678_v25 = vld [vmem:[#allocation2 + $0x31] sm:$0xff]  ;;  %351 = vst.msk [vmem:[#allocation2 + $0xe1] sm:$0xff] %vm333_vm3, %v317_v22  ;;  %356 = vst.msk [vmem:[#allocation2 + $0x121] sm:$0xff] %vm333_vm3, %v322_v23  ;;  %v324_v26 = vld [vmem:[%s4456_s26 + $0xc0] sm:$0xff]  ;;  %vm3646_vm1 = vcmask 162848  }
  0x4c   : > { %353 = vst.msk [vmem:[#allocation2 + $0xf9] sm:$0xff] %vm333_vm3, %v319_v24  ;;  %v321_v27 = vld [vmem:[%s4456_s26 + $0xa8] sm:$0xff]  ;;  %503 = vrot.lane.b32.xlu0 %v4678_v25, %s4390_s30  ;;  %v4687_v28 = vld [vmem:[#allocation2 + $0x19] sm:$0xff]  ;;  %358 = vst.msk [vmem:[#allocation2 + $0x139] sm:$0xff] %vm333_vm3, %v324_v26 }
  0x4d   : > { %355 = vst.msk [vmem:[#allocation2 + $0x111] sm:$0xff] %vm333_vm3, %v321_v27  ;;  %499 = vrot.lane.b32.xlu1 %v4687_v28, %s4390_s30  ;;  %v4693_v29 = vld [vmem:[#allocation2 + $0x49] sm:$0xff]  ;;  %v4695_v30 = vld [vmem:[#allocation2 + $0x21] sm:$0xff]  ;;  %v4703_v32 = vld [vmem:[#allocation2 + $0x39] sm:$0xff] }
  0x4e   : > { %v4701_v31 = vld [vmem:[#allocation2 + $0x61] sm:$0xff]  ;;  %v326_v33 = vld [vmem:[%s4456_s26 + $0xd0] sm:$0xff]  ;;  %v323_v34 = vld [vmem:[%s4456_s26 + $0xb8] sm:$0xff] }
  0x4f   : > { %360 = vst.msk [vmem:[#allocation2 + $0x151] sm:$0xff] %vm333_vm3, %v326_v33  ;;  %v328_v35 = vld [vmem:[%s4456_s26 + $0xe0] sm:$0xff]  ;;  %v325_v36 = vld [vmem:[%s4456_s26 + $0xc8] sm:$0xff]  ;;  %357 = vst.msk [vmem:[#allocation2 + $0x129] sm:$0xff] %vm333_vm3, %v323_v34 }
  0x50   : > { %507 = vrot.lane.b32.xlu0 %v4693_v29, %s4390_s30  ;;  %v4714_v37 = vld [vmem:[#allocation2 + $0x79] sm:$0xff]  ;;  %362 = vst.msk [vmem:[#allocation2 + $0x169] sm:$0xff] %vm333_vm3, %v328_v35  ;;  %359 = vst.msk [vmem:[#allocation2 + $0x141] sm:$0xff] %vm333_vm3, %v325_v36  ;;  %v4720_v39 = vld [vmem:[#allocation2 + $0x51] sm:$0xff] }
  0x51   : > { %501 = vrot.lane.b32.xlu1 %v4695_v30, %s4390_s30  ;;  %v327_v38 = vld [vmem:[%s4456_s26 + $0xd8] sm:$0xff]  ;;  %v329_v40 = vld [vmem:[%s4456_s26 + $0xe8] sm:$0xff]  ;;  %v366_v45 = vld [vmem:[#allocation2] sm:$0xff] }
  0x52   : > { %361 = vst.msk [vmem:[#allocation2 + $0x159] sm:$0xff] %vm333_vm3, %v327_v38  ;;  %363 = vst.msk [vmem:[#allocation2 + $0x171] sm:$0xff] %vm333_vm3, %v329_v40  ;;  %v4729_v41 = vld [vmem:[#allocation2 + $0x91] sm:$0xff]  ;;  %v4731_v42 = vld [vmem:[#allocation2 + $0x69] sm:$0xff] }
  0x53   : > { %v4737_v43 = vld [vmem:[#allocation2 + $0xa9] sm:$0xff]  ;;  %v4739_v44 = vld [vmem:[#allocation2 + $0x81] sm:$0xff]  ;;  %399 = vst.msk [vmem:[#allocation4] sm:$0xff] %vm398_vm4, %v366_v45  ;;  %v4751_v49 = vld [vmem:[#allocation2 + $0x99] sm:$0xff] }
  0x54   : > { %511 = vrot.lane.b32.xlu0 %v4701_v31, %s4390_s30  ;;  %v367_v46 = vld [vmem:[#allocation2 + $0x8] sm:$0xff]  ;;  %v4749_v48 = vld [vmem:[#allocation2 + $0x30] sm:$0xff]  ;;  %v4755_v50 = vld [vmem:[#allocation2 + $0x18] sm:$0xff] }
  0x55   : > { %505 = vrot.lane.b32.xlu1 %v4703_v32, %s4390_s30  ;;  %v4746_v47 = vld [vmem:[#allocation2 + $0xc1] sm:$0xff]  ;;  %400 = vst.msk [vmem:[#allocation4 + $0x10] sm:$0xff] %vm398_vm4, %v367_v46  ;;  %403 = vst.msk [vmem:[#allocation4 + $0x40] sm:$0xff] %vm398_vm4, %v4749_v48  ;;  %v4757_v51 = vld [vmem:[#allocation2 + $0xd9] sm:$0xff] }
  0x56   : > { %401 = vst.msk [vmem:[#allocation4 + $0x20] sm:$0xff] %vm398_vm4, %v4755_v50  ;;  %v4761_v52 = vld [vmem:[#allocation2 + $0x48] sm:$0xff]  ;;  %v4763_v53 = vld [vmem:[#allocation2 + $0x20] sm:$0xff]  ;;  %v4767_v54 = vld [vmem:[#allocation2 + $0xb1] sm:$0xff] }
  0x57   : > { %405 = vst.msk [vmem:[#allocation4 + $0x60] sm:$0xff] %vm398_vm4, %v4761_v52  ;;  %402 = vst.msk [vmem:[#allocation4 + $0x30] sm:$0xff] %vm398_vm4, %v4763_v53  ;;  %v4773_v55 = vld [vmem:[#allocation2 + $0x60] sm:$0xff]  ;;  %v4775_v56 = vld [vmem:[#allocation2 + $0x38] sm:$0xff] }
  0x58   : > { %515 = vrot.lane.b32.xlu0 %v4714_v37, %s4390_s30  ;;  %407 = vst.msk [vmem:[#allocation4 + $0x80] sm:$0xff] %vm398_vm4, %v4773_v55  ;;  %404 = vst.msk [vmem:[#allocation4 + $0x50] sm:$0xff] %vm398_vm4, %v4775_v56  ;;  %v4783_v57 = vld [vmem:[#allocation2 + $0x78] sm:$0xff]  ;;  %v4785_v58 = vld [vmem:[#allocation2 + $0x50] sm:$0xff] }
  0x59   : > { %509 = vrot.lane.b32.xlu1 %v4720_v39, %s4390_s30  ;;  %v4787_v59 = vld [vmem:[#allocation2 + $0x90] sm:$0xff]  ;;  %409 = vst.msk [vmem:[#allocation4 + $0xa0] sm:$0xff] %vm398_vm4, %v4783_v57  ;;  %406 = vst.msk [vmem:[#allocation4 + $0x70] sm:$0xff] %vm398_vm4, %v4785_v58  ;;  %v4795_v60 = vld [vmem:[#allocation2 + $0x68] sm:$0xff] }
  0x5a   : > { %411 = vst.msk [vmem:[#allocation4 + $0xc0] sm:$0xff] %vm398_vm4, %v4787_v59  ;;  %v4797_v61 = vld [vmem:[#allocation2 + $0xa8] sm:$0xff]  ;;  %v4799_v62 = vld [vmem:[#allocation2 + $0x80] sm:$0xff]  ;;  %v4801_v63 = vld [vmem:[#allocation2 + $0xf1] sm:$0xff] }
  0x5b   : > { %408 = vst.msk [vmem:[#allocation4 + $0x90] sm:$0xff] %vm398_vm4, %v4795_v60  ;;  %413 = vst.msk [vmem:[#allocation4 + $0xe0] sm:$0xff] %vm398_vm4, %v4797_v61  ;;  %v4809_v0 = vld [vmem:[#allocation2 + $0xc0] sm:$0xff]  ;;  %v4811_v1 = vld [vmem:[#allocation2 + $0x98] sm:$0xff] }
  0x5c   : > { %519 = vrot.lane.b32.xlu0 %v4729_v41, %s4390_s30  ;;  %410 = vst.msk [vmem:[#allocation4 + $0xb0] sm:$0xff] %vm398_vm4, %v4799_v62  ;;  %v4813_v2 = vld [vmem:[#allocation2 + $0xd8] sm:$0xff]  ;;  %v4817_v3 = vld [vmem:[#allocation2 + $0xc9] sm:$0xff]  ;;  %415 = vst.msk [vmem:[#allocation4 + $0x100] sm:$0xff] %vm398_vm4, %v4809_v0 }
  0x5d   : > { %513 = vrot.lane.b32.xlu1 %v4731_v42, %s4390_s30  ;;  %412 = vst.msk [vmem:[#allocation4 + $0xd0] sm:$0xff] %vm398_vm4, %v4811_v1  ;;  %417 = vst.msk [vmem:[#allocation4 + $0x120] sm:$0xff] %vm398_vm4, %v4813_v2  ;;  %v4825_v4 = vld [vmem:[#allocation2 + $0xb0] sm:$0xff]  ;;  %v4829_v6 = vld [vmem:[#allocation2 + $0xc8] sm:$0xff] }
  0x5e   : > { %v4827_v5 = vld [vmem:[#allocation2 + $0xf0] sm:$0xff]  ;;  %414 = vst.msk [vmem:[#allocation4 + $0xf0] sm:$0xff] %vm398_vm4, %v4825_v4  ;;  %416 = vst.msk [vmem:[#allocation4 + $0x110] sm:$0xff] %vm398_vm4, %v4829_v6  ;;  %v4839_v7 = vld [vmem:[#allocation2 + $0x108] sm:$0xff] }
  0x5f   : > { %419 = vst.msk [vmem:[#allocation4 + $0x140] sm:$0xff] %vm398_vm4, %v4827_v5  ;;  %v4841_v8 = vld [vmem:[#allocation2 + $0xe0] sm:$0xff]  ;;  %421 = vst.msk [vmem:[#allocation4 + $0x160] sm:$0xff] %vm398_vm4, %v4839_v7  ;;  %v4851_v10 = vld [vmem:[#allocation2 + $0xf8] sm:$0xff] }
  0x60   : > { %523 = vrot.lane.b32.xlu0 %v4737_v43, %s4390_s30  ;;  %v4843_v9 = vld [vmem:[#allocation2 + $0x120] sm:$0xff]  ;;  %418 = vst.msk [vmem:[#allocation4 + $0x130] sm:$0xff] %vm398_vm4, %v4841_v8  ;;  %v4853_v11 = vld [vmem:[#allocation2 + $0x138] sm:$0xff]  ;;  %v4855_v12 = vld [vmem:[#allocation2 + $0x110] sm:$0xff] }
  0x61   : > { %517 = vrot.lane.b32.xlu1 %v4739_v44, %s4390_s30  ;;  %423 = vst.msk [vmem:[#allocation4 + $0x180] sm:$0xff] %vm398_vm4, %v4843_v9  ;;  %420 = vst.msk [vmem:[#allocation4 + $0x150] sm:$0xff] %vm398_vm4, %v4851_v10  ;;  %v4867_v13 = vld [vmem:[#allocation2 + $0x109] sm:$0xff]  ;;  %v4871_v15 = vld [vmem:[#allocation2 + $0xe1] sm:$0xff] }
  0x62   : > { %425 = vst.msk [vmem:[#allocation4 + $0x1a0] sm:$0xff] %vm398_vm4, %v4853_v11  ;;  %422 = vst.msk [vmem:[#allocation4 + $0x170] sm:$0xff] %vm398_vm4, %v4855_v12  ;;  %v4869_v14 = vld [vmem:[#allocation2 + $0x150] sm:$0xff]  ;;  %v4875_v16 = vld [vmem:[#allocation2 + $0x128] sm:$0xff] }
  0x63   : > { %427 = vst.msk [vmem:[#allocation4 + $0x1c0] sm:$0xff] %vm398_vm4, %v4869_v14  ;;  %424 = vst.msk [vmem:[#allocation4 + $0x190] sm:$0xff] %vm398_vm4, %v4875_v16  ;;  %v4883_v17 = vld [vmem:[#allocation2 + $0x121] sm:$0xff]  ;;  %v4887_v19 = vld [vmem:[#allocation2 + $0xf9] sm:$0xff] }
  0x64   : > { %527 = vrot.lane.b32.xlu0 %v4746_v47, %s4390_s30  ;;  %v4885_v18 = vld [vmem:[#allocation2 + $0x168] sm:$0xff]  ;;  %v4891_v20 = vld [vmem:[#allocation2 + $0x140] sm:$0xff]  ;;  %v4901_v22 = vld [vmem:[#allocation2 + $0x111] sm:$0xff] }
  0x65   : > { %521 = vrot.lane.b32.xlu1 %v4751_v49, %s4390_s30  ;;  %429 = vst.msk [vmem:[#allocation4 + $0x1e0] sm:$0xff] %vm398_vm4, %v4885_v18  ;;  %426 = vst.msk [vmem:[#allocation4 + $0x1b0] sm:$0xff] %vm398_vm4, %v4891_v20  ;;  %v4899_v21 = vld [vmem:[#allocation2 + $0x139] sm:$0xff]  ;;  %v330_v24 = vld [vmem:[%s4456_s26 + $0xf0] sm:$0xff] }
  0x66   : > { %v4903_v23 = vld [vmem:[#allocation2 + $0x158] sm:$0xff]  ;;  %364 = vst.msk [vmem:[#allocation2 + $0x181] sm:$0xff] %vm333_vm3, %v330_v24  ;;  %v4915_v27 = vld [vmem:[#allocation2 + $0x129] sm:$0xff]  ;;  %v4927_v35 = vld [vmem:[#allocation2 + $0x141] sm:$0xff] }
  0x67   : > { %428 = vst.msk [vmem:[#allocation4 + $0x1d0] sm:$0xff] %vm398_vm4, %v4903_v23  ;;  %v4912_v26 = vld [vmem:[#allocation2 + $0x151] sm:$0xff]  ;;  %v4925_v34 = vld [vmem:[#allocation2 + $0x169] sm:$0xff]  ;;  %6913 = vst [vmem:[#allocation5_spill] sm:$0xff] %v4927_v35 }
  0x68   : > { %531 = vrot.lane.b32.xlu0 %v4757_v51, %s4390_s30  ;;  %v4917_v33 = vld [vmem:[#allocation2 + $0x170] sm:$0xff]  ;;  %v331_v36 = vld [vmem:[%s4456_s26 + $0xf8] sm:$0xff]  ;;  %v624_v38 = vld [vmem:[#allocation2 + $0x2] sm:$0xff]  ;;  %s4400_s26 = smov 16  }
  0x69   : > { %525 = vrot.lane.b32.xlu1 %v4767_v54, %s4390_s30  ;;  %430 = vst.msk [vmem:[#allocation4 + $0x1f0] sm:$0xff] %vm398_vm4, %v4917_v33  ;;  %v4935_v40 = vld [vmem:[#allocation2 + $0x159] sm:$0xff]  ;;  %v4942_v46 = vld [vmem:[#allocation2 + $0x171] sm:$0xff] }
  0x6a   : > { %365 = vst.msk [vmem:[#allocation2 + $0x189] sm:$0xff] %vm333_vm3, %v331_v36  ;;  %6914 = vst [vmem:[#allocation6_spill] sm:$0xff] %v4935_v40  ;;  %v4940_v45 = vld [vmem:[#allocation2 + $0x1a] sm:$0xff]  ;;  %v4948_v24 = vld [vmem:[#allocation2 + $0x32] sm:$0xff] }
  0x6b   : > { %6915 = vst [vmem:[#allocation7_spill] sm:$0xff] %v4940_v45  ;;  %6916 = vst [vmem:[#allocation8_spill] sm:$0xff] %v4942_v46  ;;  %v625_v36 = vld [vmem:[#allocation2 + $0xa] sm:$0xff] }
  0x6c   : > { %535 = vrot.lane.b32.xlu0 %v4801_v63, %s4390_s30  ;;  %6917 = vst [vmem:[#allocation9_spill] sm:$0xff] %v4948_v24 }
  0x6d   : > { %529 = vrot.lane.b32.xlu1 %v4817_v3, %s4390_s30 }
  0x70   : > { %539 = vrot.lane.b32.xlu0 %v4867_v13, %s4390_s30 }
  0x71   : > { %533 = vrot.lane.b32.xlu1 %v4871_v15, %s4390_s30 }
  0x74   : > { %543 = vrot.lane.b32.xlu0 %v4883_v17, %s4390_s30 }
  0x75   : > { %537 = vrot.lane.b32.xlu1 %v4887_v19, %s4390_s30 }
  0x78   : > { %547 = vrot.lane.b32.xlu0 %v4899_v21, %s4390_s30 }
  0x79   : > { %541 = vrot.lane.b32.xlu1 %v4901_v22, %s4390_s30 }
  0x7c   : > { %551 = vrot.lane.b32.xlu0 %v4912_v26, %s4390_s30 }
  0x7d   : > { %545 = vrot.lane.b32.xlu1 %v4915_v27, %s4390_s30 }
  0x80   : > { %555 = vrot.lane.b32.xlu0 %v4925_v34, %s4390_s30 }
  0x81   : > { %549 = vrot.lane.b32.xlu1 %v4927_v35, %s4390_s30  ;;  %v5035_v35 = vld [vmem:[#allocation2 + $0x112] sm:$0xff] }
  0x82   : > { %6939 = vst [vmem:[#allocation31_spill] sm:$0xff] %v5035_v35 }
  0x84   : > { %688 = vrot.lane.b32.xlu0 %v624_v38, %s4391_s4  ;;  %v4953_v38 = vld [vmem:[#allocation2 + $0x4a] sm:$0xff] }
  0x85   : > { %553 = vrot.lane.b32.xlu1 %v4935_v40, %s4390_s30  ;;  %6918 = vst [vmem:[#allocation10_spill] sm:$0xff] %v4953_v38  ;;  %v4955_v40 = vld [vmem:[#allocation2 + $0x22] sm:$0xff] }
  0x86   : > { %6919 = vst [vmem:[#allocation11_spill] sm:$0xff] %v4955_v40 }
  0x88   : > { %692 = vrot.lane.b32.xlu0 %v4940_v45, %s4391_s4  ;;  %v4961_v45 = vld [vmem:[#allocation2 + $0x62] sm:$0xff] }
  0x89   : > { %557 = vrot.lane.b32.xlu1 %v4942_v46, %s4390_s30  ;;  %6920 = vst [vmem:[#allocation12_spill] sm:$0xff] %v4961_v45  ;;  %v4963_v46 = vld [vmem:[#allocation2 + $0x3a] sm:$0xff] }
  0x8a   : > { %6921 = vst [vmem:[#allocation13_spill] sm:$0xff] %v4963_v46 }
  0x8c   : > { %696 = vrot.lane.b32.xlu0 %v4948_v24, %s4391_s4  ;;  %v4971_v24 = vld [vmem:[#allocation2 + $0x52] sm:$0xff] }
  0x8d   : > { %690 = vrot.lane.b32.xlu1 %v625_v36, %s4391_s4  ;;  %v4969_v36 = vld [vmem:[#allocation2 + $0x7a] sm:$0xff]  ;;  %6923 = vst [vmem:[#allocation15_spill] sm:$0xff] %v4971_v24 }
  0x8e   : > { %6922 = vst [vmem:[#allocation14_spill] sm:$0xff] %v4969_v36 }
  0x90   : > { %700 = vrot.lane.b32.xlu0 %v4953_v38, %s4391_s4  ;;  %v4979_v38 = vld [vmem:[#allocation2 + $0x6a] sm:$0xff] }
  0x91   : > { %694 = vrot.lane.b32.xlu1 %v4955_v40, %s4391_s4  ;;  %v4977_v40 = vld [vmem:[#allocation2 + $0x92] sm:$0xff]  ;;  %6925 = vst [vmem:[#allocation17_spill] sm:$0xff] %v4979_v38 }
  0x92   : > { %6924 = vst [vmem:[#allocation16_spill] sm:$0xff] %v4977_v40 }
  0x94   : > { %704 = vrot.lane.b32.xlu0 %v4961_v45, %s4391_s4  ;;  %v4987_v45 = vld [vmem:[#allocation2 + $0x82] sm:$0xff] }
  0x95   : > { %698 = vrot.lane.b32.xlu1 %v4963_v46, %s4391_s4  ;;  %v4985_v46 = vld [vmem:[#allocation2 + $0xaa] sm:$0xff]  ;;  %6927 = vst [vmem:[#allocation19_spill] sm:$0xff] %v4987_v45 }
  0x96   : > { %6926 = vst [vmem:[#allocation18_spill] sm:$0xff] %v4985_v46 }
  0x98   : > { %708 = vrot.lane.b32.xlu0 %v4969_v36, %s4391_s4  ;;  %v4995_v36 = vld [vmem:[#allocation2 + $0x9a] sm:$0xff] }
  0x99   : > { %702 = vrot.lane.b32.xlu1 %v4971_v24, %s4391_s4  ;;  %v4993_v24 = vld [vmem:[#allocation2 + $0xc2] sm:$0xff]  ;;  %6929 = vst [vmem:[#allocation21_spill] sm:$0xff] %v4995_v36 }
  0x9a   : > { %6928 = vst [vmem:[#allocation20_spill] sm:$0xff] %v4993_v24 }
  0x9c   : > { %712 = vrot.lane.b32.xlu0 %v4977_v40, %s4391_s4  ;;  %v5003_v40 = vld [vmem:[#allocation2 + $0xb2] sm:$0xff] }
  0x9d   : > { %706 = vrot.lane.b32.xlu1 %v4979_v38, %s4391_s4  ;;  %v5001_v38 = vld [vmem:[#allocation2 + $0xda] sm:$0xff]  ;;  %6931 = vst [vmem:[#allocation23_spill] sm:$0xff] %v5003_v40 }
  0x9e   : > { %6930 = vst [vmem:[#allocation22_spill] sm:$0xff] %v5001_v38 }
  0xa0   : > { %716 = vrot.lane.b32.xlu0 %v4985_v46, %s4391_s4  ;;  %v5011_v46 = vld [vmem:[#allocation2 + $0xca] sm:$0xff] }
  0xa1   : > { %710 = vrot.lane.b32.xlu1 %v4987_v45, %s4391_s4  ;;  %v5009_v45 = vld [vmem:[#allocation2 + $0xf2] sm:$0xff]  ;;  %6933 = vst [vmem:[#allocation25_spill] sm:$0xff] %v5011_v46 }
  0xa2   : > { %6932 = vst [vmem:[#allocation24_spill] sm:$0xff] %v5009_v45 }
  0xa4   : > { %720 = vrot.lane.b32.xlu0 %v4993_v24, %s4391_s4  ;;  %v5019_v24 = vld [vmem:[#allocation2 + $0xe2] sm:$0xff] }
  0xa5   : > { %714 = vrot.lane.b32.xlu1 %v4995_v36, %s4391_s4  ;;  %v5017_v36 = vld [vmem:[#allocation2 + $0x10a] sm:$0xff]  ;;  %6935 = vst [vmem:[#allocation27_spill] sm:$0xff] %v5019_v24 }
  0xa6   : > { %6934 = vst [vmem:[#allocation26_spill] sm:$0xff] %v5017_v36 }
  0xa8   : > { %724 = vrot.lane.b32.xlu0 %v5001_v38, %s4391_s4  ;;  %v5027_v38 = vld [vmem:[#allocation2 + $0xfa] sm:$0xff] }
  0xa9   : > { %718 = vrot.lane.b32.xlu1 %v5003_v40, %s4391_s4  ;;  %v5025_v40 = vld [vmem:[#allocation2 + $0x122] sm:$0xff]  ;;  %6937 = vst [vmem:[#allocation29_spill] sm:$0xff] %v5027_v38 }
  0xaa   : > { %6936 = vst [vmem:[#allocation28_spill] sm:$0xff] %v5025_v40 }
  0xac   : > { %728 = vrot.lane.b32.xlu0 %v5009_v45, %s4391_s4 }
  0xad   : > { %722 = vrot.lane.b32.xlu1 %v5011_v46, %s4391_s4  ;;  %v5033_v46 = vld [vmem:[#allocation2 + $0x13a] sm:$0xff] }
  0xae   : > { %6938 = vst [vmem:[#allocation30_spill] sm:$0xff] %v5033_v46 }
  0xb0   : > { %732 = vrot.lane.b32.xlu0 %v5017_v36, %s4391_s4  ;;  %v5044_v36 = vld [vmem:[#allocation2 + $0x12a] sm:$0xff] }
  0xb1   : > { %726 = vrot.lane.b32.xlu1 %v5019_v24, %s4391_s4  ;;  %v5042_v24 = vld [vmem:[#allocation2 + $0x152] sm:$0xff]  ;;  %6941 = vst [vmem:[#allocation33_spill] sm:$0xff] %v5044_v36 }
  0xb2   : > { %6940 = vst [vmem:[#allocation32_spill] sm:$0xff] %v5042_v24 }
  0xb4   : > { %736 = vrot.lane.b32.xlu0 %v5025_v40, %s4391_s4 }
  0xb5   : > { %730 = vrot.lane.b32.xlu1 %v5027_v38, %s4391_s4  ;;  %v496_v45 = vpop.permute.xlu0 %495 }
  0xb6   : > { %592 = vst.msk [vmem:[#allocation4] sm:$0xff] %vm591_vm5, %v496_v45  ;;  %v5051_v45 = vld [vmem:[#allocation2 + $0x16a] sm:$0xff] }
  0xb8   : > { %740 = vrot.lane.b32.xlu0 %v5033_v46, %s4391_s4  ;;  %v5053_v46 = vld [vmem:[#allocation2 + $0x142] sm:$0xff] }
  0xb9   : > { %734 = vrot.lane.b32.xlu1 %v5035_v35, %s4391_s4  ;;  %v498_v40 = vpop.permute.xlu0 %497  ;;  %6942 = vst [vmem:[#allocation34_spill] sm:$0xff] %v5053_v46 }
  0xba   : > { %593 = vst.msk [vmem:[#allocation4 + $0x10] sm:$0xff] %vm591_vm5, %v498_v40 }
  0xbc   : > { %744 = vrot.lane.b32.xlu0 %v5042_v24, %s4391_s4  ;;  %v5061_v24 = vld [vmem:[#allocation2 + $0x15a] sm:$0xff] }
  0xbd   : > { %738 = vrot.lane.b32.xlu1 %v5044_v36, %s4391_s4 }
  0xbe   : > { %v504_v38 = vpop.permute.xlu0 %503 }
  0xbf   : > { %596 = vst.msk [vmem:[#allocation4 + $0x40] sm:$0xff] %vm591_vm5, %v504_v38  ;;  %v500_v35 = vpop.permute.xlu1 %499  ;;  %v5069_v38 = vld [vmem:[#allocation2 + $0x172] sm:$0xff] }
  0xc0   : > { %594 = vst.msk [vmem:[#allocation4 + $0x20] sm:$0xff] %vm591_vm5, %v500_v35  ;;  %748 = vrot.lane.b32.xlu0 %v5051_v45, %s4391_s4 }
  0xc1   : > { %742 = vrot.lane.b32.xlu1 %v5053_v46, %s4391_s4 }
  0xc2   : > { %v508_v40 = vpop.permute.xlu0 %507 }
  0xc3   : > { %598 = vst.msk [vmem:[#allocation4 + $0x60] sm:$0xff] %vm591_vm5, %v508_v40  ;;  %v502_v36 = vpop.permute.xlu1 %501 }
  0xc4   : > { %595 = vst.msk [vmem:[#allocation4 + $0x30] sm:$0xff] %vm591_vm5, %v502_v36  ;;  %881 = vrot.lane.b32.xlu0 %v4755_v50, %s4392_s5 }
  0xc5   : > { %746 = vrot.lane.b32.xlu1 %v5061_v24, %s4391_s4 }
  0xc6   : > { %v512_v35 = vpop.permute.xlu0 %511 }
  0xc7   : > { %600 = vst.msk [vmem:[#allocation4 + $0x80] sm:$0xff] %vm591_vm5, %v512_v35  ;;  %v506_v46 = vpop.permute.xlu1 %505 }
  0xc8   : > { %597 = vst.msk [vmem:[#allocation4 + $0x50] sm:$0xff] %vm591_vm5, %v506_v46  ;;  %885 = vrot.lane.b32.xlu0 %v4749_v48, %s4392_s5 }
  0xc9   : > { %750 = vrot.lane.b32.xlu1 %v5069_v38, %s4391_s4 }
  0xca   : > { %v516_v36 = vpop.permute.xlu0 %515 }
  0xcb   : > { %602 = vst.msk [vmem:[#allocation4 + $0xa0] sm:$0xff] %vm591_vm5, %v516_v36  ;;  %v510_v50 = vpop.permute.xlu1 %509 }
  0xcc   : > { %599 = vst.msk [vmem:[#allocation4 + $0x70] sm:$0xff] %vm591_vm5, %v510_v50  ;;  %889 = vrot.lane.b32.xlu0 %v4761_v52, %s4392_s5 }
  0xcd   : > { %883 = vrot.lane.b32.xlu1 %v4763_v53, %s4392_s5 }
  0xce   : > { %v520_v40 = vpop.permute.xlu0 %519 }
  0xcf   : > { %604 = vst.msk [vmem:[#allocation4 + $0xc0] sm:$0xff] %vm591_vm5, %v520_v40  ;;  %v514_v46 = vpop.permute.xlu1 %513 }
  0xd0   : > { %601 = vst.msk [vmem:[#allocation4 + $0x90] sm:$0xff] %vm591_vm5, %v514_v46  ;;  %893 = vrot.lane.b32.xlu0 %v4773_v55, %s4392_s5 }
  0xd1   : > { %887 = vrot.lane.b32.xlu1 %v4775_v56, %s4392_s5 }
  0xd2   : > { %v524_v35 = vpop.permute.xlu0 %523 }
  0xd3   : > { %606 = vst.msk [vmem:[#allocation4 + $0xe0] sm:$0xff] %vm591_vm5, %v524_v35  ;;  %v518_v36 = vpop.permute.xlu1 %517 }
  0xd4   : > { %603 = vst.msk [vmem:[#allocation4 + $0xb0] sm:$0xff] %vm591_vm5, %v518_v36  ;;  %897 = vrot.lane.b32.xlu0 %v4783_v57, %s4392_s5 }
  0xd5   : > { %891 = vrot.lane.b32.xlu1 %v4785_v58, %s4392_s5 }
  0xd6   : > { %v528_v53 = vpop.permute.xlu0 %527 }
  0xd7   : > { %608 = vst.msk [vmem:[#allocation4 + $0x100] sm:$0xff] %vm591_vm5, %v528_v53  ;;  %v522_v50 = vpop.permute.xlu1 %521 }
  0xd8   : > { %605 = vst.msk [vmem:[#allocation4 + $0xd0] sm:$0xff] %vm591_vm5, %v522_v50  ;;  %901 = vrot.lane.b32.xlu0 %v4787_v59, %s4392_s5 }
  0xd9   : > { %895 = vrot.lane.b32.xlu1 %v4795_v60, %s4392_s5 }
  0xda   : > { %v532_v40 = vpop.permute.xlu0 %531 }
  0xdb   : > { %610 = vst.msk [vmem:[#allocation4 + $0x120] sm:$0xff] %vm591_vm5, %v532_v40  ;;  %v526_v46 = vpop.permute.xlu1 %525 }
  0xdc   : > { %607 = vst.msk [vmem:[#allocation4 + $0xf0] sm:$0xff] %vm591_vm5, %v526_v46  ;;  %905 = vrot.lane.b32.xlu0 %v4797_v61, %s4392_s5 }
  0xdd   : > { %899 = vrot.lane.b32.xlu1 %v4799_v62, %s4392_s5 }
  0xde   : > { %v536_v35 = vpop.permute.xlu0 %535 }
  0xdf   : > { %612 = vst.msk [vmem:[#allocation4 + $0x140] sm:$0xff] %vm591_vm5, %v536_v35  ;;  %v530_v36 = vpop.permute.xlu1 %529 }
  0xe0   : > { %609 = vst.msk [vmem:[#allocation4 + $0x110] sm:$0xff] %vm591_vm5, %v530_v36  ;;  %909 = vrot.lane.b32.xlu0 %v4809_v0, %s4392_s5 }
  0xe1   : > { %903 = vrot.lane.b32.xlu1 %v4811_v1, %s4392_s5 }
  0xe2   : > { %v540_v53 = vpop.permute.xlu0 %539 }
  0xe3   : > { %614 = vst.msk [vmem:[#allocation4 + $0x160] sm:$0xff] %vm591_vm5, %v540_v53  ;;  %v534_v50 = vpop.permute.xlu1 %533 }
  0xe4   : > { %611 = vst.msk [vmem:[#allocation4 + $0x130] sm:$0xff] %vm591_vm5, %v534_v50  ;;  %913 = vrot.lane.b32.xlu0 %v4813_v2, %s4392_s5 }
  0xe5   : > { %907 = vrot.lane.b32.xlu1 %v4825_v4, %s4392_s5 }
  0xe6   : > { %v544_v40 = vpop.permute.xlu0 %543 }
  0xe7   : > { %616 = vst.msk [vmem:[#allocation4 + $0x180] sm:$0xff] %vm591_vm5, %v544_v40  ;;  %v538_v46 = vpop.permute.xlu1 %537 }
  0xe8   : > { %613 = vst.msk [vmem:[#allocation4 + $0x150] sm:$0xff] %vm591_vm5, %v538_v46  ;;  %917 = vrot.lane.b32.xlu0 %v4827_v5, %s4392_s5 }
  0xe9   : > { %911 = vrot.lane.b32.xlu1 %v4829_v6, %s4392_s5 }
  0xea   : > { %v548_v35 = vpop.permute.xlu0 %547 }
  0xeb   : > { %618 = vst.msk [vmem:[#allocation4 + $0x1a0] sm:$0xff] %vm591_vm5, %v548_v35  ;;  %v542_v36 = vpop.permute.xlu1 %541 }
  0xec   : > { %615 = vst.msk [vmem:[#allocation4 + $0x170] sm:$0xff] %vm591_vm5, %v542_v36  ;;  %921 = vrot.lane.b32.xlu0 %v4839_v7, %s4392_s5 }
  0xed   : > { %915 = vrot.lane.b32.xlu1 %v4841_v8, %s4392_s5 }
  0xee   : > { %v552_v53 = vpop.permute.xlu0 %551 }
  0xef   : > { %620 = vst.msk [vmem:[#allocation4 + $0x1c0] sm:$0xff] %vm591_vm5, %v552_v53  ;;  %v546_v50 = vpop.permute.xlu1 %545 }
  0xf0   : > { %617 = vst.msk [vmem:[#allocation4 + $0x190] sm:$0xff] %vm591_vm5, %v546_v50  ;;  %925 = vrot.lane.b32.xlu0 %v4843_v9, %s4392_s5  ;;  %v847_v50 = vld [vmem:[#allocation2 + $0x180] sm:$0xff] }
  0xf1   : > { %919 = vrot.lane.b32.xlu1 %v4851_v10, %s4392_s5 }
  0xf2   : > { %v556_v40 = vpop.permute.xlu0 %555 }
  0xf3   : > { %622 = vst.msk [vmem:[#allocation4 + $0x1e0] sm:$0xff] %vm591_vm5, %v556_v40  ;;  %v550_v46 = vpop.permute.xlu1 %549 }
  0xf4   : > { %619 = vst.msk [vmem:[#allocation4 + $0x1b0] sm:$0xff] %vm591_vm5, %v550_v46  ;;  %929 = vrot.lane.b32.xlu0 %v4853_v11, %s4392_s5 }
  0xf5   : > { %923 = vrot.lane.b32.xlu1 %v4855_v12, %s4392_s5 }
  0xf6   : > { %v689_v35 = vpop.permute.xlu0 %688 }
  0xf7   : > { %785 = vst.msk [vmem:[#allocation4] sm:$0xff] %vm784_vm6, %v689_v35  ;;  %v554_v36 = vpop.permute.xlu1 %553 }
  0xf8   : > { %621 = vst.msk [vmem:[#allocation4 + $0x1d0] sm:$0xff] %vm591_vm5, %v554_v36  ;;  %933 = vrot.lane.b32.xlu0 %v4869_v14, %s4392_s5 }
  0xf9   : > { %927 = vrot.lane.b32.xlu1 %v4875_v16, %s4392_s5 }
  0xfa   : > { %v693_v53 = vpop.permute.xlu0 %692 }
  0xfb   : > { %787 = vst.msk [vmem:[#allocation4 + $0x20] sm:$0xff] %vm784_vm6, %v693_v53  ;;  %v558_v11 = vpop.permute.xlu1 %557 }
  0xfc   : > { %623 = vst.msk [vmem:[#allocation4 + $0x1f0] sm:$0xff] %vm591_vm5, %v558_v11  ;;  %937 = vrot.lane.b32.xlu0 %v4885_v18, %s4392_s5 }
  0xfd   : > { %931 = vrot.lane.b32.xlu1 %v4891_v20, %s4392_s5  ;;  %v848_v20 = vld [vmem:[#allocation2 + $0x188] sm:$0xff] }
  0xfe   : > { %v697_v40 = vpop.permute.xlu0 %696 }
  0xff   : > { %789 = vst.msk [vmem:[#allocation4 + $0x40] sm:$0xff] %vm784_vm6, %v697_v40  ;;  %v691_v14 = vpop.permute.xlu1 %690 }
 0x100   : > { %786 = vst.msk [vmem:[#allocation4 + $0x10] sm:$0xff] %vm784_vm6, %v691_v14  ;;  %941 = vrot.lane.b32.xlu0 %v847_v50, %s4392_s5 }
 0x101   : > { %935 = vrot.lane.b32.xlu1 %v4903_v23, %s4392_s5 }
 0x102   : > { %v701_v46 = vpop.permute.xlu0 %700 }
 0x103   : > { %791 = vst.msk [vmem:[#allocation4 + $0x60] sm:$0xff] %vm784_vm6, %v701_v46  ;;  %v695_v35 = vpop.permute.xlu1 %694  ;;  %v6946_v46 = vld [vmem:[#allocation8_spill] sm:$0xff] }
 0x104   : > { %788 = vst.msk [vmem:[#allocation4 + $0x30] sm:$0xff] %vm784_vm6, %v695_v35  ;;  %1074 = vrot.lane.b32.xlu0 %v4687_v28, %s4393_s6 }
 0x105   : > { %939 = vrot.lane.b32.xlu1 %v4917_v33, %s4392_s5 }
 0x106   : > { %v705_v18 = vpop.permute.xlu0 %704 }
 0x107   : > { %793 = vst.msk [vmem:[#allocation4 + $0x80] sm:$0xff] %vm784_vm6, %v705_v18  ;;  %v699_v36 = vpop.permute.xlu1 %698  ;;  %v1041_v18 = vld [vmem:[#allocation2 + $0x189] sm:$0xff] }
 0x108   : > { %790 = vst.msk [vmem:[#allocation4 + $0x50] sm:$0xff] %vm784_vm6, %v699_v36  ;;  %1078 = vrot.lane.b32.xlu0 %v4678_v25, %s4393_s6  ;;  %v6947_v36 = vld [vmem:[#allocation9_spill] sm:$0xff] }
 0x109   : > { %943 = vrot.lane.b32.xlu1 %v848_v20, %s4392_s5 }
 0x10a   : > { %v709_v23 = vpop.permute.xlu0 %708 }
 0x10b   : > { %795 = vst.msk [vmem:[#allocation4 + $0xa0] sm:$0xff] %vm784_vm6, %v709_v23  ;;  %v703_v53 = vpop.permute.xlu1 %702 }
 0x10c   : > { %792 = vst.msk [vmem:[#allocation4 + $0x70] sm:$0xff] %vm784_vm6, %v703_v53  ;;  %1082 = vrot.lane.b32.xlu0 %v4693_v29, %s4393_s6 }
 0x10d   : > { %1076 = vrot.lane.b32.xlu1 %v4695_v30, %s4393_s6 }
 0x10e   : > { %v713_v28 = vpop.permute.xlu0 %712 }
 0x10f   : > { %797 = vst.msk [vmem:[#allocation4 + $0xc0] sm:$0xff] %vm784_vm6, %v713_v28  ;;  %v707_v33 = vpop.permute.xlu1 %706  ;;  %v6948_v28 = vld [vmem:[#allocation10_spill] sm:$0xff] }
 0x110   : > { %794 = vst.msk [vmem:[#allocation4 + $0x90] sm:$0xff] %vm784_vm6, %v707_v33  ;;  %1086 = vrot.lane.b32.xlu0 %v4701_v31, %s4393_s6  ;;  %v6949_v33 = vld [vmem:[#allocation11_spill] sm:$0xff] }
 0x111   : > { %1080 = vrot.lane.b32.xlu1 %v4703_v32, %s4393_s6 }
 0x112   : > { %v717_v25 = vpop.permute.xlu0 %716 }
 0x113   : > { %799 = vst.msk [vmem:[#allocation4 + $0xe0] sm:$0xff] %vm784_vm6, %v717_v25  ;;  %v711_v11 = vpop.permute.xlu1 %710 }
 0x114   : > { %796 = vst.msk [vmem:[#allocation4 + $0xb0] sm:$0xff] %vm784_vm6, %v711_v11  ;;  %1090 = vrot.lane.b32.xlu0 %v4714_v37, %s4393_s6 }
 0x115   : > { %1084 = vrot.lane.b32.xlu1 %v4720_v39, %s4393_s6 }
 0x116   : > { %v721_v29 = vpop.permute.xlu0 %720 }
 0x117   : > { %801 = vst.msk [vmem:[#allocation4 + $0x100] sm:$0xff] %vm784_vm6, %v721_v29  ;;  %v715_v30 = vpop.permute.xlu1 %714  ;;  %v6950_v29 = vld [vmem:[#allocation12_spill] sm:$0xff] }
 0x118   : > { %798 = vst.msk [vmem:[#allocation4 + $0xd0] sm:$0xff] %vm784_vm6, %v715_v30  ;;  %1094 = vrot.lane.b32.xlu0 %v4729_v41, %s4393_s6  ;;  %v6951_v30 = vld [vmem:[#allocation13_spill] sm:$0xff] }
 0x119   : > { %1088 = vrot.lane.b32.xlu1 %v4731_v42, %s4393_s6 }
 0x11a   : > { %v725_v31 = vpop.permute.xlu0 %724 }
 0x11b   : > { %803 = vst.msk [vmem:[#allocation4 + $0x120] sm:$0xff] %vm784_vm6, %v725_v31  ;;  %v719_v32 = vpop.permute.xlu1 %718 }
 0x11c   : > { %800 = vst.msk [vmem:[#allocation4 + $0xf0] sm:$0xff] %vm784_vm6, %v719_v32  ;;  %1098 = vrot.lane.b32.xlu0 %v4737_v43, %s4393_s6 }
 0x11d   : > { %1092 = vrot.lane.b32.xlu1 %v4739_v44, %s4393_s6 }
 0x11e   : > { %v729_v37 = vpop.permute.xlu0 %728 }
 0x11f   : > { %805 = vst.msk [vmem:[#allocation4 + $0x140] sm:$0xff] %vm784_vm6, %v729_v37  ;;  %v723_v39 = vpop.permute.xlu1 %722  ;;  %v6952_v37 = vld [vmem:[#allocation14_spill] sm:$0xff] }
 0x120   : > { %802 = vst.msk [vmem:[#allocation4 + $0x110] sm:$0xff] %vm784_vm6, %v723_v39  ;;  %1102 = vrot.lane.b32.xlu0 %v4746_v47, %s4393_s6  ;;  %v6953_v39 = vld [vmem:[#allocation15_spill] sm:$0xff] }
 0x121   : > { %1096 = vrot.lane.b32.xlu1 %v4751_v49, %s4393_s6 }
 0x122   : > { %v733_v41 = vpop.permute.xlu0 %732 }
 0x123   : > { %807 = vst.msk [vmem:[#allocation4 + $0x160] sm:$0xff] %vm784_vm6, %v733_v41  ;;  %v727_v42 = vpop.permute.xlu1 %726 }
 0x124   : > { %804 = vst.msk [vmem:[#allocation4 + $0x130] sm:$0xff] %vm784_vm6, %v727_v42  ;;  %1106 = vrot.lane.b32.xlu0 %v4757_v51, %s4393_s6 }
 0x125   : > { %1100 = vrot.lane.b32.xlu1 %v4767_v54, %s4393_s6 }
 0x126   : > { %v737_v43 = vpop.permute.xlu0 %736 }
 0x127   : > { %809 = vst.msk [vmem:[#allocation4 + $0x180] sm:$0xff] %vm784_vm6, %v737_v43  ;;  %v731_v44 = vpop.permute.xlu1 %730  ;;  %v6954_v43 = vld [vmem:[#allocation16_spill] sm:$0xff] }
 0x128   : > { %806 = vst.msk [vmem:[#allocation4 + $0x150] sm:$0xff] %vm784_vm6, %v731_v44  ;;  %1110 = vrot.lane.b32.xlu0 %v4801_v63, %s4393_s6  ;;  %v6955_v44 = vld [vmem:[#allocation17_spill] sm:$0xff] }
 0x129   : > { %1104 = vrot.lane.b32.xlu1 %v4817_v3, %s4393_s6 }
 0x12a   : > { %v741_v47 = vpop.permute.xlu0 %740 }
 0x12b   : > { %811 = vst.msk [vmem:[#allocation4 + $0x1a0] sm:$0xff] %vm784_vm6, %v741_v47  ;;  %v735_v49 = vpop.permute.xlu1 %734 }
 0x12c   : > { %808 = vst.msk [vmem:[#allocation4 + $0x170] sm:$0xff] %vm784_vm6, %v735_v49  ;;  %1114 = vrot.lane.b32.xlu0 %v4867_v13, %s4393_s6 }
 0x12d   : > { %1108 = vrot.lane.b32.xlu1 %v4871_v15, %s4393_s6 }
 0x12e   : > { %v745_v51 = vpop.permute.xlu0 %744 }
 0x12f   : > { %813 = vst.msk [vmem:[#allocation4 + $0x1c0] sm:$0xff] %vm784_vm6, %v745_v51  ;;  %v739_v54 = vpop.permute.xlu1 %738  ;;  %v6956_v51 = vld [vmem:[#allocation18_spill] sm:$0xff] }
 0x130   : > { %810 = vst.msk [vmem:[#allocation4 + $0x190] sm:$0xff] %vm784_vm6, %v739_v54  ;;  %1118 = vrot.lane.b32.xlu0 %v4883_v17, %s4393_s6  ;;  %v6957_v54 = vld [vmem:[#allocation19_spill] sm:$0xff] }
 0x131   : > { %1112 = vrot.lane.b32.xlu1 %v4887_v19, %s4393_s6 }
 0x132   : > { %v749_v63 = vpop.permute.xlu0 %748 }
 0x133   : > { %815 = vst.msk [vmem:[#allocation4 + $0x1e0] sm:$0xff] %vm784_vm6, %v749_v63  ;;  %v743_v3 = vpop.permute.xlu1 %742 }
 0x134   : > { %812 = vst.msk [vmem:[#allocation4 + $0x1b0] sm:$0xff] %vm784_vm6, %v743_v3  ;;  %1122 = vrot.lane.b32.xlu0 %v4899_v21, %s4393_s6  ;;  %v6943_v21 = vld [vmem:[#allocation5_spill] sm:$0xff] }
 0x135   : > { %1116 = vrot.lane.b32.xlu1 %v4901_v22, %s4393_s6  ;;  %v1040_v22 = vld [vmem:[#allocation2 + $0x181] sm:$0xff] }
 0x136   : > { %v882_v13 = vpop.permute.xlu0 %881 }
 0x137   : > { %978 = vst.msk [vmem:[#allocation4] sm:$0xff] %vm977_vm7, %v882_v13  ;;  %v747_v15 = vpop.permute.xlu1 %746  ;;  %v6958_v13 = vld [vmem:[#allocation20_spill] sm:$0xff] }
 0x138   : > { %814 = vst.msk [vmem:[#allocation4 + $0x1d0] sm:$0xff] %vm784_vm6, %v747_v15  ;;  %1126 = vrot.lane.b32.xlu0 %v4912_v26, %s4393_s6  ;;  %v6959_v15 = vld [vmem:[#allocation21_spill] sm:$0xff] }
 0x139   : > { %1120 = vrot.lane.b32.xlu1 %v4915_v27, %s4393_s6  ;;  %v6944_v27 = vld [vmem:[#allocation6_spill] sm:$0xff] }
 0x13a   : > { %v886_v17 = vpop.permute.xlu0 %885 }
 0x13b   : > { %980 = vst.msk [vmem:[#allocation4 + $0x20] sm:$0xff] %vm977_vm7, %v886_v17  ;;  %v751_v19 = vpop.permute.xlu1 %750 }
 0x13c   : > { %816 = vst.msk [vmem:[#allocation4 + $0x1f0] sm:$0xff] %vm784_vm6, %v751_v19  ;;  %1130 = vrot.lane.b32.xlu0 %v4925_v34, %s4393_s6  ;;  %v6945_v34 = vld [vmem:[#allocation7_spill] sm:$0xff] }
 0x13d   : > { %1124 = vrot.lane.b32.xlu1 %v6943_v21, %s4393_s6  ;;  %v6960_v21 = vld [vmem:[#allocation22_spill] sm:$0xff] }
 0x13e   : > { %v890_v50 = vpop.permute.xlu0 %889 }
 0x13f   : > { %982 = vst.msk [vmem:[#allocation4 + $0x40] sm:$0xff] %vm977_vm7, %v890_v50  ;;  %v884_v26 = vpop.permute.xlu1 %883 }
 0x140   : > { %979 = vst.msk [vmem:[#allocation4 + $0x10] sm:$0xff] %vm977_vm7, %v884_v26  ;;  %1134 = vrot.lane.b32.xlu0 %v1040_v22, %s4393_s6  ;;  %v6961_v22 = vld [vmem:[#allocation23_spill] sm:$0xff] }
 0x141   : > { %1128 = vrot.lane.b32.xlu1 %v6944_v27, %s4393_s6  ;;  %v6962_v27 = vld [vmem:[#allocation24_spill] sm:$0xff] }
 0x142   : > { %v894_v40 = vpop.permute.xlu0 %893 }
 0x143   : > { %984 = vst.msk [vmem:[#allocation4 + $0x60] sm:$0xff] %vm977_vm7, %v894_v40  ;;  %v888_v14 = vpop.permute.xlu1 %887  ;;  %v6963_v40 = vld [vmem:[#allocation25_spill] sm:$0xff] }
 0x144   : > { %981 = vst.msk [vmem:[#allocation4 + $0x30] sm:$0xff] %vm977_vm7, %v888_v14  ;;  %1267 = vrot.lane.b32.xlu0 %v6945_v34, %s4394_s7 }
 0x145   : > { %1132 = vrot.lane.b32.xlu1 %v6946_v46, %s4393_s6  ;;  %v6964_v46 = vld [vmem:[#allocation26_spill] sm:$0xff] }
 0x146   : > { %v898_v35 = vpop.permute.xlu0 %897 }
 0x147   : > { %986 = vst.msk [vmem:[#allocation4 + $0x80] sm:$0xff] %vm977_vm7, %v898_v35  ;;  %v892_v20 = vpop.permute.xlu1 %891  ;;  %v6965_v35 = vld [vmem:[#allocation27_spill] sm:$0xff] }
 0x148   : > { %983 = vst.msk [vmem:[#allocation4 + $0x50] sm:$0xff] %vm977_vm7, %v892_v20  ;;  %1271 = vrot.lane.b32.xlu0 %v6947_v36, %s4394_s7  ;;  %v6966_v36 = vld [vmem:[#allocation28_spill] sm:$0xff] }
 0x149   : > { %1136 = vrot.lane.b32.xlu1 %v1041_v18, %s4393_s6 }
 0x14a   : > { %v902_v23 = vpop.permute.xlu0 %901 }
 0x14b   : > { %988 = vst.msk [vmem:[#allocation4 + $0xa0] sm:$0xff] %vm977_vm7, %v902_v23  ;;  %v896_v53 = vpop.permute.xlu1 %895  ;;  %v6967_v23 = vld [vmem:[#allocation29_spill] sm:$0xff] }
 0x14c   : > { %985 = vst.msk [vmem:[#allocation4 + $0x70] sm:$0xff] %vm977_vm7, %v896_v53  ;;  %1275 = vrot.lane.b32.xlu0 %v6948_v28, %s4394_s7 }
 0x14d   : > { %1269 = vrot.lane.b32.xlu1 %v6949_v33, %s4394_s7  ;;  %v6968_v33 = vld [vmem:[#allocation30_spill] sm:$0xff] }
 0x14e   : > { %v906_v25 = vpop.permute.xlu0 %905 }
 0x14f   : > { %990 = vst.msk [vmem:[#allocation4 + $0xc0] sm:$0xff] %vm977_vm7, %v906_v25  ;;  %v900_v11 = vpop.permute.xlu1 %899  ;;  %v6969_v25 = vld [vmem:[#allocation31_spill] sm:$0xff] }
 0x150   : > { %987 = vst.msk [vmem:[#allocation4 + $0x90] sm:$0xff] %vm977_vm7, %v900_v11  ;;  %1279 = vrot.lane.b32.xlu0 %v6950_v29, %s4394_s7 }
 0x151   : > { %1273 = vrot.lane.b32.xlu1 %v6951_v30, %s4394_s7  ;;  %v6970_v30 = vld [vmem:[#allocation32_spill] sm:$0xff] }
 0x152   : > { %v910_v31 = vpop.permute.xlu0 %909 }
 0x153   : > { %992 = vst.msk [vmem:[#allocation4 + $0xe0] sm:$0xff] %vm977_vm7, %v910_v31  ;;  %v904_v32 = vpop.permute.xlu1 %903  ;;  %v6971_v31 = vld [vmem:[#allocation33_spill] sm:$0xff] }
 0x154   : > { %989 = vst.msk [vmem:[#allocation4 + $0xb0] sm:$0xff] %vm977_vm7, %v904_v32  ;;  %1283 = vrot.lane.b32.xlu0 %v6952_v37, %s4394_s7 }
 0x155   : > { %1277 = vrot.lane.b32.xlu1 %v6953_v39, %s4394_s7  ;;  %v6972_v39 = vld [vmem:[#allocation34_spill] sm:$0xff] }
 0x156   : > { %v914_v41 = vpop.permute.xlu0 %913 }
 0x157   : > { %994 = vst.msk [vmem:[#allocation4 + $0x100] sm:$0xff] %vm977_vm7, %v914_v41  ;;  %v908_v42 = vpop.permute.xlu1 %907  ;;  %v5343_v41 = vld [vmem:[#allocation2 + $0x182] sm:$0xff] }
 0x158   : > { %991 = vst.msk [vmem:[#allocation4 + $0xd0] sm:$0xff] %vm977_vm7, %v908_v42  ;;  %1287 = vrot.lane.b32.xlu0 %v6954_v43, %s4394_s7  ;;  %v2073_v42 = vld [vmem:[%s6869_s1] sm:$0xff]  ;;  %v2074_v43 = vld [vmem:[%s6869_s1 + $0x8] sm:$0xff] }
 0x159   : > { %1281 = vrot.lane.b32.xlu1 %v6955_v44, %s4394_s7 }
 0x15a   : > { %v918_v47 = vpop.permute.xlu0 %917 }
 0x15b   : > { %996 = vst.msk [vmem:[#allocation4 + $0x120] sm:$0xff] %vm977_vm7, %v918_v47  ;;  %v912_v49 = vpop.permute.xlu1 %911  ;;  %v4395_v47 = vmov 0.0|0.0  }
 0x15c   : > { %993 = vst.msk [vmem:[#allocation4 + $0xf0] sm:$0xff] %vm977_vm7, %v912_v49  ;;  %1291 = vrot.lane.b32.xlu0 %v6956_v51, %s4394_s7  ;;  %4015 = vmatprep.subr.bf16.mxu1 %v4395_v47  ;;  %v3983_v49 = vpack.c.bf16 %v2074_v43, %v2073_v42  ;;  %v2075_v51 = vld [vmem:[%s6869_s1 + $0x10] sm:$0xff] }
 0x15d   : > { %1285 = vrot.lane.b32.xlu1 %v6957_v54, %s4394_s7  ;;  %3982 = vmatprep.subr.bf16.mxu0 %v4395_v47  ;;  %v2076_v54 = vld [vmem:[%s6869_s1 + $0x18] sm:$0xff] }
 0x15e   : > { %v922_v63 = vpop.permute.xlu0 %921  ;;  %4027 = vmatpush1.bf16.msra.mxu1 %v3983_v49  ;;  %3984 = vmatpush1.bf16.msra.mxu0 %v3983_v49 }
 0x15f   : > { %998 = vst.msk [vmem:[#allocation4 + $0x140] sm:$0xff] %vm977_vm7, %v922_v63  ;;  %v916_v3 = vpop.permute.xlu1 %915  ;;  %4016 = vmatprep.subr.bf16.mxu1 %v4395_v47  ;;  %3985 = vmatprep.subr.bf16.mxu0 %v4395_v47 }
 0x160   : > { %995 = vst.msk [vmem:[#allocation4 + $0x110] sm:$0xff] %vm977_vm7, %v916_v3  ;;  %1295 = vrot.lane.b32.xlu0 %v6958_v13, %s4394_s7  ;;  %v3986_v3 = vpack.c.bf16 %v2076_v54, %v2075_v51  ;;  %v1640_v54 = vld [vmem:[#allocation2 + $0xf9] sm:$0xff] }
 0x161   : > { %1289 = vrot.lane.b32.xlu1 %v6959_v15, %s4394_s7  ;;  %v2078_v15 = vld [vmem:[%s6869_s1 + $0x28] sm:$0xff] }
 0x162   : > { %v926_v17 = vpop.permute.xlu0 %925  ;;  %4028 = vmatpush1.bf16.msra.mxu1 %v3986_v3  ;;  %3987 = vmatpush1.bf16.msra.mxu0 %v3986_v3  ;;  %v1816_v3 = vld [vmem:[#allocation2 + $0x32] sm:$0xff] }
 0x163   : > { %1000 = vst.msk [vmem:[#allocation4 + $0x160] sm:$0xff] %vm977_vm7, %v926_v17  ;;  %v920_v19 = vpop.permute.xlu1 %919  ;;  %4017 = vmatprep.subr.bf16.mxu1 %v4395_v47  ;;  %3988 = vmatprep.subr.bf16.mxu0 %v4395_v47 }
 0x164   : > { %997 = vst.msk [vmem:[#allocation4 + $0x130] sm:$0xff] %vm977_vm7, %v920_v19  ;;  %1299 = vrot.lane.b32.xlu0 %v6960_v21, %s4394_s7  ;;  %v5380_v19 = vld [vmem:[#allocation2 + $0x18a] sm:$0xff] }
 0x165   : > { %1293 = vrot.lane.b32.xlu1 %v6961_v22, %s4394_s7  ;;  %v2080_v22 = vld [vmem:[%s6869_s1 + $0x38] sm:$0xff] }
 0x166   : > { %v930_v50 = vpop.permute.xlu0 %929 }
 0x167   : > { %1002 = vst.msk [vmem:[#allocation4 + $0x180] sm:$0xff] %vm977_vm7, %v930_v50  ;;  %v924_v26 = vpop.permute.xlu1 %923 }
 0x168   : > { %999 = vst.msk [vmem:[#allocation4 + $0x150] sm:$0xff] %vm977_vm7, %v924_v26  ;;  %1303 = vrot.lane.b32.xlu0 %v6962_v27, %s4394_s7  ;;  %v2081_v27 = vld [vmem:[%s6869_s1 + $0x40] sm:$0xff] }
 0x169   : > { %1297 = vrot.lane.b32.xlu1 %v6963_v40, %s4394_s7  ;;  %v2082_v40 = vld [vmem:[%s6869_s1 + $0x48] sm:$0xff] }
 0x16a   : > { %v934_v14 = vpop.permute.xlu0 %933 }
 0x16b   : > { %1004 = vst.msk [vmem:[#allocation4 + $0x1a0] sm:$0xff] %vm977_vm7, %v934_v14  ;;  %v928_v34 = vpop.permute.xlu1 %927 }
 0x16c   : > { %1001 = vst.msk [vmem:[#allocation4 + $0x170] sm:$0xff] %vm977_vm7, %v928_v34  ;;  %1307 = vrot.lane.b32.xlu0 %v6964_v46, %s4394_s7  ;;  %v3995_v34 = vpack.c.bf16 %v2082_v40, %v2081_v27  ;;  %v2084_v46 = vld [vmem:[%s6869_s1 + $0x58] sm:$0xff] }
 0x16d   : > { %1301 = vrot.lane.b32.xlu1 %v6965_v35, %s4394_s7  ;;  %v1626_v40 = vld [vmem:[#allocation2 + $0x51] sm:$0xff] }
 0x16e   : > { %v938_v18 = vpop.permute.xlu0 %937 }
 0x16f   : > { %1006 = vst.msk [vmem:[#allocation4 + $0x1c0] sm:$0xff] %vm977_vm7, %v938_v18  ;;  %v932_v20 = vpop.permute.xlu1 %931 }
 0x170   : > { %1003 = vst.msk [vmem:[#allocation4 + $0x190] sm:$0xff] %vm977_vm7, %v932_v20  ;;  %1311 = vrot.lane.b32.xlu0 %v6966_v36, %s4394_s7  ;;  %v2086_v20 = vld [vmem:[%s6869_s1 + $0x68] sm:$0xff] }
 0x171   : > { %1305 = vrot.lane.b32.xlu1 %v6967_v23, %s4394_s7 }
 0x172   : > { %v942_v53 = vpop.permute.xlu0 %941 }
 0x173   : > { %1008 = vst.msk [vmem:[#allocation4 + $0x1e0] sm:$0xff] %vm977_vm7, %v942_v53  ;;  %v936_v28 = vpop.permute.xlu1 %935  ;;  %v2088_v53 = vld [vmem:[%s6869_s1 + $0x78] sm:$0xff] }
 0x174   : > { %1005 = vst.msk [vmem:[#allocation4 + $0x1b0] sm:$0xff] %vm977_vm7, %v936_v28  ;;  %1315 = vrot.lane.b32.xlu0 %v6968_v33, %s4394_s7 }
 0x175   : > { %1309 = vrot.lane.b32.xlu1 %v6969_v25, %s4394_s7  ;;  %v2090_v25 = vld [vmem:[%s6869_s1 + $0x88] sm:$0xff] }
 0x176   : > { %v1075_v11 = vpop.permute.xlu0 %1074 }
 0x177   : > { %1171 = vst.msk [vmem:[#allocation4] sm:$0xff] %vm1170_vm8, %v1075_v11  ;;  %v940_v29 = vpop.permute.xlu1 %939 }
 0x178   : > { %1007 = vst.msk [vmem:[#allocation4 + $0x1d0] sm:$0xff] %vm977_vm7, %v940_v29  ;;  %1319 = vrot.lane.b32.xlu0 %v6970_v30, %s4394_s7  ;;  %v2092_v30 = vld [vmem:[%s6869_s1 + $0x98] sm:$0xff] }
 0x179   : > { %1313 = vrot.lane.b32.xlu1 %v6971_v31, %s4394_s7 }
 0x17a   : > { %v1079_v32 = vpop.permute.xlu0 %1078 }
 0x17b   : > { %1173 = vst.msk [vmem:[#allocation4 + $0x20] sm:$0xff] %vm1170_vm8, %v1079_v32  ;;  %v944_v37 = vpop.permute.xlu1 %943 }
 0x17c   : > { %1009 = vst.msk [vmem:[#allocation4 + $0x1f0] sm:$0xff] %vm977_vm7, %v944_v37  ;;  %1323 = vrot.lane.b32.xlu0 %v5051_v45, %s4394_s7  ;;  %v2094_v37 = vld [vmem:[%s6869_s1 + $0xa8] sm:$0xff] }
 0x17d   : > { %1317 = vrot.lane.b32.xlu1 %v6972_v39, %s4394_s7 }
 0x17e   : > { %v1083_v44 = vpop.permute.xlu0 %1082 }
 0x17f   : > { %1175 = vst.msk [vmem:[#allocation4 + $0x40] sm:$0xff] %vm1170_vm8, %v1083_v44  ;;  %v1077_v45 = vpop.permute.xlu1 %1076  ;;  %v4397_v44 = vmov 0.0  }
 0x180   : > { %1172 = vst.msk [vmem:[#allocation4 + $0x10] sm:$0xff] %vm1170_vm8, %v1077_v45  ;;  %1327 = vrot.lane.b32.xlu0 %v5343_v41, %s4394_s7  ;;  %v1623_v45 = vld [vmem:[#allocation2 + $0x31] sm:$0xff] }
 0x181   : > { %1321 = vrot.lane.b32.xlu1 %v5061_v24, %s4394_s7  ;;  %v2077_v24 = vld [vmem:[%s6869_s1 + $0x20] sm:$0xff] }
 0x182   : > { %v1087_v63 = vpop.permute.xlu0 %1086  ;;  %v3989_v21 = vpack.c.bf16 %v2078_v15, %v2077_v24  ;;  %v1624_v15 = vld [vmem:[#allocation2 + $0x39] sm:$0xff] }
 0x183   : > { %1177 = vst.msk [vmem:[#allocation4 + $0x60] sm:$0xff] %vm1170_vm8, %v1087_v63  ;;  %v1081_v13 = vpop.permute.xlu1 %1080 }
 0x184   : > { %1174 = vst.msk [vmem:[#allocation4 + $0x30] sm:$0xff] %vm1170_vm8, %v1081_v13  ;;  %1461 = vrot.lane.b32.xlu0 %v4749_v48, %s4396_s21  ;;  %4029 = vmatpush1.bf16.msra.mxu1 %v3989_v21  ;;  %v1833_v13 = vld [vmem:[#allocation2 + $0xfa] sm:$0xff] }
 0x185   : > { %1325 = vrot.lane.b32.xlu1 %v5069_v38, %s4394_s7  ;;  %4018 = vmatprep.subr.bf16.mxu1 %v4395_v47  ;;  %v2079_v38 = vld [vmem:[%s6869_s1 + $0x30] sm:$0xff] }
 0x186   : > { %v1091_v17 = vpop.permute.xlu0 %1090  ;;  %3990 = vmatpush1.bf16.msra.mxu0 %v3989_v21  ;;  %v3992_v26 = vpack.c.bf16 %v2080_v22, %v2079_v38  ;;  %v1641_v21 = vld [vmem:[#allocation2 + $0x109] sm:$0xff]  ;;  %v1817_v38 = vld [vmem:[#allocation2 + $0x3a] sm:$0xff] }
 0x187   : > { %1179 = vst.msk [vmem:[#allocation4 + $0x80] sm:$0xff] %vm1170_vm8, %v1091_v17  ;;  %v1085_v48 = vpop.permute.xlu1 %1084  ;;  %3991 = vmatprep.subr.bf16.mxu0 %v4395_v47 }
 0x188   : > { %1176 = vst.msk [vmem:[#allocation4 + $0x50] sm:$0xff] %vm1170_vm8, %v1085_v48  ;;  %1465 = vrot.lane.b32.xlu0 %v4761_v52, %s4396_s21  ;;  %4030 = vmatpush1.bf16.msra.mxu1 %v3992_v26 }
 0x189   : > { %1329 = vrot.lane.b32.xlu1 %v5380_v19, %s4394_s7  ;;  %4019 = vmatprep.subr.bf16.mxu1 %v4395_v47 }
 0x18a   : > { %v1095_v50 = vpop.permute.xlu0 %1094  ;;  %3993 = vmatpush1.bf16.msra.mxu0 %v3992_v26 }
 0x18b   : > { %1181 = vst.msk [vmem:[#allocation4 + $0xa0] sm:$0xff] %vm1170_vm8, %v1095_v50  ;;  %v1089_v52 = vpop.permute.xlu1 %1088  ;;  %3994 = vmatprep.subr.bf16.mxu0 %v4395_v47  ;;  %v1834_v50 = vld [vmem:[#allocation2 + $0x10a] sm:$0xff] }
 0x18c   : > { %1178 = vst.msk [vmem:[#allocation4 + $0x70] sm:$0xff] %vm1170_vm8, %v1089_v52  ;;  %1469 = vrot.lane.b32.xlu0 %v4773_v55, %s4396_s21  ;;  %4031 = vmatpush1.bf16.msra.mxu1 %v3995_v34  ;;  %v1625_v52 = vld [vmem:[#allocation2 + $0x49] sm:$0xff] }
 0x18d   : > { %1463 = vrot.lane.b32.xlu1 %v4775_v56, %s4396_s21  ;;  %4020 = vmatprep.subr.bf16.mxu1 %v4395_v47  ;;  %v2083_v56 = vld [vmem:[%s6869_s1 + $0x50] sm:$0xff] }
 0x18e   : > { %v1099_v14 = vpop.permute.xlu0 %1098  ;;  %3996 = vmatpush1.bf16.msra.mxu0 %v3995_v34  ;;  %v3998_v18 = vpack.c.bf16 %v2084_v46, %v2083_v56  ;;  %v1818_v34 = vld [vmem:[#allocation2 + $0x4a] sm:$0xff]  ;;  %v1819_v56 = vld [vmem:[#allocation2 + $0x52] sm:$0xff] }
 0x18f   : > { %1183 = vst.msk [vmem:[#allocation4 + $0xc0] sm:$0xff] %vm1170_vm8, %v1099_v14  ;;  %v1093_v55 = vpop.permute.xlu1 %1092  ;;  %3997 = vmatprep.subr.bf16.mxu0 %v4395_v47 }
 0x190   : > { %1180 = vst.msk [vmem:[#allocation4 + $0x90] sm:$0xff] %vm1170_vm8, %v1093_v55  ;;  %1473 = vrot.lane.b32.xlu0 %v4783_v57, %s4396_s21  ;;  %4032 = vmatpush1.bf16.msra.mxu1 %v3998_v18 }
 0x191   : > { %1467 = vrot.lane.b32.xlu1 %v4785_v58, %s4396_s21  ;;  %4021 = vmatprep.subr.bf16.mxu1 %v4395_v47  ;;  %v2085_v58 = vld [vmem:[%s6869_s1 + $0x60] sm:$0xff] }
 0x192   : > { %v1103_v35 = vpop.permute.xlu0 %1102  ;;  %3999 = vmatpush1.bf16.msra.mxu0 %v3998_v18  ;;  %v4001_v23 = vpack.c.bf16 %v2086_v20, %v2085_v58  ;;  %v1643_v20 = vld [vmem:[#allocation2 + $0x121] sm:$0xff] }
 0x193   : > { %1185 = vst.msk [vmem:[#allocation4 + $0xe0] sm:$0xff] %vm1170_vm8, %v1103_v35  ;;  %v1097_v57 = vpop.permute.xlu1 %1096  ;;  %4000 = vmatprep.subr.bf16.mxu0 %v4395_v47 }
 0x194   : > { %1182 = vst.msk [vmem:[#allocation4 + $0xb0] sm:$0xff] %vm1170_vm8, %v1097_v57  ;;  %1477 = vrot.lane.b32.xlu0 %v4787_v59, %s4396_s21  ;;  %4033 = vmatpush1.bf16.msra.mxu1 %v4001_v23  ;;  %v1642_v57 = vld [vmem:[#allocation2 + $0x111] sm:$0xff] }
 0x195   : > { %1471 = vrot.lane.b32.xlu1 %v4795_v60, %s4396_s21  ;;  %4022 = vmatprep.subr.bf16.mxu1 %v4395_v47  ;;  %v2087_v60 = vld [vmem:[%s6869_s1 + $0x70] sm:$0xff] }
 0x196   : > { %v1107_v36 = vpop.permute.xlu0 %1106  ;;  %4002 = vmatpush1.bf16.msra.mxu0 %v4001_v23  ;;  %v4004_v33 = vpack.c.bf16 %v2088_v53, %v2087_v60  ;;  %v1835_v23 = vld [vmem:[#allocation2 + $0x112] sm:$0xff]  ;;  %v1627_v53 = vld [vmem:[#allocation2 + $0x61] sm:$0xff] }
 0x197   : > { %1187 = vst.msk [vmem:[#allocation4 + $0x100] sm:$0xff] %vm1170_vm8, %v1107_v36  ;;  %v1101_v59 = vpop.permute.xlu1 %1100  ;;  %4003 = vmatprep.subr.bf16.mxu0 %v4395_v47 }
 0x198   : > { %1184 = vst.msk [vmem:[#allocation4 + $0xd0] sm:$0xff] %vm1170_vm8, %v1101_v59  ;;  %1481 = vrot.lane.b32.xlu0 %v4797_v61, %s4396_s21  ;;  %4034 = vmatpush1.bf16.msra.mxu1 %v4004_v33 }
 0x199   : > { %1475 = vrot.lane.b32.xlu1 %v4799_v62, %s4396_s21  ;;  %4023 = vmatprep.subr.bf16.mxu1 %v4395_v47  ;;  %v2089_v62 = vld [vmem:[%s6869_s1 + $0x80] sm:$0xff] }
 0x19a   : > { %v1111_v28 = vpop.permute.xlu0 %1110  ;;  %4005 = vmatpush1.bf16.msra.mxu0 %v4004_v33  ;;  %v4007_v29 = vpack.c.bf16 %v2090_v25, %v2089_v62  ;;  %v1821_v25 = vld [vmem:[#allocation2 + $0x6a] sm:$0xff] }
 0x19b   : > { %1189 = vst.msk [vmem:[#allocation4 + $0x120] sm:$0xff] %vm1170_vm8, %v1111_v28  ;;  %v1105_v61 = vpop.permute.xlu1 %1104  ;;  %4006 = vmatprep.subr.bf16.mxu0 %v4395_v47  ;;  %v1628_v28 = vld [vmem:[#allocation2 + $0x69] sm:$0xff] }
 0x19c   : > { %1186 = vst.msk [vmem:[#allocation4 + $0xf0] sm:$0xff] %vm1170_vm8, %v1105_v61  ;;  %1485 = vrot.lane.b32.xlu0 %v4809_v0, %s4396_s21  ;;  %4035 = vmatpush1.bf16.msra.mxu1 %v4007_v29  ;;  %v1820_v61 = vld [vmem:[#allocation2 + $0x62] sm:$0xff] }
 0x19d   : > { %1479 = vrot.lane.b32.xlu1 %v4811_v1, %s4396_s21  ;;  %4024 = vmatprep.subr.bf16.mxu1 %v4395_v47  ;;  %v2091_v1 = vld [vmem:[%s6869_s1 + $0x90] sm:$0xff] }
 0x19e   : > { %v1115_v11 = vpop.permute.xlu0 %1114  ;;  %4008 = vmatpush1.bf16.msra.mxu0 %v4007_v29  ;;  %v4010_v32 = vpack.c.bf16 %v2092_v30, %v2091_v1  ;;  %v1644_v30 = vld [vmem:[#allocation2 + $0x129] sm:$0xff] }
 0x19f   : > { %1191 = vst.msk [vmem:[#allocation4 + $0x140] sm:$0xff] %vm1170_vm8, %v1115_v11  ;;  %v1109_v0 = vpop.permute.xlu1 %1108  ;;  %4009 = vmatprep.subr.bf16.mxu0 %v4395_v47 }
 0x1a0   : > { %1188 = vst.msk [vmem:[#allocation4 + $0x110] sm:$0xff] %vm1170_vm8, %v1109_v0  ;;  %1489 = vrot.lane.b32.xlu0 %v4813_v2, %s4396_s21  ;;  %4036 = vmatpush1.bf16.msra.mxu1 %v4010_v32  ;;  %v1419_v0 = vld [vmem:[#allocation2 + $0x138] sm:$0xff] }
 0x1a1   : > { %1483 = vrot.lane.b32.xlu1 %v4825_v4, %s4396_s21  ;;  %4025 = vmatprep.subr.bf16.mxu1 %v4395_v47  ;;  %v2093_v4 = vld [vmem:[%s6869_s1 + $0xa0] sm:$0xff] }
 0x1a2   : > { %v1119_v31 = vpop.permute.xlu0 %1118  ;;  %4011 = vmatpush1.bf16.msra.mxu0 %v4010_v32  ;;  %v4013_v42 = vpack.c.bf16 %v2094_v37, %v2093_v4  ;;  %v1645_v32 = vld [vmem:[#allocation2 + $0x139] sm:$0xff]  ;;  %v1837_v4 = vld [vmem:[#allocation2 + $0x12a] sm:$0xff] }
 0x1a3   : > { %1193 = vst.msk [vmem:[#allocation4 + $0x160] sm:$0xff] %vm1170_vm8, %v1119_v31  ;;  %v1113_v2 = vpop.permute.xlu1 %1112  ;;  %4012 = vmatprep.subr.bf16.mxu0 %v4395_v47  ;;  %v2095_v47 = vld [vmem:[%s6869_s1 + $0xb0] sm:$0xf] }
 0x1a4   : > { %1190 = vst.msk [vmem:[#allocation4 + $0x130] sm:$0xff] %vm1170_vm8, %v1113_v2  ;;  %1493 = vrot.lane.b32.xlu0 %v4827_v5, %s4396_s21  ;;  %4037 = vmatpush1.bf16.msra.mxu1 %v4013_v42 }
 0x1a5   : > { %1487 = vrot.lane.b32.xlu1 %v4829_v6, %s4396_s21  ;;  %v1639_v6 = vld [vmem:[#allocation2 + $0xf1] sm:$0xff]  ;;  %4026 = vmatprep.subr.mxu1 %v4397_v44 }
 0x1a6   : > { %v1123_v39 = vpop.permute.xlu0 %1122  ;;  %4014 = vmatpush1.bf16.msra.mxu0 %v4013_v42  ;;  %v1629_v42 = vld [vmem:[#allocation2 + $0x79] sm:$0xff] }
 0x1a7   : > { %1195 = vst.msk [vmem:[#allocation4 + $0x180] sm:$0xff] %vm1170_vm8, %v1123_v39  ;;  %v1117_v5 = vpop.permute.xlu1 %1116  ;;  %2248 = vmatprep.subr.mxu0 %v4397_v44  ;;  %v1822_v44 = vld [vmem:[#allocation2 + $0x7a] sm:$0xff] }
 0x1a8   : > { %1192 = vst.msk [vmem:[#allocation4 + $0x150] sm:$0xff] %vm1170_vm8, %v1117_v5  ;;  %1497 = vrot.lane.b32.xlu0 %v4839_v7, %s4396_s21  ;;  %4038 = vmatpush1.msk.msra.mxu1 %vm2200_vm9, %v2095_v47  ;;  %v1832_v7 = vld [vmem:[#allocation2 + $0xf2] sm:$0xff] }
 0x1a9   : > { %1491 = vrot.lane.b32.xlu1 %v4841_v8, %s4396_s21 }
 0x1aa   : > { %v1127_v43 = vpop.permute.xlu0 %1126  ;;  %3915 = vmatpush1.msk.msra.mxu0 %vm2200_vm9, %v2095_v47  ;;  %v1823_v47 = vld [vmem:[#allocation2 + $0x82] sm:$0xff] }
 0x1ab   : > { %1197 = vst.msk [vmem:[#allocation4 + $0x1a0] sm:$0xff] %vm1170_vm8, %v1127_v43  ;;  %v1121_v49 = vpop.permute.xlu1 %1120 }
 0x1ac   : > { %1194 = vst.msk [vmem:[#allocation4 + $0x170] sm:$0xff] %vm1170_vm8, %v1121_v49  ;;  %1719 = vrot.lane.b32.xlu0 %v1639_v6, %s4398_s24  ;;  %v1630_v6 = vld [vmem:[#allocation2 + $0x81] sm:$0xff] }
 0x1ad   : > { %1495 = vrot.lane.b32.xlu1 %v4851_v10, %s4396_s21 }
 0x1ae   : > { %v1131_v8 = vpop.permute.xlu0 %1130 }
 0x1af   : > { %1199 = vst.msk [vmem:[#allocation4 + $0x1c0] sm:$0xff] %vm1170_vm8, %v1131_v8  ;;  %v1125_v51 = vpop.permute.xlu1 %1124  ;;  %v1420_v8 = vld [vmem:[#allocation2 + $0x140] sm:$0xff] }
 0x1b0   : > { %1196 = vst.msk [vmem:[#allocation4 + $0x190] sm:$0xff] %vm1170_vm8, %v1125_v51  ;;  %1912 = vrot.lane.b32.xlu0 %v1832_v7, %s4399_s25  ;;  %v1421_v51 = vld [vmem:[#allocation2 + $0x150] sm:$0xff] }
 0x1b1   : > { %1687 = vrot.lane.b32.xlu1 %v1623_v45, %s4398_s24 }
 0x1b2   : > { %v1135_v63 = vpop.permute.xlu0 %1134 }
 0x1b3   : > { %1201 = vst.msk [vmem:[#allocation4 + $0x1e0] sm:$0xff] %vm1170_vm8, %v1135_v63  ;;  %v1129_v10 = vpop.permute.xlu1 %1128  ;;  %v1646_v63 = vld [vmem:[#allocation2 + $0x141] sm:$0xff] }
 0x1b4   : > { %1198 = vst.msk [vmem:[#allocation4 + $0x1b0] sm:$0xff] %vm1170_vm8, %v1129_v10  ;;  %1721 = vrot.lane.b32.xlu0 %v1640_v54, %s4398_s24  ;;  %v1647_v10 = vld [vmem:[#allocation2 + $0x151] sm:$0xff] }
 0x1b5   : > { %1880 = vrot.lane.b32.xlu1 %v1816_v3, %s4399_s25 }
 0x1b6   : > { %v1268_v24 = vpop.permute.xlu0 %1267 }
 0x1b7   : > { %1364 = vst.msk [vmem:[#allocation4] sm:$0xff] %vm1363_vm10, %v1268_v24  ;;  %v1133_v17 = vpop.permute.xlu1 %1132  ;;  %v1839_v24 = vld [vmem:[#allocation2 + $0x142] sm:$0xff] }
 0x1b8   : > { %1200 = vst.msk [vmem:[#allocation4 + $0x1d0] sm:$0xff] %vm1170_vm8, %v1133_v17  ;;  %1914 = vrot.lane.b32.xlu0 %v1833_v13, %s4399_s25  ;;  %v1840_v17 = vld [vmem:[#allocation2 + $0x152] sm:$0xff] }
 0x1b9   : > { %1689 = vrot.lane.b32.xlu1 %v1624_v15, %s4398_s24 }
 0x1ba   : > { %v1272_v48 = vpop.permute.xlu0 %1271 }
 0x1bb   : > { %1366 = vst.msk [vmem:[#allocation4 + $0x20] sm:$0xff] %vm1363_vm10, %v1272_v48  ;;  %v1137_v22 = vpop.permute.xlu1 %1136  ;;  %v1631_v48 = vld [vmem:[#allocation2 + $0x91] sm:$0xff] }
 0x1bc   : > { %1202 = vst.msk [vmem:[#allocation4 + $0x1f0] sm:$0xff] %vm1170_vm8, %v1137_v22  ;;  %1723 = vrot.lane.b32.xlu0 %v1641_v21, %s4398_s24  ;;  %v1632_v22 = vld [vmem:[#allocation2 + $0x99] sm:$0xff] }
 0x1bd   : > { %1882 = vrot.lane.b32.xlu1 %v1817_v38, %s4399_s25 }
 0x1be   : > { %v1276_v26 = vpop.permute.xlu0 %1275 }
 0x1bf   : > { %1368 = vst.msk [vmem:[#allocation4 + $0x40] sm:$0xff] %vm1363_vm10, %v1276_v26  ;;  %v1270_v27 = vpop.permute.xlu1 %1269  ;;  %v1824_v26 = vld [vmem:[#allocation2 + $0x92] sm:$0xff] }
 0x1c0   : > { %1365 = vst.msk [vmem:[#allocation4 + $0x10] sm:$0xff] %vm1363_vm10, %v1270_v27  ;;  %1916 = vrot.lane.b32.xlu0 %v1834_v50, %s4399_s25  ;;  %v1825_v27 = vld [vmem:[#allocation2 + $0x9a] sm:$0xff] }
 0x1c1   : > { %1691 = vrot.lane.b32.xlu1 %v1625_v52, %s4398_s24 }
 0x1c2   : > { %v1280_v14 = vpop.permute.xlu0 %1279 }
 0x1c3   : > { %1370 = vst.msk [vmem:[#allocation4 + $0x60] sm:$0xff] %vm1363_vm10, %v1280_v14  ;;  %v1274_v55 = vpop.permute.xlu1 %1273  ;;  %v1422_v14 = vld [vmem:[#allocation2 + $0x158] sm:$0xff] }
 0x1c4   : > { %1367 = vst.msk [vmem:[#allocation4 + $0x30] sm:$0xff] %vm1363_vm10, %v1274_v55  ;;  %1693 = vrot.lane.b32.xlu0 %v1626_v40, %s4398_s24  ;;  %v1423_v55 = vld [vmem:[#allocation2 + $0x168] sm:$0xff] }
 0x1c5   : > { %1884 = vrot.lane.b32.xlu1 %v1818_v34, %s4399_s25 }
 0x1c6   : > { %v1284_v46 = vpop.permute.xlu0 %1283 }
 0x1c7   : > { %1372 = vst.msk [vmem:[#allocation4 + $0x80] sm:$0xff] %vm1363_vm10, %v1284_v46  ;;  %v1278_v35 = vpop.permute.xlu1 %1277  ;;  %v1648_v46 = vld [vmem:[#allocation2 + $0x159] sm:$0xff] }
 0x1c8   : > { %1369 = vst.msk [vmem:[#allocation4 + $0x50] sm:$0xff] %vm1363_vm10, %v1278_v35  ;;  %1886 = vrot.lane.b32.xlu0 %v1819_v56, %s4399_s25 }
 0x1c9   : > { %1499 = vrot.lane.b32.xlu1 %v4855_v12, %s4396_s21  ;;  %v1836_v12 = vld [vmem:[#allocation2 + $0x122] sm:$0xff] }
 0x1ca   : > { %v1288_v18 = vpop.permute.xlu0 %1287 }
 0x1cb   : > { %1374 = vst.msk [vmem:[#allocation4 + $0xa0] sm:$0xff] %vm1363_vm10, %v1288_v18  ;;  %v1282_v58 = vpop.permute.xlu1 %1281  ;;  %v1649_v18 = vld [vmem:[#allocation2 + $0x169] sm:$0xff] }
 0x1cc   : > { %1371 = vst.msk [vmem:[#allocation4 + $0x70] sm:$0xff] %vm1363_vm10, %v1282_v58  ;;  %1501 = vrot.lane.b32.xlu0 %v4843_v9, %s4396_s21  ;;  %v1841_v58 = vld [vmem:[#allocation2 + $0x15a] sm:$0xff] }
 0x1cd   : > { %1725 = vrot.lane.b32.xlu1 %v1642_v57, %s4398_s24 }
 0x1ce   : > { %v1292_v36 = vpop.permute.xlu0 %1291 }
 0x1cf   : > { %1376 = vst.msk [vmem:[#allocation4 + $0xc0] sm:$0xff] %vm1363_vm10, %v1292_v36  ;;  %v1286_v59 = vpop.permute.xlu1 %1285  ;;  %v1842_v36 = vld [vmem:[#allocation2 + $0x16a] sm:$0xff] }
 0x1d0   : > { %1373 = vst.msk [vmem:[#allocation4 + $0x90] sm:$0xff] %vm1363_vm10, %v1286_v59  ;;  %1727 = vrot.lane.b32.xlu0 %v1643_v20, %s4398_s24  ;;  %v1633_v59 = vld [vmem:[#allocation2 + $0xa9] sm:$0xff] }
 0x1d1   : > { %1918 = vrot.lane.b32.xlu1 %v1835_v23, %s4399_s25 }
 0x1d2   : > { %v1296_v60 = vpop.permute.xlu0 %1295 }
 0x1d3   : > { %1378 = vst.msk [vmem:[#allocation4 + $0xe0] sm:$0xff] %vm1363_vm10, %v1296_v60  ;;  %v1290_v9 = vpop.permute.xlu1 %1289  ;;  %v1634_v60 = vld [vmem:[#allocation2 + $0xb1] sm:$0xff] }
 0x1d4   : > { %1375 = vst.msk [vmem:[#allocation4 + $0xb0] sm:$0xff] %vm1363_vm10, %v1290_v9  ;;  %1920 = vrot.lane.b32.xlu0 %v1836_v12, %s4399_s25  ;;  %v1826_v9 = vld [vmem:[#allocation2 + $0xaa] sm:$0xff] }
 0x1d5   : > { %1695 = vrot.lane.b32.xlu1 %v1627_v53, %s4398_s24 }
 0x1d6   : > { %v1300_v33 = vpop.permute.xlu0 %1299 }
 0x1d7   : > { %1380 = vst.msk [vmem:[#allocation4 + $0x100] sm:$0xff] %vm1363_vm10, %v1300_v33  ;;  %v1294_v62 = vpop.permute.xlu1 %1293  ;;  %v1827_v33 = vld [vmem:[#allocation2 + $0xb2] sm:$0xff] }
 0x1d8   : > { %1377 = vst.msk [vmem:[#allocation4 + $0xd0] sm:$0xff] %vm1363_vm10, %v1294_v62  ;;  %1697 = vrot.lane.b32.xlu0 %v1628_v28, %s4398_s24  ;;  %v1424_v62 = vld [vmem:[#allocation2 + $0x170] sm:$0xff] }
 0x1d9   : > { %1888 = vrot.lane.b32.xlu1 %v1820_v61, %s4399_s25 }
 0x1da   : > { %v1304_v11 = vpop.permute.xlu0 %1303 }
 0x1db   : > { %1382 = vst.msk [vmem:[#allocation4 + $0x120] sm:$0xff] %vm1363_vm10, %v1304_v11  ;;  %v1298_v29 = vpop.permute.xlu1 %1297  ;;  %v1425_v11 = vld [vmem:[#allocation2 + $0x180] sm:$0xff] }
 0x1dc   : > { %1379 = vst.msk [vmem:[#allocation4 + $0xf0] sm:$0xff] %vm1363_vm10, %v1298_v29  ;;  %1890 = vrot.lane.b32.xlu0 %v1821_v25, %s4399_s25 }
 0x1dd   : > { %1503 = vrot.lane.b32.xlu1 %v4875_v16, %s4396_s21  ;;  %v1838_v16 = vld [vmem:[#allocation2 + $0x13a] sm:$0xff] }
 0x1de   : > { %v1308_v1 = vpop.permute.xlu0 %1307 }
 0x1df   : > { %1384 = vst.msk [vmem:[#allocation4 + $0x140] sm:$0xff] %vm1363_vm10, %v1308_v1  ;;  %v1302_v31 = vpop.permute.xlu1 %1301 }
 0x1e0   : > { %1381 = vst.msk [vmem:[#allocation4 + $0x110] sm:$0xff] %vm1363_vm10, %v1302_v31  ;;  %1505 = vrot.lane.b32.xlu0 %v1419_v0, %s4396_s21  ;;  %v1650_v0 = vld [vmem:[#allocation2 + $0x171] sm:$0xff] }
 0x1e1   : > { %1729 = vrot.lane.b32.xlu1 %v1644_v30, %s4398_s24  ;;  %v1651_v30 = vld [vmem:[#allocation2 + $0x181] sm:$0xff] }
 0x1e2   : > { %v1312_v2 = vpop.permute.xlu0 %1311 }
 0x1e3   : > { %1386 = vst.msk [vmem:[#allocation4 + $0x160] sm:$0xff] %vm1363_vm10, %v1312_v2  ;;  %v1306_v37 = vpop.permute.xlu1 %1305 }
 0x1e4   : > { %1383 = vst.msk [vmem:[#allocation4 + $0x130] sm:$0xff] %vm1363_vm10, %v1306_v37  ;;  %1731 = vrot.lane.b32.xlu0 %v1645_v32, %s4398_s24  ;;  %v1843_v32 = vld [vmem:[#allocation2 + $0x172] sm:$0xff]  ;;  %v1635_v37 = vld [vmem:[#allocation2 + $0xc1] sm:$0xff] }
 0x1e5   : > { %1922 = vrot.lane.b32.xlu1 %v1837_v4, %s4399_s25 }
 0x1e6   : > { %v1316_v39 = vpop.permute.xlu0 %1315 }
 0x1e7   : > { %1388 = vst.msk [vmem:[#allocation4 + $0x180] sm:$0xff] %vm1363_vm10, %v1316_v39  ;;  %v1310_v5 = vpop.permute.xlu1 %1309  ;;  %v1636_v39 = vld [vmem:[#allocation2 + $0xc9] sm:$0xff] }
 0x1e8   : > { %1385 = vst.msk [vmem:[#allocation4 + $0x150] sm:$0xff] %vm1363_vm10, %v1310_v5  ;;  %1924 = vrot.lane.b32.xlu0 %v1838_v16, %s4399_s25  ;;  %v1828_v5 = vld [vmem:[#allocation2 + $0xc2] sm:$0xff] }
 0x1e9   : > { %1699 = vrot.lane.b32.xlu1 %v1629_v42, %s4398_s24 }
 0x1ea   : > { %v1320_v43 = vpop.permute.xlu0 %1319 }
 0x1eb   : > { %1390 = vst.msk [vmem:[#allocation4 + $0x1a0] sm:$0xff] %vm1363_vm10, %v1320_v43  ;;  %v1314_v49 = vpop.permute.xlu1 %1313  ;;  %v1829_v43 = vld [vmem:[#allocation2 + $0xca] sm:$0xff] }
 0x1ec   : > { %1387 = vst.msk [vmem:[#allocation4 + $0x170] sm:$0xff] %vm1363_vm10, %v1314_v49  ;;  %1701 = vrot.lane.b32.xlu0 %v1630_v6, %s4398_s24 }
 0x1ed   : > { %1892 = vrot.lane.b32.xlu1 %v1822_v44, %s4399_s25 }
 0x1ee   : > { %v1324_v7 = vpop.permute.xlu0 %1323 }
 0x1ef   : > { %1392 = vst.msk [vmem:[#allocation4 + $0x1c0] sm:$0xff] %vm1363_vm10, %v1324_v7  ;;  %v1318_v45 = vpop.permute.xlu1 %1317 }
 0x1f0   : > { %1389 = vst.msk [vmem:[#allocation4 + $0x190] sm:$0xff] %vm1363_vm10, %v1318_v45  ;;  %1894 = vrot.lane.b32.xlu0 %v1823_v47, %s4399_s25  ;;  %v1426_v47 = vld [vmem:[#allocation2 + $0x188] sm:$0xff] }
 0x1f1   : > { %1507 = vrot.lane.b32.xlu1 %v1420_v8, %s4396_s21  ;;  %v1427_v8 = vld [vmem:[#allocation2 + $0x198] sm:$0xff] }
 0x1f2   : > { %v1328_v54 = vpop.permute.xlu0 %1327 }
 0x1f3   : > { %1394 = vst.msk [vmem:[#allocation4 + $0x1e0] sm:$0xff] %vm1363_vm10, %v1328_v54  ;;  %v1322_v3 = vpop.permute.xlu1 %1321 }
 0x1f4   : > { %1391 = vst.msk [vmem:[#allocation4 + $0x1b0] sm:$0xff] %vm1363_vm10, %v1322_v3  ;;  %1509 = vrot.lane.b32.xlu0 %v1421_v51, %s4396_s21  ;;  %v1652_v51 = vld [vmem:[#allocation2 + $0x189] sm:$0xff] }
 0x1f5   : > { %1733 = vrot.lane.b32.xlu1 %v1646_v63, %s4398_s24 }
 0x1f6   : > { %v1462_v13 = vpop.permute.xlu0 %1461 }
 0x1f7   : > { %1558 = vst.msk [vmem:[#allocation4] sm:$0xff] %vm1557_vm11, %v1462_v13  ;;  %v1326_v15 = vpop.permute.xlu1 %1325 }
 0x1f8   : > { %1560 = vst.msk [vmem:[#allocation4 + $0x8] sm:$0xff] %vm1559_vm12, %v1462_v13  ;;  %1735 = vrot.lane.b32.xlu0 %v1647_v10, %s4398_s24  ;;  %v1653_v10 = vld [vmem:[#allocation2 + $0x199] sm:$0xff] }
 0x1f9   : > { %1393 = vst.msk [vmem:[#allocation4 + $0x1d0] sm:$0xff] %vm1363_vm10, %v1326_v15  ;;  %1926 = vrot.lane.b32.xlu1 %v1839_v24, %s4399_s25 }
 0x1fa   : > { %v1466_v21 = vpop.permute.xlu0 %1465 }
 0x1fb   : > { %1563 = vst.msk [vmem:[#allocation4 + $0x20] sm:$0xff] %vm1557_vm11, %v1466_v21  ;;  %v1330_v38 = vpop.permute.xlu1 %1329 }
 0x1fc   : > { %1564 = vst.msk [vmem:[#allocation4 + $0x28] sm:$0xff] %vm1559_vm12, %v1466_v21  ;;  %1928 = vrot.lane.b32.xlu0 %v1840_v17, %s4399_s25  ;;  %v1846_v21 = vld [vmem:[#allocation2 + $0x19a] sm:$0xff] }
 0x1fd   : > { %1395 = vst.msk [vmem:[#allocation4 + $0x1f0] sm:$0xff] %vm1363_vm10, %v1330_v38  ;;  %1703 = vrot.lane.b32.xlu1 %v1631_v48, %s4398_s24  ;;  %v1637_v38 = vld [vmem:[#allocation2 + $0xd9] sm:$0xff] }
 0x1fe   : > { %v1470_v50 = vpop.permute.xlu0 %1469  ;;  %v2009_v3 = vld [vmem:[#allocation4] sm:$0xff] }
 0x1ff   : > { %1567 = vst.msk [vmem:[#allocation4 + $0x40] sm:$0xff] %vm1557_vm11, %v1470_v50  ;;  %v1464_v52 = vpop.permute.xlu1 %1463 }
 0x200   : > { %1568 = vst.msk [vmem:[#allocation4 + $0x48] sm:$0xff] %vm1559_vm12, %v1470_v50  ;;  %1562 = vst.msk [vmem:[#allocation4 + $0x18] sm:$0xff] %vm1559_vm12, %v1464_v52  ;;  %1705 = vrot.lane.b32.xlu0 %v1632_v22, %s4398_s24 }
 0x201   : > { %1561 = vst.msk [vmem:[#allocation4 + $0x10] sm:$0xff] %vm1557_vm11, %v1464_v52  ;;  %1896 = vrot.lane.b32.xlu1 %v1824_v26, %s4399_s25  ;;  %v1638_v52 = vld [vmem:[#allocation2 + $0xe1] sm:$0xff] }
 0x202   : > { %v1474_v40 = vpop.permute.xlu0 %1473 }
 0x203   : > { %1571 = vst.msk [vmem:[#allocation4 + $0x60] sm:$0xff] %vm1557_vm11, %v1474_v40  ;;  %v1468_v34 = vpop.permute.xlu1 %1467 }
 0x204   : > { %1572 = vst.msk [vmem:[#allocation4 + $0x68] sm:$0xff] %vm1559_vm12, %v1474_v40  ;;  %1566 = vst.msk [vmem:[#allocation4 + $0x38] sm:$0xff] %vm1559_vm12, %v1468_v34  ;;  %1898 = vrot.lane.b32.xlu0 %v1825_v27, %s4399_s25  ;;  %v1830_v40 = vld [vmem:[#allocation2 + $0xda] sm:$0xff] }
 0x205   : > { %1565 = vst.msk [vmem:[#allocation4 + $0x30] sm:$0xff] %vm1557_vm11, %v1468_v34  ;;  %1511 = vrot.lane.b32.xlu1 %v1422_v14, %s4396_s21 }
 0x206   : > { %v1478_v56 = vpop.permute.xlu0 %1477 }
 0x207   : > { %1575 = vst.msk [vmem:[#allocation4 + $0x80] sm:$0xff] %vm1557_vm11, %v1478_v56  ;;  %v1472_v35 = vpop.permute.xlu1 %1471 }
 0x208   : > { %1576 = vst.msk [vmem:[#allocation4 + $0x88] sm:$0xff] %vm1559_vm12, %v1478_v56  ;;  %1570 = vst.msk [vmem:[#allocation4 + $0x58] sm:$0xff] %vm1559_vm12, %v1472_v35  ;;  %1513 = vrot.lane.b32.xlu0 %v1423_v55, %s4396_s21  ;;  %v2011_v26 = vld [vmem:[#allocation4 + $0x10] sm:$0xff] }
 0x209   : > { %1569 = vst.msk [vmem:[#allocation4 + $0x50] sm:$0xff] %vm1557_vm11, %v1472_v35  ;;  %1737 = vrot.lane.b32.xlu1 %v1648_v46, %s4398_s24  ;;  %v1831_v55 = vld [vmem:[#allocation2 + $0xe2] sm:$0xff] }
 0x20a   : > { %v1482_v57 = vpop.permute.xlu0 %1481  ;;  %v1428_v46 = vld [vmem:[#allocation2 + $0x1a0] sm:$0xff] }
 0x20b   : > { %1579 = vst.msk [vmem:[#allocation4 + $0xa0] sm:$0xff] %vm1557_vm11, %v1482_v57  ;;  %v1476_v20 = vpop.permute.xlu1 %1475 }
 0x20c   : > { %1580 = vst.msk [vmem:[#allocation4 + $0xa8] sm:$0xff] %vm1559_vm12, %v1482_v57  ;;  %1574 = vst.msk [vmem:[#allocation4 + $0x78] sm:$0xff] %vm1559_vm12, %v1476_v20  ;;  %1739 = vrot.lane.b32.xlu0 %v1649_v18, %s4398_s24  ;;  %v2013_v57 = vld [vmem:[#allocation4 + $0x20] sm:$0xff] }
 0x20d   : > { %1573 = vst.msk [vmem:[#allocation4 + $0x70] sm:$0xff] %vm1557_vm11, %v1476_v20  ;;  %1930 = vrot.lane.b32.xlu1 %v1841_v58, %s4399_s25  ;;  %v2653_v58 = vld [vmem:[#allocation3] sm:$0xff] }
 0x20e   : > { %v1486_v23 = vpop.permute.xlu0 %1485 }
 0x20f   : > { %1583 = vst.msk [vmem:[#allocation4 + $0xc0] sm:$0xff] %vm1557_vm11, %v1486_v23  ;;  %v1480_v12 = vpop.permute.xlu1 %1479 }
 0x210   : > { %1584 = vst.msk [vmem:[#allocation4 + $0xc8] sm:$0xff] %vm1559_vm12, %v1486_v23  ;;  %1578 = vst.msk [vmem:[#allocation4 + $0x98] sm:$0xff] %vm1559_vm12, %v1480_v12  ;;  %1932 = vrot.lane.b32.xlu0 %v1842_v36, %s4399_s25  ;;  %v1654_v23 = vld [vmem:[#allocation2 + $0x1a1] sm:$0xff] }
 0x211   : > { %1577 = vst.msk [vmem:[#allocation4 + $0x90] sm:$0xff] %vm1557_vm11, %v1480_v12  ;;  %1707 = vrot.lane.b32.xlu1 %v1633_v59, %s4398_s24  ;;  %v2015_v12 = vld [vmem:[#allocation4 + $0x30] sm:$0xff] }
 0x212   : > { %v1490_v53 = vpop.permute.xlu0 %1489 }
 0x213   : > { %1587 = vst.msk [vmem:[#allocation4 + $0xe0] sm:$0xff] %vm1557_vm11, %v1490_v53  ;;  %v1484_v28 = vpop.permute.xlu1 %1483 }
 0x214   : > { %1588 = vst.msk [vmem:[#allocation4 + $0xe8] sm:$0xff] %vm1559_vm12, %v1490_v53  ;;  %1582 = vst.msk [vmem:[#allocation4 + $0xb8] sm:$0xff] %vm1559_vm12, %v1484_v28  ;;  %1709 = vrot.lane.b32.xlu0 %v1634_v60, %s4398_s24  ;;  %v2655_v60 = vld [vmem:[#allocation3 + $0x10] sm:$0xff] }
 0x215   : > { %1581 = vst.msk [vmem:[#allocation4 + $0xb0] sm:$0xff] %vm1557_vm11, %v1484_v28  ;;  %1900 = vrot.lane.b32.xlu1 %v1826_v9, %s4399_s25  ;;  %v1847_v9 = vld [vmem:[#allocation2 + $0x1a2] sm:$0xff] }
 0x216   : > { %v1494_v61 = vpop.permute.xlu0 %1493 }
 0x217   : > { %1591 = vst.msk [vmem:[#allocation4 + $0x100] sm:$0xff] %vm1557_vm11, %v1494_v61  ;;  %v1488_v25 = vpop.permute.xlu1 %1487 }
 0x218   : > { %1592 = vst.msk [vmem:[#allocation4 + $0x108] sm:$0xff] %vm1559_vm12, %v1494_v61  ;;  %1586 = vst.msk [vmem:[#allocation4 + $0xd8] sm:$0xff] %vm1559_vm12, %v1488_v25  ;;  %1902 = vrot.lane.b32.xlu0 %v1827_v33, %s4399_s25  ;;  %v2657_v33 = vld [vmem:[#allocation3 + $0x20] sm:$0xff] }
 0x219   : > { %1585 = vst.msk [vmem:[#allocation4 + $0xd0] sm:$0xff] %vm1557_vm11, %v1488_v25  ;;  %1515 = vrot.lane.b32.xlu1 %v1424_v62, %s4396_s21  ;;  %v2654_v62 = vld [vmem:[#allocation3 + $0x8] sm:$0xff] }
 0x21a   : > { %v1498_v29 = vpop.permute.xlu0 %1497 }
 0x21b   : > { %1595 = vst.msk [vmem:[#allocation4 + $0x120] sm:$0xff] %vm1557_vm11, %v1498_v29  ;;  %v1492_v1 = vpop.permute.xlu1 %1491 }
 0x21c   : > { %1596 = vst.msk [vmem:[#allocation4 + $0x128] sm:$0xff] %vm1559_vm12, %v1498_v29  ;;  %1590 = vst.msk [vmem:[#allocation4 + $0xf8] sm:$0xff] %vm1559_vm12, %v1492_v1  ;;  %1517 = vrot.lane.b32.xlu0 %v1425_v11, %s4396_s21 }
 0x21d   : > { %1589 = vst.msk [vmem:[#allocation4 + $0xf0] sm:$0xff] %vm1557_vm11, %v1492_v1  ;;  %1741 = vrot.lane.b32.xlu1 %v1650_v0, %s4398_s24  ;;  %v2659_v0 = vld [vmem:[#allocation3 + $0x30] sm:$0xff] }
 0x21e   : > { %v1720_v31 = vpop.permute.xlu0 %1719  ;;  %v2041_v7 = vld [vmem:[#allocation4 + $0x100] sm:$0xff] }
 0x21f   : > { %1800 = vst.msk [vmem:[#allocation4 + $0x108] sm:$0xff] %vm1783_vm13, %v1720_v31  ;;  %v1496_v2 = vpop.permute.xlu1 %1495  ;;  %v2656_v31 = vld [vmem:[#allocation3 + $0x18] sm:$0xff] }
 0x220   : > { %1593 = vst.msk [vmem:[#allocation4 + $0x110] sm:$0xff] %vm1557_vm11, %v1496_v2  ;;  %1743 = vrot.lane.b32.xlu0 %v1651_v30, %s4398_s24 }
 0x221   : > { %1594 = vst.msk [vmem:[#allocation4 + $0x118] sm:$0xff] %vm1559_vm12, %v1496_v2  ;;  %1934 = vrot.lane.b32.xlu1 %v1843_v32, %s4399_s25 }
 0x222   : > { %v1913_v4 = vpop.permute.xlu0 %1912  ;;  %v2045_v34 = vld [vmem:[#allocation4 + $0x120] sm:$0xff] }
 0x223   : > { %1993 = vst.msk [vmem:[#allocation4 + $0x108] sm:$0xff] %vm1976_vm14, %v1913_v4  ;;  %v1688_v16 = vpop.permute.xlu1 %1687  ;;  %v2661_v4 = vld [vmem:[#allocation3 + $0x40] sm:$0xff] }
 0x224   : > { %1784 = vst.msk [vmem:[#allocation4 + $0x8] sm:$0xff] %vm1783_vm13, %v1688_v16  ;;  %1936 = vrot.lane.b32.xlu0 %v5343_v41, %s4399_s25  ;;  %v2658_v16 = vld [vmem:[#allocation3 + $0x28] sm:$0xff] }
 0x225   : > { %1711 = vrot.lane.b32.xlu1 %v1635_v37, %s4398_s24 }
 0x226   : > { %v1722_v42 = vpop.permute.xlu0 %1721 }
 0x227   : > { %1801 = vst.msk [vmem:[#allocation4 + $0x118] sm:$0xff] %vm1783_vm13, %v1722_v42  ;;  %v1881_v6 = vpop.permute.xlu1 %1880  ;;  %v2043_v17 = vld [vmem:[#allocation4 + $0x110] sm:$0xff] }
 0x228   : > { %1977 = vst.msk [vmem:[#allocation4 + $0x8] sm:$0xff] %vm1976_vm14, %v1881_v6  ;;  %1713 = vrot.lane.b32.xlu0 %v1636_v39, %s4398_s24  ;;  %v2663_v6 = vld [vmem:[#allocation3 + $0x50] sm:$0xff] }
 0x229   : > { %1904 = vrot.lane.b32.xlu1 %v1828_v5, %s4399_s25  ;;  %v2017_v5 = vld [vmem:[#allocation4 + $0x40] sm:$0xff] }
 0x22a   : > { %v1915_v44 = vpop.permute.xlu0 %1914  ;;  %v2042_v49 = vld [vmem:[#allocation4 + $0x108] sm:$0xff] }
 0x22b   : > { %1994 = vst.msk [vmem:[#allocation4 + $0x118] sm:$0xff] %vm1976_vm14, %v1915_v44  ;;  %v1690_v41 = vpop.permute.xlu1 %1689  ;;  %3932 = vmatprep.mubr.msk.f32.mxu1 %vm2103_vm15, %v2042_v49  ;;  %v2660_v49 = vld [vmem:[#allocation3 + $0x38] sm:$0xff] }
 0x22c   : > { %1785 = vst.msk [vmem:[#allocation4 + $0x18] sm:$0xff] %vm1783_vm13, %v1690_v41  ;;  %1906 = vrot.lane.b32.xlu0 %v1829_v43, %s4399_s25  ;;  %2349 = vmatmul.mubr.f32.vlgmr.msra.gmra.mrb[0].mxu1 %v2041_v7  ;;  %v2019_v41 = vld [vmem:[#allocation4 + $0x50] sm:$0xff]  ;;  %v2665_v7 = vld [vmem:[#allocation3 + $0x60] sm:$0xff] }
 0x22d   : > { %1519 = vrot.lane.b32.xlu1 %v1426_v47, %s4396_s21 }
 0x22e   : > { %v1724_v45 = vpop.permute.xlu0 %1723 }
 0x22f   : > { %1802 = vst.msk [vmem:[#allocation4 + $0x128] sm:$0xff] %vm1783_vm13, %v1724_v45  ;;  %v1883_v54 = vpop.permute.xlu1 %1882  ;;  %v2010_v63 = vld [vmem:[#allocation4 + $0x8] sm:$0xff] }
 0x230   : > { %1978 = vst.msk [vmem:[#allocation4 + $0x18] sm:$0xff] %vm1976_vm14, %v1883_v54  ;;  %3916 = vmatprep.mubr.msk.f32.mxu0 %vm2103_vm15, %v2010_v63  ;;  %1521 = vrot.lane.b32.xlu0 %v1427_v8, %s4396_s21  ;;  %v2662_v45 = vld [vmem:[#allocation3 + $0x48] sm:$0xff]  ;;  %v2667_v54 = vld [vmem:[#allocation3 + $0x70] sm:$0xff] }
 0x231   : > { %1745 = vrot.lane.b32.xlu1 %v1652_v51, %s4398_s24  ;;  %2269 = vmatmul.mubr.f32.vlgmr.msra.gmra.mrb[0].mxu0 %v2009_v3  ;;  %v2664_v3 = vld [vmem:[#allocation3 + $0x58] sm:$0xff] }
 0x232   : > { %v1917_v13 = vpop.permute.xlu0 %1916  ;;  %v2044_v24 = vld [vmem:[#allocation4 + $0x118] sm:$0xff] }
 0x233   : > { %1995 = vst.msk [vmem:[#allocation4 + $0x128] sm:$0xff] %vm1976_vm14, %v1917_v13  ;;  %v1692_v15 = vpop.permute.xlu1 %1691  ;;  %3933 = vmatprep.mubr.msk.f32.mxu1 %vm2103_vm15, %v2044_v24 }
 0x234   : > { %1786 = vst.msk [vmem:[#allocation4 + $0x28] sm:$0xff] %vm1783_vm13, %v1692_v15  ;;  %1747 = vrot.lane.b32.xlu0 %v1653_v10, %s4398_s24  ;;  %2354 = vmatmul.mubr.f32.gmra.mrb[2].mxu1 %v2043_v17  ;;  %v2669_v15 = vld [vmem:[#allocation3 + $0x80] sm:$0xff] }
 0x235   : > { %1938 = vrot.lane.b32.xlu1 %v5380_v19, %s4399_s25 }
 0x236   : > { %v1694_v48 = vpop.permute.xlu0 %1693 }
 0x237   : > { %1787 = vst.msk [vmem:[#allocation4 + $0x38] sm:$0xff] %vm1783_vm13, %v1694_v48  ;;  %v1885_v22 = vpop.permute.xlu1 %1884  ;;  %v2012_v50 = vld [vmem:[#allocation4 + $0x18] sm:$0xff]  ;;  %v2666_v48 = vld [vmem:[#allocation3 + $0x68] sm:$0xff] }
 0x238   : > { %1979 = vst.msk [vmem:[#allocation4 + $0x28] sm:$0xff] %vm1976_vm14, %v1885_v22  ;;  %3917 = vmatprep.mubr.msk.f32.mxu0 %vm2103_vm15, %v2012_v50  ;;  %1940 = vrot.lane.b32.xlu0 %v1846_v21, %s4399_s25  ;;  %v2671_v50 = vld [vmem:[#allocation3 + $0x90] sm:$0xff] }
 0x239   : > { %1715 = vrot.lane.b32.xlu1 %v1637_v38, %s4398_s24  ;;  %2274 = vmatmul.mubr.f32.gmra.mrb[2].mxu0 %v2011_v26 }
 0x23a   : > { %v1887_v27 = vpop.permute.xlu0 %1886  ;;  %v2046_v19 = vld [vmem:[#allocation4 + $0x128] sm:$0xff] }
 0x23b   : > { %1980 = vst.msk [vmem:[#allocation4 + $0x38] sm:$0xff] %vm1976_vm14, %v1887_v27  ;;  %v1500_v14 = vpop.permute.xlu1 %1499  ;;  %3934 = vmatprep.mubr.msk.f32.mxu1 %vm2103_vm15, %v2046_v19 }
 0x23c   : > { %1597 = vst.msk [vmem:[#allocation4 + $0x130] sm:$0xff] %vm1557_vm11, %v1500_v14  ;;  %1717 = vrot.lane.b32.xlu0 %v1638_v52, %s4398_s24  ;;  %2359 = vmatmul.mubr.f32.gmra.mrb[4].mxu1 %v2045_v34  ;;  %v2668_v52 = vld [vmem:[#allocation3 + $0x78] sm:$0xff] }
 0x23d   : > { %1598 = vst.msk [vmem:[#allocation4 + $0x138] sm:$0xff] %vm1559_vm12, %v1500_v14  ;;  %1908 = vrot.lane.b32.xlu1 %v1830_v40, %s4399_s25  ;;  %v2021_v40 = vld [vmem:[#allocation4 + $0x60] sm:$0xff] }
 0x23e   : > { %v1502_v56 = vpop.permute.xlu0 %1501  ;;  %v2673_v14 = vld [vmem:[#allocation3 + $0xa0] sm:$0xff] }
 0x23f   : > { %1599 = vst.msk [vmem:[#allocation4 + $0x140] sm:$0xff] %vm1557_vm11, %v1502_v56  ;;  %v1726_v35 = vpop.permute.xlu1 %1725  ;;  %v2014_v18 = vld [vmem:[#allocation4 + $0x28] sm:$0xff] }
 0x240   : > { %1600 = vst.msk [vmem:[#allocation4 + $0x148] sm:$0xff] %vm1559_vm12, %v1502_v56  ;;  %3918 = vmatprep.mubr.msk.f32.mxu0 %vm2103_vm15, %v2014_v18  ;;  %1910 = vrot.lane.b32.xlu0 %v1831_v55, %s4399_s25  ;;  %v2670_v56 = vld [vmem:[#allocation3 + $0x88] sm:$0xff]  ;;  %v2675_v18 = vld [vmem:[#allocation3 + $0xb0] sm:$0xff] }
 0x241   : > { %1803 = vst.msk [vmem:[#allocation4 + $0x138] sm:$0xff] %vm1783_vm13, %v1726_v35  ;;  %2279 = vmatmul.mubr.f32.gmra.mrb[4].mxu0 %v2013_v57  ;;  %1523 = vrot.lane.b32.xlu1 %v1428_v46, %s4396_s21  ;;  %v2023_v35 = vld [vmem:[#allocation4 + $0x70] sm:$0xff] }
 0x242   : > { %v1728_v20 = vpop.permute.xlu0 %1727  ;;  %v2016_v36 = vld [vmem:[#allocation4 + $0x38] sm:$0xff] }
 0x243   : > { %1804 = vst.msk [vmem:[#allocation4 + $0x148] sm:$0xff] %vm1783_vm13, %v1728_v20  ;;  %v1919_v59 = vpop.permute.xlu1 %1918  ;;  %3919 = vmatprep.mubr.msk.f32.mxu0 %vm2103_vm15, %v2016_v36  ;;  %v2047_v29 = vld [vmem:[#allocation4 + $0x130] sm:$0xff]  ;;  %v2677_v36 = vld [vmem:[#allocation3 + $0xc0] sm:$0xff] }
 0x244   : > { %1996 = vst.msk [vmem:[#allocation4 + $0x138] sm:$0xff] %vm1976_vm14, %v1919_v59  ;;  %2717 = vrot.lane.b32.xlu0 %v2653_v58, %s4400_s26  ;;  %v2672_v58 = vld [vmem:[#allocation3 + $0x98] sm:$0xff]  ;;  %v2674_v59 = vld [vmem:[#allocation3 + $0xa8] sm:$0xff] }
 0x245   : > { %2284 = vmatmul.mubr.f32.gmra.mrb[6].mxu0 %v2015_v12  ;;  %1749 = vrot.lane.b32.xlu1 %v1654_v23, %s4398_s24 }
 0x246   : > { %v1921_v53 = vpop.permute.xlu0 %1920  ;;  %v2049_v2 = vld [vmem:[#allocation4 + $0x140] sm:$0xff] }
 0x247   : > { %1997 = vst.msk [vmem:[#allocation4 + $0x148] sm:$0xff] %vm1976_vm14, %v1921_v53  ;;  %v1696_v28 = vpop.permute.xlu1 %1695 }
 0x248   : > { %1788 = vst.msk [vmem:[#allocation4 + $0x48] sm:$0xff] %vm1783_vm13, %v1696_v28  ;;  %2721 = vrot.lane.b32.xlu0 %v2655_v60, %s4400_s26 }
 0x249   : > { %1942 = vrot.lane.b32.xlu1 %v1847_v9, %s4399_s25 }
 0x24a   : > { %v1698_v61 = vpop.permute.xlu0 %1697 }
 0x24b   : > { %1789 = vst.msk [vmem:[#allocation4 + $0x58] sm:$0xff] %vm1783_vm13, %v1698_v61  ;;  %v1889_v25 = vpop.permute.xlu1 %1888  ;;  %v2048_v11 = vld [vmem:[#allocation4 + $0x138] sm:$0xff] }
 0x24c   : > { %1981 = vst.msk [vmem:[#allocation4 + $0x48] sm:$0xff] %vm1976_vm14, %v1889_v25  ;;  %3935 = vmatprep.mubr.msk.f32.mxu1 %vm2103_vm15, %v2048_v11  ;;  %2725 = vrot.lane.b32.xlu0 %v2657_v33, %s4400_s26  ;;  %v2676_v33 = vld [vmem:[#allocation3 + $0xb8] sm:$0xff] }
 0x24d   : > { %2364 = vmatmul.mubr.f32.gmra.mrb[6].mxu1 %v2047_v29  ;;  %2719 = vrot.lane.b32.xlu1 %v2654_v62, %s4400_s26 }
 0x24e   : > { %v1891_v1 = vpop.permute.xlu0 %1890  ;;  %v2050_v30 = vld [vmem:[#allocation4 + $0x148] sm:$0xff] }
 0x24f   : > { %1982 = vst.msk [vmem:[#allocation4 + $0x58] sm:$0xff] %vm1976_vm14, %v1891_v1  ;;  %v1504_v32 = vpop.permute.xlu1 %1503  ;;  %3936 = vmatprep.mubr.msk.f32.mxu1 %vm2103_vm15, %v2050_v30 }
 0x250   : > { %1601 = vst.msk [vmem:[#allocation4 + $0x150] sm:$0xff] %vm1557_vm11, %v1504_v32  ;;  %2729 = vrot.lane.b32.xlu0 %v2659_v0, %s4400_s26  ;;  %v2025_v0 = vld [vmem:[#allocation4 + $0x80] sm:$0xff] }
 0x251   : > { %1602 = vst.msk [vmem:[#allocation4 + $0x158] sm:$0xff] %vm1559_vm12, %v1504_v32  ;;  %2369 = vmatmul.mubr.f32.gmra.mrb[8].mxu1 %v2049_v2  ;;  %2723 = vrot.lane.b32.xlu1 %v2656_v31, %s4400_s26  ;;  %v2027_v32 = vld [vmem:[#allocation4 + $0x90] sm:$0xff] }
 0x252   : > { %v1506_v37 = vpop.permute.xlu0 %1505 }
 0x253   : > { %1603 = vst.msk [vmem:[#allocation4 + $0x160] sm:$0xff] %vm1557_vm11, %v1506_v37  ;;  %v1730_v39 = vpop.permute.xlu1 %1729  ;;  %v2018_v42 = vld [vmem:[#allocation4 + $0x48] sm:$0xff] }
 0x254   : > { %1604 = vst.msk [vmem:[#allocation4 + $0x168] sm:$0xff] %vm1559_vm12, %v1506_v37  ;;  %3920 = vmatprep.mubr.msk.f32.mxu0 %vm2103_vm15, %v2018_v42  ;;  %2733 = vrot.lane.b32.xlu0 %v2661_v4, %s4400_s26  ;;  %v2679_v37 = vld [vmem:[#allocation3 + $0xd0] sm:$0xff] }
 0x255   : > { %1805 = vst.msk [vmem:[#allocation4 + $0x158] sm:$0xff] %vm1783_vm13, %v1730_v39  ;;  %2289 = vmatmul.mubr.f32.gmra.mrb[8].mxu0 %v2017_v5  ;;  %2727 = vrot.lane.b32.xlu1 %v2658_v16, %s4400_s26  ;;  %v2678_v16 = vld [vmem:[#allocation3 + $0xc8] sm:$0xff] }
 0x256   : > { %v1732_v43 = vpop.permute.xlu0 %1731  ;;  %v2020_v44 = vld [vmem:[#allocation4 + $0x58] sm:$0xff] }
 0x257   : > { %1806 = vst.msk [vmem:[#allocation4 + $0x168] sm:$0xff] %vm1783_vm13, %v1732_v43  ;;  %v1923_v47 = vpop.permute.xlu1 %1922  ;;  %3921 = vmatprep.mubr.msk.f32.mxu0 %vm2103_vm15, %v2020_v44  ;;  %v2051_v24 = vld [vmem:[#allocation4 + $0x150] sm:$0xff]  ;;  %v2681_v43 = vld [vmem:[#allocation3 + $0xe0] sm:$0xff] }
 0x258   : > { %1998 = vst.msk [vmem:[#allocation4 + $0x158] sm:$0xff] %vm1976_vm14, %v1923_v47  ;;  %2737 = vrot.lane.b32.xlu0 %v2663_v6, %s4400_s26 }
 0x259   : > { %2294 = vmatmul.mubr.f32.gmra.mrb[10].mxu0 %v2019_v41  ;;  %2731 = vrot.lane.b32.xlu1 %v2660_v49, %s4400_s26 }
 0x25a   : > { %v1925_v8 = vpop.permute.xlu0 %1924  ;;  %v2053_v22 = vld [vmem:[#allocation4 + $0x160] sm:$0xff] }
 0x25b   : > { %1999 = vst.msk [vmem:[#allocation4 + $0x168] sm:$0xff] %vm1976_vm14, %v1925_v8  ;;  %v1700_v51 = vpop.permute.xlu1 %1699  ;;  %v2683_v8 = vld [vmem:[#allocation3 + $0xf0] sm:$0xff] }
 0x25c   : > { %1790 = vst.msk [vmem:[#allocation4 + $0x68] sm:$0xff] %vm1783_vm13, %v1700_v51  ;;  %2741 = vrot.lane.b32.xlu0 %v2665_v7, %s4400_s26 }
 0x25d   : > { %2735 = vrot.lane.b32.xlu1 %v2662_v45, %s4400_s26  ;;  %v2680_v45 = vld [vmem:[#allocation3 + $0xd8] sm:$0xff] }
 0x25e   : > { %v1702_v63 = vpop.permute.xlu0 %1701 }
 0x25f   : > { %1791 = vst.msk [vmem:[#allocation4 + $0x78] sm:$0xff] %vm1783_vm13, %v1702_v63  ;;  %v1893_v10 = vpop.permute.xlu1 %1892  ;;  %v2052_v13 = vld [vmem:[#allocation4 + $0x158] sm:$0xff]  ;;  %v2029_v63 = vld [vmem:[#allocation4 + $0xa0] sm:$0xff] }
 0x260   : > { %1983 = vst.msk [vmem:[#allocation4 + $0x68] sm:$0xff] %vm1976_vm14, %v1893_v10  ;;  %3937 = vmatprep.mubr.msk.f32.mxu1 %vm2103_vm15, %v2052_v13  ;;  %2745 = vrot.lane.b32.xlu0 %v2667_v54, %s4400_s26  ;;  %v2682_v13 = vld [vmem:[#allocation3 + $0xe8] sm:$0xff] }
 0x261   : > { %2374 = vmatmul.mubr.f32.gmra.mrb[10].mxu1 %v2051_v24  ;;  %2739 = vrot.lane.b32.xlu1 %v2664_v3, %s4400_s26 }
 0x262   : > { %v1895_v17 = vpop.permute.xlu0 %1894  ;;  %v2054_v21 = vld [vmem:[#allocation4 + $0x168] sm:$0xff] }
 0x263   : > { %1984 = vst.msk [vmem:[#allocation4 + $0x78] sm:$0xff] %vm1976_vm14, %v1895_v17  ;;  %v1508_v38 = vpop.permute.xlu1 %1507  ;;  %3938 = vmatprep.mubr.msk.f32.mxu1 %vm2103_vm15, %v2054_v21  ;;  %v2684_v21 = vld [vmem:[#allocation3 + $0xf8] sm:$0xff] }
 0x264   : > { %1605 = vst.msk [vmem:[#allocation4 + $0x170] sm:$0xff] %vm1557_vm11, %v1508_v38  ;;  %2749 = vrot.lane.b32.xlu0 %v2669_v15, %s4400_s26  ;;  %v2031_v15 = vld [vmem:[#allocation4 + $0xb0] sm:$0xff] }
 0x265   : > { %1606 = vst.msk [vmem:[#allocation4 + $0x178] sm:$0xff] %vm1559_vm12, %v1508_v38  ;;  %2379 = vmatmul.mubr.f32.gmra.mrb[12].mxu1 %v2053_v22  ;;  %2743 = vrot.lane.b32.xlu1 %v2666_v48, %s4400_s26 }
 0x266   : > { %v1510_v26 = vpop.permute.xlu0 %1509 }
 0x267   : > { %1607 = vst.msk [vmem:[#allocation4 + $0x180] sm:$0xff] %vm1557_vm11, %v1510_v26  ;;  %v1734_v27 = vpop.permute.xlu1 %1733  ;;  %v2022_v19 = vld [vmem:[#allocation4 + $0x68] sm:$0xff] }
 0x268   : > { %1608 = vst.msk [vmem:[#allocation4 + $0x188] sm:$0xff] %vm1559_vm12, %v1510_v26  ;;  %3922 = vmatprep.mubr.msk.f32.mxu0 %vm2103_vm15, %v2022_v19  ;;  %2753 = vrot.lane.b32.xlu0 %v2671_v50, %s4400_s26 }
 0x269   : > { %1807 = vst.msk [vmem:[#allocation4 + $0x178] sm:$0xff] %vm1783_vm13, %v1734_v27  ;;  %2299 = vmatmul.mubr.f32.gmra.mrb[12].mxu0 %v2021_v40  ;;  %2747 = vrot.lane.b32.xlu1 %v2668_v52, %s4400_s26 }
 0x26a   : > { %v1736_v34 = vpop.permute.xlu0 %1735  ;;  %v2024_v55 = vld [vmem:[#allocation4 + $0x78] sm:$0xff] }
 0x26b   : > { %1808 = vst.msk [vmem:[#allocation4 + $0x188] sm:$0xff] %vm1783_vm13, %v1736_v34  ;;  %v1927_v46 = vpop.permute.xlu1 %1926  ;;  %3923 = vmatprep.mubr.msk.f32.mxu0 %vm2103_vm15, %v2024_v55  ;;  %v2055_v53 = vld [vmem:[#allocation4 + $0x170] sm:$0xff] }
 0x26c   : > { %2000 = vst.msk [vmem:[#allocation4 + $0x178] sm:$0xff] %vm1976_vm14, %v1927_v46  ;;  %2757 = vrot.lane.b32.xlu0 %v2673_v14, %s4400_s26 }
 0x26d   : > { %2304 = vmatmul.mubr.f32.gmra.mrb[14].mxu0 %v2023_v35  ;;  %2751 = vrot.lane.b32.xlu1 %v2670_v56, %s4400_s26  ;;  %v2033_v56 = vld [vmem:[#allocation4 + $0xc0] sm:$0xff] }
 0x26e   : > { %v1929_v57 = vpop.permute.xlu0 %1928  ;;  %v2057_v62 = vld [vmem:[#allocation4 + $0x180] sm:$0xff] }
 0x26f   : > { %2001 = vst.msk [vmem:[#allocation4 + $0x188] sm:$0xff] %vm1976_vm14, %v1929_v57  ;;  %v1704_v20 = vpop.permute.xlu1 %1703  ;;  %v2035_v57 = vld [vmem:[#allocation4 + $0xd0] sm:$0xff] }
 0x270   : > { %1792 = vst.msk [vmem:[#allocation4 + $0x88] sm:$0xff] %vm1783_vm13, %v1704_v20  ;;  %2761 = vrot.lane.b32.xlu0 %v2675_v18, %s4400_s26 }
 0x271   : > { %2755 = vrot.lane.b32.xlu1 %v2672_v58, %s4400_s26 }
 0x272   : > { %v1706_v23 = vpop.permute.xlu0 %1705 }
 0x273   : > { %1793 = vst.msk [vmem:[#allocation4 + $0x98] sm:$0xff] %vm1783_vm13, %v1706_v23  ;;  %v1897_v12 = vpop.permute.xlu1 %1896  ;;  %v2056_v60 = vld [vmem:[#allocation4 + $0x178] sm:$0xff] }
 0x274   : > { %1985 = vst.msk [vmem:[#allocation4 + $0x88] sm:$0xff] %vm1976_vm14, %v1897_v12  ;;  %3939 = vmatprep.mubr.msk.f32.mxu1 %vm2103_vm15, %v2056_v60  ;;  %2765 = vrot.lane.b32.xlu0 %v2677_v36, %s4400_s26 }
 0x275   : > { %2384 = vmatmul.mubr.f32.gmra.mrb[14].mxu1 %v2055_v53  ;;  %2759 = vrot.lane.b32.xlu1 %v2674_v59, %s4400_s26 }
 0x276   : > { %v1899_v9 = vpop.permute.xlu0 %1898  ;;  %v2058_v28 = vld [vmem:[#allocation4 + $0x188] sm:$0xff] }
 0x277   : > { %1986 = vst.msk [vmem:[#allocation4 + $0x98] sm:$0xff] %vm1976_vm14, %v1899_v9  ;;  %v1512_v61 = vpop.permute.xlu1 %1511  ;;  %3940 = vmatprep.mubr.msk.f32.mxu1 %vm2103_vm15, %v2058_v28 }
 0x278   : > { %1609 = vst.msk [vmem:[#allocation4 + $0x190] sm:$0xff] %vm1557_vm11, %v1512_v61  ;;  %2769 = vrot.lane.b32.xlu0 %v2679_v37, %s4400_s26 }
 0x279   : > { %1610 = vst.msk [vmem:[#allocation4 + $0x198] sm:$0xff] %vm1559_vm12, %v1512_v61  ;;  %2389 = vmatmul.mubr.f32.gmra.mrb[16].mxu1 %v2057_v62  ;;  %2763 = vrot.lane.b32.xlu1 %v2676_v33, %s4400_s26  ;;  %v2037_v62 = vld [vmem:[#allocation4 + $0xe0] sm:$0xff] }
 0x27a   : > { %v1514_v25 = vpop.permute.xlu0 %1513 }
 0x27b   : > { %1611 = vst.msk [vmem:[#allocation4 + $0x1a0] sm:$0xff] %vm1557_vm11, %v1514_v25  ;;  %v1738_v11 = vpop.permute.xlu1 %1737  ;;  %v2026_v29 = vld [vmem:[#allocation4 + $0x88] sm:$0xff] }
 0x27c   : > { %1612 = vst.msk [vmem:[#allocation4 + $0x1a8] sm:$0xff] %vm1559_vm12, %v1514_v25  ;;  %3924 = vmatprep.mubr.msk.f32.mxu0 %vm2103_vm15, %v2026_v29  ;;  %2773 = vrot.lane.b32.xlu0 %v2681_v43, %s4400_s26  ;;  %v2039_v29 = vld [vmem:[#allocation4 + $0xf0] sm:$0xff] }
 0x27d   : > { %1809 = vst.msk [vmem:[#allocation4 + $0x198] sm:$0xff] %vm1783_vm13, %v1738_v11  ;;  %2309 = vmatmul.mubr.f32.gmra.mrb[16].mxu0 %v2025_v0  ;;  %2767 = vrot.lane.b32.xlu1 %v2678_v16, %s4400_s26 }
 0x27e   : > { %v1740_v1 = vpop.permute.xlu0 %1739  ;;  %v2028_v30 = vld [vmem:[#allocation4 + $0x98] sm:$0xff] }
 0x27f   : > { %1810 = vst.msk [vmem:[#allocation4 + $0x1a8] sm:$0xff] %vm1783_vm13, %v1740_v1  ;;  %v1931_v31 = vpop.permute.xlu1 %1930  ;;  %3925 = vmatprep.mubr.msk.f32.mxu0 %vm2103_vm15, %v2028_v30  ;;  %v2059_v6 = vld [vmem:[#allocation4 + $0x190] sm:$0xff] }
 0x280   : > { %2002 = vst.msk [vmem:[#allocation4 + $0x198] sm:$0xff] %vm1976_vm14, %v1931_v31  ;;  %2777 = vrot.lane.b32.xlu0 %v2683_v8, %s4400_s26 }
 0x281   : > { %2314 = vmatmul.mubr.f32.gmra.mrb[18].mxu0 %v2027_v32  ;;  %2771 = vrot.lane.b32.xlu1 %v2680_v45, %s4400_s26  ;;  %v5825_v32 = vld [vmem:[%s6870_s2] ss:$0 sm:$0xff] }
 0x282   : > { %v1933_v2 = vpop.permute.xlu0 %1932  ;;  %v2061_v41 = vld [vmem:[#allocation4 + $0x1a0] sm:$0xff] }
 0x283   : > { %2003 = vst.msk [vmem:[#allocation4 + $0x1a8] sm:$0xff] %vm1976_vm14, %v1933_v2  ;;  %v1708_v4 = vpop.permute.xlu1 %1707 }
 0x284   : > { %1794 = vst.msk [vmem:[#allocation4 + $0xa8] sm:$0xff] %vm1783_vm13, %v1708_v4 }
 0x285   : > { %2775 = vrot.lane.b32.xlu1 %v2682_v13, %s4400_s26 }
 0x286   : > { %v1710_v39 = vpop.permute.xlu0 %1709 }
 0x287   : > { %1795 = vst.msk [vmem:[#allocation4 + $0xb8] sm:$0xff] %vm1783_vm13, %v1710_v39  ;;  %v1901_v42 = vpop.permute.xlu1 %1900  ;;  %v2060_v5 = vld [vmem:[#allocation4 + $0x198] sm:$0xff] }
 0x288   : > { %1987 = vst.msk [vmem:[#allocation4 + $0xa8] sm:$0xff] %vm1976_vm14, %v1901_v42  ;;  %3941 = vmatprep.mubr.msk.f32.mxu1 %vm2103_vm15, %v2060_v5 }
 0x289   : > { %2394 = vmatmul.mubr.f32.gmra.mrb[18].mxu1 %v2059_v6  ;;  %2779 = vrot.lane.b32.xlu1 %v2684_v21, %s4400_s26 }
 0x28a   : > { %v1903_v44 = vpop.permute.xlu0 %1902  ;;  %v2062_v49 = vld [vmem:[#allocation4 + $0x1a8] sm:$0xff] }
 0x28b   : > { %1988 = vst.msk [vmem:[#allocation4 + $0xb8] sm:$0xff] %vm1976_vm14, %v1903_v44  ;;  %v1516_v47 = vpop.permute.xlu1 %1515  ;;  %3942 = vmatprep.mubr.msk.f32.mxu1 %vm2103_vm15, %v2062_v49 }
 0x28c   : > { %1613 = vst.msk [vmem:[#allocation4 + $0x1b0] sm:$0xff] %vm1557_vm11, %v1516_v47 }
 0x28d   : > { %1614 = vst.msk [vmem:[#allocation4 + $0x1b8] sm:$0xff] %vm1559_vm12, %v1516_v47  ;;  %2399 = vmatmul.mubr.f32.gmra.mrb[20].mxu1 %v2061_v41 }
 0x28e   : > { %v1518_v7 = vpop.permute.xlu0 %1517 }
 0x28f   : > { %1615 = vst.msk [vmem:[#allocation4 + $0x1c0] sm:$0xff] %vm1557_vm11, %v1518_v7  ;;  %v1742_v51 = vpop.permute.xlu1 %1741  ;;  %v2030_v54 = vld [vmem:[#allocation4 + $0xa8] sm:$0xff] }
 0x290   : > { %1616 = vst.msk [vmem:[#allocation4 + $0x1c8] sm:$0xff] %vm1559_vm12, %v1518_v7  ;;  %3926 = vmatprep.mubr.msk.f32.mxu0 %vm2103_vm15, %v2030_v54 }
 0x291   : > { %1811 = vst.msk [vmem:[#allocation4 + $0x1b8] sm:$0xff] %vm1783_vm13, %v1742_v51  ;;  %2319 = vmatmul.mubr.f32.gmra.mrb[20].mxu0 %v2029_v63 }
 0x292   : > { %v1744_v3 = vpop.permute.xlu0 %1743  ;;  %v2032_v10 = vld [vmem:[#allocation4 + $0xb8] sm:$0xff] }
 0x293   : > { %1812 = vst.msk [vmem:[#allocation4 + $0x1c8] sm:$0xff] %vm1783_vm13, %v1744_v3  ;;  %v1935_v24 = vpop.permute.xlu1 %1934  ;;  %3927 = vmatprep.mubr.msk.f32.mxu0 %vm2103_vm15, %v2032_v10  ;;  %v2063_v26 = vld [vmem:[#allocation4 + $0x1b0] sm:$0xff] }
 0x294   : > { %2004 = vst.msk [vmem:[#allocation4 + $0x1b8] sm:$0xff] %vm1976_vm14, %v1935_v24 }
 0x295   : > { %2324 = vmatmul.mubr.f32.gmra.mrb[22].mxu0 %v2031_v15 }
 0x296   : > { %v1937_v17 = vpop.permute.xlu0 %1936  ;;  %v2065_v40 = vld [vmem:[#allocation4 + $0x1c0] sm:$0xff] }
 0x297   : > { %2005 = vst.msk [vmem:[#allocation4 + $0x1c8] sm:$0xff] %vm1976_vm14, %v1937_v17  ;;  %v1712_v48 = vpop.permute.xlu1 %1711 }
 0x298   : > { %1796 = vst.msk [vmem:[#allocation4 + $0xc8] sm:$0xff] %vm1783_vm13, %v1712_v48 }
 0x29a   : > { %v1714_v38 = vpop.permute.xlu0 %1713 }
 0x29b   : > { %1797 = vst.msk [vmem:[#allocation4 + $0xd8] sm:$0xff] %vm1783_vm13, %v1714_v38  ;;  %v1905_v22 = vpop.permute.xlu1 %1904  ;;  %v2064_v50 = vld [vmem:[#allocation4 + $0x1b8] sm:$0xff] }
 0x29c   : > { %1989 = vst.msk [vmem:[#allocation4 + $0xc8] sm:$0xff] %vm1976_vm14, %v1905_v22  ;;  %3943 = vmatprep.mubr.msk.f32.mxu1 %vm2103_vm15, %v2064_v50 }
 0x29d   : > { %2404 = vmatmul.mubr.f32.gmra.mrb[22].mxu1 %v2063_v26 }
 0x29e   : > { %v1907_v52 = vpop.permute.xlu0 %1906  ;;  %v2066_v27 = vld [vmem:[#allocation4 + $0x1c8] sm:$0xff] }
 0x29f   : > { %1990 = vst.msk [vmem:[#allocation4 + $0xd8] sm:$0xff] %vm1976_vm14, %v1907_v52  ;;  %v1520_v19 = vpop.permute.xlu1 %1519  ;;  %3944 = vmatprep.mubr.msk.f32.mxu1 %vm2103_vm15, %v2066_v27 }
 0x2a0   : > { %1617 = vst.msk [vmem:[#allocation4 + $0x1d0] sm:$0xff] %vm1557_vm11, %v1520_v19 }
 0x2a1   : > { %1618 = vst.msk [vmem:[#allocation4 + $0x1d8] sm:$0xff] %vm1559_vm12, %v1520_v19  ;;  %2409 = vmatmul.mubr.f32.gmra.mrb[24].mxu1 %v2065_v40 }
 0x2a2   : > { %v1522_v14 = vpop.permute.xlu0 %1521 }
 0x2a3   : > { %1619 = vst.msk [vmem:[#allocation4 + $0x1e0] sm:$0xff] %vm1557_vm11, %v1522_v14  ;;  %v1746_v34 = vpop.permute.xlu1 %1745  ;;  %v2034_v55 = vld [vmem:[#allocation4 + $0xc8] sm:$0xff] }
 0x2a4   : > { %1620 = vst.msk [vmem:[#allocation4 + $0x1e8] sm:$0xff] %vm1559_vm12, %v1522_v14  ;;  %3928 = vmatprep.mubr.msk.f32.mxu0 %vm2103_vm15, %v2034_v55 }
 0x2a5   : > { %1813 = vst.msk [vmem:[#allocation4 + $0x1d8] sm:$0xff] %vm1783_vm13, %v1746_v34  ;;  %2329 = vmatmul.mubr.f32.gmra.mrb[24].mxu0 %v2033_v56 }
 0x2a6   : > { %v1748_v46 = vpop.permute.xlu0 %1747  ;;  %v2036_v35 = vld [vmem:[#allocation4 + $0xd8] sm:$0xff] }
 0x2a7   : > { %1814 = vst.msk [vmem:[#allocation4 + $0x1e8] sm:$0xff] %vm1783_vm13, %v1748_v46  ;;  %v1939_v18 = vpop.permute.xlu1 %1938  ;;  %3929 = vmatprep.mubr.msk.f32.mxu0 %vm2103_vm15, %v2036_v35  ;;  %v2067_v12 = vld [vmem:[#allocation4 + $0x1d0] sm:$0xff] }
 0x2a8   : > { %2006 = vst.msk [vmem:[#allocation4 + $0x1d8] sm:$0xff] %vm1976_vm14, %v1939_v18 }
 0x2a9   : > { %2334 = vmatmul.mubr.f32.gmra.mrb[26].mxu0 %v2035_v57 }
 0x2aa   : > { %v1941_v58 = vpop.permute.xlu0 %1940  ;;  %v2069_v28 = vld [vmem:[#allocation4 + $0x1e0] sm:$0xff] }
 0x2ab   : > { %2007 = vst.msk [vmem:[#allocation4 + $0x1e8] sm:$0xff] %vm1976_vm14, %v1941_v58  ;;  %v1716_v20 = vpop.permute.xlu1 %1715 }
 0x2ac   : > { %1798 = vst.msk [vmem:[#allocation4 + $0xe8] sm:$0xff] %vm1783_vm13, %v1716_v20 }
 0x2ae   : > { %v1718_v36 = vpop.permute.xlu0 %1717 }
 0x2af   : > { %1799 = vst.msk [vmem:[#allocation4 + $0xf8] sm:$0xff] %vm1783_vm13, %v1718_v36  ;;  %v1909_v23 = vpop.permute.xlu1 %1908  ;;  %v2068_v59 = vld [vmem:[#allocation4 + $0x1d8] sm:$0xff] }
 0x2b0   : > { %1991 = vst.msk [vmem:[#allocation4 + $0xe8] sm:$0xff] %vm1976_vm14, %v1909_v23  ;;  %3945 = vmatprep.mubr.msk.f32.mxu1 %vm2103_vm15, %v2068_v59 }
 0x2b1   : > { %2414 = vmatmul.mubr.f32.gmra.mrb[26].mxu1 %v2067_v12 }
 0x2b2   : > { %v1911_v60 = vpop.permute.xlu0 %1910  ;;  %v2070_v53 = vld [vmem:[#allocation4 + $0x1e8] sm:$0xff] }
 0x2b3   : > { %1992 = vst.msk [vmem:[#allocation4 + $0xf8] sm:$0xff] %vm1976_vm14, %v1911_v60  ;;  %3946 = vmatprep.mubr.msk.f32.mxu1 %vm2103_vm15, %v2070_v53  ;;  %v1524_v9 = vpop.permute.xlu1 %1523 }
 0x2b4   : > { %1621 = vst.msk [vmem:[#allocation4 + $0x1f0] sm:$0xff] %vm1557_vm11, %v1524_v9 }
 0x2b5   : > { %1622 = vst.msk [vmem:[#allocation4 + $0x1f8] sm:$0xff] %vm1559_vm12, %v1524_v9  ;;  %2419 = vmatmul.mubr.f32.gmra.mrb[28].mxu1 %v2069_v28 }
 0x2b7   : > { %v2038_v33 = vld [vmem:[#allocation4 + $0xe8] sm:$0xff]  ;;  %v1750_v61 = vpop.permute.xlu1 %1749 }
 0x2b8   : > { %3930 = vmatprep.mubr.msk.f32.mxu0 %vm2103_vm15, %v2038_v33  ;;  %1815 = vst.msk [vmem:[#allocation4 + $0x1f8] sm:$0xff] %vm1783_vm13, %v1750_v61 }
 0x2b9   : > { %2339 = vmatmul.mubr.f32.gmra.mrb[28].mxu0 %v2037_v62 }
 0x2ba   : > { %v2040_v25 = vld [vmem:[#allocation4 + $0xf8] sm:$0xff] }
 0x2bb   : > { %3931 = vmatprep.mubr.msk.f32.mxu0 %vm2103_vm15, %v2040_v25  ;;  %v1943_v11 = vpop.permute.xlu1 %1942  ;;  %v2071_v0 = vld [vmem:[#allocation4 + $0x1f0] sm:$0xff] }
 0x2bc   : > { %2008 = vst.msk [vmem:[#allocation4 + $0x1f8] sm:$0xff] %vm1976_vm14, %v1943_v11 }
 0x2bd   : > { %2344 = vmatmul.mubr.f32.gmra.mrb[30].mxu0 %v2039_v29 }
 0x2c3   : > { %v2072_v1 = vld [vmem:[#allocation4 + $0x1f8] sm:$0xff] }
 0x2c4   : > { %3947 = vmatprep.mubr.msk.f32.mxu1 %vm2103_vm15, %v2072_v1  ;;  %v5897_v1 = vpop.permute.xlu0 %2717 }
 0x2c5   : > { %2424 = vmatmul.mubr.f32.gmra.mrb[30].mxu1 %v2071_v0 }
 0x2ff   : > { %v5820_v30 = vpop.f32.mrb[0].mxu1 }
 0x300   : > { %v2352_v31 = vpop.f32.mrb[1].mxu1 }
 0x304   : > { %v2270_v2 = vpop.f32.mrb[0].mxu0 }
 0x305   : > { %v5828_v4 = vadd.f32 %v5825_v32, %v2270_v2  ;;  %v2272_v37 = vpop.f32.mrb[1].mxu0 }
 0x307   : > { %4093 = vtanh.f32 %v5828_v4  ;;  %v5831_v16 = vpop.f32.mrb[2].mxu1 }
 0x308   : > { %v2357_v39 = vpop.f32.mrb[3].mxu1 }
 0x309   : > { %v5902_v39 = vpop.permute.xlu1 %2719 }
 0x30c   : > { %v2275_v42 = vpop.f32.mrb[2].mxu0 }
 0x30d   : > { %v5834_v5 = vadd.f32 %v5825_v32, %v2275_v42  ;;  %v2277_v6 = vpop.f32.mrb[3].mxu0 }
 0x30e   : > { %v5905_v6 = vpop.permute.xlu0 %2721 }
 0x30f   : > { %4095 = vtanh.f32 %v5834_v5  ;;  %v5837_v43 = vpop.f32.mrb[4].mxu1 }
 0x310   : > { %v2362_v44 = vpop.f32.mrb[5].mxu1 }
 0x311   : > { %v4094_v49 = vpop.eup %4093 }
 0x312   : > { %2877 = vrot.lane.b32.xlu0 %v4094_v49, %s4393_s6 }
 0x314   : > { %v2280_v47 = vpop.f32.mrb[4].mxu0 }
 0x315   : > { %v5841_v41 = vadd.f32 %v5825_v32, %v2280_v47  ;;  %v2282_v7 = vpop.f32.mrb[5].mxu0  ;;  %v5911_v47 = vpop.permute.xlu1 %2723 }
 0x316   : > { %v5913_v7 = vpop.permute.xlu0 %2725 }
 0x317   : > { %4097 = vtanh.f32 %v5841_v41 }
 0x318   : > { %v2285_v8 = vpop.f32.mrb[6].mxu0 }
 0x319   : > { %v4096_v45 = vpop.eup %4095  ;;  %v5845_v51 = vadd.f32 %v5825_v32, %v2285_v8  ;;  %v2287_v54 = vpop.f32.mrb[7].mxu0 }
 0x31a   : > { %2879 = vrot.lane.b32.xlu1 %v4096_v45, %s4393_s6 }
 0x31b   : > { %4099 = vtanh.f32 %v5845_v51 }
 0x320   : > { %v5849_v63 = vpop.f32.mrb[6].mxu1 }
 0x321   : > { %v4098_v3 = vpop.eup %4097  ;;  %v2367_v10 = vpop.f32.mrb[7].mxu1 }
 0x322   : > { %2881 = vrot.lane.b32.xlu0 %v4098_v3, %s4393_s6  ;;  %v5918_v3 = vpop.permute.xlu1 %2727 }
 0x324   : > { %v5852_v13 = vpop.f32.mrb[8].mxu1 }
 0x325   : > { %v4100_v24 = vpop.eup %4099  ;;  %v2372_v15 = vpop.f32.mrb[9].mxu1 }
 0x326   : > { %2883 = vrot.lane.b32.xlu1 %v4100_v24, %s4393_s6  ;;  %v5922_v15 = vpop.permute.xlu0 %2729 }
 0x328   : > { %v2290_v17 = vpop.f32.mrb[8].mxu0 }
 0x329   : > { %v5856_v21 = vadd.f32 %v5825_v32, %v2290_v17  ;;  %v2292_v48 = vpop.f32.mrb[9].mxu0 }
 0x32b   : > { %4101 = vtanh.f32 %v5856_v21 }
 0x32c   : > { %v2295_v38 = vpop.f32.mrb[10].mxu0 }
 0x32d   : > { %v5860_v22 = vadd.f32 %v5825_v32, %v2295_v38  ;;  %v2297_v50 = vpop.f32.mrb[11].mxu0  ;;  %v5925_v38 = vpop.permute.xlu1 %2731 }
 0x32f   : > { %4103 = vtanh.f32 %v5860_v22 }
 0x334   : > { %v5863_v26 = vpop.f32.mrb[10].mxu1 }
 0x335   : > { %v4102_v52 = vpop.eup %4101  ;;  %v2377_v27 = vpop.f32.mrb[11].mxu1 }
 0x336   : > { %2885 = vrot.lane.b32.xlu0 %v4102_v52, %s4393_s6  ;;  %v5930_v27 = vpop.permute.xlu0 %2733 }
 0x338   : > { %v5866_v19 = vpop.f32.mrb[12].mxu1 }
 0x339   : > { %v4104_v40 = vpop.eup %4103  ;;  %v2382_v14 = vpop.f32.mrb[13].mxu1 }
 0x33a   : > { %2887 = vrot.lane.b32.xlu1 %v4104_v40, %s4393_s6 }
 0x33c   : > { %v2300_v34 = vpop.f32.mrb[12].mxu0 }
 0x33d   : > { %v5870_v55 = vadd.f32 %v5825_v32, %v2300_v34  ;;  %v2302_v56 = vpop.f32.mrb[13].mxu0 }
 0x33e   : > { %v5936_v56 = vpop.permute.xlu1 %2735 }
 0x33f   : > { %4105 = vtanh.f32 %v5870_v55 }
 0x340   : > { %v2305_v46 = vpop.f32.mrb[14].mxu0 }
 0x341   : > { %v5874_v35 = vadd.f32 %v5825_v32, %v2305_v46  ;;  %v2307_v18 = vpop.f32.mrb[15].mxu0  ;;  %v5939_v46 = vpop.permute.xlu0 %2737 }
 0x343   : > { %4107 = vtanh.f32 %v5874_v35 }
 0x348   : > { %v5877_v57 = vpop.f32.mrb[14].mxu1 }
 0x349   : > { %v4106_v58 = vpop.eup %4105  ;;  %v2387_v20 = vpop.f32.mrb[15].mxu1 }
 0x34a   : > { %2889 = vrot.lane.b32.xlu0 %v4106_v58, %s4393_s6  ;;  %v5943_v20 = vpop.permute.xlu1 %2739 }
 0x34c   : > { %v5880_v36 = vpop.f32.mrb[16].mxu1 }
 0x34d   : > { %v4108_v23 = vpop.eup %4107  ;;  %v2392_v59 = vpop.f32.mrb[17].mxu1 }
 0x34e   : > { %2891 = vrot.lane.b32.xlu1 %v4108_v23, %s4393_s6  ;;  %v5946_v59 = vpop.permute.xlu0 %2741 }
 0x350   : > { %v2310_v12 = vpop.f32.mrb[16].mxu0 }
 0x351   : > { %v5884_v60 = vadd.f32 %v5825_v32, %v2310_v12  ;;  %v2312_v53 = vpop.f32.mrb[17].mxu0 }
 0x353   : > { %4109 = vtanh.f32 %v5884_v60 }
 0x354   : > { %v2315_v9 = vpop.f32.mrb[18].mxu0 }
 0x355   : > { %v5888_v28 = vadd.f32 %v5825_v32, %v2315_v9  ;;  %v2317_v33 = vpop.f32.mrb[19].mxu0 }
 0x356   : > { %v5951_v33 = vpop.permute.xlu1 %2743 }
 0x357   : > { %4111 = vtanh.f32 %v5888_v28 }
 0x35c   : > { %v5891_v61 = vpop.f32.mrb[18].mxu1 }
 0x35d   : > { %v4110_v62 = vpop.eup %4109  ;;  %v2397_v25 = vpop.f32.mrb[19].mxu1 }
 0x35e   : > { %2893 = vrot.lane.b32.xlu0 %v4110_v62, %s4393_s6  ;;  %v5953_v25 = vpop.permute.xlu0 %2745 }
 0x360   : > { %v5894_v11 = vpop.f32.mrb[20].mxu1 }
 0x361   : > { %v4112_v29 = vpop.eup %4111  ;;  %v2402_v0 = vpop.f32.mrb[21].mxu1 }
 0x362   : > { %2895 = vrot.lane.b32.xlu1 %v4112_v29, %s4393_s6 }
 0x364   : > { %v2320_v31 = vpop.f32.mrb[20].mxu0 }
 0x365   : > { %v5900_v2 = vadd.f32 %v5825_v32, %v2320_v31  ;;  %v2322_v37 = vpop.f32.mrb[21].mxu0  ;;  %v5960_v31 = vadd.f32 %v5825_v32, %v5820_v30  ;;  %v5977_v30 = vpop.permute.xlu0 %2749 }
 0x367   : > { %4113 = vtanh.f32 %v5900_v2 }
 0x368   : > { %v2325_v42 = vpop.f32.mrb[22].mxu0 }
 0x369   : > { %v5908_v44 = vadd.f32 %v5825_v32, %v2325_v42  ;;  %v2327_v49 = vpop.f32.mrb[23].mxu0  ;;  %v5963_v42 = vpop.permute.xlu1 %2747 }
 0x36b   : > { %4115 = vtanh.f32 %v5908_v44 }
 0x370   : > { %v5915_v8 = vpop.f32.mrb[22].mxu1 }
 0x371   : > { %v4114_v45 = vpop.eup %4113  ;;  %v2407_v54 = vpop.f32.mrb[23].mxu1 }
 0x372   : > { %2897 = vrot.lane.b32.xlu0 %v4114_v45, %s4393_s6  ;;  %v5971_v54 = vadd.f32 %v5825_v32, %v5831_v16  ;;  %v5988_v16 = vadd.f32 %v5825_v32, %v5852_v13  ;;  %v6006_v13 = vadd.f32 %v5825_v32, %v5866_v19  ;;  %v6024_v19 = vadd.f32 %v5825_v32, %v5880_v36 }
 0x373   : > { %v6042_v36 = vadd.f32 %v5825_v32, %v5894_v11 }
 0x374   : > { %v5920_v10 = vpop.f32.mrb[24].mxu1 }
 0x375   : > { %v4116_v24 = vpop.eup %4115  ;;  %v2412_v17 = vpop.f32.mrb[25].mxu1 }
 0x376   : > { %2899 = vrot.lane.b32.xlu1 %v4116_v24, %s4393_s6  ;;  %v5975_v24 = vadd.f32 %v5825_v32, %v5837_v43  ;;  %v5983_v17 = vadd.f32 %v5825_v32, %v5849_v63  ;;  %v5992_v43 = vpop.permute.xlu0 %2753  ;;  %v6000_v63 = vadd.f32 %v5825_v32, %v5863_v26  ;;  %v3950_v26 = vmul.f32 -1.442695, %v5841_v41 }
 0x378   : > { %v2330_v48 = vpop.f32.mrb[24].mxu0 }
 0x379   : > { %v5928_v50 = vadd.f32 %v5825_v32, %v2330_v48  ;;  %v2332_v52 = vpop.f32.mrb[25].mxu0  ;;  %v5990_v48 = vpop.permute.xlu1 %2751 }
 0x37b   : > { %4117 = vtanh.f32 %v5928_v50 }
 0x37c   : > { %v2335_v40 = vpop.f32.mrb[26].mxu0 }
 0x37d   : > { %v5934_v14 = vadd.f32 %v5825_v32, %v2335_v40  ;;  %v2337_v34 = vpop.f32.mrb[27].mxu0 }
 0x37e   : > { %v3948_v34 = vmul.f32 -1.442695, %v5828_v4 }
 0x37f   : > { %4119 = vtanh.f32 %v5934_v14 }
 0x384   : > { %v5941_v18 = vpop.f32.mrb[26].mxu1 }
 0x385   : > { %v4118_v58 = vpop.eup %4117  ;;  %v2417_v23 = vpop.f32.mrb[27].mxu1 }
 0x386   : > { %2901 = vrot.lane.b32.xlu0 %v4118_v58, %s4393_s6  ;;  %v6008_v23 = vpop.permute.xlu1 %2755 }
 0x388   : > { %v5948_v12 = vpop.f32.mrb[28].mxu1 }
 0x389   : > { %v4120_v53 = vpop.eup %4119  ;;  %v2422_v9 = vpop.f32.mrb[29].mxu1 }
 0x38a   : > { %2903 = vrot.lane.b32.xlu1 %v4120_v53, %s4393_s6  ;;  %v6010_v53 = vpop.permute.xlu0 %2757  ;;  %v3949_v9 = vmul.f32 -1.442695, %v5834_v5  ;;  %v6026_v5 = vpop.permute.xlu1 %2759 }
 0x38c   : > { %v2340_v62 = vpop.f32.mrb[28].mxu0 }
 0x38d   : > { %v5956_v29 = vadd.f32 %v5825_v32, %v2340_v62  ;;  %v2342_v0 = vpop.f32.mrb[29].mxu0 }
 0x38e   : > { %v6017_v0 = vadd.f32 %v5825_v32, %v5877_v57 }
 0x38f   : > { %4121 = vtanh.f32 %v5956_v29 }
 0x390   : > { %v2345_v37 = vpop.f32.mrb[30].mxu0  ;;  %4123 = vtanh.f32 %v5960_v31 }
 0x391   : > { %v5966_v49 = vadd.f32 %v5825_v32, %v2345_v37  ;;  %v2347_v45 = vpop.f32.mrb[31].mxu0  ;;  %v6028_v37 = vpop.permute.xlu0 %2761 }
 0x392   : > { %6973 = vst [vmem:[#allocation5_spill] sm:$0xff] %v6028_v37  ;;  %v3951_v45 = vmul.f32 -1.442695, %v5845_v51  ;;  %v6044_v51 = vpop.permute.xlu1 %2763 }
 0x393   : > { %4125 = vtanh.f32 %v5966_v49  ;;  %6974 = vst [vmem:[#allocation6_spill] sm:$0xff] %v6044_v51 }
 0x394   : > { %4127 = vtanh.f32 %v5971_v54 }
 0x395   : > { %4129 = vtanh.f32 %v5975_v24 }
 0x396   : > { %4131 = vtanh.f32 %v5983_v17 }
 0x397   : > { %4133 = vtanh.f32 %v5988_v16 }
 0x398   : > { %v5994_v52 = vpop.f32.mrb[30].mxu1  ;;  %4135 = vpow2.f32 %v3948_v34  ;;  %v6035_v34 = vadd.f32 %v5825_v32, %v5891_v61  ;;  %v3953_v61 = vmul.f32 -1.442695, %v5860_v22  ;;  %v6063_v22 = vpop.permute.xlu1 %2767 }
 0x399   : > { %v4122_v40 = vpop.eup %4121  ;;  %v2427_v58 = vpop.f32.mrb[31].mxu1  ;;  %4137 = vtanh.f32 %v6000_v63  ;;  %6977 = vst [vmem:[#allocation9_spill] sm:$0xff] %v6063_v22 }
 0x39a   : > { %2905 = vrot.lane.b32.xlu0 %v4122_v40, %s4393_s6  ;;  %v4124_v4 = vpop.eup %4123  ;;  %4139 = vtanh.f32 %v6006_v13  ;;  %v3952_v40 = vmul.f32 -1.442695, %v5856_v21  ;;  %v6046_v58 = vpop.permute.xlu0 %2765 }
 0x39b   : > { %4141 = vpow2.f32 %v3949_v9  ;;  %6975 = vst [vmem:[#allocation7_spill] sm:$0xff] %v6046_v58  ;;  %v6052_v9 = vadd.f32 %v5825_v32, %v5915_v8 }
 0x39c   : > { %4143 = vpow2.f32 %v3950_v26 }
 0x39d   : > { %v4126_v62 = vpop.eup %4125  ;;  %4145 = vtanh.f32 %v6017_v0 }
 0x39e   : > { %2907 = vrot.lane.b32.xlu1 %v4126_v62, %s4393_s6  ;;  %2909 = vrot.lane.b32.xlu0 %v4124_v4, %s4393_s6  ;;  %v4128_v41 = vpop.eup %4127  ;;  %4147 = vtanh.f32 %v6024_v19  ;;  %v6059_v62 = vadd.f32 %v5825_v32, %v5920_v10  ;;  %v6061_v26 = vpop.permute.xlu0 %2769 }
 0x39f   : > { %v4130_v57 = vpop.eup %4129  ;;  %4149 = vpow2.f32 %v3951_v45  ;;  %6976 = vst [vmem:[#allocation8_spill] sm:$0xff] %v6061_v26  ;;  %v3954_v45 = vmul.f32 -1.442695, %v5870_v55  ;;  %v6078_v55 = vadd.f32 %v5825_v32, %v5948_v12  ;;  %v6089_v12 = vadd.f32 %v5825_v32, %v5994_v52 }
 0x3a0   : > { %v4132_v21 = vpop.eup %4131  ;;  %4151 = vpow2.f32 %v3952_v40  ;;  %v6069_v40 = vadd.f32 %v5825_v32, %v5941_v18 }
 0x3a1   : > { %v4134_v4 = vpop.eup %4133  ;;  %4153 = vtanh.f32 %v6035_v34 }
 0x3a2   : > { %2911 = vrot.lane.b32.xlu1 %v4128_v41, %s4393_s6  ;;  %2913 = vrot.lane.b32.xlu0 %v4130_v57, %s4393_s6  ;;  %v4136_v11 = vpop.eup %4135  ;;  %4155 = vtanh.f32 %v6042_v36  ;;  %v6081_v26 = vpop.permute.xlu0 %2773 }
 0x3a3   : > { %v4138_v41 = vpop.eup %4137  ;;  %4157 = vpow2.f32 %v3953_v61  ;;  %v3955_v61 = vmul.f32 -1.442695, %v5874_v35  ;;  %v2525_v18 = vadd.f32 1.0, %v4136_v11  ;;  %6979 = vst [vmem:[#allocation11_spill] sm:$0xff] %v6081_v26 }
 0x3a4   : > { %v4140_v8 = vpop.eup %4139  ;;  %4159 = vtanh.f32 %v6052_v9 }
 0x3a5   : > { %v4142_v57 = vpop.eup %4141  ;;  %4161 = vtanh.f32 %v6059_v62 }
 0x3a6   : > { %2915 = vrot.lane.b32.xlu1 %v4132_v21, %s4393_s6  ;;  %2917 = vrot.lane.b32.xlu0 %v4134_v4, %s4393_s6  ;;  %v4144_v10 = vpop.eup %4143  ;;  %v6074_v21 = vpop.permute.xlu1 %2771  ;;  %4163 = vpow2.f32 %v3954_v45  ;;  %v2526_v58 = vadd.f32 1.0, %v4142_v57  ;;  %v3956_v57 = vmul.f32 -1.442695, %v5884_v60  ;;  %v3957_v60 = vmul.f32 -1.442695, %v5888_v28 }
 0x3a7   : > { %6978 = vst [vmem:[#allocation10_spill] sm:$0xff] %v6074_v21  ;;  %v4146_v4 = vpop.eup %4145  ;;  %4165 = vtanh.f32 %v6069_v40  ;;  %v2527_v45 = vadd.f32 1.0, %v4144_v10  ;;  %v6096_v26 = vpop.permute.xlu0 %2777 }
 0x3a8   : > { %v4148_v22 = vpop.eup %4147  ;;  %4167 = vtanh.f32 %v6078_v55  ;;  %6981 = vst [vmem:[#allocation13_spill] sm:$0xff] %v6096_v26 }
 0x3a9   : > { %4169 = vpow2.f32 %v3955_v61 }
 0x3aa   : > { %2919 = vrot.lane.b32.xlu1 %v4138_v41, %s4393_s6  ;;  %2921 = vrot.lane.b32.xlu0 %v4140_v8, %s4393_s6  ;;  %v4150_v41 = vpop.eup %4149  ;;  %4171 = vrcp.f32 %v2525_v18  ;;  %v6092_v21 = vpop.permute.xlu1 %2775 }
 0x3ab   : > { %v4152_v8 = vpop.eup %4151  ;;  %6980 = vst [vmem:[#allocation12_spill] sm:$0xff] %v6092_v21  ;;  %4173 = vrcp.f32 %v2526_v58 }
 0x3ac   : > { %v4154_v35 = vpop.eup %4153  ;;  %4175 = vtanh.f32 %v6089_v12  ;;  %v2529_v52 = vadd.f32 1.0, %v4152_v8 }
 0x3ad   : > { %v4156_v11 = vpop.eup %4155  ;;  %4177 = vrcp.f32 %v2527_v45  ;;  %v2878_v45 = vpop.permute.xlu0 %2877 }
 0x3ae   : > { %2923 = vrot.lane.b32.xlu1 %v4146_v4, %s4393_s6  ;;  %2925 = vrot.lane.b32.xlu0 %v4148_v22, %s4393_s6  ;;  %v4158_v22 = vpop.eup %4157  ;;  %v2528_v4 = vadd.f32 1.0, %v4150_v41  ;;  %4179 = vpow2.f32 %v3956_v57  ;;  %v6102_v58 = vpop.permute.xlu1 %2779 }
 0x3af   : > { %v4160_v32 = vpop.eup %4159  ;;  %6982 = vst [vmem:[#allocation14_spill] sm:$0xff] %v6102_v58  ;;  %v2530_v41 = vadd.f32 1.0, %v4158_v22 }
 0x3b0   : > { %v4162_v10 = vpop.eup %4161  ;;  %4181 = vrcp.f32 %v2528_v4 }
 0x3b1   : > { %v4164_v61 = vpop.eup %4163  ;;  %4183 = vrcp.f32 %v2529_v52 }
 0x3b2   : > { %2927 = vrot.lane.b32.xlu1 %v4154_v35, %s4393_s6  ;;  %2929 = vrot.lane.b32.xlu0 %v4156_v11, %s4393_s6  ;;  %v4166_v18 = vpop.eup %4165  ;;  %v2531_v11 = vadd.f32 1.0, %v4164_v61  ;;  %4185 = vpow2.f32 %v3957_v60  ;;  %v2880_v22 = vpop.permute.xlu1 %2879 }
 0x3b3   : > { %v4168_v35 = vpop.eup %4167  ;;  %4187 = vrcp.f32 %v2530_v41 }
 0x3b4   : > { %v4170_v8 = vpop.eup %4169  ;;  %4189 = vrcp.f32 %v2531_v11 }
 0x3b5   : > { %v6106_v28 = vpop.eup %4171  ;;  %v2532_v52 = vadd.f32 1.0, %v4170_v8 }
 0x3b6   : > { %2931 = vrot.lane.b32.xlu1 %v4160_v32, %s4393_s6  ;;  %2933 = vrot.lane.b32.xlu0 %v4162_v10, %s4393_s6  ;;  %v6108_v57 = vpop.eup %4173  ;;  %v2973_v4 = vmul.f32 %v6106_v28, %v2878_v45  ;;  %v2882_v10 = vpop.permute.xlu0 %2881 }
 0x3b7   : > { %v4176_v32 = vpop.eup %4175  ;;  %4191 = vrcp.f32 %v2532_v52  ;;  %v2884_v41 = vpop.permute.xlu1 %2883 }
 0x3b8   : > { %v6111_v61 = vpop.eup %4177 }
 0x3b9   : > { %v4180_v60 = vpop.eup %4179 }
 0x3ba   : > { %2935 = vrot.lane.b32.xlu1 %v4166_v18, %s4393_s6  ;;  %2937 = vrot.lane.b32.xlu0 %v4168_v35, %s4393_s6  ;;  %v2974_v18 = vmul.f32 %v6108_v57, %v2880_v22  ;;  %v2975_v35 = vmul.f32 %v6111_v61, %v2882_v10  ;;  %v6117_v58 = vpop.eup %4181  ;;  %v2886_v45 = vpop.permute.xlu0 %2885  ;;  %v2533_v8 = vadd.f32 1.0, %v4180_v60  ;;  %v3958_v22 = vmul.f32 -1.442695, %v5900_v2 }
 0x3bb   : > { %v6119_v11 = vpop.eup %4183  ;;  %v2888_v10 = vpop.permute.xlu1 %2887 }
 0x3bc   : > { %6983 = vst [vmem:[#allocation15_spill] sm:$0xff] %v6119_v11  ;;  %v2977_v26 = vmul.f32 %v6119_v11, %v2886_v45  ;;  %4193 = vrcp.f32 %v2533_v8 }
 0x3bd   : > { %4195 = vpow2.f32 %v3958_v22 }
 0x3be   : > { %2939 = vrot.lane.b32.xlu1 %v4176_v32, %s4393_s6  ;;  %3037 = vrot.lane.b32.xlu0 %v2973_v4, %s4400_s26  ;;  %v4186_v32 = vpop.eup %4185  ;;  %v2976_v4 = vmul.f32 %v6117_v58, %v2884_v41  ;;  %v2890_v21 = vpop.permute.xlu0 %2889  ;;  %v3959_v41 = vmul.f32 -1.442695, %v5908_v44  ;;  %s4401_s6 = smov 112  }
 0x3bf   : > { %v6126_v51 = vpop.eup %4187  ;;  %v2534_v52 = vadd.f32 1.0, %v4186_v32 }
 0x3c0   : > { %v6130_v60 = vpop.eup %4189  ;;  %v2892_v2 = vpop.permute.xlu1 %2891 }
 0x3c1   : > { %4197 = vrcp.f32 %v2534_v52  ;;  %v6137_v45 = vpop.eup %4191 }
 0x3c2   : > { %3039 = vrot.lane.b32.xlu1 %v2974_v18, %s4400_s26  ;;  %3041 = vrot.lane.b32.xlu0 %v2975_v35, %s4400_s26  ;;  %v2978_v18 = vmul.f32 %v6126_v51, %v2888_v10  ;;  %v2979_v35 = vmul.f32 %v6130_v60, %v2890_v21  ;;  %v2980_v8 = vmul.f32 %v6137_v45, %v2892_v2  ;;  %4199 = vpow2.f32 %v3959_v41 }
 0x3c3   : > { %v3961_v2 = vmul.f32 -1.442695, %v5934_v14  ;;  %v3962_v14 = vmul.f32 -1.442695, %v5956_v29 }
 0x3c6   : > { %3043 = vrot.lane.b32.xlu1 %v2976_v4, %s4400_s26  ;;  %3045 = vrot.lane.b32.xlu0 %v2977_v26, %s4400_s26  ;;  %v6141_v26 = vpop.eup %4193 }
 0x3c7   : > { %v4196_v4 = vpop.eup %4195 }
 0x3c8   : > { %v2535_v52 = vadd.f32 1.0, %v4196_v4 }
 0x3ca   : > { %3047 = vrot.lane.b32.xlu1 %v2978_v18, %s4400_s26  ;;  %3049 = vrot.lane.b32.xlu0 %v2979_v35, %s4400_s26  ;;  %v3960_v35 = vmul.f32 -1.442695, %v5928_v50  ;;  %4201 = vrcp.f32 %v2535_v52 }
 0x3cb   : > { %v6145_v44 = vpop.eup %4197 }
 0x3cc   : > { %v4200_v18 = vpop.eup %4199  ;;  %4203 = vpow2.f32 %v3960_v35  ;;  %v3964_v35 = vmul.f32 -1.442695, %v5960_v31 }
 0x3cd   : > { %v2536_v41 = vadd.f32 1.0, %v4200_v18 }
 0x3ce   : > { %3051 = vrot.lane.b32.xlu1 %v2980_v8, %s4400_s26 }
 0x3cf   : > { %4205 = vrcp.f32 %v2536_v41  ;;  %v3963_v41 = vmul.f32 -1.442695, %v5966_v49  ;;  %v3969_v49 = vmul.f32 -1.442695, %v6000_v63 }
 0x3d0   : > { %v2894_v32 = vpop.permute.xlu0 %2893  ;;  %4207 = vpow2.f32 %v3961_v2  ;;  %v3965_v2 = vmul.f32 -1.442695, %v5971_v54 }
 0x3d1   : > { %v2981_v21 = vmul.f32 %v6141_v26, %v2894_v32 }
 0x3d3   : > { %3053 = vrot.lane.b32.xlu0 %v2981_v21, %s4400_s26 }
 0x3d4   : > { %v2896_v22 = vpop.permute.xlu1 %2895  ;;  %v6151_v8 = vpop.eup %4201 }
 0x3d5   : > { %v2982_v10 = vmul.f32 %v6145_v44, %v2896_v22 }
 0x3d6   : > { %v4204_v37 = vpop.eup %4203 }
 0x3d7   : > { %3055 = vrot.lane.b32.xlu1 %v2982_v10, %s4400_s26  ;;  %v2537_v10 = vadd.f32 1.0, %v4204_v37  ;;  %v3967_v37 = vmul.f32 -1.442695, %v5983_v17  ;;  %v3970_v17 = vmul.f32 -1.442695, %v6006_v13 }
 0x3d9   : > { %v6155_v4 = vpop.eup %4205  ;;  %4209 = vrcp.f32 %v2537_v10 }
 0x3da   : > { %v4208_v52 = vpop.eup %4207  ;;  %4211 = vpow2.f32 %v3962_v14 }
 0x3db   : > { %v2538_v18 = vadd.f32 1.0, %v4208_v52 }
 0x3dd   : > { %4213 = vrcp.f32 %v2538_v18  ;;  %v3971_v18 = vmul.f32 -1.442695, %v6017_v0 }
 0x3de   : > { %4215 = vpow2.f32 %v3964_v35 }
 0x3df   : > { %4217 = vpow2.f32 %v3963_v41  ;;  %v3972_v41 = vmul.f32 -1.442695, %v6024_v19  ;;  %v3975_v19 = vmul.f32 -1.442695, %v6052_v9 }
 0x3e0   : > { %4219 = vpow2.f32 %v3965_v2 }
 0x3e4   : > { %v2898_v32 = vpop.permute.xlu0 %2897 }
 0x3e5   : > { %v2983_v21 = vmul.f32 %v6151_v8, %v2898_v32  ;;  %v3966_v32 = vmul.f32 -1.442695, %v5975_v24 }
 0x3e7   : > { %3057 = vrot.lane.b32.xlu0 %v2983_v21, %s4400_s26  ;;  %v6165_v21 = vpop.eup %4209  ;;  %4221 = vpow2.f32 %v3966_v32 }
 0x3e8   : > { %v2900_v22 = vpop.permute.xlu1 %2899  ;;  %4223 = vpow2.f32 %v3967_v37  ;;  %v4212_v54 = vpop.eup %4211 }
 0x3e9   : > { %v2984_v50 = vmul.f32 %v6155_v4, %v2900_v22  ;;  %v3968_v22 = vmul.f32 -1.442695, %v5988_v16  ;;  %v2539_v14 = vadd.f32 1.0, %v4212_v54 }
 0x3eb   : > { %3059 = vrot.lane.b32.xlu1 %v2984_v50, %s4400_s26  ;;  %v6171_v50 = vpop.eup %4213  ;;  %4225 = vpow2.f32 %v3968_v22  ;;  %v3974_v22 = vmul.f32 -1.442695, %v6042_v36  ;;  %v3977_v36 = vmul.f32 -1.442695, %v6069_v40 }
 0x3ec   : > { %v4216_v10 = vpop.eup %4215  ;;  %4227 = vpow2.f32 %v3969_v49 }
 0x3ed   : > { %v4218_v16 = vpop.eup %4217  ;;  %v2541_v35 = vadd.f32 1.0, %v4216_v10  ;;  %4229 = vpow2.f32 %v3970_v17 }
 0x3ee   : > { %v4220_v63 = vpop.eup %4219  ;;  %4231 = vrcp.f32 %v2539_v14  ;;  %v2540_v2 = vadd.f32 1.0, %v4218_v16 }
 0x3ef   : > { %v2542_v37 = vadd.f32 1.0, %v4220_v63  ;;  %4233 = vpow2.f32 %v3971_v18  ;;  %v3978_v18 = vmul.f32 -1.442695, %v6078_v55  ;;  %v3979_v55 = vmul.f32 -1.442695, %v6089_v12 }
 0x3f0   : > { %4235 = vrcp.f32 %v2541_v35 }
 0x3f1   : > { %v4222_v32 = vpop.eup %4221  ;;  %4237 = vpow2.f32 %v3972_v41 }
 0x3f2   : > { %v4224_v13 = vpop.eup %4223  ;;  %v2543_v0 = vadd.f32 1.0, %v4222_v32  ;;  %4239 = vrcp.f32 %v2540_v2 }
 0x3f3   : > { %4241 = vrcp.f32 %v2542_v37  ;;  %v2544_v49 = vadd.f32 1.0, %v4224_v13 }
 0x3f8   : > { %v2902_v29 = vpop.permute.xlu0 %2901 }
 0x3f9   : > { %v2985_v31 = vmul.f32 %v6165_v21, %v2902_v29  ;;  %v3973_v29 = vmul.f32 -1.442695, %v6035_v34 }
 0x3fb   : > { %3061 = vrot.lane.b32.xlu0 %v2985_v31, %s4400_s26  ;;  %v4226_v31 = vpop.eup %4225  ;;  %4243 = vpow2.f32 %v3973_v29 }
 0x3fc   : > { %v2904_v24 = vpop.permute.xlu1 %2903  ;;  %v4228_v54 = vpop.eup %4227  ;;  %4245 = vpow2.f32 %v3974_v22  ;;  %v2545_v10 = vadd.f32 1.0, %v4226_v31 }
 0x3fd   : > { %v2986_v52 = vmul.f32 %v6171_v50, %v2904_v24  ;;  %v3976_v24 = vmul.f32 -1.442695, %v6059_v62  ;;  %4247 = vrcp.f32 %v2543_v0  ;;  %v4230_v17 = vpop.eup %4229  ;;  %v2546_v34 = vadd.f32 1.0, %v4228_v54 }
 0x3fe   : > { %4249 = vrcp.f32 %v2544_v49  ;;  %v2547_v62 = vadd.f32 1.0, %v4230_v17 }
 0x3ff   : > { %3063 = vrot.lane.b32.xlu1 %v2986_v52, %s4400_s26  ;;  %v6182_v52 = vpop.eup %4231  ;;  %4251 = vpow2.f32 %v3975_v19 }
 0x400   : > { %v4234_v16 = vpop.eup %4233  ;;  %4253 = vpow2.f32 %v3976_v24 }
 0x401   : > { %v6187_v63 = vpop.eup %4235  ;;  %4255 = vrcp.f32 %v2545_v10  ;;  %v2548_v2 = vadd.f32 1.0, %v4234_v16 }
 0x402   : > { %v4238_v35 = vpop.eup %4237  ;;  %4257 = vrcp.f32 %v2546_v34 }
 0x403   : > { %v6190_v41 = vpop.eup %4239  ;;  %4259 = vpow2.f32 %v3977_v36  ;;  %v2549_v0 = vadd.f32 1.0, %v4238_v35 }
 0x404   : > { %v6192_v37 = vpop.eup %4241  ;;  %4261 = vpow2.f32 %v3978_v18 }
 0x405   : > { %v4244_v22 = vpop.eup %4243  ;;  %4263 = vrcp.f32 %v2547_v62 }
 0x406   : > { %v4246_v31 = vpop.eup %4245  ;;  %4265 = vrcp.f32 %v2548_v2  ;;  %v2550_v12 = vadd.f32 1.0, %v4244_v22 }
 0x407   : > { %v6199_v49 = vpop.eup %4247  ;;  %4267 = vpow2.f32 %v3979_v55  ;;  %v2551_v36 = vadd.f32 1.0, %v4246_v31 }
 0x408   : > { %v6201_v24 = vpop.eup %4249  ;;  %4269 = vrcp.f32 %v2549_v0 }
 0x409   : > { %v4252_v34 = vpop.eup %4251  ;;  %4271 = vrcp.f32 %v2550_v12 }
 0x40a   : > { %v2552_v35 = vadd.f32 1.0, %v4252_v34  ;;  %4273 = vrcp.f32 %v2551_v36 }
 0x40c   : > { %v2906_v14 = vpop.permute.xlu0 %2905  ;;  %4275 = vrcp.f32 %v2552_v35 }
 0x40d   : > { %v2987_v9 = vmul.f32 %v6182_v52, %v2906_v14  ;;  %v4254_v14 = vpop.eup %4253 }
 0x40e   : > { %v6207_v16 = vpop.eup %4255  ;;  %v2553_v55 = vadd.f32 1.0, %v4254_v14 }
 0x40f   : > { %3065 = vrot.lane.b32.xlu0 %v2987_v9, %s4400_s26  ;;  %6984 = vst [vmem:[#allocation16_spill] sm:$0xff] %v6207_v16  ;;  %v6209_v62 = vpop.eup %4257 }
 0x410   : > { %v2908_v40 = vpop.permute.xlu1 %2907  ;;  %v2910_v32 = vpop.permute.xlu0 %2909  ;;  %4277 = vrcp.f32 %v2553_v55 }
 0x411   : > { %v2988_v13 = vmul.f32 %v6190_v41, %v2908_v40  ;;  %v2989_v29 = vmul.f32 %v6187_v63, %v2910_v32  ;;  %v4260_v32 = vpop.eup %4259 }
 0x412   : > { %v2554_v31 = vadd.f32 1.0, %v4260_v32 }
 0x413   : > { %3067 = vrot.lane.b32.xlu1 %v2988_v13, %s4400_s26  ;;  %3069 = vrot.lane.b32.xlu0 %v2989_v29, %s4400_s26  ;;  %v4262_v13 = vpop.eup %4261 }
 0x414   : > { %v2912_v54 = vpop.permute.xlu1 %2911  ;;  %v2914_v19 = vpop.permute.xlu0 %2913  ;;  %4279 = vrcp.f32 %v2554_v31 }
 0x415   : > { %v2990_v10 = vmul.f32 %v6192_v37, %v2912_v54  ;;  %v2991_v17 = vmul.f32 %v6199_v49, %v2914_v19  ;;  %v6215_v29 = vpop.eup %4263 }
 0x416   : > { %6985 = vst [vmem:[#allocation17_spill] sm:$0xff] %v6215_v29  ;;  %v6219_v12 = vpop.eup %4265 }
 0x417   : > { %3071 = vrot.lane.b32.xlu1 %v2990_v10, %s4400_s26  ;;  %3073 = vrot.lane.b32.xlu0 %v2991_v17, %s4400_s26  ;;  %6986 = vst [vmem:[#allocation18_spill] sm:$0xff] %v6219_v12  ;;  %v2555_v10 = vadd.f32 1.0, %v4262_v13  ;;  %v4268_v17 = vpop.eup %4267 }
 0x418   : > { %v2916_v18 = vpop.permute.xlu1 %2915  ;;  %v2918_v9 = vpop.permute.xlu0 %2917  ;;  %v2556_v35 = vadd.f32 1.0, %v4268_v17 }
 0x419   : > { %v2992_v2 = vmul.f32 %v6201_v24, %v2916_v18  ;;  %v2993_v40 = vmul.f32 %v6207_v16, %v2918_v9  ;;  %v6223_v34 = vpop.eup %4269  ;;  %4281 = vrcp.f32 %v2555_v10 }
 0x41a   : > { %6987 = vst [vmem:[#allocation19_spill] sm:$0xff] %v6223_v34  ;;  %4283 = vrcp.f32 %v2556_v35 }
 0x41b   : > { %3075 = vrot.lane.b32.xlu1 %v2992_v2, %s4400_s26  ;;  %3077 = vrot.lane.b32.xlu0 %v2993_v40, %s4400_s26  ;;  %v6227_v2 = vpop.eup %4271 }
 0x41c   : > { %v2920_v22 = vpop.permute.xlu1 %2919  ;;  %v2922_v0 = vpop.permute.xlu0 %2921  ;;  %6988 = vst [vmem:[#allocation20_spill] sm:$0xff] %v6227_v2 }
 0x41d   : > { %v2994_v54 = vmul.f32 %v6209_v62, %v2920_v22  ;;  %v2995_v19 = vmul.f32 %v6215_v29, %v2922_v0  ;;  %v6231_v40 = vpop.eup %4273 }
 0x41e   : > { %6989 = vst [vmem:[#allocation21_spill] sm:$0xff] %v6231_v40  ;;  %v6235_v0 = vpop.eup %4275 }
 0x41f   : > { %3079 = vrot.lane.b32.xlu1 %v2994_v54, %s4400_s26  ;;  %3081 = vrot.lane.b32.xlu0 %v2995_v19, %s4400_s26  ;;  %6990 = vst [vmem:[#allocation22_spill] sm:$0xff] %v6235_v0  ;;  %v6239_v31 = vpop.eup %4277 }
 0x420   : > { %v2924_v36 = vpop.permute.xlu1 %2923  ;;  %v2926_v14 = vpop.permute.xlu0 %2925  ;;  %6991 = vst [vmem:[#allocation23_spill] sm:$0xff] %v6239_v31 }
 0x421   : > { %v2996_v18 = vmul.f32 %v6219_v12, %v2924_v36  ;;  %v2997_v9 = vmul.f32 %v6223_v34, %v2926_v14  ;;  %v6243_v36 = vpop.eup %4279 }
 0x422   : > { %6992 = vst [vmem:[#allocation24_spill] sm:$0xff] %v6243_v36 }
 0x423   : > { %3083 = vrot.lane.b32.xlu1 %v2996_v18, %s4400_s26  ;;  %3085 = vrot.lane.b32.xlu0 %v2997_v9, %s4400_s26  ;;  %v6247_v14 = vpop.eup %4281 }
 0x424   : > { %v2928_v32 = vpop.permute.xlu1 %2927  ;;  %v2930_v55 = vpop.permute.xlu0 %2929  ;;  %6993 = vst [vmem:[#allocation25_spill] sm:$0xff] %v6247_v14 }
 0x425   : > { %v2998_v13 = vmul.f32 %v6227_v2, %v2928_v32  ;;  %v2999_v22 = vmul.f32 %v6231_v40, %v2930_v55  ;;  %v2813_v55 = vmul.f32 %v6106_v28, %v5897_v1 }
 0x427   : > { %3087 = vrot.lane.b32.xlu1 %v2998_v13, %s4400_s26  ;;  %3089 = vrot.lane.b32.xlu0 %v2999_v22, %s4400_s26  ;;  %v6255_v13 = vpop.eup %4283 }
 0x428   : > { %v2932_v54 = vpop.permute.xlu1 %2931  ;;  %v2934_v19 = vpop.permute.xlu0 %2933 }
 0x429   : > { %v3000_v10 = vmul.f32 %v6235_v0, %v2932_v54  ;;  %v3001_v17 = vmul.f32 %v6239_v31, %v2934_v19 }
 0x42b   : > { %3091 = vrot.lane.b32.xlu1 %v3000_v10, %s4400_s26  ;;  %3093 = vrot.lane.b32.xlu0 %v3001_v17, %s4400_s26  ;;  %v2814_v17 = vmul.f32 %v6108_v57, %v5902_v39 }
 0x42c   : > { %v2936_v18 = vpop.permute.xlu1 %2935  ;;  %v2938_v9 = vpop.permute.xlu0 %2937 }
 0x42d   : > { %v3002_v35 = vmul.f32 %v6243_v36, %v2936_v18  ;;  %v3003_v32 = vmul.f32 %v6247_v14, %v2938_v9  ;;  %v2815_v18 = vmul.f32 %v6111_v61, %v5905_v6 }
 0x42f   : > { %3095 = vrot.lane.b32.xlu1 %v3002_v35, %s4400_s26  ;;  %3097 = vrot.lane.b32.xlu0 %v3003_v32, %s4400_s26 }
 0x430   : > { %v2940_v22 = vpop.permute.xlu1 %2939  ;;  %v3038_v54 = vpop.permute.xlu0 %3037 }
 0x431   : > { %v3004_v19 = vmul.f32 %v6255_v13, %v2940_v22  ;;  %v6258_v10 = vadd.f32 %v3038_v54, %v2813_v55  ;;  %v2816_v55 = vmul.f32 %v6117_v58, %v5911_v47  ;;  %v2817_v22 = vmul.f32 %v6119_v11, %v5913_v7 }
 0x433   : > { %4285 = vtanh.f32 %v6258_v10  ;;  %3099 = vrot.lane.b32.xlu1 %v3004_v19, %s4400_s26 }
 0x434   : > { %v3040_v9 = vpop.permute.xlu1 %3039  ;;  %v3042_v1 = vpop.permute.xlu0 %3041 }
 0x435   : > { %v6266_v35 = vadd.f32 %v3040_v9, %v2814_v17  ;;  %v6268_v32 = vadd.f32 %v3042_v1, %v2815_v18  ;;  %v2818_v17 = vmul.f32 %v6126_v51, %v5918_v3  ;;  %v2819_v18 = vmul.f32 %v6130_v60, %v5922_v15 }
 0x437   : > { %4287 = vtanh.f32 %v6266_v35 }
 0x438   : > { %4289 = vtanh.f32 %v6268_v32  ;;  %v3044_v39 = vpop.permute.xlu1 %3043  ;;  %v3046_v54 = vpop.permute.xlu0 %3045 }
 0x439   : > { %v6276_v19 = vadd.f32 %v3044_v39, %v2816_v55  ;;  %v6278_v6 = vadd.f32 %v3046_v54, %v2817_v22  ;;  %v2820_v55 = vmul.f32 %v6137_v45, %v5925_v38  ;;  %v2821_v54 = vmul.f32 %v6141_v26, %v5930_v27 }
 0x43b   : > { %4291 = vtanh.f32 %v6276_v19 }
 0x43c   : > { %4293 = vtanh.f32 %v6278_v6  ;;  %v3048_v47 = vpop.permute.xlu1 %3047  ;;  %v3050_v7 = vpop.permute.xlu0 %3049 }
 0x43d   : > { %v4286_v9 = vpop.eup %4285  ;;  %v6286_v1 = vadd.f32 %v3048_v47, %v2818_v17  ;;  %v6288_v11 = vadd.f32 %v3050_v7, %v2819_v18  ;;  %v2822_v7 = vmul.f32 %v6145_v44, %v5936_v56  ;;  %v2823_v56 = vmul.f32 %v6151_v8, %v5939_v46 }
 0x43e   : > { %3229 = vrot.lane.b32.xlu0 %v4286_v9, %s4400_s26  ;;  %v2825_v46 = vmul.f32 %v6165_v21, %v5946_v59  ;;  %v2827_v59 = vmul.f32 %v6182_v52, %v5953_v25  ;;  %v2830_v25 = vmul.f32 %v6192_v37, %v5990_v48 }
 0x43f   : > { %4295 = vtanh.f32 %v6286_v1 }
 0x440   : > { %4297 = vtanh.f32 %v6288_v11  ;;  %v3052_v3 = vpop.permute.xlu1 %3051 }
 0x441   : > { %v4288_v15 = vpop.eup %4287  ;;  %v6295_v22 = vadd.f32 %v3052_v3, %v2820_v55 }
 0x442   : > { %v4290_v39 = vpop.eup %4289  ;;  %3231 = vrot.lane.b32.xlu1 %v4288_v15, %s4400_s26 }
 0x443   : > { %4299 = vtanh.f32 %v6295_v22  ;;  %3233 = vrot.lane.b32.xlu0 %v4290_v39, %s4400_s26 }
 0x445   : > { %v4292_v17 = vpop.eup %4291  ;;  %v3054_v18 = vpop.permute.xlu0 %3053 }
 0x446   : > { %v4294_v47 = vpop.eup %4293  ;;  %v6302_v38 = vadd.f32 %v3054_v18, %v2821_v54  ;;  %3235 = vrot.lane.b32.xlu1 %v4292_v17, %s4400_s26 }
 0x447   : > { %3237 = vrot.lane.b32.xlu0 %v4294_v47, %s4400_s26  ;;  %v2824_v47 = vmul.f32 %v6155_v4, %v5943_v20  ;;  %v2826_v20 = vmul.f32 %v6171_v50, %v5951_v33  ;;  %v2829_v33 = vmul.f32 %v6187_v63, %v5977_v30 }
 0x448   : > { %4301 = vtanh.f32 %v6302_v38 }
 0x449   : > { %v4296_v9 = vpop.eup %4295  ;;  %v3056_v55 = vpop.permute.xlu1 %3055 }
 0x44a   : > { %v4298_v3 = vpop.eup %4297  ;;  %v6309_v15 = vadd.f32 %v3056_v55, %v2822_v7  ;;  %3239 = vrot.lane.b32.xlu1 %v4296_v9, %s4400_s26 }
 0x44b   : > { %3241 = vrot.lane.b32.xlu0 %v4298_v3, %s4400_s26 }
 0x44c   : > { %4303 = vtanh.f32 %v6309_v15 }
 0x44d   : > { %v4300_v27 = vpop.eup %4299 }
 0x44e   : > { %3243 = vrot.lane.b32.xlu1 %v4300_v27, %s4400_s26 }
 0x452   : > { %v4302_v39 = vpop.eup %4301 }
 0x453   : > { %3245 = vrot.lane.b32.xlu0 %v4302_v39, %s4400_s26 }
 0x456   : > { %v4304_v54 = vpop.eup %4303 }
 0x457   : > { %3247 = vrot.lane.b32.xlu1 %v4304_v54, %s4400_s26 }
 0x459   : > { %v3058_v17 = vpop.permute.xlu0 %3057 }
 0x45a   : > { %v6319_v18 = vadd.f32 %v3058_v17, %v2823_v56 }
 0x45c   : > { %4305 = vtanh.f32 %v6319_v18 }
 0x45d   : > { %v3060_v7 = vpop.permute.xlu1 %3059 }
 0x45e   : > { %v6324_v9 = vadd.f32 %v3060_v7, %v2824_v47 }
 0x460   : > { %4307 = vtanh.f32 %v6324_v9 }
 0x466   : > { %v4306_v55 = vpop.eup %4305 }
 0x467   : > { %3249 = vrot.lane.b32.xlu0 %v4306_v55, %s4400_s26 }
 0x46a   : > { %v4308_v3 = vpop.eup %4307 }
 0x46b   : > { %3251 = vrot.lane.b32.xlu1 %v4308_v3, %s4400_s26  ;;  %v2828_v3 = vmul.f32 %v6190_v41, %v5963_v42 }
 0x46d   : > { %v3062_v27 = vpop.permute.xlu0 %3061 }
 0x46e   : > { %v6331_v39 = vadd.f32 %v3062_v27, %v2825_v46 }
 0x470   : > { %4309 = vtanh.f32 %v6331_v39 }
 0x471   : > { %v3064_v54 = vpop.permute.xlu1 %3063 }
 0x472   : > { %v6336_v56 = vadd.f32 %v3064_v54, %v2826_v20 }
 0x474   : > { %4311 = vtanh.f32 %v6336_v56 }
 0x47a   : > { %v4310_v17 = vpop.eup %4309 }
 0x47b   : > { %3253 = vrot.lane.b32.xlu0 %v4310_v17, %s4400_s26  ;;  %v2831_v17 = vmul.f32 %v6199_v49, %v5992_v43 }
 0x47e   : > { %v4312_v47 = vpop.eup %4311 }
 0x47f   : > { %3255 = vrot.lane.b32.xlu1 %v4312_v47, %s4400_s26 }
 0x481   : > { %v3066_v7 = vpop.permute.xlu0 %3065 }
 0x482   : > { %v6343_v55 = vadd.f32 %v3066_v7, %v2827_v59  ;;  %v2832_v7 = vmul.f32 %v6201_v24, %v6008_v23  ;;  %v6994_v23 = vld [vmem:[#allocation5_spill] sm:$0xff] }
 0x484   : > { %4313 = vtanh.f32 %v6343_v55 }
 0x485   : > { %v3068_v46 = vpop.permute.xlu1 %3067  ;;  %v3070_v27 = vpop.permute.xlu0 %3069 }
 0x486   : > { %v6350_v20 = vadd.f32 %v3068_v46, %v2828_v3  ;;  %v6352_v54 = vadd.f32 %v3070_v27, %v2829_v33  ;;  %v2833_v33 = vmul.f32 %v6207_v16, %v6010_v53 }
 0x488   : > { %4315 = vtanh.f32 %v6350_v20 }
 0x489   : > { %4317 = vtanh.f32 %v6352_v54  ;;  %v3072_v30 = vpop.permute.xlu1 %3071  ;;  %v3074_v47 = vpop.permute.xlu0 %3073 }
 0x48a   : > { %v6360_v59 = vadd.f32 %v3072_v30, %v2830_v25  ;;  %v6362_v42 = vadd.f32 %v3074_v47, %v2831_v17  ;;  %v2834_v25 = vmul.f32 %v6209_v62, %v6026_v5  ;;  %v2835_v17 = vmul.f32 %v6215_v29, %v6994_v23 }
 0x48c   : > { %4319 = vtanh.f32 %v6360_v59 }
 0x48d   : > { %4321 = vtanh.f32 %v6362_v42  ;;  %v3076_v48 = vpop.permute.xlu1 %3075  ;;  %v3078_v43 = vpop.permute.xlu0 %3077 }
 0x48e   : > { %v4314_v3 = vpop.eup %4313  ;;  %v6370_v46 = vadd.f32 %v3076_v48, %v2832_v7  ;;  %v6372_v27 = vadd.f32 %v3078_v43, %v2833_v33  ;;  %v6995_v48 = vld [vmem:[#allocation6_spill] sm:$0xff]  ;;  %v6996_v43 = vld [vmem:[#allocation7_spill] sm:$0xff] }
 0x48f   : > { %3257 = vrot.lane.b32.xlu0 %v4314_v3, %s4400_s26  ;;  %v2836_v5 = vmul.f32 %v6219_v12, %v6995_v48  ;;  %v2837_v3 = vmul.f32 %v6223_v34, %v6996_v43  ;;  %v6997_v48 = vld [vmem:[#allocation8_spill] sm:$0xff]  ;;  %v6998_v43 = vld [vmem:[#allocation9_spill] sm:$0xff] }
 0x490   : > { %4323 = vtanh.f32 %v6370_v46  ;;  %v2839_v12 = vmul.f32 %v6231_v40, %v6997_v48  ;;  %v2838_v34 = vmul.f32 %v6227_v2, %v6998_v43  ;;  %v6999_v48 = vld [vmem:[#allocation11_spill] sm:$0xff]  ;;  %v7000_v43 = vld [vmem:[#allocation10_spill] sm:$0xff] }
 0x491   : > { %4325 = vtanh.f32 %v6372_v27  ;;  %v3080_v53 = vpop.permute.xlu1 %3079  ;;  %v3082_v30 = vpop.permute.xlu0 %3081  ;;  %v2841_v40 = vmul.f32 %v6239_v31, %v6999_v48  ;;  %v2840_v2 = vmul.f32 %v6235_v0, %v7000_v43  ;;  %v7001_v48 = vld [vmem:[#allocation12_spill] sm:$0xff] }
 0x492   : > { %v4316_v47 = vpop.eup %4315  ;;  %v6381_v16 = vadd.f32 %v3080_v53, %v2834_v25  ;;  %v6383_v7 = vadd.f32 %v3082_v30, %v2835_v17  ;;  %v2842_v31 = vmul.f32 %v6243_v36, %v7001_v48 }
 0x493   : > { %v4318_v33 = vpop.eup %4317  ;;  %3259 = vrot.lane.b32.xlu1 %v4316_v47, %s4400_s26 }
 0x494   : > { %4327 = vtanh.f32 %v6381_v16  ;;  %3261 = vrot.lane.b32.xlu0 %v4318_v33, %s4400_s26 }
 0x495   : > { %4329 = vtanh.f32 %v6383_v7  ;;  %v3084_v23 = vpop.permute.xlu1 %3083  ;;  %v3086_v25 = vpop.permute.xlu0 %3085 }
 0x496   : > { %v4320_v53 = vpop.eup %4319  ;;  %v6393_v17 = vadd.f32 %v3084_v23, %v2836_v5  ;;  %v6395_v30 = vadd.f32 %v3086_v25, %v2837_v3 }
 0x497   : > { %v4322_v47 = vpop.eup %4321  ;;  %3263 = vrot.lane.b32.xlu1 %v4320_v53, %s4400_s26 }
 0x498   : > { %4331 = vtanh.f32 %v6393_v17  ;;  %3265 = vrot.lane.b32.xlu0 %v4322_v47, %s4400_s26 }
 0x499   : > { %4333 = vtanh.f32 %v6395_v30  ;;  %v3088_v33 = vpop.permute.xlu1 %3087  ;;  %v3090_v5 = vpop.permute.xlu0 %3089 }
 0x49a   : > { %v4324_v23 = vpop.eup %4323  ;;  %v6405_v3 = vadd.f32 %v3088_v33, %v2838_v34  ;;  %v6407_v25 = vadd.f32 %v3090_v5, %v2839_v12 }
 0x49b   : > { %v4326_v53 = vpop.eup %4325  ;;  %3267 = vrot.lane.b32.xlu1 %v4324_v23, %s4400_s26 }
 0x49c   : > { %4335 = vtanh.f32 %v6405_v3  ;;  %3269 = vrot.lane.b32.xlu0 %v4326_v53, %s4400_s26  ;;  %v7002_v53 = vld [vmem:[#allocation13_spill] sm:$0xff] }
 0x49d   : > { %4337 = vtanh.f32 %v6407_v25  ;;  %v3092_v47 = vpop.permute.xlu1 %3091  ;;  %v3094_v34 = vpop.permute.xlu0 %3093  ;;  %v2843_v43 = vmul.f32 %v6247_v14, %v7002_v53 }
 0x49e   : > { %v4328_v33 = vpop.eup %4327  ;;  %v6417_v12 = vadd.f32 %v3092_v47, %v2840_v2  ;;  %v6419_v5 = vadd.f32 %v3094_v34, %v2841_v40 }
 0x49f   : > { %v4330_v23 = vpop.eup %4329  ;;  %3271 = vrot.lane.b32.xlu1 %v4328_v33, %s4400_s26  ;;  %v7003_v33 = vld [vmem:[#allocation14_spill] sm:$0xff] }
 0x4a0   : > { %4339 = vtanh.f32 %v6417_v12  ;;  %3273 = vrot.lane.b32.xlu0 %v4330_v23, %s4400_s26  ;;  %v2844_v48 = vmul.f32 %v6255_v13, %v7003_v33  ;;  %v7006_v33 = vld [vmem:[#allocation17_spill] sm:$0xff] }
 0x4a1   : > { %4341 = vtanh.f32 %v6419_v5  ;;  %v3096_v0 = vpop.permute.xlu1 %3095  ;;  %v3098_v2 = vpop.permute.xlu0 %3097 }
 0x4a2   : > { %v4332_v47 = vpop.eup %4331  ;;  %v3162_v40 = vadd.f32 %v3096_v0, %v2842_v31  ;;  %v3163_v34 = vadd.f32 %v3098_v2, %v2843_v43 }
 0x4a3   : > { %v4334_v29 = vpop.eup %4333  ;;  %3275 = vrot.lane.b32.xlu1 %v4332_v47, %s4400_s26  ;;  %v7005_v47 = vld [vmem:[#allocation16_spill] sm:$0xff] }
 0x4a4   : > { %4343 = vtanh.f32 %v3162_v40  ;;  %3277 = vrot.lane.b32.xlu0 %v4334_v29, %s4400_s26 }
 0x4a5   : > { %4345 = vtanh.f32 %v3163_v34  ;;  %v3100_v23 = vpop.permute.xlu1 %3099 }
 0x4a6   : > { %v4336_v36 = vpop.eup %4335  ;;  %v3164_v53 = vadd.f32 %v3100_v23, %v2844_v48  ;;  %v7007_v23 = vld [vmem:[#allocation18_spill] sm:$0xff] }
 0x4a7   : > { %v4338_v14 = vpop.eup %4337  ;;  %3279 = vrot.lane.b32.xlu1 %v4336_v36, %s4400_s26 }
 0x4a8   : > { %4347 = vtanh.f32 %v3164_v53  ;;  %3281 = vrot.lane.b32.xlu0 %v4338_v14, %s4400_s26 }
 0x4aa   : > { %v4340_v0 = vpop.eup %4339 }
 0x4ab   : > { %v4342_v31 = vpop.eup %4341  ;;  %3283 = vrot.lane.b32.xlu1 %v4340_v0, %s4400_s26 }
 0x4ac   : > { %3285 = vrot.lane.b32.xlu0 %v4342_v31, %s4400_s26  ;;  %v7008_v31 = vld [vmem:[#allocation19_spill] sm:$0xff] }
 0x4ae   : > { %v4344_v29 = vpop.eup %4343 }
 0x4af   : > { %v4346_v43 = vpop.eup %4345  ;;  %3287 = vrot.lane.b32.xlu1 %v4344_v29, %s4400_s26 }
 0x4b0   : > { %3289 = vrot.lane.b32.xlu0 %v4346_v43, %s4400_s26  ;;  %v7009_v43 = vld [vmem:[#allocation20_spill] sm:$0xff] }
 0x4b2   : > { %v4348_v2 = vpop.eup %4347 }
 0x4b3   : > { %3291 = vrot.lane.b32.xlu1 %v4348_v2, %s4400_s26 }
 0x4b4   : > { %3389 = vrot.lane.b32.xlu0 %v6258_v10, %s4401_s6  ;;  %v3232_v36 = vpop.permute.xlu1 %3231 }
 0x4b7   : > { %3391 = vrot.lane.b32.xlu1 %v6266_v35, %s4401_s6 }
 0x4b8   : > { %3393 = vrot.lane.b32.xlu0 %v6268_v32, %s4401_s6  ;;  %v3236_v10 = vpop.permute.xlu1 %3235 }
 0x4bb   : > { %3395 = vrot.lane.b32.xlu1 %v6276_v19, %s4401_s6 }
 0x4bc   : > { %3397 = vrot.lane.b32.xlu0 %v6278_v6, %s4401_s6  ;;  %v6507_v6 = vmul.f32 %v6108_v57, %v3232_v36  ;;  %v7010_v36 = vld [vmem:[#allocation21_spill] sm:$0xff] }
 0x4bf   : > { %3399 = vrot.lane.b32.xlu1 %v6286_v1, %s4401_s6 }
 0x4c0   : > { %3401 = vrot.lane.b32.xlu0 %v6288_v11, %s4401_s6  ;;  %v3230_v11 = vpop.permute.xlu0 %3229 }
 0x4c1   : > { %v6501_v19 = vmul.f32 %v6106_v28, %v3230_v11  ;;  %v6517_v28 = vmul.f32 %v6117_v58, %v3236_v10 }
 0x4c3   : > { %3403 = vrot.lane.b32.xlu1 %v6295_v22, %s4401_s6 }
 0x4c4   : > { %3405 = vrot.lane.b32.xlu0 %v6302_v38, %s4401_s6  ;;  %v3234_v14 = vpop.permute.xlu0 %3233 }
 0x4c5   : > { %v6510_v38 = vmul.f32 %v6111_v61, %v3234_v14 }
 0x4c7   : > { %3407 = vrot.lane.b32.xlu1 %v6309_v15, %s4401_s6 }
 0x4c8   : > { %3409 = vrot.lane.b32.xlu0 %v6319_v18, %s4401_s6  ;;  %v3238_v35 = vpop.permute.xlu0 %3237 }
 0x4cb   : > { %3411 = vrot.lane.b32.xlu1 %v6324_v9, %s4401_s6  ;;  %v7004_v9 = vld [vmem:[#allocation15_spill] sm:$0xff] }
 0x4cc   : > { %3413 = vrot.lane.b32.xlu0 %v6331_v39, %s4401_s6  ;;  %v3242_v32 = vpop.permute.xlu0 %3241  ;;  %v6520_v39 = vmul.f32 %v7004_v9, %v3238_v35  ;;  %v7011_v35 = vld [vmem:[#allocation22_spill] sm:$0xff] }
 0x4cf   : > { %3415 = vrot.lane.b32.xlu1 %v6336_v56, %s4401_s6 }
 0x4d0   : > { %3417 = vrot.lane.b32.xlu0 %v6343_v55, %s4401_s6  ;;  %v3246_v22 = vpop.permute.xlu0 %3245  ;;  %v6530_v55 = vmul.f32 %v6130_v60, %v3242_v32 }
 0x4d3   : > { %3419 = vrot.lane.b32.xlu1 %v6350_v20, %s4401_s6 }
 0x4d4   : > { %3421 = vrot.lane.b32.xlu0 %v6352_v54, %s4401_s6 }
 0x4d7   : > { %3423 = vrot.lane.b32.xlu1 %v6360_v59, %s4401_s6  ;;  %v6540_v59 = vmul.f32 %v6141_v26, %v3246_v22 }
 0x4d8   : > { %3425 = vrot.lane.b32.xlu0 %v6362_v42, %s4401_s6 }
 0x4d9   : > { %v3250_v18 = vpop.permute.xlu0 %3249 }
 0x4da   : > { %v6550_v42 = vmul.f32 %v6151_v8, %v3250_v18  ;;  %v7013_v18 = vld [vmem:[#allocation24_spill] sm:$0xff] }
 0x4db   : > { %3427 = vrot.lane.b32.xlu1 %v6370_v46, %s4401_s6 }
 0x4dc   : > { %3429 = vrot.lane.b32.xlu0 %v6372_v27, %s4401_s6 }
 0x4df   : > { %3431 = vrot.lane.b32.xlu1 %v6381_v16, %s4401_s6  ;;  %v3240_v16 = vpop.permute.xlu1 %3239 }
 0x4e0   : > { %3433 = vrot.lane.b32.xlu0 %v6383_v7, %s4401_s6  ;;  %v6527_v57 = vmul.f32 %v6126_v51, %v3240_v16 }
 0x4e3   : > { %3435 = vrot.lane.b32.xlu1 %v6393_v17, %s4401_s6  ;;  %v3244_v1 = vpop.permute.xlu1 %3243 }
 0x4e4   : > { %3437 = vrot.lane.b32.xlu0 %v6395_v30, %s4401_s6  ;;  %v6537_v58 = vmul.f32 %v6137_v45, %v3244_v1  ;;  %v7012_v1 = vld [vmem:[#allocation23_spill] sm:$0xff] }
 0x4e7   : > { %3439 = vrot.lane.b32.xlu1 %v6405_v3, %s4401_s6  ;;  %v3248_v15 = vpop.permute.xlu1 %3247 }
 0x4e8   : > { %3441 = vrot.lane.b32.xlu0 %v6407_v25, %s4401_s6  ;;  %v6547_v51 = vmul.f32 %v6145_v44, %v3248_v15 }
 0x4eb   : > { %3443 = vrot.lane.b32.xlu1 %v6417_v12, %s4401_s6  ;;  %v3252_v61 = vpop.permute.xlu1 %3251 }
 0x4ec   : > { %3445 = vrot.lane.b32.xlu0 %v6419_v5, %s4401_s6  ;;  %v6557_v26 = vmul.f32 %v6155_v4, %v3252_v61 }
 0x4ed   : > { %v3254_v56 = vpop.permute.xlu0 %3253 }
 0x4ee   : > { %v6560_v27 = vmul.f32 %v6165_v21, %v3254_v56  ;;  %v7014_v56 = vld [vmem:[#allocation25_spill] sm:$0xff] }
 0x4ef   : > { %3447 = vrot.lane.b32.xlu1 %v3162_v40, %s4401_s6 }
 0x4f0   : > { %3449 = vrot.lane.b32.xlu0 %v3163_v34, %s4401_s6 }
 0x4f1   : > { %v3256_v20 = vpop.permute.xlu1 %3255 }
 0x4f2   : > { %v6567_v8 = vmul.f32 %v6171_v50, %v3256_v20 }
 0x4f3   : > { %3451 = vrot.lane.b32.xlu1 %v3164_v53, %s4401_s6 }
 0x4f4   : > { %3550 = vrot.lane.b32.xlu0 %v6501_v19, %s4394_s7 }
 0x4f7   : > { %3552 = vrot.lane.b32.xlu1 %v6507_v6, %s4394_s7 }
 0x4f8   : > { %3554 = vrot.lane.b32.xlu0 %v6510_v38, %s4394_s7 }
 0x4fb   : > { %3556 = vrot.lane.b32.xlu1 %v6517_v28, %s4394_s7 }
 0x4fc   : > { %3558 = vrot.lane.b32.xlu0 %v6520_v39, %s4394_s7 }
 0x4ff   : > { %3560 = vrot.lane.b32.xlu1 %v6527_v57, %s4394_s7 }
 0x500   : > { %3562 = vrot.lane.b32.xlu0 %v6530_v55, %s4394_s7 }
 0x501   : > { %v3258_v54 = vpop.permute.xlu0 %3257 }
 0x502   : > { %v6570_v17 = vmul.f32 %v6182_v52, %v3258_v54 }
 0x503   : > { %3564 = vrot.lane.b32.xlu1 %v6537_v58, %s4394_s7 }
 0x504   : > { %3566 = vrot.lane.b32.xlu0 %v6540_v59, %s4394_s7 }
 0x505   : > { %v3260_v60 = vpop.permute.xlu1 %3259 }
 0x506   : > { %v3262_v45 = vpop.permute.xlu0 %3261  ;;  %v6577_v21 = vmul.f32 %v6190_v41, %v3260_v60 }
 0x507   : > { %3568 = vrot.lane.b32.xlu1 %v6547_v51, %s4394_s7  ;;  %v6580_v3 = vmul.f32 %v6187_v63, %v3262_v45 }
 0x508   : > { %3570 = vrot.lane.b32.xlu0 %v6550_v42, %s4394_s7 }
 0x509   : > { %v3264_v46 = vpop.permute.xlu1 %3263 }
 0x50a   : > { %v3266_v44 = vpop.permute.xlu0 %3265  ;;  %v6587_v52 = vmul.f32 %v6192_v37, %v3264_v46 }
 0x50b   : > { %3572 = vrot.lane.b32.xlu1 %v6557_v26, %s4394_s7  ;;  %v6590_v12 = vmul.f32 %v6199_v49, %v3266_v44 }
 0x50c   : > { %3574 = vrot.lane.b32.xlu0 %v6560_v27, %s4394_s7 }
 0x50d   : > { %v3268_v7 = vpop.permute.xlu1 %3267 }
 0x50e   : > { %v3270_v4 = vpop.permute.xlu0 %3269  ;;  %v6597_v63 = vmul.f32 %v6201_v24, %v3268_v7 }
 0x50f   : > { %3576 = vrot.lane.b32.xlu1 %v6567_v8, %s4394_s7  ;;  %v6600_v40 = vmul.f32 %v7005_v47, %v3270_v4 }
 0x510   : > { %3578 = vrot.lane.b32.xlu0 %v6570_v17, %s4394_s7 }
 0x511   : > { %v3272_v30 = vpop.permute.xlu1 %3271 }
 0x512   : > { %v3274_v50 = vpop.permute.xlu0 %3273  ;;  %v6607_v49 = vmul.f32 %v6209_v62, %v3272_v30 }
 0x513   : > { %3580 = vrot.lane.b32.xlu1 %v6577_v21, %s4394_s7  ;;  %v6610_v48 = vmul.f32 %v7006_v33, %v3274_v50 }
 0x514   : > { %3582 = vrot.lane.b32.xlu0 %v6580_v3, %s4394_s7 }
 0x515   : > { %v3276_v25 = vpop.permute.xlu1 %3275 }
 0x516   : > { %v3278_v41 = vpop.permute.xlu0 %3277  ;;  %v6617_v53 = vmul.f32 %v7007_v23, %v3276_v25 }
 0x517   : > { %3584 = vrot.lane.b32.xlu1 %v6587_v52, %s4394_s7  ;;  %v6620_v29 = vmul.f32 %v7008_v31, %v3278_v41 }
 0x518   : > { %3586 = vrot.lane.b32.xlu0 %v6590_v12, %s4394_s7 }
 0x519   : > { %v3280_v5 = vpop.permute.xlu1 %3279 }
 0x51a   : > { %v3282_v37 = vpop.permute.xlu0 %3281  ;;  %v6627_v2 = vmul.f32 %v7009_v43, %v3280_v5 }
 0x51b   : > { %3588 = vrot.lane.b32.xlu1 %v6597_v63, %s4394_s7  ;;  %v6630_v14 = vmul.f32 %v7010_v36, %v3282_v37 }
 0x51c   : > { %3590 = vrot.lane.b32.xlu0 %v6600_v40, %s4394_s7 }
 0x51d   : > { %v3284_v34 = vpop.permute.xlu1 %3283 }
 0x51e   : > { %v3286_v24 = vpop.permute.xlu0 %3285  ;;  %v6638_v16 = vmul.f32 %v7011_v35, %v3284_v34 }
 0x51f   : > { %3592 = vrot.lane.b32.xlu1 %v6607_v49, %s4394_s7  ;;  %v6641_v22 = vmul.f32 %v7012_v1, %v3286_v24 }
 0x520   : > { %3594 = vrot.lane.b32.xlu0 %v6610_v48, %s4394_s7 }
 0x521   : > { %v3288_v0 = vpop.permute.xlu1 %3287 }
 0x522   : > { %v3290_v62 = vpop.permute.xlu0 %3289  ;;  %v6650_v9 = vmul.f32 %v7013_v18, %v3288_v0 }
 0x523   : > { %3596 = vrot.lane.b32.xlu1 %v6617_v53, %s4394_s7  ;;  %v6653_v20 = vmul.f32 %v7014_v56, %v3290_v62 }
 0x524   : > { %3598 = vrot.lane.b32.xlu0 %v6620_v29, %s4394_s7 }
 0x525   : > { %v3292_v11 = vpop.permute.xlu1 %3291 }
 0x526   : > { %v3390_v10 = vpop.permute.xlu0 %3389  ;;  %v6662_v60 = vmul.f32 %v6255_v13, %v3292_v11 }
 0x527   : > { %3486 = vst.msk [vmem:[#allocation3] sm:$0xff] %vm3485_vm0, %v3390_v10  ;;  %3600 = vrot.lane.b32.xlu1 %v6627_v2, %s4394_s7 }
 0x528   : > { %3602 = vrot.lane.b32.xlu0 %v6630_v14, %s4394_s7 }
 0x529   : > { %v3392_v32 = vpop.permute.xlu1 %3391 }
 0x52a   : > { %3487 = vst.msk [vmem:[#allocation3 + $0x8] sm:$0xff] %vm3485_vm0, %v3392_v32  ;;  %v3394_v15 = vpop.permute.xlu0 %3393 }
 0x52b   : > { %3488 = vst.msk [vmem:[#allocation3 + $0x10] sm:$0xff] %vm3485_vm0, %v3394_v15  ;;  %3604 = vrot.lane.b32.xlu1 %v6638_v16, %s4394_s7 }
 0x52c   : > { %3606 = vrot.lane.b32.xlu0 %v6641_v22, %s4394_s7 }
 0x52d   : > { %v3396_v61 = vpop.permute.xlu1 %3395 }
 0x52e   : > { %3489 = vst.msk [vmem:[#allocation3 + $0x18] sm:$0xff] %vm3485_vm0, %v3396_v61  ;;  %v3398_v54 = vpop.permute.xlu0 %3397 }
 0x52f   : > { %3490 = vst.msk [vmem:[#allocation3 + $0x20] sm:$0xff] %vm3485_vm0, %v3398_v54  ;;  %3608 = vrot.lane.b32.xlu1 %v6650_v9, %s4394_s7 }
 0x530   : > { %3610 = vrot.lane.b32.xlu0 %v6653_v20, %s4394_s7 }
 0x531   : > { %v3400_v45 = vpop.permute.xlu1 %3399 }
 0x532   : > { %3491 = vst.msk [vmem:[#allocation3 + $0x28] sm:$0xff] %vm3485_vm0, %v3400_v45  ;;  %v3402_v46 = vpop.permute.xlu0 %3401 }
 0x533   : > { %3492 = vst.msk [vmem:[#allocation3 + $0x30] sm:$0xff] %vm3485_vm0, %v3402_v46  ;;  %3612 = vrot.lane.b32.xlu1 %v6662_v60, %s4394_s7 }
 0x534   : > { %3679 = vrot.lane.b32.xlu0 %v6501_v19, %s4402_s28 }
 0x535   : > { %v3404_v44 = vpop.permute.xlu1 %3403 }
 0x536   : > { %3493 = vst.msk [vmem:[#allocation3 + $0x38] sm:$0xff] %vm3485_vm0, %v3404_v44  ;;  %v3406_v7 = vpop.permute.xlu0 %3405 }
 0x537   : > { %3494 = vst.msk [vmem:[#allocation3 + $0x40] sm:$0xff] %vm3485_vm0, %v3406_v7  ;;  %3681 = vrot.lane.b32.xlu1 %v6507_v6, %s4402_s28 }
 0x538   : > { %3683 = vrot.lane.b32.xlu0 %v6510_v38, %s4402_s28 }
 0x539   : > { %v3408_v13 = vpop.permute.xlu1 %3407 }
 0x53a   : > { %3495 = vst.msk [vmem:[#allocation3 + $0x48] sm:$0xff] %vm3485_vm0, %v3408_v13  ;;  %v3410_v4 = vpop.permute.xlu0 %3409 }
 0x53b   : > { %3496 = vst.msk [vmem:[#allocation3 + $0x50] sm:$0xff] %vm3485_vm0, %v3410_v4  ;;  %3685 = vrot.lane.b32.xlu1 %v6517_v28, %s4402_s28 }
 0x53c   : > { %3687 = vrot.lane.b32.xlu0 %v6520_v39, %s4402_s28 }
 0x53d   : > { %v3412_v19 = vpop.permute.xlu1 %3411 }
 0x53e   : > { %3497 = vst.msk [vmem:[#allocation3 + $0x58] sm:$0xff] %vm3485_vm0, %v3412_v19  ;;  %v3414_v30 = vpop.permute.xlu0 %3413 }
 0x53f   : > { %3498 = vst.msk [vmem:[#allocation3 + $0x60] sm:$0xff] %vm3485_vm0, %v3414_v30  ;;  %3689 = vrot.lane.b32.xlu1 %v6527_v57, %s4402_s28 }
 0x540   : > { %3691 = vrot.lane.b32.xlu0 %v6530_v55, %s4402_s28 }
 0x541   : > { %v3416_v6 = vpop.permute.xlu1 %3415 }
 0x542   : > { %3499 = vst.msk [vmem:[#allocation3 + $0x68] sm:$0xff] %vm3485_vm0, %v3416_v6  ;;  %v3418_v38 = vpop.permute.xlu0 %3417 }
 0x543   : > { %3500 = vst.msk [vmem:[#allocation3 + $0x70] sm:$0xff] %vm3485_vm0, %v3418_v38  ;;  %3693 = vrot.lane.b32.xlu1 %v6537_v58, %s4402_s28 }
 0x544   : > { %3695 = vrot.lane.b32.xlu0 %v6540_v59, %s4402_s28 }
 0x545   : > { %v3420_v28 = vpop.permute.xlu1 %3419 }
 0x546   : > { %3501 = vst.msk [vmem:[#allocation3 + $0x78] sm:$0xff] %vm3485_vm0, %v3420_v28  ;;  %v3422_v39 = vpop.permute.xlu0 %3421 }
 0x547   : > { %3502 = vst.msk [vmem:[#allocation3 + $0x80] sm:$0xff] %vm3485_vm0, %v3422_v39  ;;  %3697 = vrot.lane.b32.xlu1 %v6547_v51, %s4402_s28 }
 0x548   : > { %3699 = vrot.lane.b32.xlu0 %v6550_v42, %s4402_s28 }
 0x549   : > { %v3424_v57 = vpop.permute.xlu1 %3423 }
 0x54a   : > { %3503 = vst.msk [vmem:[#allocation3 + $0x88] sm:$0xff] %vm3485_vm0, %v3424_v57  ;;  %v3426_v55 = vpop.permute.xlu0 %3425 }
 0x54b   : > { %3504 = vst.msk [vmem:[#allocation3 + $0x90] sm:$0xff] %vm3485_vm0, %v3426_v55  ;;  %3701 = vrot.lane.b32.xlu1 %v6557_v26, %s4402_s28 }
 0x54c   : > { %3703 = vrot.lane.b32.xlu0 %v6560_v27, %s4402_s28 }
 0x54d   : > { %v3428_v58 = vpop.permute.xlu1 %3427 }
 0x54e   : > { %3505 = vst.msk [vmem:[#allocation3 + $0x98] sm:$0xff] %vm3485_vm0, %v3428_v58  ;;  %v3430_v59 = vpop.permute.xlu0 %3429 }
 0x54f   : > { %3506 = vst.msk [vmem:[#allocation3 + $0xa0] sm:$0xff] %vm3485_vm0, %v3430_v59  ;;  %3705 = vrot.lane.b32.xlu1 %v6567_v8, %s4402_s28 }
 0x550   : > { %3707 = vrot.lane.b32.xlu0 %v6570_v17, %s4402_s28 }
 0x551   : > { %v3432_v51 = vpop.permute.xlu1 %3431 }
 0x552   : > { %3507 = vst.msk [vmem:[#allocation3 + $0xa8] sm:$0xff] %vm3485_vm0, %v3432_v51  ;;  %v3434_v42 = vpop.permute.xlu0 %3433 }
 0x553   : > { %3508 = vst.msk [vmem:[#allocation3 + $0xb0] sm:$0xff] %vm3485_vm0, %v3434_v42  ;;  %3709 = vrot.lane.b32.xlu1 %v6577_v21, %s4402_s28 }
 0x554   : > { %3711 = vrot.lane.b32.xlu0 %v6580_v3, %s4402_s28 }
 0x555   : > { %v3436_v26 = vpop.permute.xlu1 %3435 }
 0x556   : > { %3509 = vst.msk [vmem:[#allocation3 + $0xb8] sm:$0xff] %vm3485_vm0, %v3436_v26  ;;  %v3438_v27 = vpop.permute.xlu0 %3437 }
 0x557   : > { %3510 = vst.msk [vmem:[#allocation3 + $0xc0] sm:$0xff] %vm3485_vm0, %v3438_v27  ;;  %3713 = vrot.lane.b32.xlu1 %v6587_v52, %s4402_s28 }
 0x558   : > { %3715 = vrot.lane.b32.xlu0 %v6590_v12, %s4402_s28 }
 0x559   : > { %v3440_v8 = vpop.permute.xlu1 %3439 }
 0x55a   : > { %3511 = vst.msk [vmem:[#allocation3 + $0xc8] sm:$0xff] %vm3485_vm0, %v3440_v8  ;;  %v3442_v17 = vpop.permute.xlu0 %3441 }
 0x55b   : > { %3512 = vst.msk [vmem:[#allocation3 + $0xd0] sm:$0xff] %vm3485_vm0, %v3442_v17  ;;  %3717 = vrot.lane.b32.xlu1 %v6597_v63, %s4402_s28 }
 0x55c   : > { %3719 = vrot.lane.b32.xlu0 %v6600_v40, %s4402_s28 }
 0x55d   : > { %v3444_v21 = vpop.permute.xlu1 %3443 }
 0x55e   : > { %3513 = vst.msk [vmem:[#allocation3 + $0xd8] sm:$0xff] %vm3485_vm0, %v3444_v21  ;;  %v3446_v3 = vpop.permute.xlu0 %3445 }
 0x55f   : > { %3514 = vst.msk [vmem:[#allocation3 + $0xe0] sm:$0xff] %vm3485_vm0, %v3446_v3  ;;  %3721 = vrot.lane.b32.xlu1 %v6607_v49, %s4402_s28 }
 0x560   : > { %3723 = vrot.lane.b32.xlu0 %v6610_v48, %s4402_s28 }
 0x561   : > { %v3448_v50 = vpop.permute.xlu1 %3447 }
 0x562   : > { %3515 = vst.msk [vmem:[#allocation3 + $0xe8] sm:$0xff] %vm3485_vm0, %v3448_v50  ;;  %v3450_v52 = vpop.permute.xlu0 %3449 }
 0x563   : > { %3516 = vst.msk [vmem:[#allocation3 + $0xf0] sm:$0xff] %vm3485_vm0, %v3450_v52  ;;  %3725 = vrot.lane.b32.xlu1 %v6617_v53, %s4402_s28 }
 0x564   : > { %3727 = vrot.lane.b32.xlu0 %v6620_v29, %s4402_s28 }
 0x565   : > { %v3452_v25 = vpop.permute.xlu1 %3451 }
 0x566   : > { %3517 = vst.msk [vmem:[#allocation3 + $0xf8] sm:$0xff] %vm3485_vm0, %v3452_v25  ;;  %v3551_v12 = vpop.permute.xlu0 %3550 }
 0x567   : > { %3647 = vst.msk [vmem:[#allocation2 + $0x19] sm:$0xff] %vm3646_vm1, %v3551_v12  ;;  %3729 = vrot.lane.b32.xlu1 %v6627_v2, %s4402_s28 }
 0x568   : > { %3731 = vrot.lane.b32.xlu0 %v6630_v14, %s4402_s28 }
 0x569   : > { %v3553_v41 = vpop.permute.xlu1 %3552 }
 0x56a   : > { %3648 = vst.msk [vmem:[#allocation2 + $0x21] sm:$0xff] %vm3646_vm1, %v3553_v41  ;;  %v3555_v63 = vpop.permute.xlu0 %3554 }
 0x56b   : > { %3649 = vst.msk [vmem:[#allocation2 + $0x31] sm:$0xff] %vm3646_vm1, %v3555_v63  ;;  %3733 = vrot.lane.b32.xlu1 %v6638_v16, %s4402_s28 }
 0x56c   : > { %3735 = vrot.lane.b32.xlu0 %v6641_v22, %s4402_s28 }
 0x56d   : > { %v3557_v5 = vpop.permute.xlu1 %3556 }
 0x56e   : > { %3650 = vst.msk [vmem:[#allocation2 + $0x39] sm:$0xff] %vm3646_vm1, %v3557_v5  ;;  %v3559_v47 = vpop.permute.xlu0 %3558 }
 0x56f   : > { %3651 = vst.msk [vmem:[#allocation2 + $0x49] sm:$0xff] %vm3646_vm1, %v3559_v47  ;;  %3737 = vrot.lane.b32.xlu1 %v6650_v9, %s4402_s28 }
 0x570   : > { %3739 = vrot.lane.b32.xlu0 %v6653_v20, %s4402_s28 }
 0x571   : > { %v3561_v40 = vpop.permute.xlu1 %3560 }
 0x572   : > { %3652 = vst.msk [vmem:[#allocation2 + $0x51] sm:$0xff] %vm3646_vm1, %v3561_v40  ;;  %v3563_v37 = vpop.permute.xlu0 %3562 }
 0x573   : > { %3653 = vst.msk [vmem:[#allocation2 + $0x61] sm:$0xff] %vm3646_vm1, %v3563_v37  ;;  %3741 = vrot.lane.b32.xlu1 %v6662_v60, %s4402_s28 }
 0x575   : > { %v3565_v49 = vpop.permute.xlu1 %3564 }
 0x576   : > { %3654 = vst.msk [vmem:[#allocation2 + $0x69] sm:$0xff] %vm3646_vm1, %v3565_v49  ;;  %v3567_v34 = vpop.permute.xlu0 %3566 }
 0x577   : > { %3655 = vst.msk [vmem:[#allocation2 + $0x79] sm:$0xff] %vm3646_vm1, %v3567_v34 }
 0x579   : > { %v3569_v33 = vpop.permute.xlu1 %3568 }
 0x57a   : > { %3656 = vst.msk [vmem:[#allocation2 + $0x81] sm:$0xff] %vm3646_vm1, %v3569_v33  ;;  %v3571_v48 = vpop.permute.xlu0 %3570 }
 0x57b   : > { %3657 = vst.msk [vmem:[#allocation2 + $0x91] sm:$0xff] %vm3646_vm1, %v3571_v48 }
 0x57d   : > { %v3573_v24 = vpop.permute.xlu1 %3572 }
 0x57e   : > { %3658 = vst.msk [vmem:[#allocation2 + $0x99] sm:$0xff] %vm3646_vm1, %v3573_v24  ;;  %v3575_v23 = vpop.permute.xlu0 %3574 }
 0x57f   : > { %3659 = vst.msk [vmem:[#allocation2 + $0xa9] sm:$0xff] %vm3646_vm1, %v3575_v23 }
 0x581   : > { %v3577_v53 = vpop.permute.xlu1 %3576 }
 0x582   : > { %3660 = vst.msk [vmem:[#allocation2 + $0xb1] sm:$0xff] %vm3646_vm1, %v3577_v53  ;;  %v3579_v0 = vpop.permute.xlu0 %3578 }
 0x583   : > { %3661 = vst.msk [vmem:[#allocation2 + $0xc1] sm:$0xff] %vm3646_vm1, %v3579_v0 }
 0x585   : > { %v3581_v31 = vpop.permute.xlu1 %3580 }
 0x586   : > { %3662 = vst.msk [vmem:[#allocation2 + $0xc9] sm:$0xff] %vm3646_vm1, %v3581_v31  ;;  %v3583_v29 = vpop.permute.xlu0 %3582 }
 0x587   : > { %3663 = vst.msk [vmem:[#allocation2 + $0xd9] sm:$0xff] %vm3646_vm1, %v3583_v29 }
 0x589   : > { %v3585_v62 = vpop.permute.xlu1 %3584 }
 0x58a   : > { %3664 = vst.msk [vmem:[#allocation2 + $0xe1] sm:$0xff] %vm3646_vm1, %v3585_v62  ;;  %v3587_v43 = vpop.permute.xlu0 %3586 }
 0x58b   : > { %3665 = vst.msk [vmem:[#allocation2 + $0xf1] sm:$0xff] %vm3646_vm1, %v3587_v43 }
 0x58d   : > { %v3589_v2 = vpop.permute.xlu1 %3588 }
 0x58e   : > { %3666 = vst.msk [vmem:[#allocation2 + $0xf9] sm:$0xff] %vm3646_vm1, %v3589_v2  ;;  %v3591_v11 = vpop.permute.xlu0 %3590 }
 0x58f   : > { %3667 = vst.msk [vmem:[#allocation2 + $0x109] sm:$0xff] %vm3646_vm1, %v3591_v11 }
 0x591   : > { %v3593_v36 = vpop.permute.xlu1 %3592 }
 0x592   : > { %3668 = vst.msk [vmem:[#allocation2 + $0x111] sm:$0xff] %vm3646_vm1, %v3593_v36  ;;  %v3595_v14 = vpop.permute.xlu0 %3594 }
 0x593   : > { %3669 = vst.msk [vmem:[#allocation2 + $0x121] sm:$0xff] %vm3646_vm1, %v3595_v14 }
 0x595   : > { %v3597_v10 = vpop.permute.xlu1 %3596 }
 0x596   : > { %3670 = vst.msk [vmem:[#allocation2 + $0x129] sm:$0xff] %vm3646_vm1, %v3597_v10  ;;  %v3599_v35 = vpop.permute.xlu0 %3598 }
 0x597   : > { %3671 = vst.msk [vmem:[#allocation2 + $0x139] sm:$0xff] %vm3646_vm1, %v3599_v35 }
 0x599   : > { %v3601_v16 = vpop.permute.xlu1 %3600 }
 0x59a   : > { %3672 = vst.msk [vmem:[#allocation2 + $0x141] sm:$0xff] %vm3646_vm1, %v3601_v16  ;;  %v3603_v32 = vpop.permute.xlu0 %3602 }
 0x59b   : > { %3673 = vst.msk [vmem:[#allocation2 + $0x151] sm:$0xff] %vm3646_vm1, %v3603_v32 }
 0x59d   : > { %v3605_v1 = vpop.permute.xlu1 %3604 }
 0x59e   : > { %3674 = vst.msk [vmem:[#allocation2 + $0x159] sm:$0xff] %vm3646_vm1, %v3605_v1  ;;  %v3607_v22 = vpop.permute.xlu0 %3606 }
 0x59f   : > { %3675 = vst.msk [vmem:[#allocation2 + $0x169] sm:$0xff] %vm3646_vm1, %v3607_v22 }
 0x5a1   : > { %v3609_v15 = vpop.permute.xlu1 %3608 }
 0x5a2   : > { %3676 = vst.msk [vmem:[#allocation2 + $0x171] sm:$0xff] %vm3646_vm1, %v3609_v15  ;;  %v3611_v18 = vpop.permute.xlu0 %3610 }
 0x5a3   : > { %3677 = vst.msk [vmem:[#allocation2 + $0x181] sm:$0xff] %vm3646_vm1, %v3611_v18 }
 0x5a5   : > { %v3613_v9 = vpop.permute.xlu1 %3612 }
 0x5a6   : > { %3678 = vst.msk [vmem:[#allocation2 + $0x189] sm:$0xff] %vm3646_vm1, %v3613_v9  ;;  %v3680_v61 = vpop.permute.xlu0 %3679 }
 0x5a7   : > { %3775 = vst.msk [vmem:[%s4461_s29] sm:$0xff] %vm3485_vm0, %v3680_v61 }
 0x5a9   : > { %v3682_v56 = vpop.permute.xlu1 %3681 }
 0x5aa   : > { %3776 = vst.msk [vmem:[%s4461_s29 + $0x8] sm:$0xff] %vm3485_vm0, %v3682_v56  ;;  %v3684_v20 = vpop.permute.xlu0 %3683 }
 0x5ab   : > { %3777 = vst.msk [vmem:[%s4461_s29 + $0x10] sm:$0xff] %vm3485_vm0, %v3684_v20 }
 0x5ad   : > { %v3686_v54 = vpop.permute.xlu1 %3685 }
 0x5ae   : > { %3778 = vst.msk [vmem:[%s4461_s29 + $0x18] sm:$0xff] %vm3485_vm0, %v3686_v54  ;;  %v3688_v60 = vpop.permute.xlu0 %3687 }
 0x5af   : > { %3779 = vst.msk [vmem:[%s4461_s29 + $0x20] sm:$0xff] %vm3485_vm0, %v3688_v60 }
 0x5b1   : > { %v3690_v45 = vpop.permute.xlu1 %3689 }
 0x5b2   : > { %3780 = vst.msk [vmem:[%s4461_s29 + $0x28] sm:$0xff] %vm3485_vm0, %v3690_v45  ;;  %v3692_v46 = vpop.permute.xlu0 %3691 }
 0x5b3   : > { %3781 = vst.msk [vmem:[%s4461_s29 + $0x30] sm:$0xff] %vm3485_vm0, %v3692_v46 }
 0x5b5   : > { %v3694_v44 = vpop.permute.xlu1 %3693 }
 0x5b6   : > { %3782 = vst.msk [vmem:[%s4461_s29 + $0x38] sm:$0xff] %vm3485_vm0, %v3694_v44  ;;  %v3696_v7 = vpop.permute.xlu0 %3695 }
 0x5b7   : > { %3783 = vst.msk [vmem:[%s4461_s29 + $0x40] sm:$0xff] %vm3485_vm0, %v3696_v7 }
 0x5b9   : > { %v3698_v13 = vpop.permute.xlu1 %3697 }
 0x5ba   : > { %3784 = vst.msk [vmem:[%s4461_s29 + $0x48] sm:$0xff] %vm3485_vm0, %v3698_v13  ;;  %v3700_v4 = vpop.permute.xlu0 %3699 }
 0x5bb   : > { %3785 = vst.msk [vmem:[%s4461_s29 + $0x50] sm:$0xff] %vm3485_vm0, %v3700_v4 }
 0x5bd   : > { %v3702_v19 = vpop.permute.xlu1 %3701 }
 0x5be   : > { %3786 = vst.msk [vmem:[%s4461_s29 + $0x58] sm:$0xff] %vm3485_vm0, %v3702_v19  ;;  %v3704_v30 = vpop.permute.xlu0 %3703 }
 0x5bf   : > { %3787 = vst.msk [vmem:[%s4461_s29 + $0x60] sm:$0xff] %vm3485_vm0, %v3704_v30 }
 0x5c1   : > { %v3706_v6 = vpop.permute.xlu1 %3705 }
 0x5c2   : > { %3788 = vst.msk [vmem:[%s4461_s29 + $0x68] sm:$0xff] %vm3485_vm0, %v3706_v6  ;;  %v3708_v38 = vpop.permute.xlu0 %3707 }
 0x5c3   : > { %3789 = vst.msk [vmem:[%s4461_s29 + $0x70] sm:$0xff] %vm3485_vm0, %v3708_v38 }
 0x5c5   : > { %v3710_v28 = vpop.permute.xlu1 %3709 }
 0x5c6   : > { %3790 = vst.msk [vmem:[%s4461_s29 + $0x78] sm:$0xff] %vm3485_vm0, %v3710_v28  ;;  %v3712_v39 = vpop.permute.xlu0 %3711 }
 0x5c7   : > { %3791 = vst.msk [vmem:[%s4461_s29 + $0x80] sm:$0xff] %vm3485_vm0, %v3712_v39 }
 0x5c9   : > { %v3714_v57 = vpop.permute.xlu1 %3713 }
 0x5ca   : > { %3792 = vst.msk [vmem:[%s4461_s29 + $0x88] sm:$0xff] %vm3485_vm0, %v3714_v57  ;;  %v3716_v55 = vpop.permute.xlu0 %3715 }
 0x5cb   : > { %3793 = vst.msk [vmem:[%s4461_s29 + $0x90] sm:$0xff] %vm3485_vm0, %v3716_v55 }
 0x5cd   : > { %v3718_v58 = vpop.permute.xlu1 %3717 }
 0x5ce   : > { %3794 = vst.msk [vmem:[%s4461_s29 + $0x98] sm:$0xff] %vm3485_vm0, %v3718_v58  ;;  %v3720_v59 = vpop.permute.xlu0 %3719 }
 0x5cf   : > { %3795 = vst.msk [vmem:[%s4461_s29 + $0xa0] sm:$0xff] %vm3485_vm0, %v3720_v59 }
 0x5d1   : > { %v3722_v51 = vpop.permute.xlu1 %3721 }
 0x5d2   : > { %3796 = vst.msk [vmem:[%s4461_s29 + $0xa8] sm:$0xff] %vm3485_vm0, %v3722_v51  ;;  %v3724_v42 = vpop.permute.xlu0 %3723 }
 0x5d3   : > { %3797 = vst.msk [vmem:[%s4461_s29 + $0xb0] sm:$0xff] %vm3485_vm0, %v3724_v42 }
 0x5d5   : > { %v3726_v26 = vpop.permute.xlu1 %3725 }
 0x5d6   : > { %3798 = vst.msk [vmem:[%s4461_s29 + $0xb8] sm:$0xff] %vm3485_vm0, %v3726_v26  ;;  %v3728_v27 = vpop.permute.xlu0 %3727 }
 0x5d7   : > { %3799 = vst.msk [vmem:[%s4461_s29 + $0xc0] sm:$0xff] %vm3485_vm0, %v3728_v27 }
 0x5d9   : > { %v3730_v8 = vpop.permute.xlu1 %3729 }
 0x5da   : > { %3800 = vst.msk [vmem:[%s4461_s29 + $0xc8] sm:$0xff] %vm3485_vm0, %v3730_v8  ;;  %v3732_v17 = vpop.permute.xlu0 %3731 }
 0x5db   : > { %3801 = vst.msk [vmem:[%s4461_s29 + $0xd0] sm:$0xff] %vm3485_vm0, %v3732_v17 }
 0x5dd   : > { %v3734_v21 = vpop.permute.xlu1 %3733 }
 0x5de   : > { %3802 = vst.msk [vmem:[%s4461_s29 + $0xd8] sm:$0xff] %vm3485_vm0, %v3734_v21  ;;  %v3736_v3 = vpop.permute.xlu0 %3735 }
 0x5df   : > { %3803 = vst.msk [vmem:[%s4461_s29 + $0xe0] sm:$0xff] %vm3485_vm0, %v3736_v3 }
 0x5e1   : > { %v3738_v50 = vpop.permute.xlu1 %3737 }
 0x5e2   : > { %3804 = vst.msk [vmem:[%s4461_s29 + $0xe8] sm:$0xff] %vm3485_vm0, %v3738_v50  ;;  %v3740_v52 = vpop.permute.xlu0 %3739 }
 0x5e3   : > { %3805 = vst.msk [vmem:[%s4461_s29 + $0xf0] sm:$0xff] %vm3485_vm0, %v3740_v52 }
 0x5e5   : > { %v3742_v25 = vpop.permute.xlu1 %3741 }
 0x5e6   : > { %3806 = vst.msk [vmem:[%s4461_s29 + $0xf8] sm:$0xff] %vm3485_vm0, %v3742_v25 }
 0x5e7 PF: > { %s13_s16 = sadd.s32 1, %s4387_s16   ;;  %s7015_s12 = smov %s4379_s14 }
 0x5e8   : > { %p10_p8 = scmp.ge.s32.totalorder %s13_s16, 18   ;;  %s7016_s13 = smov %s4383_s15 }
 0x5e9   : > { %s7017_s14 = smov %s7020_s17  ;;  %s7018_s15 = smov %s7024_s18 }
 0x5ea   :  { %12 = sbr.rel (!%p10_p8) target bundleno = 3 (0x3), region = 68 }

// kernel: convlstm_encoder_forward.3
= control target key start
LH: loop header
LB: loop body
LE: loop exit
PB: predicated region body
PF: predicated region fallthrough
CT: control target
= control target key end

     0   :  { %s4722_s12 = smov 0   ;;  %s4724_s13 = smov 0   ;;  %s7152_s0 = inlined_call_operand.vmem [shape: f32[8,2,16,16,16], index: 0, kind: input, shape index: {}]   ;;  %s7153_s1 = inlined_call_operand.vmem [shape: f32[432,128], index: 1, kind: input, shape index: {}]   ;;  %s7154_s2 = inlined_call_operand.vmem [shape: f32[1,128], index: 2, kind: input, shape index: {}]   ;;  %s7155_s3 = inlined_call_operand.vmem [shape: f32[8,2,16,16,32], index: 3, kind: output, shape index: {}]  }
   0x1   :  { %s4726_s14 = smov 0   ;;  %s4728_s15 = smov 0  }
   0x2   :  { %s4730_s16 = smov 0  }
   0x3 LB: > { %s22_s17 = sadd.s32 1, %s4683_s14  ;;  %s25_s18 = sadd.s32 1, %s4687_s15  ;;  %s4691_s16 = sphi %s4730_s16, %s13_s16   ;;  %s4687_s15 = sphi %s4728_s15, %s7192_s15   ;;  %s4683_s14 = sphi %s4726_s14, %s7191_s14   ;;  %s4679_s13 = sphi %s4724_s13, %s7190_s13   ;;  %s4675_s12 = sphi %s4722_s12, %s7189_s12  }
   0x4   : > { %p23_p0 = scmp.ge.s32.totalorder %s22_s17, 8  ;;  %p4123_p1 = scmp.ge.s32.totalorder %s4691_s16, 1 }
   0x5   : > { %p157_p2 = scmp.lt.s32.totalorder %s4691_s16, 17 }
   0x6   : > { %s7194_s17 = smov (%p23_p0, %s22_s17), 0  ;;  %s7196_s18 = smov (!%p23_p0, %s25_s18), %s4687_s15 }
   0x7   : > { %p158_p3 = pnand %p4123_p1, %p157_p2  ;;  %p27_p4 = scmp.ge.s32.totalorder %s7196_s18, 2 }
   0x9   : > { %s7198_s18 = smov (%p27_p4, %s7196_s18), 0  ;;  %161 = sbr.rel (%p158_p3) target bundleno = 1393 (0x571), region = 32 }
  0x10   : > { %p189_p5 = scmp.lt.s32.totalorder %s4675_s12, 7  ;;  %p191_p6 = scmp.lt.s32.totalorder %s4679_s13, 1 }
  0x11   : > { %p4130_p7 = scmp.ne.s32.totalorder %s4675_s12, 0 }
  0x12   : > { %s190_s19 = scalar_select %p189_p5, %s4675_s12, 7 }
  0x13   : > { %s7200_s13 = smov (!%p191_p6, %s4679_s13), 1  ;;  %210 = sbr.rel (%p4130_p7) target bundleno = 64 (0x40), region = 36 }
  0x14   : > { %s4125_s20 = sshll.u32 %s190_s19, 6  ;;  %s4124_s21 = sshll.u32 %s7200_s13, 5  ;;  %vm211_vm0 = vcmask (!%p4130_p7), 392192   ;;  %vm214_vm1 = vcmask (!%p4130_p7), 386048   ;;  %vm267_vm2 = vcmask (!%p4130_p7), 261120   ;;  %v4693_v0 = vmov (!%p4130_p7), 0.0  }
  0x15   : > { %s195_s22 = sadd.s32 %s4125_s20, %s4124_s21  ;;  %212 = vst.msk [vmem:[#allocation2] sm:$0xff] (!%p4130_p7), %vm211_vm0, %v4693_v0  ;;  %213 = vst.msk [vmem:[#allocation2 + $0x8] sm:$0xff] (!%p4130_p7), %vm211_vm0, %v4693_v0 }
  0x16   : > { %s4126_s23 = sshll.u32 %s195_s22, 3  ;;  %216 = vst.msk [vmem:[#allocation2 + $0x18] sm:$0xff] (!%p4130_p7), %vm211_vm0, %v4693_v0  ;;  %217 = vst.msk [vmem:[#allocation2 + $0x20] sm:$0xff] (!%p4130_p7), %vm211_vm0, %v4693_v0 }
  0x17   : > { %s4755_s26 = scalar_lea.vmem %s7152_s0, %s4126_s23  ;;  %s4760_s29 = scalar_lea.vmem %s7155_s3, %s4126_s23  ;;  %219 = vst.msk [vmem:[#allocation2 + $0x30] sm:$0xff] (!%p4130_p7), %vm211_vm0, %v4693_v0  ;;  %220 = vst.msk [vmem:[#allocation2 + $0x38] sm:$0xff] (!%p4130_p7), %vm211_vm0, %v4693_v0 }
  0x18   : > { %222 = vst.msk [vmem:[#allocation2 + $0x48] sm:$0xff] (!%p4130_p7), %vm211_vm0, %v4693_v0  ;;  %223 = vst.msk [vmem:[#allocation2 + $0x50] sm:$0xff] (!%p4130_p7), %vm211_vm0, %v4693_v0 }
  0x19   : > { %225 = vst.msk [vmem:[#allocation2 + $0x60] sm:$0xff] (!%p4130_p7), %vm211_vm0, %v4693_v0  ;;  %226 = vst.msk [vmem:[#allocation2 + $0x68] sm:$0xff] (!%p4130_p7), %vm211_vm0, %v4693_v0 }
  0x1a   : > { %228 = vst.msk [vmem:[#allocation2 + $0x78] sm:$0xff] %vm211_vm0, %v4693_v0  ;;  %229 = vst.msk [vmem:[#allocation2 + $0x80] sm:$0xff] %vm211_vm0, %v4693_v0 }
  0x1b   : > { %231 = vst.msk [vmem:[#allocation2 + $0x90] sm:$0xff] %vm211_vm0, %v4693_v0  ;;  %232 = vst.msk [vmem:[#allocation2 + $0x98] sm:$0xff] %vm211_vm0, %v4693_v0 }
  0x1c   : > { %234 = vst.msk [vmem:[#allocation2 + $0xa8] sm:$0xff] %vm211_vm0, %v4693_v0  ;;  %235 = vst.msk [vmem:[#allocation2 + $0xb0] sm:$0xff] %vm211_vm0, %v4693_v0 }
  0x1d   : > { %237 = vst.msk [vmem:[#allocation2 + $0xc0] sm:$0xff] %vm211_vm0, %v4693_v0  ;;  %238 = vst.msk [vmem:[#allocation2 + $0xc8] sm:$0xff] %vm211_vm0, %v4693_v0 }
  0x1e   : > { %240 = vst.msk [vmem:[#allocation2 + $0xd8] sm:$0xff] %vm211_vm0, %v4693_v0  ;;  %241 = vst.msk [vmem:[#allocation2 + $0xe0] sm:$0xff] %vm211_vm0, %v4693_v0 }
  0x1f   : > { %243 = vst.msk [vmem:[#allocation2 + $0xf0] sm:$0xff] %vm211_vm0, %v4693_v0  ;;  %244 = vst.msk [vmem:[#allocation2 + $0xf8] sm:$0xff] %vm211_vm0, %v4693_v0 }
  0x20   : > { %246 = vst.msk [vmem:[#allocation2 + $0x108] sm:$0xff] %vm211_vm0, %v4693_v0  ;;  %247 = vst.msk [vmem:[#allocation2 + $0x110] sm:$0xff] %vm211_vm0, %v4693_v0 }
  0x21   : > { %249 = vst.msk [vmem:[#allocation2 + $0x120] sm:$0xff] %vm211_vm0, %v4693_v0  ;;  %250 = vst.msk [vmem:[#allocation2 + $0x128] sm:$0xff] %vm211_vm0, %v4693_v0 }
  0x22   : > { %252 = vst.msk [vmem:[#allocation2 + $0x138] sm:$0xff] %vm211_vm0, %v4693_v0  ;;  %253 = vst.msk [vmem:[#allocation2 + $0x140] sm:$0xff] %vm211_vm0, %v4693_v0 }
  0x23   : > { %255 = vst.msk [vmem:[#allocation2 + $0x150] sm:$0xff] %vm211_vm0, %v4693_v0  ;;  %256 = vst.msk [vmem:[#allocation2 + $0x158] sm:$0xff] %vm211_vm0, %v4693_v0 }
  0x24   : > { %258 = vst.msk [vmem:[#allocation2 + $0x168] sm:$0xff] %vm211_vm0, %v4693_v0  ;;  %259 = vst.msk [vmem:[#allocation2 + $0x170] sm:$0xff] %vm211_vm0, %v4693_v0 }
  0x25   : > { %261 = vst.msk [vmem:[#allocation2 + $0x180] sm:$0xff] %vm211_vm0, %v4693_v0  ;;  %262 = vst.msk [vmem:[#allocation2 + $0x188] sm:$0xff] %vm211_vm0, %v4693_v0 }
  0x26   : > { %264 = vst.msk [vmem:[#allocation2 + $0x198] sm:$0xff] %vm211_vm0, %v4693_v0  ;;  %265 = vst.msk [vmem:[#allocation2 + $0x1a0] sm:$0xff] %vm211_vm0, %v4693_v0 }
  0x27   : > { %215 = vst.msk [vmem:[#allocation2 + $0x10] sm:$0x3] %vm214_vm1, %v4693_v0  ;;  %218 = vst.msk [vmem:[#allocation2 + $0x28] sm:$0x3] %vm214_vm1, %v4693_v0 }
  0x28   : > { %221 = vst.msk [vmem:[#allocation2 + $0x40] sm:$0x3] %vm214_vm1, %v4693_v0  ;;  %224 = vst.msk [vmem:[#allocation2 + $0x58] sm:$0x3] %vm214_vm1, %v4693_v0 }
  0x29   : > { %227 = vst.msk [vmem:[#allocation2 + $0x70] sm:$0x3] %vm214_vm1, %v4693_v0  ;;  %230 = vst.msk [vmem:[#allocation2 + $0x88] sm:$0x3] %vm214_vm1, %v4693_v0 }
  0x2a   : > { %233 = vst.msk [vmem:[#allocation2 + $0xa0] sm:$0x3] %vm214_vm1, %v4693_v0  ;;  %236 = vst.msk [vmem:[#allocation2 + $0xb8] sm:$0x3] %vm214_vm1, %v4693_v0 }
  0x2b   : > { %239 = vst.msk [vmem:[#allocation2 + $0xd0] sm:$0x3] %vm214_vm1, %v4693_v0  ;;  %242 = vst.msk [vmem:[#allocation2 + $0xe8] sm:$0x3] %vm214_vm1, %v4693_v0 }
  0x2c   : > { %245 = vst.msk [vmem:[#allocation2 + $0x100] sm:$0x3] %vm214_vm1, %v4693_v0  ;;  %248 = vst.msk [vmem:[#allocation2 + $0x118] sm:$0x3] %vm214_vm1, %v4693_v0 }
  0x2d   : > { %251 = vst.msk [vmem:[#allocation2 + $0x130] sm:$0x3] %vm214_vm1, %v4693_v0  ;;  %254 = vst.msk [vmem:[#allocation2 + $0x148] sm:$0x3] %vm214_vm1, %v4693_v0 }
  0x2e   : > { %257 = vst.msk [vmem:[#allocation2 + $0x160] sm:$0x3] %vm214_vm1, %v4693_v0  ;;  %260 = vst.msk [vmem:[#allocation2 + $0x178] sm:$0x3] %vm214_vm1, %v4693_v0 }
  0x2f   : > { %263 = vst.msk [vmem:[#allocation2 + $0x190] sm:$0x3] %vm214_vm1, %v4693_v0  ;;  %266 = vst.msk [vmem:[#allocation2 + $0x1a8] sm:$0x3] %vm214_vm1, %v4693_v0 }
  0x30   : > { %268 = vst.msk [vmem:[#allocation3] sm:$0xff] %vm267_vm2, %v4693_v0  ;;  %269 = vst.msk [vmem:[#allocation3 + $0x8] sm:$0xff] %vm267_vm2, %v4693_v0 }
  0x31   : > { %270 = vst.msk [vmem:[#allocation3 + $0x10] sm:$0xff] %vm267_vm2, %v4693_v0  ;;  %271 = vst.msk [vmem:[#allocation3 + $0x18] sm:$0xff] %vm267_vm2, %v4693_v0 }
  0x32   : > { %272 = vst.msk [vmem:[#allocation3 + $0x20] sm:$0xff] %vm267_vm2, %v4693_v0  ;;  %273 = vst.msk [vmem:[#allocation3 + $0x28] sm:$0xff] %vm267_vm2, %v4693_v0 }
  0x33   : > { %274 = vst.msk [vmem:[#allocation3 + $0x30] sm:$0xff] %vm267_vm2, %v4693_v0  ;;  %275 = vst.msk [vmem:[#allocation3 + $0x38] sm:$0xff] %vm267_vm2, %v4693_v0 }
  0x34   : > { %276 = vst.msk [vmem:[#allocation3 + $0x40] sm:$0xff] %vm267_vm2, %v4693_v0  ;;  %277 = vst.msk [vmem:[#allocation3 + $0x48] sm:$0xff] %vm267_vm2, %v4693_v0 }
  0x35   : > { %278 = vst.msk [vmem:[#allocation3 + $0x50] sm:$0xff] %vm267_vm2, %v4693_v0  ;;  %279 = vst.msk [vmem:[#allocation3 + $0x58] sm:$0xff] %vm267_vm2, %v4693_v0 }
  0x36   : > { %280 = vst.msk [vmem:[#allocation3 + $0x60] sm:$0xff] %vm267_vm2, %v4693_v0  ;;  %281 = vst.msk [vmem:[#allocation3 + $0x68] sm:$0xff] %vm267_vm2, %v4693_v0 }
  0x37   : > { %282 = vst.msk [vmem:[#allocation3 + $0x70] sm:$0xff] %vm267_vm2, %v4693_v0  ;;  %283 = vst.msk [vmem:[#allocation3 + $0x78] sm:$0xff] %vm267_vm2, %v4693_v0 }
  0x38   : > { %284 = vst.msk [vmem:[#allocation3 + $0x80] sm:$0xff] %vm267_vm2, %v4693_v0  ;;  %285 = vst.msk [vmem:[#allocation3 + $0x88] sm:$0xff] %vm267_vm2, %v4693_v0 }
  0x39   : > { %286 = vst.msk [vmem:[#allocation3 + $0x90] sm:$0xff] %vm267_vm2, %v4693_v0  ;;  %287 = vst.msk [vmem:[#allocation3 + $0x98] sm:$0xff] %vm267_vm2, %v4693_v0 }
  0x3a   : > { %288 = vst.msk [vmem:[#allocation3 + $0xa0] sm:$0xff] %vm267_vm2, %v4693_v0  ;;  %289 = vst.msk [vmem:[#allocation3 + $0xa8] sm:$0xff] %vm267_vm2, %v4693_v0 }
  0x3b   : > { %290 = vst.msk [vmem:[#allocation3 + $0xb0] sm:$0xff] %vm267_vm2, %v4693_v0  ;;  %291 = vst.msk [vmem:[#allocation3 + $0xb8] sm:$0xff] %vm267_vm2, %v4693_v0 }
  0x3c   : > { %292 = vst.msk [vmem:[#allocation3 + $0xc0] sm:$0xff] %vm267_vm2, %v4693_v0  ;;  %293 = vst.msk [vmem:[#allocation3 + $0xc8] sm:$0xff] %vm267_vm2, %v4693_v0 }
  0x3d   : > { %294 = vst.msk [vmem:[#allocation3 + $0xd0] sm:$0xff] %vm267_vm2, %v4693_v0  ;;  %295 = vst.msk [vmem:[#allocation3 + $0xd8] sm:$0xff] %vm267_vm2, %v4693_v0 }
  0x3e   : > { %296 = vst.msk [vmem:[#allocation3 + $0xe0] sm:$0xff] %vm267_vm2, %v4693_v0  ;;  %297 = vst.msk [vmem:[#allocation3 + $0xe8] sm:$0xff] %vm267_vm2, %v4693_v0 }
  0x3f   : > { %298 = vst.msk [vmem:[#allocation3 + $0xf0] sm:$0xff] %vm267_vm2, %v4693_v0  ;;  %299 = vst.msk [vmem:[#allocation3 + $0xf8] sm:$0xff] %vm267_vm2, %v4693_v0 }
  0x40 PF: > { %v300_v3 = vld [vmem:[%s4755_s26] sm:$0xff]  ;;  %vm333_vm3 = vcmask 130048   ;;  %s4694_s30 = smov 48   ;;  %v302_v4 = vld [vmem:[%s4755_s26 + $0x10] sm:$0xff]  ;;  %v301_v5 = vld [vmem:[%s4755_s26 + $0x8] sm:$0xff]  ;;  %vm398_vm4 = vcmask 392192  }
  0x41   : > { %334 = vst.msk [vmem:[#allocation2 + $0x19] sm:$0xff] %vm333_vm3, %v300_v3  ;;  %v304_v6 = vld [vmem:[%s4755_s26 + $0x20] sm:$0xff]  ;;  %336 = vst.msk [vmem:[#allocation2 + $0x31] sm:$0xff] %vm333_vm3, %v302_v4  ;;  %v303_v7 = vld [vmem:[%s4755_s26 + $0x18] sm:$0xff]  ;;  %s4695_s4 = smov 96   ;;  %vm591_vm5 = vcmask 785792  }
  0x42   : > { %v431_v1 = vld [vmem:[#allocation2 + $0x1] sm:$0xff]  ;;  %v432_v2 = vld [vmem:[#allocation2 + $0x9] sm:$0xff]  ;;  %335 = vst.msk [vmem:[#allocation2 + $0x21] sm:$0xff] %vm333_vm3, %v301_v5  ;;  %338 = vst.msk [vmem:[#allocation2 + $0x49] sm:$0xff] %vm333_vm3, %v304_v6  ;;  %s4696_s5 = smov 16   ;;  %vm784_vm6 = vcmask 1048320  }
  0x43   : > { %495 = vrot.lane.b32.xlu0 %v431_v1, %s4694_s30  ;;  %v306_v8 = vld [vmem:[%s4755_s26 + $0x30] sm:$0xff]  ;;  %v305_v9 = vld [vmem:[%s4755_s26 + $0x28] sm:$0xff]  ;;  %337 = vst.msk [vmem:[#allocation2 + $0x39] sm:$0xff] %vm333_vm3, %v303_v7  ;;  %v308_v10 = vld [vmem:[%s4755_s26 + $0x40] sm:$0xff]  ;;  %s4698_s24 = smov 64   ;;  %s4699_s25 = smov 32  }
  0x44   : > { %340 = vst.msk [vmem:[#allocation2 + $0x61] sm:$0xff] %vm333_vm3, %v306_v8  ;;  %339 = vst.msk [vmem:[#allocation2 + $0x51] sm:$0xff] %vm333_vm3, %v305_v9  ;;  %v307_v11 = vld [vmem:[%s4755_s26 + $0x38] sm:$0xff]  ;;  %v310_v12 = vld [vmem:[%s4755_s26 + $0x50] sm:$0xff]  ;;  %s4701_s27 = smov 80   ;;  %vm1009_vm7 = vcmask 523392  }
  0x45   : > { %342 = vst.msk [vmem:[#allocation2 + $0x79] sm:$0xff] %vm333_vm3, %v308_v10  ;;  %341 = vst.msk [vmem:[#allocation2 + $0x69] sm:$0xff] %vm333_vm3, %v307_v11  ;;  %v309_v13 = vld [vmem:[%s4755_s26 + $0x48] sm:$0xff]  ;;  %v312_v14 = vld [vmem:[%s4755_s26 + $0x60] sm:$0xff]  ;;  %vm1202_vm8 = vcmask 916992   ;;  %vm1395_vm9 = vcmask 1048448  }
  0x46   : > { %344 = vst.msk [vmem:[#allocation2 + $0x91] sm:$0xff] %vm333_vm3, %v310_v12  ;;  %v311_v15 = vld [vmem:[%s4755_s26 + $0x58] sm:$0xff]  ;;  %343 = vst.msk [vmem:[#allocation2 + $0x81] sm:$0xff] %vm333_vm3, %v309_v13  ;;  %v314_v16 = vld [vmem:[%s4755_s26 + $0x70] sm:$0xff]  ;;  %vm1397_vm10 = vcmask 261120   ;;  %vm1622_vm11 = vcmask 654592  }
  0x47   : > { %497 = vrot.lane.b32.xlu0 %v432_v2, %s4694_s30  ;;  %346 = vst.msk [vmem:[#allocation2 + $0xa9] sm:$0xff] %vm333_vm3, %v312_v14  ;;  %345 = vst.msk [vmem:[#allocation2 + $0x99] sm:$0xff] %vm333_vm3, %v311_v15  ;;  %v313_v17 = vld [vmem:[%s4755_s26 + $0x68] sm:$0xff]  ;;  %v316_v18 = vld [vmem:[%s4755_s26 + $0x80] sm:$0xff]  ;;  %vm1815_vm12 = vcmask 1048192   ;;  %vm3863_vm13 = vcmask 392320  }
  0x48   : > { %348 = vst.msk [vmem:[#allocation2 + $0xc1] sm:$0xff] %vm333_vm3, %v314_v16  ;;  %347 = vst.msk [vmem:[#allocation2 + $0xb1] sm:$0xff] %vm333_vm3, %v313_v17  ;;  %v315_v19 = vld [vmem:[%s4755_s26 + $0x78] sm:$0xff]  ;;  %v318_v20 = vld [vmem:[%s4755_s26 + $0x90] sm:$0xff] }
  0x49   : > { %350 = vst.msk [vmem:[#allocation2 + $0xd9] sm:$0xff] %vm333_vm3, %v316_v18  ;;  %v317_v21 = vld [vmem:[%s4755_s26 + $0x88] sm:$0xff]  ;;  %349 = vst.msk [vmem:[#allocation2 + $0xc9] sm:$0xff] %vm333_vm3, %v315_v19  ;;  %v320_v22 = vld [vmem:[%s4755_s26 + $0xa0] sm:$0xff] }
  0x4a   : > { %352 = vst.msk [vmem:[#allocation2 + $0xf1] sm:$0xff] %vm333_vm3, %v318_v20  ;;  %351 = vst.msk [vmem:[#allocation2 + $0xe1] sm:$0xff] %vm333_vm3, %v317_v21  ;;  %v319_v23 = vld [vmem:[%s4755_s26 + $0x98] sm:$0xff]  ;;  %v322_v24 = vld [vmem:[%s4755_s26 + $0xb0] sm:$0xff] }
  0x4b   : > { %v4977_v25 = vld [vmem:[#allocation2 + $0x19] sm:$0xff]  ;;  %354 = vst.msk [vmem:[#allocation2 + $0x109] sm:$0xff] %vm333_vm3, %v320_v22  ;;  %353 = vst.msk [vmem:[#allocation2 + $0xf9] sm:$0xff] %vm333_vm3, %v319_v23  ;;  %v321_v26 = vld [vmem:[%s4755_s26 + $0xa8] sm:$0xff] }
  0x4c   : > { %356 = vst.msk [vmem:[#allocation2 + $0x121] sm:$0xff] %vm333_vm3, %v322_v24  ;;  %v324_v27 = vld [vmem:[%s4755_s26 + $0xc0] sm:$0xff]  ;;  %499 = vrot.lane.b32.xlu1 %v4977_v25, %s4694_s30  ;;  %v4986_v28 = vld [vmem:[#allocation2 + $0x31] sm:$0xff]  ;;  %355 = vst.msk [vmem:[#allocation2 + $0x111] sm:$0xff] %vm333_vm3, %v321_v26 }
  0x4d   : > { %358 = vst.msk [vmem:[#allocation2 + $0x139] sm:$0xff] %vm333_vm3, %v324_v27  ;;  %503 = vrot.lane.b32.xlu0 %v4986_v28, %s4694_s30  ;;  %v4992_v29 = vld [vmem:[#allocation2 + $0x21] sm:$0xff]  ;;  %v4994_v30 = vld [vmem:[#allocation2 + $0x49] sm:$0xff]  ;;  %v5000_v31 = vld [vmem:[#allocation2 + $0x39] sm:$0xff] }
  0x4e   : > { %v5002_v32 = vld [vmem:[#allocation2 + $0x61] sm:$0xff]  ;;  %v323_v33 = vld [vmem:[%s4755_s26 + $0xb8] sm:$0xff]  ;;  %v326_v34 = vld [vmem:[%s4755_s26 + $0xd0] sm:$0xff] }
  0x4f   : > { %357 = vst.msk [vmem:[#allocation2 + $0x129] sm:$0xff] %vm333_vm3, %v323_v33  ;;  %v325_v35 = vld [vmem:[%s4755_s26 + $0xc8] sm:$0xff]  ;;  %v328_v36 = vld [vmem:[%s4755_s26 + $0xe0] sm:$0xff]  ;;  %v5013_v37 = vld [vmem:[#allocation2 + $0x51] sm:$0xff] }
  0x50   : > { %501 = vrot.lane.b32.xlu1 %v4992_v29, %s4694_s30  ;;  %360 = vst.msk [vmem:[#allocation2 + $0x151] sm:$0xff] %vm333_vm3, %v326_v34  ;;  %359 = vst.msk [vmem:[#allocation2 + $0x141] sm:$0xff] %vm333_vm3, %v325_v35  ;;  %v327_v38 = vld [vmem:[%s4755_s26 + $0xd8] sm:$0xff]  ;;  %v329_v39 = vld [vmem:[%s4755_s26 + $0xe8] sm:$0xff] }
  0x51   : > { %507 = vrot.lane.b32.xlu0 %v4994_v30, %s4694_s30  ;;  %362 = vst.msk [vmem:[#allocation2 + $0x169] sm:$0xff] %vm333_vm3, %v328_v36  ;;  %v5020_v40 = vld [vmem:[#allocation2 + $0x79] sm:$0xff]  ;;  %361 = vst.msk [vmem:[#allocation2 + $0x159] sm:$0xff] %vm333_vm3, %v327_v38  ;;  %v5028_v41 = vld [vmem:[#allocation2 + $0x69] sm:$0xff] }
  0x52   : > { %363 = vst.msk [vmem:[#allocation2 + $0x171] sm:$0xff] %vm333_vm3, %v329_v39  ;;  %v5030_v42 = vld [vmem:[#allocation2 + $0x91] sm:$0xff]  ;;  %v5036_v43 = vld [vmem:[#allocation2 + $0x81] sm:$0xff]  ;;  %v5038_v44 = vld [vmem:[#allocation2 + $0xa9] sm:$0xff] }
  0x53   : > { %v366_v45 = vld [vmem:[#allocation2] sm:$0xff]  ;;  %v367_v47 = vld [vmem:[#allocation2 + $0x8] sm:$0xff]  ;;  %v5047_v48 = vld [vmem:[#allocation2 + $0x18] sm:$0xff] }
  0x54   : > { %505 = vrot.lane.b32.xlu1 %v5000_v31, %s4694_s30  ;;  %v5044_v46 = vld [vmem:[#allocation2 + $0x99] sm:$0xff]  ;;  %399 = vst.msk [vmem:[#allocation4] sm:$0xff] %vm398_vm4, %v366_v45  ;;  %v5049_v49 = vld [vmem:[#allocation2 + $0xc1] sm:$0xff]  ;;  %400 = vst.msk [vmem:[#allocation4 + $0x20] sm:$0xff] %vm398_vm4, %v367_v47 }
  0x55   : > { %511 = vrot.lane.b32.xlu0 %v5002_v32, %s4694_s30  ;;  %401 = vst.msk [vmem:[#allocation4 + $0x40] sm:$0xff] %vm398_vm4, %v5047_v48  ;;  %v5054_v50 = vld [vmem:[#allocation2 + $0x30] sm:$0xff]  ;;  %v5056_v51 = vld [vmem:[#allocation2 + $0x20] sm:$0xff]  ;;  %v5064_v53 = vld [vmem:[#allocation2 + $0x48] sm:$0xff] }
  0x56   : > { %v5058_v52 = vld [vmem:[#allocation2 + $0xb1] sm:$0xff]  ;;  %403 = vst.msk [vmem:[#allocation4 + $0x80] sm:$0xff] %vm398_vm4, %v5054_v50  ;;  %402 = vst.msk [vmem:[#allocation4 + $0x60] sm:$0xff] %vm398_vm4, %v5056_v51  ;;  %v5068_v54 = vld [vmem:[#allocation2 + $0xd9] sm:$0xff] }
  0x57   : > { %405 = vst.msk [vmem:[#allocation4 + $0xc0] sm:$0xff] %vm398_vm4, %v5064_v53  ;;  %v5072_v55 = vld [vmem:[#allocation2 + $0x38] sm:$0xff]  ;;  %v5074_v56 = vld [vmem:[#allocation2 + $0x60] sm:$0xff]  ;;  %v5082_v57 = vld [vmem:[#allocation2 + $0x50] sm:$0xff] }
  0x58   : > { %509 = vrot.lane.b32.xlu1 %v5013_v37, %s4694_s30  ;;  %404 = vst.msk [vmem:[#allocation4 + $0xa0] sm:$0xff] %vm398_vm4, %v5072_v55  ;;  %407 = vst.msk [vmem:[#allocation4 + $0x100] sm:$0xff] %vm398_vm4, %v5074_v56  ;;  %v5084_v58 = vld [vmem:[#allocation2 + $0x78] sm:$0xff]  ;;  %v5086_v59 = vld [vmem:[#allocation2 + $0x68] sm:$0xff] }
  0x59   : > { %515 = vrot.lane.b32.xlu0 %v5020_v40, %s4694_s30  ;;  %406 = vst.msk [vmem:[#allocation4 + $0xe0] sm:$0xff] %vm398_vm4, %v5082_v57  ;;  %409 = vst.msk [vmem:[#allocation4 + $0x140] sm:$0xff] %vm398_vm4, %v5084_v58  ;;  %v5094_v60 = vld [vmem:[#allocation2 + $0x90] sm:$0xff]  ;;  %v5096_v61 = vld [vmem:[#allocation2 + $0x80] sm:$0xff] }
  0x5a   : > { %408 = vst.msk [vmem:[#allocation4 + $0x120] sm:$0xff] %vm398_vm4, %v5086_v59  ;;  %v5098_v62 = vld [vmem:[#allocation2 + $0xa8] sm:$0xff]  ;;  %411 = vst.msk [vmem:[#allocation4 + $0x180] sm:$0xff] %vm398_vm4, %v5094_v60  ;;  %v5108_v0 = vld [vmem:[#allocation2 + $0x98] sm:$0xff] }
  0x5b   : > { %v5100_v63 = vld [vmem:[#allocation2 + $0xc9] sm:$0xff]  ;;  %410 = vst.msk [vmem:[#allocation4 + $0x160] sm:$0xff] %vm398_vm4, %v5096_v61  ;;  %413 = vst.msk [vmem:[#allocation4 + $0x1c0] sm:$0xff] %vm398_vm4, %v5098_v62  ;;  %v5110_v1 = vld [vmem:[#allocation2 + $0xc0] sm:$0xff] }
  0x5c   : > { %513 = vrot.lane.b32.xlu1 %v5028_v41, %s4694_s30  ;;  %v5112_v2 = vld [vmem:[#allocation2 + $0xb0] sm:$0xff]  ;;  %412 = vst.msk [vmem:[#allocation4 + $0x1a0] sm:$0xff] %vm398_vm4, %v5108_v0  ;;  %415 = vst.msk [vmem:[#allocation4 + $0x200] sm:$0xff] %vm398_vm4, %v5110_v1  ;;  %v5122_v3 = vld [vmem:[#allocation2 + $0xd8] sm:$0xff] }
  0x5d   : > { %519 = vrot.lane.b32.xlu0 %v5030_v42, %s4694_s30  ;;  %414 = vst.msk [vmem:[#allocation4 + $0x1e0] sm:$0xff] %vm398_vm4, %v5112_v2  ;;  %v5124_v4 = vld [vmem:[#allocation2 + $0xc8] sm:$0xff]  ;;  %v5126_v5 = vld [vmem:[#allocation2 + $0xf0] sm:$0xff]  ;;  %417 = vst.msk [vmem:[#allocation4 + $0x240] sm:$0xff] %vm398_vm4, %v5122_v3 }
  0x5e   : > { %416 = vst.msk [vmem:[#allocation4 + $0x220] sm:$0xff] %vm398_vm4, %v5124_v4  ;;  %419 = vst.msk [vmem:[#allocation4 + $0x280] sm:$0xff] %vm398_vm4, %v5126_v5  ;;  %v5136_v6 = vld [vmem:[#allocation2 + $0xe0] sm:$0xff]  ;;  %v5138_v7 = vld [vmem:[#allocation2 + $0x108] sm:$0xff] }
  0x5f   : > { %v5140_v8 = vld [vmem:[#allocation2 + $0xf8] sm:$0xff]  ;;  %418 = vst.msk [vmem:[#allocation4 + $0x260] sm:$0xff] %vm398_vm4, %v5136_v6  ;;  %421 = vst.msk [vmem:[#allocation4 + $0x2c0] sm:$0xff] %vm398_vm4, %v5138_v7  ;;  %v5150_v10 = vld [vmem:[#allocation2 + $0x120] sm:$0xff] }
  0x60   : > { %517 = vrot.lane.b32.xlu1 %v5036_v43, %s4694_s30  ;;  %v5142_v9 = vld [vmem:[#allocation2 + $0xf1] sm:$0xff]  ;;  %420 = vst.msk [vmem:[#allocation4 + $0x2a0] sm:$0xff] %vm398_vm4, %v5140_v8  ;;  %423 = vst.msk [vmem:[#allocation4 + $0x300] sm:$0xff] %vm398_vm4, %v5150_v10  ;;  %v5162_v13 = vld [vmem:[#allocation2 + $0x128] sm:$0xff] }
  0x61   : > { %523 = vrot.lane.b32.xlu0 %v5038_v44, %s4694_s30  ;;  %v5152_v11 = vld [vmem:[#allocation2 + $0x110] sm:$0xff]  ;;  %v5160_v12 = vld [vmem:[#allocation2 + $0x138] sm:$0xff]  ;;  %v5166_v14 = vld [vmem:[#allocation2 + $0xe1] sm:$0xff]  ;;  %424 = vst.msk [vmem:[#allocation4 + $0x320] sm:$0xff] %vm398_vm4, %v5162_v13 }
  0x62   : > { %422 = vst.msk [vmem:[#allocation4 + $0x2e0] sm:$0xff] %vm398_vm4, %v5152_v11  ;;  %425 = vst.msk [vmem:[#allocation4 + $0x340] sm:$0xff] %vm398_vm4, %v5160_v12  ;;  %v453_v15 = vld [vmem:[#allocation2 + $0x109] sm:$0xff]  ;;  %v5176_v17 = vld [vmem:[#allocation2 + $0x140] sm:$0xff] }
  0x63   : > { %v5174_v16 = vld [vmem:[#allocation2 + $0x150] sm:$0xff]  ;;  %v452_v18 = vld [vmem:[#allocation2 + $0xf9] sm:$0xff]  ;;  %426 = vst.msk [vmem:[#allocation4 + $0x360] sm:$0xff] %vm398_vm4, %v5176_v17  ;;  %v455_v19 = vld [vmem:[#allocation2 + $0x121] sm:$0xff] }
  0x64   : > { %521 = vrot.lane.b32.xlu1 %v5044_v46, %s4694_s30  ;;  %427 = vst.msk [vmem:[#allocation4 + $0x380] sm:$0xff] %vm398_vm4, %v5174_v16  ;;  %v5184_v20 = vld [vmem:[#allocation2 + $0x168] sm:$0xff]  ;;  %v5186_v21 = vld [vmem:[#allocation2 + $0x158] sm:$0xff]  ;;  %v5194_v24 = vld [vmem:[#allocation2 + $0x170] sm:$0xff] }
  0x65   : > { %527 = vrot.lane.b32.xlu0 %v5049_v49, %s4694_s30  ;;  %v454_v22 = vld [vmem:[#allocation2 + $0x111] sm:$0xff]  ;;  %429 = vst.msk [vmem:[#allocation4 + $0x3c0] sm:$0xff] %vm398_vm4, %v5184_v20  ;;  %428 = vst.msk [vmem:[#allocation4 + $0x3a0] sm:$0xff] %vm398_vm4, %v5186_v21  ;;  %v457_v23 = vld [vmem:[#allocation2 + $0x139] sm:$0xff] }
  0x66   : > { %v456_v26 = vld [vmem:[#allocation2 + $0x129] sm:$0xff]  ;;  %430 = vst.msk [vmem:[#allocation4 + $0x3e0] sm:$0xff] %vm398_vm4, %v5194_v24  ;;  %v459_v27 = vld [vmem:[#allocation2 + $0x151] sm:$0xff]  ;;  %v458_v34 = vld [vmem:[#allocation2 + $0x141] sm:$0xff] }
  0x67   : > { %v330_v33 = vld [vmem:[%s4755_s26 + $0xf0] sm:$0xff]  ;;  %v331_v36 = vld [vmem:[%s4755_s26 + $0xf8] sm:$0xff]  ;;  %v624_v39 = vld [vmem:[#allocation2 + $0x2] sm:$0xff]  ;;  %s4700_s26 = smov 112  }
  0x68   : > { %525 = vrot.lane.b32.xlu1 %v5058_v52, %s4694_s30  ;;  %364 = vst.msk [vmem:[#allocation2 + $0x181] sm:$0xff] %vm333_vm3, %v330_v33  ;;  %v461_v35 = vld [vmem:[#allocation2 + $0x169] sm:$0xff]  ;;  %365 = vst.msk [vmem:[#allocation2 + $0x189] sm:$0xff] %vm333_vm3, %v331_v36  ;;  %v460_v38 = vld [vmem:[#allocation2 + $0x159] sm:$0xff] }
  0x69   : > { %531 = vrot.lane.b32.xlu0 %v5068_v54, %s4694_s30  ;;  %v462_v45 = vld [vmem:[#allocation2 + $0x171] sm:$0xff]  ;;  %v5209_v47 = vld [vmem:[#allocation2 + $0x1a] sm:$0xff]  ;;  %v635_v36 = vld [vmem:[#allocation2 + $0x82] sm:$0xff] }
  0x6a   : > { %v634_v33 = vld [vmem:[#allocation2 + $0x7a] sm:$0xff] }
  0x6c   : > { %529 = vrot.lane.b32.xlu1 %v5100_v63, %s4694_s30 }
  0x6d   : > { %535 = vrot.lane.b32.xlu0 %v5142_v9, %s4694_s30 }
  0x70   : > { %533 = vrot.lane.b32.xlu1 %v5166_v14, %s4694_s30 }
  0x71   : > { %539 = vrot.lane.b32.xlu0 %v453_v15, %s4694_s30  ;;  %v625_v15 = vld [vmem:[#allocation2 + $0xa] sm:$0xff] }
  0x74   : > { %537 = vrot.lane.b32.xlu1 %v452_v18, %s4694_s30  ;;  %v5214_v18 = vld [vmem:[#allocation2 + $0x32] sm:$0xff] }
  0x75   : > { %543 = vrot.lane.b32.xlu0 %v455_v19, %s4694_s30  ;;  %v5219_v19 = vld [vmem:[#allocation2 + $0x22] sm:$0xff] }
  0x78   : > { %541 = vrot.lane.b32.xlu1 %v454_v22, %s4694_s30  ;;  %v5221_v22 = vld [vmem:[#allocation2 + $0x4a] sm:$0xff] }
  0x79   : > { %547 = vrot.lane.b32.xlu0 %v457_v23, %s4694_s30  ;;  %v5227_v23 = vld [vmem:[#allocation2 + $0x3a] sm:$0xff] }
  0x7c   : > { %545 = vrot.lane.b32.xlu1 %v456_v26, %s4694_s30  ;;  %v5229_v26 = vld [vmem:[#allocation2 + $0x62] sm:$0xff] }
  0x7d   : > { %551 = vrot.lane.b32.xlu0 %v459_v27, %s4694_s30  ;;  %7161 = vst [vmem:[#allocation5_spill] sm:$0xff] %v5229_v26  ;;  %v5235_v27 = vld [vmem:[#allocation2 + $0x52] sm:$0xff] }
  0x7e   : > { %7162 = vst [vmem:[#allocation6_spill] sm:$0xff] %v5235_v27 }
  0x80   : > { %549 = vrot.lane.b32.xlu1 %v458_v34, %s4694_s30  ;;  %v5240_v34 = vld [vmem:[#allocation2 + $0x6a] sm:$0xff] }
  0x81   : > { %555 = vrot.lane.b32.xlu0 %v461_v35, %s4694_s30  ;;  %7163 = vst [vmem:[#allocation7_spill] sm:$0xff] %v5240_v34  ;;  %v636_v35 = vld [vmem:[#allocation2 + $0x92] sm:$0xff] }
  0x84   : > { %553 = vrot.lane.b32.xlu1 %v460_v38, %s4694_s30  ;;  %v638_v38 = vld [vmem:[#allocation2 + $0xaa] sm:$0xff] }
  0x85   : > { %688 = vrot.lane.b32.xlu0 %v624_v39, %s4695_s4  ;;  %v637_v39 = vld [vmem:[#allocation2 + $0x9a] sm:$0xff] }
  0x88   : > { %557 = vrot.lane.b32.xlu1 %v462_v45, %s4694_s30  ;;  %v640_v45 = vld [vmem:[#allocation2 + $0xc2] sm:$0xff] }
  0x89   : > { %692 = vrot.lane.b32.xlu0 %v5209_v47, %s4695_s4 }
  0x8c   : > { %690 = vrot.lane.b32.xlu1 %v625_v15, %s4695_s4  ;;  %v639_v15 = vld [vmem:[#allocation2 + $0xb2] sm:$0xff] }
  0x8d   : > { %696 = vrot.lane.b32.xlu0 %v5214_v18, %s4695_s4 }
  0x90   : > { %694 = vrot.lane.b32.xlu1 %v5219_v19, %s4695_s4 }
  0x91   : > { %700 = vrot.lane.b32.xlu0 %v5221_v22, %s4695_s4 }
  0x94   : > { %698 = vrot.lane.b32.xlu1 %v5227_v23, %s4695_s4 }
  0x95   : > { %704 = vrot.lane.b32.xlu0 %v5229_v26, %s4695_s4  ;;  %v650_v26 = vld [vmem:[#allocation2 + $0x13a] sm:$0xff] }
  0x98   : > { %702 = vrot.lane.b32.xlu1 %v5235_v27, %s4695_s4 }
  0x99   : > { %708 = vrot.lane.b32.xlu0 %v634_v33, %s4695_s4  ;;  %v642_v33 = vld [vmem:[#allocation2 + $0xda] sm:$0xff] }
  0x9c   : > { %706 = vrot.lane.b32.xlu1 %v5240_v34, %s4695_s4  ;;  %v641_v34 = vld [vmem:[#allocation2 + $0xca] sm:$0xff] }
  0x9d   : > { %712 = vrot.lane.b32.xlu0 %v636_v35, %s4695_s4  ;;  %v644_v35 = vld [vmem:[#allocation2 + $0xf2] sm:$0xff] }
  0xa0   : > { %710 = vrot.lane.b32.xlu1 %v635_v36, %s4695_s4  ;;  %v643_v36 = vld [vmem:[#allocation2 + $0xe2] sm:$0xff] }
  0xa1   : > { %716 = vrot.lane.b32.xlu0 %v638_v38, %s4695_s4  ;;  %v646_v38 = vld [vmem:[#allocation2 + $0x10a] sm:$0xff] }
  0xa4   : > { %714 = vrot.lane.b32.xlu1 %v637_v39, %s4695_s4  ;;  %v645_v39 = vld [vmem:[#allocation2 + $0xfa] sm:$0xff] }
  0xa5   : > { %720 = vrot.lane.b32.xlu0 %v640_v45, %s4695_s4  ;;  %v648_v45 = vld [vmem:[#allocation2 + $0x122] sm:$0xff] }
  0xa8   : > { %718 = vrot.lane.b32.xlu1 %v639_v15, %s4695_s4  ;;  %v647_v15 = vld [vmem:[#allocation2 + $0x112] sm:$0xff] }
  0xa9   : > { %724 = vrot.lane.b32.xlu0 %v642_v33, %s4695_s4 }
  0xac   : > { %722 = vrot.lane.b32.xlu1 %v641_v34, %s4695_s4  ;;  %v649_v34 = vld [vmem:[#allocation2 + $0x12a] sm:$0xff] }
  0xad   : > { %728 = vrot.lane.b32.xlu0 %v644_v35, %s4695_s4 }
  0xb0   : > { %726 = vrot.lane.b32.xlu1 %v643_v36, %s4695_s4  ;;  %v652_v36 = vld [vmem:[#allocation2 + $0x152] sm:$0xff] }
  0xb1   : > { %732 = vrot.lane.b32.xlu0 %v646_v38, %s4695_s4  ;;  %v651_v38 = vld [vmem:[#allocation2 + $0x142] sm:$0xff] }
  0xb4   : > { %730 = vrot.lane.b32.xlu1 %v645_v39, %s4695_s4 }
  0xb5   : > { %736 = vrot.lane.b32.xlu0 %v648_v45, %s4695_s4  ;;  %v496_v33 = vpop.permute.xlu0 %495  ;;  %v654_v45 = vld [vmem:[#allocation2 + $0x16a] sm:$0xff] }
  0xb6   : > { %592 = vst.msk [vmem:[#allocation4] sm:$0xff] %vm591_vm5, %v496_v33 }
  0xb8   : > { %734 = vrot.lane.b32.xlu1 %v647_v15, %s4695_s4 }
  0xb9   : > { %740 = vrot.lane.b32.xlu0 %v650_v26, %s4695_s4  ;;  %v498_v35 = vpop.permute.xlu0 %497  ;;  %v653_v26 = vld [vmem:[#allocation2 + $0x15a] sm:$0xff] }
  0xba   : > { %593 = vst.msk [vmem:[#allocation4 + $0x20] sm:$0xff] %vm591_vm5, %v498_v35 }
  0xbc   : > { %738 = vrot.lane.b32.xlu1 %v649_v34, %s4695_s4  ;;  %v655_v34 = vld [vmem:[#allocation2 + $0x172] sm:$0xff] }
  0xbd   : > { %744 = vrot.lane.b32.xlu0 %v652_v36, %s4695_s4 }
  0xbe   : > { %v500_v39 = vpop.permute.xlu1 %499 }
  0xbf   : > { %594 = vst.msk [vmem:[#allocation4 + $0x40] sm:$0xff] %vm591_vm5, %v500_v39  ;;  %v504_v27 = vpop.permute.xlu0 %503 }
  0xc0   : > { %742 = vrot.lane.b32.xlu1 %v651_v38, %s4695_s4  ;;  %596 = vst.msk [vmem:[#allocation4 + $0x80] sm:$0xff] %vm591_vm5, %v504_v27 }
  0xc1   : > { %748 = vrot.lane.b32.xlu0 %v654_v45, %s4695_s4 }
  0xc2   : > { %v502_v15 = vpop.permute.xlu1 %501 }
  0xc3   : > { %595 = vst.msk [vmem:[#allocation4 + $0x60] sm:$0xff] %vm591_vm5, %v502_v15  ;;  %v508_v33 = vpop.permute.xlu0 %507 }
  0xc4   : > { %746 = vrot.lane.b32.xlu1 %v653_v26, %s4695_s4  ;;  %598 = vst.msk [vmem:[#allocation4 + $0xc0] sm:$0xff] %vm591_vm5, %v508_v33 }
  0xc5   : > { %913 = vrot.lane.b32.xlu0 %v5047_v48, %s4696_s5 }
  0xc6   : > { %v506_v35 = vpop.permute.xlu1 %505 }
  0xc7   : > { %597 = vst.msk [vmem:[#allocation4 + $0xa0] sm:$0xff] %vm591_vm5, %v506_v35  ;;  %v512_v27 = vpop.permute.xlu0 %511 }
  0xc8   : > { %750 = vrot.lane.b32.xlu1 %v655_v34, %s4695_s4  ;;  %600 = vst.msk [vmem:[#allocation4 + $0x100] sm:$0xff] %vm591_vm5, %v512_v27 }
  0xc9   : > { %917 = vrot.lane.b32.xlu0 %v5054_v50, %s4696_s5 }
  0xca   : > { %v510_v36 = vpop.permute.xlu1 %509 }
  0xcb   : > { %599 = vst.msk [vmem:[#allocation4 + $0xe0] sm:$0xff] %vm591_vm5, %v510_v36  ;;  %v516_v38 = vpop.permute.xlu0 %515 }
  0xcc   : > { %915 = vrot.lane.b32.xlu1 %v5056_v51, %s4696_s5  ;;  %602 = vst.msk [vmem:[#allocation4 + $0x140] sm:$0xff] %vm591_vm5, %v516_v38 }
  0xcd   : > { %921 = vrot.lane.b32.xlu0 %v5064_v53, %s4696_s5 }
  0xce   : > { %v514_v48 = vpop.permute.xlu1 %513 }
  0xcf   : > { %601 = vst.msk [vmem:[#allocation4 + $0x120] sm:$0xff] %vm591_vm5, %v514_v48  ;;  %v520_v39 = vpop.permute.xlu0 %519 }
  0xd0   : > { %919 = vrot.lane.b32.xlu1 %v5072_v55, %s4696_s5  ;;  %604 = vst.msk [vmem:[#allocation4 + $0x180] sm:$0xff] %vm591_vm5, %v520_v39 }
  0xd1   : > { %925 = vrot.lane.b32.xlu0 %v5074_v56, %s4696_s5 }
  0xd2   : > { %v518_v45 = vpop.permute.xlu1 %517 }
  0xd3   : > { %603 = vst.msk [vmem:[#allocation4 + $0x160] sm:$0xff] %vm591_vm5, %v518_v45  ;;  %v524_v51 = vpop.permute.xlu0 %523 }
  0xd4   : > { %923 = vrot.lane.b32.xlu1 %v5082_v57, %s4696_s5  ;;  %606 = vst.msk [vmem:[#allocation4 + $0x1c0] sm:$0xff] %vm591_vm5, %v524_v51  ;;  %v2040_v51 = vld [vmem:[%s7153_s1] sm:$0xff] }
  0xd5   : > { %929 = vrot.lane.b32.xlu0 %v5084_v58, %s4696_s5 }
  0xd6   : > { %v522_v26 = vpop.permute.xlu1 %521 }
  0xd7   : > { %605 = vst.msk [vmem:[#allocation4 + $0x1a0] sm:$0xff] %vm591_vm5, %v522_v26  ;;  %v528_v15 = vpop.permute.xlu0 %527  ;;  %v2041_v26 = vld [vmem:[%s7153_s1 + $0x8] sm:$0xff] }
  0xd8   : > { %927 = vrot.lane.b32.xlu1 %v5086_v59, %s4696_s5  ;;  %608 = vst.msk [vmem:[#allocation4 + $0x200] sm:$0xff] %vm591_vm5, %v528_v15 }
  0xd9   : > { %933 = vrot.lane.b32.xlu0 %v5094_v60, %s4696_s5 }
  0xda   : > { %v526_v33 = vpop.permute.xlu1 %525 }
  0xdb   : > { %607 = vst.msk [vmem:[#allocation4 + $0x1e0] sm:$0xff] %vm591_vm5, %v526_v33  ;;  %v532_v34 = vpop.permute.xlu0 %531  ;;  %v4199_v33 = vpack.c.bf16 %v2041_v26, %v2040_v51 }
  0xdc   : > { %931 = vrot.lane.b32.xlu1 %v5096_v61, %s4696_s5  ;;  %610 = vst.msk [vmem:[#allocation4 + $0x240] sm:$0xff] %vm591_vm5, %v532_v34  ;;  %v4697_v34 = vmov 0.0|0.0  }
  0xdd   : > { %937 = vrot.lane.b32.xlu0 %v5098_v62, %s4696_s5  ;;  %4198 = vmatprep.subr.bf16.mxu1 %v4697_v34 }
  0xde   : > { %v530_v35 = vpop.permute.xlu1 %529  ;;  %4200 = vmatpush1.bf16.msra.mxu1 %v4199_v33  ;;  %4246 = vmatprep.subr.bf16.mxu0 %v4697_v34  ;;  %v2047_v33 = vld [vmem:[%s7153_s1 + $0x38] sm:$0xff] }
  0xdf   : > { %609 = vst.msk [vmem:[#allocation4 + $0x220] sm:$0xff] %vm591_vm5, %v530_v35  ;;  %v536_v27 = vpop.permute.xlu0 %535  ;;  %4201 = vmatprep.subr.bf16.mxu1 %v4697_v34 }
  0xe0   : > { %935 = vrot.lane.b32.xlu1 %v5108_v0, %s4696_s5  ;;  %612 = vst.msk [vmem:[#allocation4 + $0x280] sm:$0xff] %vm591_vm5, %v536_v27  ;;  %v2042_v27 = vld [vmem:[%s7153_s1 + $0x10] sm:$0xff] }
  0xe1   : > { %941 = vrot.lane.b32.xlu0 %v5110_v1, %s4696_s5 }
  0xe2   : > { %v534_v36 = vpop.permute.xlu1 %533 }
  0xe3   : > { %611 = vst.msk [vmem:[#allocation4 + $0x260] sm:$0xff] %vm591_vm5, %v534_v36  ;;  %v540_v38 = vpop.permute.xlu0 %539  ;;  %v2043_v36 = vld [vmem:[%s7153_s1 + $0x18] sm:$0xff] }
  0xe4   : > { %939 = vrot.lane.b32.xlu1 %v5112_v2, %s4696_s5  ;;  %614 = vst.msk [vmem:[#allocation4 + $0x2c0] sm:$0xff] %vm591_vm5, %v540_v38 }
  0xe5   : > { %945 = vrot.lane.b32.xlu0 %v5122_v3, %s4696_s5 }
  0xe6   : > { %v538_v48 = vpop.permute.xlu1 %537 }
  0xe7   : > { %613 = vst.msk [vmem:[#allocation4 + $0x2a0] sm:$0xff] %vm591_vm5, %v538_v48  ;;  %v544_v39 = vpop.permute.xlu0 %543  ;;  %v4202_v48 = vpack.c.bf16 %v2043_v36, %v2042_v27  ;;  %v5383_v36 = vld [vmem:[#allocation2 + $0xb2] sm:$0xff] }
  0xe8   : > { %943 = vrot.lane.b32.xlu1 %v5124_v4, %s4696_s5  ;;  %616 = vst.msk [vmem:[#allocation4 + $0x300] sm:$0xff] %vm591_vm5, %v544_v39  ;;  %v2044_v39 = vld [vmem:[%s7153_s1 + $0x20] sm:$0xff] }
  0xe9   : > { %949 = vrot.lane.b32.xlu0 %v5126_v5, %s4696_s5  ;;  %4203 = vmatpush1.bf16.msra.mxu1 %v4202_v48  ;;  %1891 = vst.msk [vmem:[#allocation4 + $0x178] sm:$0xff] %vm398_vm4, %v5383_v36 }
  0xea   : > { %v542_v45 = vpop.permute.xlu1 %541  ;;  %4204 = vmatprep.subr.bf16.mxu1 %v4697_v34 }
  0xeb   : > { %615 = vst.msk [vmem:[#allocation4 + $0x2e0] sm:$0xff] %vm591_vm5, %v542_v45  ;;  %v548_v15 = vpop.permute.xlu0 %547  ;;  %v2045_v45 = vld [vmem:[%s7153_s1 + $0x28] sm:$0xff] }
  0xec   : > { %947 = vrot.lane.b32.xlu1 %v5136_v6, %s4696_s5  ;;  %618 = vst.msk [vmem:[#allocation4 + $0x340] sm:$0xff] %vm591_vm5, %v548_v15  ;;  %v4205_v26 = vpack.c.bf16 %v2045_v45, %v2044_v39  ;;  %v2046_v15 = vld [vmem:[%s7153_s1 + $0x30] sm:$0xff]  ;;  %v879_v39 = vld [vmem:[#allocation2 + $0x180] sm:$0xff] }
  0xed   : > { %953 = vrot.lane.b32.xlu0 %v5138_v7, %s4696_s5  ;;  %v4208_v27 = vpack.c.bf16 %v2047_v33, %v2046_v15  ;;  %v2050_v45 = vld [vmem:[%s7153_s1 + $0x50] sm:$0xff] }
  0xee   : > { %v546_v35 = vpop.permute.xlu1 %545  ;;  %4206 = vmatpush1.bf16.msra.mxu1 %v4205_v26 }
  0xef   : > { %617 = vst.msk [vmem:[#allocation4 + $0x320] sm:$0xff] %vm591_vm5, %v546_v35  ;;  %v552_v38 = vpop.permute.xlu0 %551  ;;  %4207 = vmatprep.subr.bf16.mxu1 %v4697_v34  ;;  %v5373_v35 = vld [vmem:[#allocation2 + $0xaa] sm:$0xff] }
  0xf0   : > { %951 = vrot.lane.b32.xlu1 %v5140_v8, %s4696_s5  ;;  %620 = vst.msk [vmem:[#allocation4 + $0x380] sm:$0xff] %vm591_vm5, %v552_v38  ;;  %v2049_v38 = vld [vmem:[%s7153_s1 + $0x48] sm:$0xff] }
  0xf1   : > { %957 = vrot.lane.b32.xlu0 %v5150_v10, %s4696_s5  ;;  %1890 = vst.msk [vmem:[#allocation4 + $0x158] sm:$0xff] %vm398_vm4, %v5373_v35 }
  0xf2   : > { %v550_v7 = vpop.permute.xlu1 %549  ;;  %4209 = vmatpush1.bf16.msra.mxu1 %v4208_v27 }
  0xf3   : > { %619 = vst.msk [vmem:[#allocation4 + $0x360] sm:$0xff] %vm591_vm5, %v550_v7  ;;  %v556_v51 = vpop.permute.xlu0 %555  ;;  %4210 = vmatprep.subr.bf16.mxu1 %v4697_v34 }
  0xf4   : > { %955 = vrot.lane.b32.xlu1 %v5152_v11, %s4696_s5  ;;  %622 = vst.msk [vmem:[#allocation4 + $0x3c0] sm:$0xff] %vm591_vm5, %v556_v51 }
  0xf5   : > { %961 = vrot.lane.b32.xlu0 %v5160_v12, %s4696_s5 }
  0xf6   : > { %v554_v10 = vpop.permute.xlu1 %553 }
  0xf7   : > { %621 = vst.msk [vmem:[#allocation4 + $0x3a0] sm:$0xff] %vm591_vm5, %v554_v10  ;;  %v689_v11 = vpop.permute.xlu0 %688  ;;  %v2073_v10 = vld [vmem:[%s7153_s1 + $0x108] sm:$0xff] }
  0xf8   : > { %959 = vrot.lane.b32.xlu1 %v5162_v13, %s4696_s5  ;;  %785 = vst.msk [vmem:[#allocation4] sm:$0xff] %vm784_vm6, %v689_v11  ;;  %v2048_v13 = vld [vmem:[%s7153_s1 + $0x40] sm:$0xff] }
  0xf9   : > { %786 = vst.msk [vmem:[#allocation4 + $0x8] sm:$0xff] %vm333_vm3, %v689_v11  ;;  %965 = vrot.lane.b32.xlu0 %v5174_v16, %s4696_s5  ;;  %v4211_v7 = vpack.c.bf16 %v2049_v38, %v2048_v13  ;;  %v2053_v11 = vld [vmem:[%s7153_s1 + $0x68] sm:$0xff] }
  0xfa   : > { %v558_v12 = vpop.permute.xlu1 %557  ;;  %v880_v38 = vld [vmem:[#allocation2 + $0x188] sm:$0xff] }
  0xfb   : > { %623 = vst.msk [vmem:[#allocation4 + $0x3e0] sm:$0xff] %vm591_vm5, %v558_v12  ;;  %v693_v48 = vpop.permute.xlu0 %692  ;;  %4212 = vmatpush1.bf16.msra.mxu1 %v4211_v7  ;;  %v5430_v12 = vld [vmem:[#allocation2 + $0xc2] sm:$0xff] }
  0xfc   : > { %963 = vrot.lane.b32.xlu1 %v5176_v17, %s4696_s5  ;;  %789 = vst.msk [vmem:[#allocation4 + $0x40] sm:$0xff] %vm784_vm6, %v693_v48  ;;  %4213 = vmatprep.subr.bf16.mxu1 %v4697_v34  ;;  %v2051_v17 = vld [vmem:[%s7153_s1 + $0x58] sm:$0xff] }
  0xfd   : > { %790 = vst.msk [vmem:[#allocation4 + $0x48] sm:$0xff] %vm333_vm3, %v693_v48  ;;  %969 = vrot.lane.b32.xlu0 %v5184_v20, %s4696_s5  ;;  %v4214_v26 = vpack.c.bf16 %v2051_v17, %v2050_v45  ;;  %v2072_v20 = vld [vmem:[%s7153_s1 + $0x100] sm:$0xff]  ;;  %v2074_v48 = vld [vmem:[%s7153_s1 + $0x110] sm:$0xff]  ;;  %v2055_v45 = vld [vmem:[%s7153_s1 + $0x78] sm:$0xff] }
  0xfe   : > { %v691_v16 = vpop.permute.xlu1 %690  ;;  %v4247_v33 = vpack.c.bf16 %v2073_v10, %v2072_v20  ;;  %1892 = vst.msk [vmem:[#allocation4 + $0x198] sm:$0xff] %vm398_vm4, %v5430_v12  ;;  %v2077_v20 = vld [vmem:[%s7153_s1 + $0x128] sm:$0xff] }
  0xff   : > { %787 = vst.msk [vmem:[#allocation4 + $0x20] sm:$0xff] %vm784_vm6, %v691_v16  ;;  %v697_v51 = vpop.permute.xlu0 %696  ;;  %4215 = vmatpush1.bf16.msra.mxu1 %v4214_v26  ;;  %v2076_v26 = vld [vmem:[%s7153_s1 + $0x120] sm:$0xff] }
 0x100   : > { %788 = vst.msk [vmem:[#allocation4 + $0x28] sm:$0xff] %vm333_vm3, %v691_v16  ;;  %967 = vrot.lane.b32.xlu1 %v5186_v21, %s4696_s5  ;;  %794 = vst.msk [vmem:[#allocation4 + $0x88] sm:$0xff] %vm333_vm3, %v697_v51  ;;  %4216 = vmatprep.subr.bf16.mxu1 %v4697_v34  ;;  %v2052_v21 = vld [vmem:[%s7153_s1 + $0x60] sm:$0xff]  ;;  %v5447_v16 = vld [vmem:[#allocation2 + $0xca] sm:$0xff] }
 0x101   : > { %793 = vst.msk [vmem:[#allocation4 + $0x80] sm:$0xff] %vm784_vm6, %v697_v51  ;;  %973 = vrot.lane.b32.xlu0 %v879_v39, %s4696_s5  ;;  %v4217_v13 = vpack.c.bf16 %v2053_v11, %v2052_v21  ;;  %4248 = vmatpush1.bf16.msra.mxu0 %v4247_v33  ;;  %v2056_v33 = vld [vmem:[%s7153_s1 + $0x80] sm:$0xff] }
 0x102   : > { %v695_v15 = vpop.permute.xlu1 %694  ;;  %4249 = vmatprep.subr.bf16.mxu0 %v4697_v34  ;;  %1893 = vst.msk [vmem:[#allocation4 + $0x1b8] sm:$0xff] %vm398_vm4, %v5447_v16 }
 0x103   : > { %791 = vst.msk [vmem:[#allocation4 + $0x60] sm:$0xff] %vm784_vm6, %v695_v15  ;;  %v701_v27 = vpop.permute.xlu0 %700  ;;  %4218 = vmatpush1.bf16.msra.mxu1 %v4217_v13  ;;  %v2079_v13 = vld [vmem:[%s7153_s1 + $0x138] sm:$0xff] }
 0x104   : > { %792 = vst.msk [vmem:[#allocation4 + $0x68] sm:$0xff] %vm333_vm3, %v695_v15  ;;  %971 = vrot.lane.b32.xlu1 %v5194_v24, %s4696_s5  ;;  %798 = vst.msk [vmem:[#allocation4 + $0xc8] sm:$0xff] %vm333_vm3, %v701_v27  ;;  %v2075_v24 = vld [vmem:[%s7153_s1 + $0x118] sm:$0xff]  ;;  %4219 = vmatprep.subr.bf16.mxu1 %v4697_v34  ;;  %v4253_v15 = vpack.c.bf16 %v2077_v20, %v2076_v26  ;;  %v2061_v26 = vld [vmem:[%s7153_s1 + $0xa8] sm:$0xff] }
 0x105   : > { %797 = vst.msk [vmem:[#allocation4 + $0xc0] sm:$0xff] %vm784_vm6, %v701_v27  ;;  %1106 = vrot.lane.b32.xlu0 %v4977_v25, %s4698_s24  ;;  %v4250_v39 = vpack.c.bf16 %v2075_v24, %v2074_v48  ;;  %v2054_v25 = vld [vmem:[%s7153_s1 + $0x70] sm:$0xff] }
 0x106   : > { %v699_v7 = vpop.permute.xlu1 %698  ;;  %v4220_v51 = vpack.c.bf16 %v2055_v45, %v2054_v25  ;;  %v2078_v27 = vld [vmem:[%s7153_s1 + $0x130] sm:$0xff]  ;;  %v2080_v25 = vld [vmem:[%s7153_s1 + $0x140] sm:$0xff] }
 0x107   : > { %795 = vst.msk [vmem:[#allocation4 + $0xa0] sm:$0xff] %vm784_vm6, %v699_v7  ;;  %v705_v17 = vpop.permute.xlu0 %704  ;;  %4251 = vmatpush1.bf16.msra.mxu0 %v4250_v39  ;;  %v2058_v48 = vld [vmem:[%s7153_s1 + $0x90] sm:$0xff] }
 0x108   : > { %796 = vst.msk [vmem:[#allocation4 + $0xa8] sm:$0xff] %vm333_vm3, %v699_v7  ;;  %975 = vrot.lane.b32.xlu1 %v880_v38, %s4696_s5  ;;  %802 = vst.msk [vmem:[#allocation4 + $0x108] sm:$0xff] %vm333_vm3, %v705_v17  ;;  %4221 = vmatpush1.bf16.msra.mxu1 %v4220_v51  ;;  %v5503_v7 = vld [vmem:[#allocation2 + $0xda] sm:$0xff] }
 0x109   : > { %801 = vst.msk [vmem:[#allocation4 + $0x100] sm:$0xff] %vm784_vm6, %v705_v17  ;;  %1110 = vrot.lane.b32.xlu0 %v4986_v28, %s4698_s24  ;;  %4252 = vmatprep.subr.bf16.mxu0 %v4697_v34  ;;  %v2057_v28 = vld [vmem:[%s7153_s1 + $0x88] sm:$0xff] }
 0x10a   : > { %v703_v10 = vpop.permute.xlu1 %702  ;;  %4222 = vmatprep.subr.bf16.mxu1 %v4697_v34  ;;  %v4223_v11 = vpack.c.bf16 %v2057_v28, %v2056_v33  ;;  %1894 = vst.msk [vmem:[#allocation4 + $0x1d8] sm:$0xff] %vm398_vm4, %v5503_v7  ;;  %v5520_v17 = vld [vmem:[#allocation2 + $0xe2] sm:$0xff]  ;;  %v2083_v33 = vld [vmem:[%s7153_s1 + $0x158] sm:$0xff] }
 0x10b   : > { %799 = vst.msk [vmem:[#allocation4 + $0xe0] sm:$0xff] %vm784_vm6, %v703_v10  ;;  %v709_v21 = vpop.permute.xlu0 %708  ;;  %4254 = vmatpush1.bf16.msra.mxu0 %v4253_v15  ;;  %v2082_v15 = vld [vmem:[%s7153_s1 + $0x150] sm:$0xff] }
 0x10c   : > { %800 = vst.msk [vmem:[#allocation4 + $0xe8] sm:$0xff] %vm333_vm3, %v703_v10  ;;  %1108 = vrot.lane.b32.xlu1 %v4992_v29, %s4698_s24  ;;  %806 = vst.msk [vmem:[#allocation4 + $0x148] sm:$0xff] %vm333_vm3, %v709_v21  ;;  %4224 = vmatpush1.bf16.msra.mxu1 %v4223_v11  ;;  %v4256_v29 = vpack.c.bf16 %v2079_v13, %v2078_v27  ;;  %v2084_v13 = vld [vmem:[%s7153_s1 + $0x160] sm:$0xff] }
 0x10d   : > { %805 = vst.msk [vmem:[#allocation4 + $0x140] sm:$0xff] %vm784_vm6, %v709_v21  ;;  %1114 = vrot.lane.b32.xlu0 %v4994_v30, %s4698_s24  ;;  %4255 = vmatprep.subr.bf16.mxu0 %v4697_v34  ;;  %v2059_v30 = vld [vmem:[%s7153_s1 + $0x98] sm:$0xff]  ;;  %v2062_v21 = vld [vmem:[%s7153_s1 + $0xb0] sm:$0xff] }
 0x10e   : > { %v707_v38 = vpop.permute.xlu1 %706  ;;  %4225 = vmatprep.subr.bf16.mxu1 %v4697_v34  ;;  %v4226_v39 = vpack.c.bf16 %v2059_v30, %v2058_v48  ;;  %1895 = vst.msk [vmem:[#allocation4 + $0x1f8] sm:$0xff] %vm398_vm4, %v5520_v17  ;;  %v2064_v48 = vld [vmem:[%s7153_s1 + $0xc0] sm:$0xff] }
 0x10f   : > { %803 = vst.msk [vmem:[#allocation4 + $0x120] sm:$0xff] %vm784_vm6, %v707_v38  ;;  %v713_v24 = vpop.permute.xlu0 %712  ;;  %4257 = vmatpush1.bf16.msra.mxu0 %v4256_v29 }
 0x110   : > { %804 = vst.msk [vmem:[#allocation4 + $0x128] sm:$0xff] %vm333_vm3, %v707_v38  ;;  %1112 = vrot.lane.b32.xlu1 %v5000_v31, %s4698_s24  ;;  %810 = vst.msk [vmem:[#allocation4 + $0x188] sm:$0xff] %vm333_vm3, %v713_v24  ;;  %4227 = vmatpush1.bf16.msra.mxu1 %v4226_v39  ;;  %v2081_v31 = vld [vmem:[%s7153_s1 + $0x148] sm:$0xff] }
 0x111   : > { %809 = vst.msk [vmem:[#allocation4 + $0x180] sm:$0xff] %vm784_vm6, %v713_v24  ;;  %1118 = vrot.lane.b32.xlu0 %v5002_v32, %s4698_s24  ;;  %4258 = vmatprep.subr.bf16.mxu0 %v4697_v34  ;;  %v4259_v51 = vpack.c.bf16 %v2081_v31, %v2080_v25  ;;  %v2060_v32 = vld [vmem:[%s7153_s1 + $0xa0] sm:$0xff]  ;;  %v2085_v38 = vld [vmem:[%s7153_s1 + $0x168] sm:$0xff]  ;;  %v5577_v24 = vld [vmem:[#allocation2 + $0xf2] sm:$0xff] }
 0x112   : > { %v711_v45 = vpop.permute.xlu1 %710  ;;  %4228 = vmatprep.subr.bf16.mxu1 %v4697_v34  ;;  %v4229_v10 = vpack.c.bf16 %v2061_v26, %v2060_v32  ;;  %1896 = vst.msk [vmem:[#allocation4 + $0x218] sm:$0xff] %vm398_vm4, %v5577_v24  ;;  %v2086_v25 = vld [vmem:[%s7153_s1 + $0x170] sm:$0xff] }
 0x113   : > { %807 = vst.msk [vmem:[#allocation4 + $0x160] sm:$0xff] %vm784_vm6, %v711_v45  ;;  %v717_v20 = vpop.permute.xlu0 %716  ;;  %4260 = vmatpush1.bf16.msra.mxu0 %v4259_v51  ;;  %v2066_v51 = vld [vmem:[%s7153_s1 + $0xd0] sm:$0xff] }
 0x114   : > { %808 = vst.msk [vmem:[#allocation4 + $0x168] sm:$0xff] %vm333_vm3, %v711_v45  ;;  %1116 = vrot.lane.b32.xlu1 %v5013_v37, %s4698_s24  ;;  %814 = vst.msk [vmem:[#allocation4 + $0x1c8] sm:$0xff] %vm333_vm3, %v717_v20  ;;  %4230 = vmatpush1.bf16.msra.mxu1 %v4229_v10  ;;  %v4262_v37 = vpack.c.bf16 %v2083_v33, %v2082_v15  ;;  %v2089_v10 = vld [vmem:[%s7153_s1 + $0x188] sm:$0xff]  ;;  %v2068_v33 = vld [vmem:[%s7153_s1 + $0xe0] sm:$0xff] }
 0x115   : > { %813 = vst.msk [vmem:[#allocation4 + $0x1c0] sm:$0xff] %vm784_vm6, %v717_v20  ;;  %1122 = vrot.lane.b32.xlu0 %v5020_v40, %s4698_s24  ;;  %4261 = vmatprep.subr.bf16.mxu0 %v4697_v34  ;;  %v2063_v40 = vld [vmem:[%s7153_s1 + $0xb8] sm:$0xff]  ;;  %v2088_v20 = vld [vmem:[%s7153_s1 + $0x180] sm:$0xff] }
 0x116   : > { %v715_v28 = vpop.permute.xlu1 %714  ;;  %4231 = vmatprep.subr.bf16.mxu1 %v4697_v34  ;;  %v4232_v27 = vpack.c.bf16 %v2063_v40, %v2062_v21  ;;  %v2090_v40 = vld [vmem:[%s7153_s1 + $0x190] sm:$0xff] }
 0x117   : > { %811 = vst.msk [vmem:[#allocation4 + $0x1a0] sm:$0xff] %vm784_vm6, %v715_v28  ;;  %v721_v11 = vpop.permute.xlu0 %720  ;;  %4263 = vmatpush1.bf16.msra.mxu0 %v4262_v37  ;;  %v5625_v37 = vld [vmem:[#allocation2 + $0xfa] sm:$0xff] }
 0x118   : > { %812 = vst.msk [vmem:[#allocation4 + $0x1a8] sm:$0xff] %vm333_vm3, %v715_v28  ;;  %1120 = vrot.lane.b32.xlu1 %v5028_v41, %s4698_s24  ;;  %818 = vst.msk [vmem:[#allocation4 + $0x208] sm:$0xff] %vm333_vm3, %v721_v11  ;;  %4233 = vmatpush1.bf16.msra.mxu1 %v4232_v27  ;;  %v4265_v41 = vpack.c.bf16 %v2085_v38, %v2084_v13  ;;  %v2071_v38 = vld [vmem:[%s7153_s1 + $0xf8] sm:$0xff] }
 0x119   : > { %817 = vst.msk [vmem:[#allocation4 + $0x200] sm:$0xff] %vm784_vm6, %v721_v11  ;;  %1126 = vrot.lane.b32.xlu0 %v5030_v42, %s4698_s24  ;;  %4264 = vmatprep.subr.bf16.mxu0 %v4697_v34  ;;  %v2065_v42 = vld [vmem:[%s7153_s1 + $0xc8] sm:$0xff]  ;;  %v1848_v11 = vld [vmem:[#allocation2 + $0x32] sm:$0xff] }
 0x11a   : > { %v719_v29 = vpop.permute.xlu1 %718  ;;  %4234 = vmatprep.subr.bf16.mxu1 %v4697_v34  ;;  %v4235_v39 = vpack.c.bf16 %v2065_v42, %v2064_v48  ;;  %1897 = vst.msk [vmem:[#allocation4 + $0x238] sm:$0xff] %vm398_vm4, %v5625_v37  ;;  %1880 = vst.msk [vmem:[#allocation4 + $0x18] sm:$0xff] %vm398_vm4, %v1848_v11  ;;  %v2092_v48 = vld [vmem:[%s7153_s1 + $0x1a0] sm:$0xff]  ;;  %v2093_v42 = vld [vmem:[%s7153_s1 + $0x1a8] sm:$0xff] }
 0x11b   : > { %815 = vst.msk [vmem:[#allocation4 + $0x1e0] sm:$0xff] %vm784_vm6, %v719_v29  ;;  %v725_v30 = vpop.permute.xlu0 %724  ;;  %4266 = vmatpush1.bf16.msra.mxu0 %v4265_v41  ;;  %v1659_v11 = vld [vmem:[#allocation2 + $0x61] sm:$0xff] }
 0x11c   : > { %816 = vst.msk [vmem:[#allocation4 + $0x1e8] sm:$0xff] %vm333_vm3, %v719_v29  ;;  %1124 = vrot.lane.b32.xlu1 %v5036_v43, %s4698_s24  ;;  %822 = vst.msk [vmem:[#allocation4 + $0x248] sm:$0xff] %vm333_vm3, %v725_v30  ;;  %4236 = vmatpush1.bf16.msra.mxu1 %v4235_v39  ;;  %v2087_v43 = vld [vmem:[%s7153_s1 + $0x178] sm:$0xff] }
 0x11d   : > { %821 = vst.msk [vmem:[#allocation4 + $0x240] sm:$0xff] %vm784_vm6, %v725_v30  ;;  %1130 = vrot.lane.b32.xlu0 %v5038_v44, %s4698_s24  ;;  %4267 = vmatprep.subr.bf16.mxu0 %v4697_v34  ;;  %v4268_v45 = vpack.c.bf16 %v2087_v43, %v2086_v25  ;;  %v2067_v44 = vld [vmem:[%s7153_s1 + $0xd8] sm:$0xff]  ;;  %v5667_v25 = vld [vmem:[#allocation2 + $0x10a] sm:$0xff] }
 0x11e   : > { %v723_v31 = vpop.permute.xlu1 %722  ;;  %4237 = vmatprep.subr.bf16.mxu1 %v4697_v34  ;;  %v4238_v26 = vpack.c.bf16 %v2067_v44, %v2066_v51  ;;  %1898 = vst.msk [vmem:[#allocation4 + $0x258] sm:$0xff] %vm398_vm4, %v5667_v25  ;;  %v5689_v44 = vld [vmem:[#allocation2 + $0x112] sm:$0xff] }
 0x11f   : > { %819 = vst.msk [vmem:[#allocation4 + $0x220] sm:$0xff] %vm784_vm6, %v723_v31  ;;  %v729_v32 = vpop.permute.xlu0 %728  ;;  %4269 = vmatpush1.bf16.msra.mxu0 %v4268_v45  ;;  %v1850_v45 = vld [vmem:[#allocation2 + $0x4a] sm:$0xff] }
 0x120   : > { %820 = vst.msk [vmem:[#allocation4 + $0x228] sm:$0xff] %vm333_vm3, %v723_v31  ;;  %1128 = vrot.lane.b32.xlu1 %v5044_v46, %s4698_s24  ;;  %826 = vst.msk [vmem:[#allocation4 + $0x288] sm:$0xff] %vm333_vm3, %v729_v32  ;;  %4239 = vmatpush1.bf16.msra.mxu1 %v4238_v26  ;;  %v4271_v46 = vpack.c.bf16 %v2089_v10, %v2088_v20  ;;  %v1851_v26 = vld [vmem:[#allocation2 + $0x52] sm:$0xff] }
 0x121   : > { %825 = vst.msk [vmem:[#allocation4 + $0x280] sm:$0xff] %vm784_vm6, %v729_v32  ;;  %1134 = vrot.lane.b32.xlu0 %v5049_v49, %s4698_s24  ;;  %4270 = vmatprep.subr.bf16.mxu0 %v4697_v34  ;;  %v2069_v49 = vld [vmem:[%s7153_s1 + $0xe8] sm:$0xff] }
 0x122   : > { %v727_v15 = vpop.permute.xlu1 %726  ;;  %4240 = vmatprep.subr.bf16.mxu1 %v4697_v34  ;;  %v4241_v21 = vpack.c.bf16 %v2069_v49, %v2068_v33  ;;  %1882 = vst.msk [vmem:[#allocation4 + $0x58] sm:$0xff] %vm398_vm4, %v1850_v45  ;;  %1899 = vst.msk [vmem:[#allocation4 + $0x278] sm:$0xff] %vm398_vm4, %v5689_v44  ;;  %v1852_v33 = vld [vmem:[#allocation2 + $0x62] sm:$0xff]  ;;  %v5774_v45 = vld [vmem:[#allocation2 + $0x152] sm:$0xff] }
 0x123   : > { %823 = vst.msk [vmem:[#allocation4 + $0x260] sm:$0xff] %vm784_vm6, %v727_v15  ;;  %v733_v28 = vpop.permute.xlu0 %732  ;;  %4272 = vmatpush1.bf16.msra.mxu0 %v4271_v46  ;;  %v1658_v46 = vld [vmem:[#allocation2 + $0x51] sm:$0xff] }
 0x124   : > { %824 = vst.msk [vmem:[#allocation4 + $0x268] sm:$0xff] %vm333_vm3, %v727_v15  ;;  %1132 = vrot.lane.b32.xlu1 %v5058_v52, %s4698_s24  ;;  %830 = vst.msk [vmem:[#allocation4 + $0x2c8] sm:$0xff] %vm333_vm3, %v733_v28  ;;  %4242 = vmatpush1.bf16.msra.mxu1 %v4241_v21  ;;  %v2091_v52 = vld [vmem:[%s7153_s1 + $0x198] sm:$0xff]  ;;  %v5711_v15 = vld [vmem:[#allocation2 + $0x122] sm:$0xff] }
 0x125   : > { %829 = vst.msk [vmem:[#allocation4 + $0x2c0] sm:$0xff] %vm784_vm6, %v733_v28  ;;  %1138 = vrot.lane.b32.xlu0 %v5068_v54, %s4698_s24  ;;  %4273 = vmatprep.subr.bf16.mxu0 %v4697_v34  ;;  %v4274_v13 = vpack.c.bf16 %v2091_v52, %v2090_v40  ;;  %v2070_v54 = vld [vmem:[%s7153_s1 + $0xf0] sm:$0xff] }
 0x126   : > { %v731_v27 = vpop.permute.xlu1 %730  ;;  %4243 = vmatprep.subr.bf16.mxu1 %v4697_v34  ;;  %v4244_v41 = vpack.c.bf16 %v2071_v38, %v2070_v54  ;;  %1883 = vst.msk [vmem:[#allocation4 + $0x78] sm:$0xff] %vm398_vm4, %v1851_v26  ;;  %1900 = vst.msk [vmem:[#allocation4 + $0x298] sm:$0xff] %vm398_vm4, %v5711_v15  ;;  %v1853_v28 = vld [vmem:[#allocation2 + $0x6a] sm:$0xff]  ;;  %v1854_v54 = vld [vmem:[#allocation2 + $0x7a] sm:$0xff] }
 0x127   : > { %827 = vst.msk [vmem:[#allocation4 + $0x2a0] sm:$0xff] %vm784_vm6, %v731_v27  ;;  %v737_v29 = vpop.permute.xlu0 %736  ;;  %4275 = vmatpush1.bf16.msra.mxu0 %v4274_v13  ;;  %v5726_v21 = vld [vmem:[#allocation2 + $0x12a] sm:$0xff]  ;;  %v5740_v38 = vld [vmem:[#allocation2 + $0x13a] sm:$0xff] }
 0x128   : > { %828 = vst.msk [vmem:[#allocation4 + $0x2a8] sm:$0xff] %vm333_vm3, %v731_v27  ;;  %1136 = vrot.lane.b32.xlu1 %v5100_v63, %s4698_s24  ;;  %834 = vst.msk [vmem:[#allocation4 + $0x308] sm:$0xff] %vm333_vm3, %v737_v29  ;;  %4245 = vmatpush1.bf16.msra.mxu1 %v4244_v41  ;;  %v4277_v63 = vpack.c.bf16 %v2093_v42, %v2092_v48  ;;  %v1660_v13 = vld [vmem:[#allocation2 + $0x69] sm:$0xff] }
 0x129   : > { %833 = vst.msk [vmem:[#allocation4 + $0x300] sm:$0xff] %vm784_vm6, %v737_v29  ;;  %1142 = vrot.lane.b32.xlu0 %v5142_v9, %s4698_s24  ;;  %4276 = vmatprep.subr.bf16.mxu0 %v4697_v34  ;;  %v1849_v9 = vld [vmem:[#allocation2 + $0x3a] sm:$0xff]  ;;  %v1915_v34 = vld [vmem:[#allocation4 + $0x18] sm:$0xff] }
 0x12a   : > { %v735_v30 = vpop.permute.xlu1 %734  ;;  %1881 = vst.msk [vmem:[#allocation4 + $0x38] sm:$0xff] %vm398_vm4, %v1849_v9  ;;  %4132 = vmatprep.mubr.msk.f32.mxu0 %vm398_vm4, %v1915_v34  ;;  %1884 = vst.msk [vmem:[#allocation4 + $0x98] sm:$0xff] %vm398_vm4, %v1852_v33  ;;  %v1855_v41 = vld [vmem:[#allocation2 + $0x82] sm:$0xff]  ;;  %v1856_v34 = vld [vmem:[#allocation2 + $0x92] sm:$0xff] }
 0x12b   : > { %831 = vst.msk [vmem:[#allocation4 + $0x2e0] sm:$0xff] %vm784_vm6, %v735_v30  ;;  %v741_v39 = vpop.permute.xlu0 %740  ;;  %4278 = vmatpush1.bf16.msra.mxu0 %v4277_v63  ;;  %v5759_v63 = vld [vmem:[#allocation2 + $0x142] sm:$0xff] }
 0x12c   : > { %832 = vst.msk [vmem:[#allocation4 + $0x2e8] sm:$0xff] %vm333_vm3, %v735_v30  ;;  %1140 = vrot.lane.b32.xlu1 %v5166_v14, %s4698_s24  ;;  %838 = vst.msk [vmem:[#allocation4 + $0x348] sm:$0xff] %vm333_vm3, %v741_v39  ;;  %v7165_v30 = vld [vmem:[#allocation5_spill] sm:$0xff] }
 0x12d   : > { %837 = vst.msk [vmem:[#allocation4 + $0x340] sm:$0xff] %vm784_vm6, %v741_v39  ;;  %1526 = vrot.lane.b32.xlu0 %v5054_v50, %s4699_s25  ;;  %v1655_v50 = vld [vmem:[#allocation2 + $0x31] sm:$0xff]  ;;  %v1661_v39 = vld [vmem:[#allocation2 + $0x79] sm:$0xff] }
 0x12e   : > { %v739_v43 = vpop.permute.xlu1 %738  ;;  %1885 = vst.msk [vmem:[#allocation4 + $0xb8] sm:$0xff] %vm398_vm4, %v1853_v28  ;;  %1901 = vst.msk [vmem:[#allocation4 + $0x2b8] sm:$0xff] %vm398_vm4, %v5726_v21 }
 0x12f   : > { %835 = vst.msk [vmem:[#allocation4 + $0x320] sm:$0xff] %vm784_vm6, %v739_v43  ;;  %v745_v14 = vpop.permute.xlu0 %744 }
 0x130   : > { %836 = vst.msk [vmem:[#allocation4 + $0x328] sm:$0xff] %vm333_vm3, %v739_v43  ;;  %1299 = vrot.lane.b32.xlu1 %v5209_v47, %s4700_s26  ;;  %842 = vst.msk [vmem:[#allocation4 + $0x388] sm:$0xff] %vm333_vm3, %v745_v14  ;;  %v4648_v47 = vld [vmem:[#allocation2 + $0x39] sm:$0xff] }
 0x131   : > { %841 = vst.msk [vmem:[#allocation4 + $0x380] sm:$0xff] %vm784_vm6, %v745_v14  ;;  %1301 = vrot.lane.b32.xlu0 %v5219_v19, %s4700_s26 }
 0x132   : > { %v743_v31 = vpop.permute.xlu1 %742  ;;  %1886 = vst.msk [vmem:[#allocation4 + $0xd8] sm:$0xff] %vm398_vm4, %v1854_v54  ;;  %1902 = vst.msk [vmem:[#allocation4 + $0x2d8] sm:$0xff] %vm398_vm4, %v5740_v38 }
 0x133   : > { %839 = vst.msk [vmem:[#allocation4 + $0x360] sm:$0xff] %vm784_vm6, %v743_v31  ;;  %v749_v51 = vpop.permute.xlu0 %748 }
 0x134   : > { %840 = vst.msk [vmem:[#allocation4 + $0x368] sm:$0xff] %vm333_vm3, %v743_v31  ;;  %1719 = vrot.lane.b32.xlu1 %v1655_v50, %s4701_s27  ;;  %846 = vst.msk [vmem:[#allocation4 + $0x3c8] sm:$0xff] %vm333_vm3, %v749_v51  ;;  %v1857_v31 = vld [vmem:[#allocation2 + $0x9a] sm:$0xff] }
 0x135   : > { %845 = vst.msk [vmem:[#allocation4 + $0x3c0] sm:$0xff] %vm784_vm6, %v749_v51  ;;  %1721 = vrot.lane.b32.xlu0 %v4648_v47, %s4701_s27 }
 0x136   : > { %v747_v19 = vpop.permute.xlu1 %746  ;;  %1887 = vst.msk [vmem:[#allocation4 + $0xf8] sm:$0xff] %vm398_vm4, %v1855_v41  ;;  %1903 = vst.msk [vmem:[#allocation4 + $0x2f8] sm:$0xff] %vm398_vm4, %v5759_v63 }
 0x137   : > { %843 = vst.msk [vmem:[#allocation4 + $0x3a0] sm:$0xff] %vm784_vm6, %v747_v19  ;;  %v914_v32 = vpop.permute.xlu0 %913 }
 0x138   : > { %844 = vst.msk [vmem:[#allocation4 + $0x3a8] sm:$0xff] %vm333_vm3, %v747_v19  ;;  %1528 = vrot.lane.b32.xlu1 %v5072_v55, %s4699_s25  ;;  %v1657_v55 = vld [vmem:[#allocation2 + $0x49] sm:$0xff]  ;;  %v4649_v19 = vld [vmem:[#allocation2 + $0x7a] sm:$0xff] }
 0x139   : > { %1010 = vst.msk [vmem:[#allocation4 + $0x8] sm:$0xff] %vm1009_vm7, %v914_v32  ;;  %1530 = vrot.lane.b32.xlu0 %v5064_v53, %s4699_s25  ;;  %v1663_v32 = vld [vmem:[#allocation2 + $0x91] sm:$0xff] }
 0x13a   : > { %v751_v20 = vpop.permute.xlu1 %750  ;;  %1888 = vst.msk [vmem:[#allocation4 + $0x118] sm:$0xff] %vm398_vm4, %v1856_v34  ;;  %1889 = vst.msk [vmem:[#allocation4 + $0x138] sm:$0xff] %vm398_vm4, %v1857_v31 }
 0x13b   : > { %847 = vst.msk [vmem:[#allocation4 + $0x3e0] sm:$0xff] %vm784_vm6, %v751_v20  ;;  %v918_v10 = vpop.permute.xlu0 %917 }
 0x13c   : > { %848 = vst.msk [vmem:[#allocation4 + $0x3e8] sm:$0xff] %vm333_vm3, %v751_v20  ;;  %1303 = vrot.lane.b32.xlu1 %v5214_v18, %s4700_s26  ;;  %v1664_v20 = vld [vmem:[#allocation2 + $0x99] sm:$0xff] }
 0x13d   : > { %1012 = vst.msk [vmem:[#allocation4 + $0x48] sm:$0xff] %vm1009_vm7, %v918_v10  ;;  %1305 = vrot.lane.b32.xlu0 %v5227_v23, %s4700_s26  ;;  %v5786_v10 = vld [vmem:[#allocation2 + $0x15a] sm:$0xff] }
 0x13e   : > { %v916_v53 = vpop.permute.xlu1 %915  ;;  %1904 = vst.msk [vmem:[#allocation4 + $0x318] sm:$0xff] %vm398_vm4, %v5774_v45  ;;  %1905 = vst.msk [vmem:[#allocation4 + $0x338] sm:$0xff] %vm398_vm4, %v5786_v10 }
 0x13f   : > { %1011 = vst.msk [vmem:[#allocation4 + $0x28] sm:$0xff] %vm1009_vm7, %v916_v53  ;;  %v922_v49 = vpop.permute.xlu0 %921 }
 0x140   : > { %1723 = vrot.lane.b32.xlu1 %v1657_v55, %s4701_s27  ;;  %1014 = vst.msk [vmem:[#allocation4 + $0x88] sm:$0xff] %vm1009_vm7, %v922_v49  ;;  %v4651_v49 = vld [vmem:[#allocation2 + $0x92] sm:$0xff] }
 0x141   : > { %1725 = vrot.lane.b32.xlu0 %v1658_v46, %s4701_s27 }
 0x142   : > { %v920_v18 = vpop.permute.xlu1 %919 }
 0x143   : > { %1013 = vst.msk [vmem:[#allocation4 + $0x68] sm:$0xff] %vm1009_vm7, %v920_v18  ;;  %v926_v23 = vpop.permute.xlu0 %925  ;;  %v5802_v18 = vld [vmem:[#allocation2 + $0x16a] sm:$0xff] }
 0x144   : > { %1532 = vrot.lane.b32.xlu1 %v5082_v57, %s4699_s25  ;;  %1016 = vst.msk [vmem:[#allocation4 + $0xc8] sm:$0xff] %vm1009_vm7, %v926_v23  ;;  %v7164_v57 = vld [vmem:[#allocation6_spill] sm:$0xff] }
 0x145   : > { %1534 = vrot.lane.b32.xlu0 %v5074_v56, %s4699_s25  ;;  %v4652_v23 = vld [vmem:[#allocation2 + $0x9a] sm:$0xff]  ;;  %1906 = vst.msk [vmem:[#allocation4 + $0x358] sm:$0xff] %vm398_vm4, %v5802_v18 }
 0x146   : > { %v924_v40 = vpop.permute.xlu1 %923 }
 0x147   : > { %1015 = vst.msk [vmem:[#allocation4 + $0xa8] sm:$0xff] %vm1009_vm7, %v924_v40  ;;  %v930_v52 = vpop.permute.xlu0 %929 }
 0x148   : > { %1307 = vrot.lane.b32.xlu1 %v5221_v22, %s4700_s26  ;;  %1018 = vst.msk [vmem:[#allocation4 + $0x108] sm:$0xff] %vm1009_vm7, %v930_v52 }
 0x149   : > { %1309 = vrot.lane.b32.xlu0 %v7164_v57, %s4700_s26 }
 0x14a   : > { %v928_v27 = vpop.permute.xlu1 %927 }
 0x14b   : > { %1017 = vst.msk [vmem:[#allocation4 + $0xe8] sm:$0xff] %vm1009_vm7, %v928_v27  ;;  %v934_v56 = vpop.permute.xlu0 %933 }
 0x14c   : > { %1727 = vrot.lane.b32.xlu1 %v1659_v11, %s4701_s27  ;;  %1020 = vst.msk [vmem:[#allocation4 + $0x148] sm:$0xff] %vm1009_vm7, %v934_v56  ;;  %v5815_v11 = vld [vmem:[#allocation2 + $0x172] sm:$0xff]  ;;  %v1668_v56 = vld [vmem:[#allocation2 + $0xc9] sm:$0xff] }
 0x14d   : > { %1729 = vrot.lane.b32.xlu0 %v1660_v13, %s4701_s27  ;;  %1907 = vst.msk [vmem:[#allocation4 + $0x378] sm:$0xff] %vm398_vm4, %v5815_v11 }
 0x14e   : > { %v932_v22 = vpop.permute.xlu1 %931 }
 0x14f   : > { %1019 = vst.msk [vmem:[#allocation4 + $0x128] sm:$0xff] %vm1009_vm7, %v932_v22  ;;  %v938_v29 = vpop.permute.xlu0 %937  ;;  %v5828_v22 = vld [vmem:[#allocation2 + $0x182] sm:$0xff] }
 0x150   : > { %1536 = vrot.lane.b32.xlu1 %v5086_v59, %s4699_s25  ;;  %1022 = vst.msk [vmem:[#allocation4 + $0x188] sm:$0xff] %vm1009_vm7, %v938_v29  ;;  %v7166_v59 = vld [vmem:[#allocation7_spill] sm:$0xff] }
 0x151   : > { %1538 = vrot.lane.b32.xlu0 %v5084_v58, %s4699_s25  ;;  %v1662_v58 = vld [vmem:[#allocation2 + $0x81] sm:$0xff]  ;;  %1908 = vst.msk [vmem:[#allocation4 + $0x398] sm:$0xff] %vm398_vm4, %v5828_v22 }
 0x152   : > { %v936_v48 = vpop.permute.xlu1 %935 }
 0x153   : > { %1021 = vst.msk [vmem:[#allocation4 + $0x168] sm:$0xff] %vm1009_vm7, %v936_v48  ;;  %v942_v42 = vpop.permute.xlu0 %941  ;;  %v5845_v48 = vld [vmem:[#allocation2 + $0x18a] sm:$0xff] }
 0x154   : > { %1311 = vrot.lane.b32.xlu1 %v7165_v30, %s4700_s26  ;;  %1024 = vst.msk [vmem:[#allocation4 + $0x1c8] sm:$0xff] %vm1009_vm7, %v942_v42 }
 0x155   : > { %1313 = vrot.lane.b32.xlu0 %v7166_v59, %s4700_s26  ;;  %1909 = vst.msk [vmem:[#allocation4 + $0x3b8] sm:$0xff] %vm398_vm4, %v5845_v48 }
 0x156   : > { %v940_v9 = vpop.permute.xlu1 %939 }
 0x157   : > { %1023 = vst.msk [vmem:[#allocation4 + $0x1a8] sm:$0xff] %vm1009_vm7, %v940_v9  ;;  %v946_v43 = vpop.permute.xlu0 %945  ;;  %v1671_v9 = vld [vmem:[#allocation2 + $0xf1] sm:$0xff] }
 0x158   : > { %1731 = vrot.lane.b32.xlu1 %v1661_v39, %s4701_s27  ;;  %1026 = vst.msk [vmem:[#allocation4 + $0x208] sm:$0xff] %vm1009_vm7, %v946_v43  ;;  %v1480_v43 = vld [vmem:[#allocation2 + $0x108] sm:$0xff] }
 0x159   : > { %1733 = vrot.lane.b32.xlu0 %v1662_v58, %s4701_s27 }
 0x15a   : > { %v944_v14 = vpop.permute.xlu1 %943 }
 0x15b   : > { %1025 = vst.msk [vmem:[#allocation4 + $0x1e8] sm:$0xff] %vm1009_vm7, %v944_v14  ;;  %v950_v50 = vpop.permute.xlu0 %949  ;;  %v1673_v14 = vld [vmem:[#allocation2 + $0x109] sm:$0xff] }
 0x15c   : > { %1540 = vrot.lane.b32.xlu1 %v5096_v61, %s4699_s25  ;;  %1028 = vst.msk [vmem:[#allocation4 + $0x248] sm:$0xff] %vm1009_vm7, %v950_v50  ;;  %v4650_v61 = vld [vmem:[#allocation2 + $0x82] sm:$0xff] }
 0x15d   : > { %1542 = vrot.lane.b32.xlu0 %v5094_v60, %s4699_s25 }
 0x15e   : > { %v948_v51 = vpop.permute.xlu1 %947 }
 0x15f   : > { %1027 = vst.msk [vmem:[#allocation4 + $0x228] sm:$0xff] %vm1009_vm7, %v948_v51  ;;  %v954_v47 = vpop.permute.xlu0 %953  ;;  %v1481_v51 = vld [vmem:[#allocation2 + $0x110] sm:$0xff] }
 0x160   : > { %1315 = vrot.lane.b32.xlu1 %v4649_v19, %s4700_s26  ;;  %1030 = vst.msk [vmem:[#allocation4 + $0x288] sm:$0xff] %vm1009_vm7, %v954_v47  ;;  %v1674_v19 = vld [vmem:[#allocation2 + $0x111] sm:$0xff] }
 0x161   : > { %1317 = vrot.lane.b32.xlu0 %v4650_v61, %s4700_s26 }
 0x162   : > { %v952_v26 = vpop.permute.xlu1 %951 }
 0x163   : > { %1029 = vst.msk [vmem:[#allocation4 + $0x268] sm:$0xff] %vm1009_vm7, %v952_v26  ;;  %v958_v60 = vpop.permute.xlu0 %957 }
 0x164   : > { %1735 = vrot.lane.b32.xlu1 %v1663_v32, %s4701_s27  ;;  %1032 = vst.msk [vmem:[#allocation4 + $0x2c8] sm:$0xff] %vm1009_vm7, %v958_v60  ;;  %v1482_v32 = vld [vmem:[#allocation2 + $0x120] sm:$0xff] }
 0x165   : > { %1737 = vrot.lane.b32.xlu0 %v1664_v20, %s4701_s27  ;;  %v1675_v60 = vld [vmem:[#allocation2 + $0x121] sm:$0xff] }
 0x166   : > { %v956_v55 = vpop.permute.xlu1 %955 }
 0x167   : > { %1031 = vst.msk [vmem:[#allocation4 + $0x2a8] sm:$0xff] %vm1009_vm7, %v956_v55  ;;  %v962_v53 = vpop.permute.xlu0 %961  ;;  %v1912_v55 = vld [vmem:[#allocation4] sm:$0xff] }
 0x168   : > { %1544 = vrot.lane.b32.xlu1 %v5108_v0, %s4699_s25  ;;  %1034 = vst.msk [vmem:[#allocation4 + $0x308] sm:$0xff] %vm1009_vm7, %v962_v53  ;;  %v1665_v0 = vld [vmem:[#allocation2 + $0xa9] sm:$0xff] }
 0x169   : > { %1546 = vrot.lane.b32.xlu0 %v5098_v62, %s4699_s25  ;;  %v1666_v62 = vld [vmem:[#allocation2 + $0xb1] sm:$0xff] }
 0x16a   : > { %v960_v46 = vpop.permute.xlu1 %959 }
 0x16b   : > { %1033 = vst.msk [vmem:[#allocation4 + $0x2e8] sm:$0xff] %vm1009_vm7, %v960_v46  ;;  %v966_v33 = vpop.permute.xlu0 %965 }
 0x16c   : > { %1319 = vrot.lane.b32.xlu1 %v4651_v49, %s4700_s26  ;;  %1036 = vst.msk [vmem:[#allocation4 + $0x348] sm:$0xff] %vm1009_vm7, %v966_v33 }
 0x16d   : > { %1321 = vrot.lane.b32.xlu0 %v4652_v23, %s4700_s26  ;;  %v1483_v23 = vld [vmem:[#allocation2 + $0x128] sm:$0xff] }
 0x16e   : > { %v964_v28 = vpop.permute.xlu1 %963 }
 0x16f   : > { %1035 = vst.msk [vmem:[#allocation4 + $0x328] sm:$0xff] %vm1009_vm7, %v964_v28  ;;  %v970_v40 = vpop.permute.xlu0 %969  ;;  %v1916_v28 = vld [vmem:[#allocation4 + $0x20] sm:$0xff] }
 0x170   : > { %1739 = vrot.lane.b32.xlu1 %v1665_v0, %s4701_s27  ;;  %1038 = vst.msk [vmem:[#allocation4 + $0x388] sm:$0xff] %vm1009_vm7, %v970_v40  ;;  %v1919_v0 = vld [vmem:[#allocation4 + $0x38] sm:$0xff] }
 0x171   : > { %1741 = vrot.lane.b32.xlu0 %v1666_v62, %s4701_s27  ;;  %v1676_v40 = vld [vmem:[#allocation2 + $0x129] sm:$0xff] }
 0x172   : > { %v968_v52 = vpop.permute.xlu1 %967 }
 0x173   : > { %1037 = vst.msk [vmem:[#allocation4 + $0x368] sm:$0xff] %vm1009_vm7, %v968_v52  ;;  %v974_v57 = vpop.permute.xlu0 %973  ;;  %v1923_v52 = vld [vmem:[#allocation4 + $0x58] sm:$0xff] }
 0x174   : > { %1548 = vrot.lane.b32.xlu1 %v5112_v2, %s4699_s25  ;;  %1040 = vst.msk [vmem:[#allocation4 + $0x3c8] sm:$0xff] %vm1009_vm7, %v974_v57  ;;  %v1667_v2 = vld [vmem:[#allocation2 + $0xc1] sm:$0xff] }
 0x175   : > { %1550 = vrot.lane.b32.xlu0 %v5110_v1, %s4699_s25 }
 0x176   : > { %v972_v27 = vpop.permute.xlu1 %971 }
 0x177   : > { %1039 = vst.msk [vmem:[#allocation4 + $0x3a8] sm:$0xff] %vm1009_vm7, %v972_v27  ;;  %v1107_v13 = vpop.permute.xlu0 %1106 }
 0x178   : > { %1323 = vrot.lane.b32.xlu1 %v5373_v35, %s4700_s26  ;;  %1203 = vst.msk [vmem:[#allocation4 + $0x8] sm:$0xff] %vm1202_vm8, %v1107_v13 }
 0x179   : > { %1325 = vrot.lane.b32.xlu0 %v5383_v36, %s4700_s26 }
 0x17a   : > { %v976_v54 = vpop.permute.xlu1 %975 }
 0x17b   : > { %1041 = vst.msk [vmem:[#allocation4 + $0x3e8] sm:$0xff] %vm1009_vm7, %v976_v54  ;;  %v1111_v1 = vpop.permute.xlu0 %1110  ;;  %v1484_v54 = vld [vmem:[#allocation2 + $0x138] sm:$0xff] }
 0x17c   : > { %1743 = vrot.lane.b32.xlu1 %v1667_v2, %s4701_s27  ;;  %1205 = vst.msk [vmem:[#allocation4 + $0x48] sm:$0xff] %vm1202_vm8, %v1111_v1 }
 0x17d   : > { %1745 = vrot.lane.b32.xlu0 %v1668_v56, %s4701_s27  ;;  %v1920_v56 = vld [vmem:[#allocation4 + $0x40] sm:$0xff] }
 0x17e   : > { %v1109_v35 = vpop.permute.xlu1 %1108 }
 0x17f   : > { %1204 = vst.msk [vmem:[#allocation4 + $0x28] sm:$0xff] %vm1202_vm8, %v1109_v35  ;;  %v1115_v36 = vpop.permute.xlu0 %1114 }
 0x180   : > { %1552 = vrot.lane.b32.xlu1 %v5124_v4, %s4699_s25  ;;  %1207 = vst.msk [vmem:[#allocation4 + $0x88] sm:$0xff] %vm1202_vm8, %v1115_v36  ;;  %v1669_v4 = vld [vmem:[#allocation2 + $0xd9] sm:$0xff] }
 0x181   : > { %1554 = vrot.lane.b32.xlu0 %v5122_v3, %s4699_s25  ;;  %v1670_v3 = vld [vmem:[#allocation2 + $0xe1] sm:$0xff] }
 0x182   : > { %v1113_v29 = vpop.permute.xlu1 %1112 }
 0x183   : > { %1206 = vst.msk [vmem:[#allocation4 + $0x68] sm:$0xff] %vm1202_vm8, %v1113_v29  ;;  %v1119_v41 = vpop.permute.xlu0 %1118  ;;  %v1677_v29 = vld [vmem:[#allocation2 + $0x139] sm:$0xff] }
 0x184   : > { %1327 = vrot.lane.b32.xlu1 %v5430_v12, %s4700_s26  ;;  %1209 = vst.msk [vmem:[#allocation4 + $0xc8] sm:$0xff] %vm1202_vm8, %v1119_v41  ;;  %v1927_v41 = vld [vmem:[#allocation4 + $0x78] sm:$0xff] }
 0x185   : > { %1329 = vrot.lane.b32.xlu0 %v5447_v16, %s4700_s26 }
 0x186   : > { %v1117_v42 = vpop.permute.xlu1 %1116 }
 0x187   : > { %1208 = vst.msk [vmem:[#allocation4 + $0xa8] sm:$0xff] %vm1202_vm8, %v1117_v42  ;;  %v1123_v30 = vpop.permute.xlu0 %1122 }
 0x188   : > { %1747 = vrot.lane.b32.xlu1 %v1669_v4, %s4701_s27  ;;  %1211 = vst.msk [vmem:[#allocation4 + $0x108] sm:$0xff] %vm1202_vm8, %v1123_v30  ;;  %v1924_v4 = vld [vmem:[#allocation4 + $0x60] sm:$0xff]  ;;  %v1485_v30 = vld [vmem:[#allocation2 + $0x140] sm:$0xff] }
 0x189   : > { %1749 = vrot.lane.b32.xlu0 %v1670_v3, %s4701_s27 }
 0x18a   : > { %v1121_v12 = vpop.permute.xlu1 %1120 }
 0x18b   : > { %1210 = vst.msk [vmem:[#allocation4 + $0xe8] sm:$0xff] %vm1202_vm8, %v1121_v12  ;;  %v1127_v59 = vpop.permute.xlu0 %1126  ;;  %v1931_v12 = vld [vmem:[#allocation4 + $0x98] sm:$0xff] }
 0x18c   : > { %1556 = vrot.lane.b32.xlu1 %v5136_v6, %s4699_s25  ;;  %1213 = vst.msk [vmem:[#allocation4 + $0x148] sm:$0xff] %vm1202_vm8, %v1127_v59  ;;  %v1672_v6 = vld [vmem:[#allocation2 + $0xf9] sm:$0xff] }
 0x18d   : > { %1558 = vrot.lane.b32.xlu0 %v5126_v5, %s4699_s25 }
 0x18e   : > { %v1125_v16 = vpop.permute.xlu1 %1124 }
 0x18f   : > { %1212 = vst.msk [vmem:[#allocation4 + $0x128] sm:$0xff] %vm1202_vm8, %v1125_v16  ;;  %v1131_v39 = vpop.permute.xlu0 %1130 }
 0x190   : > { %1331 = vrot.lane.b32.xlu1 %v5503_v7, %s4700_s26  ;;  %1215 = vst.msk [vmem:[#allocation4 + $0x188] sm:$0xff] %vm1202_vm8, %v1131_v39 }
 0x191   : > { %1333 = vrot.lane.b32.xlu0 %v5520_v17, %s4700_s26 }
 0x192   : > { %v1129_v58 = vpop.permute.xlu1 %1128 }
 0x193   : > { %1214 = vst.msk [vmem:[#allocation4 + $0x168] sm:$0xff] %vm1202_vm8, %v1129_v58  ;;  %v1135_v34 = vpop.permute.xlu0 %1134  ;;  %v1928_v58 = vld [vmem:[#allocation4 + $0x80] sm:$0xff] }
 0x194   : > { %1751 = vrot.lane.b32.xlu1 %v1671_v9, %s4701_s27  ;;  %1217 = vst.msk [vmem:[#allocation4 + $0x1c8] sm:$0xff] %vm1202_vm8, %v1135_v34  ;;  %v1678_v9 = vld [vmem:[#allocation2 + $0x141] sm:$0xff] }
 0x195   : > { %1753 = vrot.lane.b32.xlu0 %v1672_v6, %s4701_s27 }
 0x196   : > { %v1133_v5 = vpop.permute.xlu1 %1132 }
 0x197   : > { %1216 = vst.msk [vmem:[#allocation4 + $0x1a8] sm:$0xff] %vm1202_vm8, %v1133_v5  ;;  %v1139_v7 = vpop.permute.xlu0 %1138 }
 0x198   : > { %1560 = vrot.lane.b32.xlu1 %v5140_v8, %s4699_s25  ;;  %1219 = vst.msk [vmem:[#allocation4 + $0x208] sm:$0xff] %vm1202_vm8, %v1139_v7  ;;  %v1486_v7 = vld [vmem:[#allocation2 + $0x150] sm:$0xff] }
 0x199   : > { %1562 = vrot.lane.b32.xlu0 %v1480_v43, %s4699_s25 }
 0x19a   : > { %v1137_v17 = vpop.permute.xlu1 %1136 }
 0x19b   : > { %1218 = vst.msk [vmem:[#allocation4 + $0x1e8] sm:$0xff] %vm1202_vm8, %v1137_v17  ;;  %v1143_v50 = vpop.permute.xlu0 %1142  ;;  %v1935_v17 = vld [vmem:[#allocation4 + $0xb8] sm:$0xff] }
 0x19c   : > { %1335 = vrot.lane.b32.xlu1 %v5577_v24, %s4700_s26  ;;  %1221 = vst.msk [vmem:[#allocation4 + $0x248] sm:$0xff] %vm1202_vm8, %v1143_v50 }
 0x19d   : > { %1755 = vrot.lane.b32.xlu0 %v1673_v14, %s4701_s27 }
 0x19e   : > { %v1141_v31 = vpop.permute.xlu1 %1140 }
 0x19f   : > { %1220 = vst.msk [vmem:[#allocation4 + $0x228] sm:$0xff] %vm1202_vm8, %v1141_v31  ;;  %v1527_v8 = vpop.permute.xlu0 %1526  ;;  %v1679_v31 = vld [vmem:[#allocation2 + $0x151] sm:$0xff] }
 0x1a0   : > { %1144 = vrot.lane.b32.xlu1 %v1672_v6, %s4698_s24 }
 0x1a1   : > { %1564 = vrot.lane.b32.xlu0 %v1481_v51, %s4699_s25  ;;  %v1939_v51 = vld [vmem:[#allocation4 + $0xd8] sm:$0xff] }
 0x1a2   : > { %v1300_v47 = vpop.permute.xlu1 %1299 }
 0x1a3   : > { %1396 = vst.msk [vmem:[#allocation4 + $0x8] sm:$0xff] %vm1395_vm9, %v1300_v47  ;;  %v1302_v24 = vpop.permute.xlu0 %1301 }
 0x1a4   : > { %1398 = vst.msk [vmem:[#allocation4 + $0x10] sm:$0xff] %vm1397_vm10, %v1300_v47  ;;  %1337 = vrot.lane.b32.xlu1 %v5625_v37, %s4700_s26  ;;  %1400 = vst.msk [vmem:[#allocation4 + $0x30] sm:$0xff] %vm1397_vm10, %v1302_v24 }
 0x1a5   : > { %1399 = vst.msk [vmem:[#allocation4 + $0x28] sm:$0xff] %vm1395_vm9, %v1302_v24  ;;  %1757 = vrot.lane.b32.xlu0 %v1674_v19, %s4701_s27 }
 0x1a6   : > { %1623 = vst.msk [vmem:[#allocation4 + $0x10] sm:$0xff] %vm1622_vm11, %v1527_v8  ;;  %v1720_v61 = vpop.permute.xlu1 %1719 }
 0x1a7   : > { %1816 = vst.msk [vmem:[#allocation4 + $0x10] sm:$0xff] %vm1815_vm12, %v1720_v61  ;;  %v1722_v26 = vpop.permute.xlu0 %1721  ;;  %v1487_v61 = vld [vmem:[#allocation2 + $0x158] sm:$0xff] }
 0x1a8   : > { %1146 = vrot.lane.b32.xlu1 %v1673_v14, %s4698_s24  ;;  %v1932_v14 = vld [vmem:[#allocation4 + $0xa0] sm:$0xff] }
 0x1a9   : > { %1566 = vrot.lane.b32.xlu0 %v1482_v32, %s4699_s25  ;;  %v1936_v32 = vld [vmem:[#allocation4 + $0xc0] sm:$0xff] }
 0x1aa   : > { %v1529_v20 = vpop.permute.xlu1 %1528  ;;  %v1913_v37 = vld [vmem:[#allocation4 + $0x8] sm:$0xff] }
 0x1ab   : > { %1624 = vst.msk [vmem:[#allocation4 + $0x30] sm:$0xff] %vm1622_vm11, %v1529_v20  ;;  %2261 = vmatprep.mubr.f32.mxu1 %v1913_v37  ;;  %v1531_v53 = vpop.permute.xlu0 %1530 }
 0x1ac   : > { %v1917_v46 = vld [vmem:[#allocation4 + $0x28] sm:$0xff]  ;;  %1817 = vst.msk [vmem:[#allocation4 + $0x30] sm:$0xff] %vm1815_vm12, %v1722_v26  ;;  %1339 = vrot.lane.b32.xlu1 %v5667_v25, %s4700_s26  ;;  %2262 = vmatmul.mubr.f32.vlgmr.msra.gmra.mrb[0].mxu1 %v1912_v55  ;;  %v1943_v55 = vld [vmem:[#allocation4 + $0xf8] sm:$0xff] }
 0x1ad   : > { %1759 = vrot.lane.b32.xlu0 %v1675_v60, %s4701_s27  ;;  %2266 = vmatprep.mubr.f32.mxu1 %v1917_v46 }
 0x1ae   : > { %v1304_v33 = vpop.permute.xlu1 %1303  ;;  %v1914_v49 = vld [vmem:[#allocation4 + $0x10] sm:$0xff] }
 0x1af   : > { %1401 = vst.msk [vmem:[#allocation4 + $0x48] sm:$0xff] %vm1395_vm9, %v1304_v33  ;;  %2487 = vmatmul.mubr.f32.vlgmr.msra.gmra.mrb[0].mxu0 %v1914_v49  ;;  %v1306_v62 = vpop.permute.xlu0 %1305  ;;  %v1488_v49 = vld [vmem:[#allocation2 + $0x168] sm:$0xff] }
 0x1b0   : > { %1402 = vst.msk [vmem:[#allocation4 + $0x50] sm:$0xff] %vm1397_vm10, %v1304_v33  ;;  %1148 = vrot.lane.b32.xlu1 %v1674_v19, %s4698_s24  ;;  %2267 = vmatmul.mubr.f32.gmra.mrb[2].mxu1 %v1916_v28  ;;  %1404 = vst.msk [vmem:[#allocation4 + $0x70] sm:$0xff] %vm1397_vm10, %v1306_v62 }
 0x1b1   : > { %1625 = vst.msk [vmem:[#allocation4 + $0x50] sm:$0xff] %vm1622_vm11, %v1531_v53  ;;  %1568 = vrot.lane.b32.xlu0 %v1483_v23, %s4699_s25  ;;  %4133 = vmatprep.mubr.msk.f32.mxu0 %vm398_vm4, %v1919_v0  ;;  %v1940_v53 = vld [vmem:[#allocation4 + $0xe0] sm:$0xff]  ;;  %v1947_v23 = vld [vmem:[#allocation4 + $0x118] sm:$0xff] }
 0x1b2   : > { %1403 = vst.msk [vmem:[#allocation4 + $0x68] sm:$0xff] %vm1395_vm9, %v1306_v62  ;;  %v1724_v25 = vpop.permute.xlu1 %1723 }
 0x1b3   : > { %1818 = vst.msk [vmem:[#allocation4 + $0x50] sm:$0xff] %vm1815_vm12, %v1724_v25  ;;  %v1918_v57 = vld [vmem:[#allocation4 + $0x30] sm:$0xff]  ;;  %v1726_v27 = vpop.permute.xlu0 %1725  ;;  %v1681_v25 = vld [vmem:[#allocation2 + $0x169] sm:$0xff] }
 0x1b4   : > { %1341 = vrot.lane.b32.xlu1 %v5689_v44, %s4700_s26  ;;  %2492 = vmatmul.mubr.f32.gmra.mrb[2].mxu0 %v1918_v57 }
 0x1b5   : > { %1761 = vrot.lane.b32.xlu0 %v1676_v40, %s4701_s27  ;;  %4134 = vmatprep.mubr.msk.f32.mxu0 %vm398_vm4, %v1923_v52 }
 0x1b6   : > { %v1533_v13 = vpop.permute.xlu1 %1532  ;;  %v1921_v2 = vld [vmem:[#allocation4 + $0x48] sm:$0xff] }
 0x1b7   : > { %1626 = vst.msk [vmem:[#allocation4 + $0x70] sm:$0xff] %vm1622_vm11, %v1533_v13  ;;  %2271 = vmatprep.mubr.f32.mxu1 %v1921_v2  ;;  %v1535_v1 = vpop.permute.xlu0 %1534  ;;  %v1489_v2 = vld [vmem:[#allocation2 + $0x170] sm:$0xff] }
 0x1b8   : > { %1819 = vst.msk [vmem:[#allocation4 + $0x70] sm:$0xff] %vm1815_vm12, %v1726_v27  ;;  %1150 = vrot.lane.b32.xlu1 %v1675_v60, %s4698_s24  ;;  %2272 = vmatmul.mubr.f32.gmra.mrb[4].mxu1 %v1920_v56  ;;  %v1680_v60 = vld [vmem:[#allocation2 + $0x159] sm:$0xff]  ;;  %v1948_v56 = vld [vmem:[#allocation4 + $0x120] sm:$0xff] }
 0x1b9   : > { %v1925_v35 = vld [vmem:[#allocation4 + $0x68] sm:$0xff]  ;;  %1570 = vrot.lane.b32.xlu0 %v1484_v54, %s4699_s25  ;;  %v1951_v54 = vld [vmem:[#allocation4 + $0x138] sm:$0xff] }
 0x1ba   : > { %2276 = vmatprep.mubr.f32.mxu1 %v1925_v35  ;;  %v1308_v44 = vpop.permute.xlu1 %1307  ;;  %v1922_v36 = vld [vmem:[#allocation4 + $0x50] sm:$0xff]  ;;  %v1682_v35 = vld [vmem:[#allocation2 + $0x171] sm:$0xff] }
 0x1bb   : > { %1405 = vst.msk [vmem:[#allocation4 + $0x88] sm:$0xff] %vm1395_vm9, %v1308_v44  ;;  %2497 = vmatmul.mubr.f32.gmra.mrb[4].mxu0 %v1922_v36  ;;  %v1310_v42 = vpop.permute.xlu0 %1309 }
 0x1bc   : > { %1406 = vst.msk [vmem:[#allocation4 + $0x90] sm:$0xff] %vm1397_vm10, %v1308_v44  ;;  %1343 = vrot.lane.b32.xlu1 %v5711_v15, %s4700_s26  ;;  %2277 = vmatmul.mubr.f32.gmra.mrb[6].mxu1 %v1924_v4  ;;  %1408 = vst.msk [vmem:[#allocation4 + $0xb0] sm:$0xff] %vm1397_vm10, %v1310_v42  ;;  %v1955_v44 = vld [vmem:[#allocation4 + $0x158] sm:$0xff] }
 0x1bd   : > { %1627 = vst.msk [vmem:[#allocation4 + $0x90] sm:$0xff] %vm1622_vm11, %v1535_v1  ;;  %1763 = vrot.lane.b32.xlu0 %v1677_v29, %s4701_s27  ;;  %4135 = vmatprep.mubr.msk.f32.mxu0 %vm398_vm4, %v1927_v41 }
 0x1be   : > { %1407 = vst.msk [vmem:[#allocation4 + $0xa8] sm:$0xff] %vm1395_vm9, %v1310_v42  ;;  %v1728_v3 = vpop.permute.xlu1 %1727  ;;  %v1490_v42 = vld [vmem:[#allocation2 + $0x180] sm:$0xff] }
 0x1bf   : > { %1820 = vst.msk [vmem:[#allocation4 + $0x90] sm:$0xff] %vm1815_vm12, %v1728_v3  ;;  %v1926_v59 = vld [vmem:[#allocation4 + $0x70] sm:$0xff]  ;;  %v1730_v16 = vpop.permute.xlu0 %1729  ;;  %v1952_v3 = vld [vmem:[#allocation4 + $0x140] sm:$0xff] }
 0x1c0   : > { %1152 = vrot.lane.b32.xlu1 %v1676_v40, %s4698_s24  ;;  %2502 = vmatmul.mubr.f32.gmra.mrb[6].mxu0 %v1926_v59  ;;  %v1944_v40 = vld [vmem:[#allocation4 + $0x100] sm:$0xff] }
 0x1c1   : > { %1572 = vrot.lane.b32.xlu0 %v1485_v30, %s4699_s25  ;;  %4136 = vmatprep.mubr.msk.f32.mxu0 %vm398_vm4, %v1931_v12 }
 0x1c2   : > { %v1537_v15 = vpop.permute.xlu1 %1536  ;;  %v1929_v39 = vld [vmem:[#allocation4 + $0x88] sm:$0xff] }
 0x1c3   : > { %1628 = vst.msk [vmem:[#allocation4 + $0xb0] sm:$0xff] %vm1622_vm11, %v1537_v15  ;;  %2281 = vmatprep.mubr.f32.mxu1 %v1929_v39  ;;  %v1539_v6 = vpop.permute.xlu0 %1538  ;;  %v1959_v15 = vld [vmem:[#allocation4 + $0x178] sm:$0xff]  ;;  %v1956_v39 = vld [vmem:[#allocation4 + $0x160] sm:$0xff] }
 0x1c4   : > { %1821 = vst.msk [vmem:[#allocation4 + $0xb0] sm:$0xff] %vm1815_vm12, %v1730_v16  ;;  %1345 = vrot.lane.b32.xlu1 %v5726_v21, %s4700_s26  ;;  %2282 = vmatmul.mubr.f32.gmra.mrb[8].mxu1 %v1928_v58  ;;  %v1683_v16 = vld [vmem:[#allocation2 + $0x181] sm:$0xff] }
 0x1c5   : > { %v1933_v34 = vld [vmem:[#allocation4 + $0xa8] sm:$0xff]  ;;  %1765 = vrot.lane.b32.xlu0 %v1678_v9, %s4701_s27 }
 0x1c6   : > { %2286 = vmatprep.mubr.f32.mxu1 %v1933_v34  ;;  %v1312_v5 = vpop.permute.xlu1 %1311  ;;  %v1930_v43 = vld [vmem:[#allocation4 + $0x90] sm:$0xff]  ;;  %v1963_v34 = vld [vmem:[#allocation4 + $0x198] sm:$0xff] }
 0x1c7   : > { %1409 = vst.msk [vmem:[#allocation4 + $0xc8] sm:$0xff] %vm1395_vm9, %v1312_v5  ;;  %2507 = vmatmul.mubr.f32.gmra.mrb[8].mxu0 %v1930_v43  ;;  %v1314_v50 = vpop.permute.xlu0 %1313 }
 0x1c8   : > { %1410 = vst.msk [vmem:[#allocation4 + $0xd0] sm:$0xff] %vm1397_vm10, %v1312_v5  ;;  %1154 = vrot.lane.b32.xlu1 %v1677_v29, %s4698_s24  ;;  %2287 = vmatmul.mubr.f32.gmra.mrb[10].mxu1 %v1932_v14  ;;  %1412 = vst.msk [vmem:[#allocation4 + $0xf0] sm:$0xff] %vm1397_vm10, %v1314_v50  ;;  %v1684_v14 = vld [vmem:[#allocation2 + $0x189] sm:$0xff] }
 0x1c9   : > { %1629 = vst.msk [vmem:[#allocation4 + $0xd0] sm:$0xff] %vm1622_vm11, %v1539_v6  ;;  %1574 = vrot.lane.b32.xlu0 %v1486_v7, %s4699_s25  ;;  %4137 = vmatprep.mubr.msk.f32.mxu0 %vm398_vm4, %v1935_v17  ;;  %v1491_v6 = vld [vmem:[#allocation2 + $0x188] sm:$0xff] }
 0x1ca   : > { %1411 = vst.msk [vmem:[#allocation4 + $0xe8] sm:$0xff] %vm1395_vm9, %v1314_v50  ;;  %v1732_v21 = vpop.permute.xlu1 %1731  ;;  %v1960_v50 = vld [vmem:[#allocation4 + $0x180] sm:$0xff] }
 0x1cb   : > { %1822 = vst.msk [vmem:[#allocation4 + $0xd0] sm:$0xff] %vm1815_vm12, %v1732_v21  ;;  %v1934_v8 = vld [vmem:[#allocation4 + $0xb0] sm:$0xff]  ;;  %v1734_v47 = vpop.permute.xlu0 %1733 }
 0x1cc   : > { %1347 = vrot.lane.b32.xlu1 %v5740_v38, %s4700_s26  ;;  %2512 = vmatmul.mubr.f32.gmra.mrb[10].mxu0 %v1934_v8 }
 0x1cd   : > { %1767 = vrot.lane.b32.xlu0 %v1679_v31, %s4701_s27  ;;  %4138 = vmatprep.mubr.msk.f32.mxu0 %vm398_vm4, %v1939_v51 }
 0x1ce   : > { %v1541_v19 = vpop.permute.xlu1 %1540  ;;  %v1937_v24 = vld [vmem:[#allocation4 + $0xc8] sm:$0xff] }
 0x1cf   : > { %1630 = vst.msk [vmem:[#allocation4 + $0xf0] sm:$0xff] %vm1622_vm11, %v1541_v19  ;;  %2291 = vmatprep.mubr.f32.mxu1 %v1937_v24  ;;  %v1543_v26 = vpop.permute.xlu0 %1542  ;;  %v1967_v19 = vld [vmem:[#allocation4 + $0x1b8] sm:$0xff]  ;;  %v1964_v24 = vld [vmem:[#allocation4 + $0x1a0] sm:$0xff] }
 0x1d0   : > { %1823 = vst.msk [vmem:[#allocation4 + $0xf0] sm:$0xff] %vm1815_vm12, %v1734_v47  ;;  %1156 = vrot.lane.b32.xlu1 %v1678_v9, %s4698_s24  ;;  %2292 = vmatmul.mubr.f32.gmra.mrb[12].mxu1 %v1936_v32  ;;  %v1492_v47 = vld [vmem:[#allocation2 + $0x198] sm:$0xff] }
 0x1d1   : > { %v1941_v20 = vld [vmem:[#allocation4 + $0xe8] sm:$0xff]  ;;  %1576 = vrot.lane.b32.xlu0 %v1487_v61, %s4699_s25 }
 0x1d2   : > { %2296 = vmatprep.mubr.f32.mxu1 %v1941_v20  ;;  %v1316_v38 = vpop.permute.xlu1 %1315  ;;  %v1938_v37 = vld [vmem:[#allocation4 + $0xd0] sm:$0xff] }
 0x1d3   : > { %1413 = vst.msk [vmem:[#allocation4 + $0x108] sm:$0xff] %vm1395_vm9, %v1316_v38  ;;  %2517 = vmatmul.mubr.f32.gmra.mrb[12].mxu0 %v1938_v37  ;;  %v1318_v46 = vpop.permute.xlu0 %1317  ;;  %v1685_v32 = vld [vmem:[#allocation2 + $0x199] sm:$0xff]  ;;  %v1879_v20 = vld [vmem:[#allocation2 + $0x1a2] sm:$0xff] }
 0x1d4   : > { %1414 = vst.msk [vmem:[#allocation4 + $0x110] sm:$0xff] %vm1397_vm10, %v1316_v38  ;;  %1349 = vrot.lane.b32.xlu1 %v5759_v63, %s4700_s26  ;;  %2297 = vmatmul.mubr.f32.gmra.mrb[14].mxu1 %v1940_v53  ;;  %1416 = vst.msk [vmem:[#allocation4 + $0x130] sm:$0xff] %vm1397_vm10, %v1318_v46  ;;  %v1493_v53 = vld [vmem:[#allocation2 + $0x1a0] sm:$0xff] }
 0x1d5   : > { %1631 = vst.msk [vmem:[#allocation4 + $0x110] sm:$0xff] %vm1622_vm11, %v1543_v26  ;;  %1769 = vrot.lane.b32.xlu0 %v1680_v60, %s4701_s27  ;;  %4139 = vmatprep.mubr.msk.f32.mxu0 %vm398_vm4, %v1943_v55  ;;  %v1971_v26 = vld [vmem:[#allocation4 + $0x1d8] sm:$0xff] }
 0x1d6   : > { %1415 = vst.msk [vmem:[#allocation4 + $0x128] sm:$0xff] %vm1395_vm9, %v1318_v46  ;;  %v1736_v33 = vpop.permute.xlu1 %1735  ;;  %v1968_v46 = vld [vmem:[#allocation4 + $0x1c0] sm:$0xff] }
 0x1d7   : > { %1824 = vst.msk [vmem:[#allocation4 + $0x110] sm:$0xff] %vm1815_vm12, %v1736_v33  ;;  %v1942_v0 = vld [vmem:[#allocation4 + $0xf0] sm:$0xff]  ;;  %v1738_v28 = vpop.permute.xlu0 %1737 }
 0x1d8   : > { %1158 = vrot.lane.b32.xlu1 %v1679_v31, %s4698_s24  ;;  %2522 = vmatmul.mubr.f32.gmra.mrb[14].mxu0 %v1942_v0  ;;  %1911 = vst.msk [vmem:[#allocation4 + $0x3f8] sm:$0xff] %vm398_vm4, %v1879_v20  ;;  %v1975_v0 = vld [vmem:[#allocation4 + $0x1f8] sm:$0xff]  ;;  %v2887_v20 = vld [vmem:[#allocation3 + $0x80] sm:$0xff] }
 0x1d9   : > { %1578 = vrot.lane.b32.xlu0 %v1488_v49, %s4699_s25  ;;  %4140 = vmatprep.mubr.msk.f32.mxu0 %vm398_vm4, %v1947_v23 }
 0x1da   : > { %v1545_v63 = vpop.permute.xlu1 %1544  ;;  %v1945_v62 = vld [vmem:[#allocation4 + $0x108] sm:$0xff] }
 0x1db   : > { %1632 = vst.msk [vmem:[#allocation4 + $0x130] sm:$0xff] %vm1622_vm11, %v1545_v63  ;;  %2301 = vmatprep.mubr.f32.mxu1 %v1945_v62  ;;  %v1547_v52 = vpop.permute.xlu0 %1546  ;;  %v1972_v63 = vld [vmem:[#allocation4 + $0x1e0] sm:$0xff] }
 0x1dc   : > { %1825 = vst.msk [vmem:[#allocation4 + $0x130] sm:$0xff] %vm1815_vm12, %v1738_v28  ;;  %1351 = vrot.lane.b32.xlu1 %v5774_v45, %s4700_s26  ;;  %2302 = vmatmul.mubr.f32.gmra.mrb[16].mxu1 %v1944_v40  ;;  %v2871_v28 = vld [vmem:[#allocation3] sm:$0xff] }
 0x1dd   : > { %v1949_v57 = vld [vmem:[#allocation4 + $0x128] sm:$0xff]  ;;  %1771 = vrot.lane.b32.xlu0 %v1681_v25, %s4701_s27 }
 0x1de   : > { %2306 = vmatprep.mubr.f32.mxu1 %v1949_v57  ;;  %v1320_v27 = vpop.permute.xlu1 %1319  ;;  %v1946_v13 = vld [vmem:[#allocation4 + $0x110] sm:$0xff] }
 0x1df   : > { %1417 = vst.msk [vmem:[#allocation4 + $0x148] sm:$0xff] %vm1395_vm9, %v1320_v27  ;;  %2527 = vmatmul.mubr.f32.gmra.mrb[16].mxu0 %v1946_v13  ;;  %v1322_v1 = vpop.permute.xlu0 %1321  ;;  %v2873_v57 = vld [vmem:[#allocation3 + $0x10] sm:$0xff] }
 0x1e0   : > { %1418 = vst.msk [vmem:[#allocation4 + $0x150] sm:$0xff] %vm1397_vm10, %v1320_v27  ;;  %1160 = vrot.lane.b32.xlu1 %v1680_v60, %s4698_s24  ;;  %2307 = vmatmul.mubr.f32.gmra.mrb[18].mxu1 %v1948_v56  ;;  %1420 = vst.msk [vmem:[#allocation4 + $0x170] sm:$0xff] %vm1397_vm10, %v1322_v1  ;;  %v2875_v56 = vld [vmem:[#allocation3 + $0x20] sm:$0xff] }
 0x1e1   : > { %1633 = vst.msk [vmem:[#allocation4 + $0x150] sm:$0xff] %vm1622_vm11, %v1547_v52  ;;  %1580 = vrot.lane.b32.xlu0 %v1489_v2, %s4699_s25  ;;  %4141 = vmatprep.mubr.msk.f32.mxu0 %vm398_vm4, %v1951_v54  ;;  %v1979_v52 = vld [vmem:[#allocation4 + $0x218] sm:$0xff] }
 0x1e2   : > { %1419 = vst.msk [vmem:[#allocation4 + $0x168] sm:$0xff] %vm1395_vm9, %v1322_v1  ;;  %v1740_v45 = vpop.permute.xlu1 %1739  ;;  %v1976_v1 = vld [vmem:[#allocation4 + $0x200] sm:$0xff] }
 0x1e3   : > { %1826 = vst.msk [vmem:[#allocation4 + $0x150] sm:$0xff] %vm1815_vm12, %v1740_v45  ;;  %v1950_v36 = vld [vmem:[#allocation4 + $0x130] sm:$0xff]  ;;  %v1742_v29 = vpop.permute.xlu0 %1741 }
 0x1e4   : > { %1353 = vrot.lane.b32.xlu1 %v5786_v10, %s4700_s26  ;;  %2532 = vmatmul.mubr.f32.gmra.mrb[18].mxu0 %v1950_v36 }
 0x1e5   : > { %1773 = vrot.lane.b32.xlu0 %v1682_v35, %s4701_s27  ;;  %4142 = vmatprep.mubr.msk.f32.mxu0 %vm398_vm4, %v1955_v44  ;;  %v1983_v44 = vld [vmem:[#allocation4 + $0x238] sm:$0xff] }
 0x1e6   : > { %v1549_v41 = vpop.permute.xlu1 %1548  ;;  %v1953_v4 = vld [vmem:[#allocation4 + $0x148] sm:$0xff] }
 0x1e7   : > { %1634 = vst.msk [vmem:[#allocation4 + $0x170] sm:$0xff] %vm1622_vm11, %v1549_v41  ;;  %2311 = vmatprep.mubr.f32.mxu1 %v1953_v4  ;;  %v1551_v30 = vpop.permute.xlu0 %1550  ;;  %v2874_v41 = vld [vmem:[#allocation3 + $0x18] sm:$0xff]  ;;  %v2877_v4 = vld [vmem:[#allocation3 + $0x30] sm:$0xff] }
 0x1e8   : > { %1827 = vst.msk [vmem:[#allocation4 + $0x170] sm:$0xff] %vm1815_vm12, %v1742_v29  ;;  %1162 = vrot.lane.b32.xlu1 %v1681_v25, %s4698_s24  ;;  %2312 = vmatmul.mubr.f32.gmra.mrb[20].mxu1 %v1952_v3  ;;  %v1686_v25 = vld [vmem:[#allocation2 + $0x1a1] sm:$0xff] }
 0x1e9   : > { %v1957_v12 = vld [vmem:[#allocation4 + $0x168] sm:$0xff]  ;;  %1582 = vrot.lane.b32.xlu0 %v1490_v42, %s4699_s25  ;;  %v1980_v42 = vld [vmem:[#allocation4 + $0x220] sm:$0xff] }
 0x1ea   : > { %2316 = vmatprep.mubr.f32.mxu1 %v1957_v12  ;;  %v1324_v10 = vpop.permute.xlu1 %1323  ;;  %v1954_v59 = vld [vmem:[#allocation4 + $0x150] sm:$0xff]  ;;  %v1987_v12 = vld [vmem:[#allocation4 + $0x258] sm:$0xff] }
 0x1eb   : > { %1421 = vst.msk [vmem:[#allocation4 + $0x188] sm:$0xff] %vm1395_vm9, %v1324_v10  ;;  %2537 = vmatmul.mubr.f32.gmra.mrb[20].mxu0 %v1954_v59  ;;  %v1326_v9 = vpop.permute.xlu0 %1325 }
 0x1ec   : > { %1422 = vst.msk [vmem:[#allocation4 + $0x190] sm:$0xff] %vm1397_vm10, %v1324_v10  ;;  %1355 = vrot.lane.b32.xlu1 %v5802_v18, %s4700_s26  ;;  %2317 = vmatmul.mubr.f32.gmra.mrb[22].mxu1 %v1956_v39  ;;  %1424 = vst.msk [vmem:[#allocation4 + $0x1b0] sm:$0xff] %vm1397_vm10, %v1326_v9  ;;  %v1878_v18 = vld [vmem:[#allocation2 + $0x19a] sm:$0xff] }
 0x1ed   : > { %1635 = vst.msk [vmem:[#allocation4 + $0x190] sm:$0xff] %vm1622_vm11, %v1551_v30  ;;  %1775 = vrot.lane.b32.xlu0 %v1683_v16, %s4701_s27  ;;  %4143 = vmatprep.mubr.msk.f32.mxu0 %vm398_vm4, %v1959_v15  ;;  %v2876_v10 = vld [vmem:[#allocation3 + $0x28] sm:$0xff]  ;;  %v2879_v15 = vld [vmem:[#allocation3 + $0x40] sm:$0xff] }
 0x1ee   : > { %1423 = vst.msk [vmem:[#allocation4 + $0x1a8] sm:$0xff] %vm1395_vm9, %v1326_v9  ;;  %v1744_v58 = vpop.permute.xlu1 %1743 }
 0x1ef   : > { %1828 = vst.msk [vmem:[#allocation4 + $0x190] sm:$0xff] %vm1815_vm12, %v1744_v58  ;;  %v1958_v5 = vld [vmem:[#allocation4 + $0x170] sm:$0xff]  ;;  %v1746_v43 = vpop.permute.xlu0 %1745  ;;  %v2878_v58 = vld [vmem:[#allocation3 + $0x38] sm:$0xff] }
 0x1f0   : > { %1164 = vrot.lane.b32.xlu1 %v1682_v35, %s4698_s24  ;;  %2542 = vmatmul.mubr.f32.gmra.mrb[22].mxu0 %v1958_v5  ;;  %1910 = vst.msk [vmem:[#allocation4 + $0x3d8] sm:$0xff] %vm398_vm4, %v1878_v18  ;;  %v1991_v5 = vld [vmem:[#allocation4 + $0x278] sm:$0xff] }
 0x1f1   : > { %1584 = vrot.lane.b32.xlu0 %v1491_v6, %s4699_s25  ;;  %4144 = vmatprep.mubr.msk.f32.mxu0 %vm398_vm4, %v1963_v34  ;;  %v1984_v6 = vld [vmem:[#allocation4 + $0x240] sm:$0xff] }
 0x1f2   : > { %v1553_v7 = vpop.permute.xlu1 %1552  ;;  %v1961_v17 = vld [vmem:[#allocation4 + $0x188] sm:$0xff] }
 0x1f3   : > { %1636 = vst.msk [vmem:[#allocation4 + $0x1b0] sm:$0xff] %vm1622_vm11, %v1553_v7  ;;  %2321 = vmatprep.mubr.f32.mxu1 %v1961_v17  ;;  %v1555_v21 = vpop.permute.xlu0 %1554  ;;  %v2880_v17 = vld [vmem:[#allocation3 + $0x48] sm:$0xff] }
 0x1f4   : > { %1829 = vst.msk [vmem:[#allocation4 + $0x1b0] sm:$0xff] %vm1815_vm12, %v1746_v43  ;;  %1357 = vrot.lane.b32.xlu1 %v5815_v11, %s4700_s26  ;;  %2322 = vmatmul.mubr.f32.gmra.mrb[24].mxu1 %v1960_v50  ;;  %v2881_v43 = vld [vmem:[#allocation3 + $0x50] sm:$0xff]  ;;  %v2883_v50 = vld [vmem:[#allocation3 + $0x60] sm:$0xff] }
 0x1f5   : > { %v1965_v31 = vld [vmem:[#allocation4 + $0x1a8] sm:$0xff]  ;;  %1777 = vrot.lane.b32.xlu0 %v1684_v14, %s4701_s27 }
 0x1f6   : > { %2326 = vmatprep.mubr.f32.mxu1 %v1965_v31  ;;  %v1328_v51 = vpop.permute.xlu1 %1327  ;;  %v1962_v8 = vld [vmem:[#allocation4 + $0x190] sm:$0xff] }
 0x1f7   : > { %1425 = vst.msk [vmem:[#allocation4 + $0x1c8] sm:$0xff] %vm1395_vm9, %v1328_v51  ;;  %2547 = vmatmul.mubr.f32.gmra.mrb[24].mxu0 %v1962_v8  ;;  %v1330_v61 = vpop.permute.xlu0 %1329  ;;  %v1988_v8 = vld [vmem:[#allocation4 + $0x260] sm:$0xff] }
 0x1f8   : > { %1426 = vst.msk [vmem:[#allocation4 + $0x1d0] sm:$0xff] %vm1397_vm10, %v1328_v51  ;;  %1166 = vrot.lane.b32.xlu1 %v1683_v16, %s4698_s24  ;;  %2327 = vmatmul.mubr.f32.gmra.mrb[26].mxu1 %v1964_v24  ;;  %1428 = vst.msk [vmem:[#allocation4 + $0x1f0] sm:$0xff] %vm1397_vm10, %v1330_v61  ;;  %v2882_v51 = vld [vmem:[#allocation3 + $0x58] sm:$0xff]  ;;  %v2885_v24 = vld [vmem:[#allocation3 + $0x70] sm:$0xff] }
 0x1f9   : > { %1637 = vst.msk [vmem:[#allocation4 + $0x1d0] sm:$0xff] %vm1622_vm11, %v1555_v21  ;;  %1586 = vrot.lane.b32.xlu0 %v1492_v47, %s4699_s25  ;;  %4145 = vmatprep.mubr.msk.f32.mxu0 %vm398_vm4, %v1967_v19  ;;  %v1995_v19 = vld [vmem:[#allocation4 + $0x298] sm:$0xff] }
 0x1fa   : > { %1427 = vst.msk [vmem:[#allocation4 + $0x1e8] sm:$0xff] %vm1395_vm9, %v1330_v61  ;;  %v1748_v11 = vpop.permute.xlu1 %1747 }
 0x1fb   : > { %1830 = vst.msk [vmem:[#allocation4 + $0x1d0] sm:$0xff] %vm1815_vm12, %v1748_v11  ;;  %v1966_v38 = vld [vmem:[#allocation4 + $0x1b0] sm:$0xff]  ;;  %v1750_v37 = vpop.permute.xlu0 %1749 }
 0x1fc   : > { %1359 = vrot.lane.b32.xlu1 %v5828_v22, %s4700_s26  ;;  %2552 = vmatmul.mubr.f32.gmra.mrb[26].mxu0 %v1966_v38 }
 0x1fd   : > { %1779 = vrot.lane.b32.xlu0 %v1685_v32, %s4701_s27  ;;  %4146 = vmatprep.mubr.msk.f32.mxu0 %vm398_vm4, %v1971_v26  ;;  %v2884_v32 = vld [vmem:[#allocation3 + $0x68] sm:$0xff] }
 0x1fe   : > { %v1557_v60 = vpop.permute.xlu1 %1556  ;;  %v1969_v55 = vld [vmem:[#allocation4 + $0x1c8] sm:$0xff] }
 0x1ff   : > { %1638 = vst.msk [vmem:[#allocation4 + $0x1f0] sm:$0xff] %vm1622_vm11, %v1557_v60  ;;  %2331 = vmatprep.mubr.f32.mxu1 %v1969_v55  ;;  %v1559_v33 = vpop.permute.xlu0 %1558  ;;  %v2886_v60 = vld [vmem:[#allocation3 + $0x78] sm:$0xff]  ;;  %v1992_v55 = vld [vmem:[#allocation4 + $0x280] sm:$0xff] }
 0x200   : > { %1831 = vst.msk [vmem:[#allocation4 + $0x1f0] sm:$0xff] %vm1815_vm12, %v1750_v37  ;;  %1168 = vrot.lane.b32.xlu1 %v1684_v14, %s4698_s24  ;;  %2332 = vmatmul.mubr.f32.gmra.mrb[28].mxu1 %v1968_v46  ;;  %v1999_v46 = vld [vmem:[#allocation4 + $0x2b8] sm:$0xff] }
 0x201   : > { %v1973_v49 = vld [vmem:[#allocation4 + $0x1e8] sm:$0xff]  ;;  %1588 = vrot.lane.b32.xlu0 %v1493_v53, %s4699_s25 }
 0x202   : > { %2336 = vmatprep.mubr.f32.mxu1 %v1973_v49  ;;  %v1332_v22 = vpop.permute.xlu1 %1331  ;;  %v1970_v23 = vld [vmem:[#allocation4 + $0x1d0] sm:$0xff] }
 0x203   : > { %1429 = vst.msk [vmem:[#allocation4 + $0x208] sm:$0xff] %vm1395_vm9, %v1332_v22  ;;  %2557 = vmatmul.mubr.f32.gmra.mrb[28].mxu0 %v1970_v23  ;;  %v1334_v62 = vpop.permute.xlu0 %1333  ;;  %v2888_v23 = vld [vmem:[#allocation3 + $0x88] sm:$0xff] }
 0x204   : > { %1430 = vst.msk [vmem:[#allocation4 + $0x210] sm:$0xff] %vm1397_vm10, %v1332_v22  ;;  %1361 = vrot.lane.b32.xlu1 %v5845_v48, %s4700_s26  ;;  %2337 = vmatmul.mubr.f32.gmra.mrb[30].mxu1 %v1972_v63  ;;  %1432 = vst.msk [vmem:[#allocation4 + $0x230] sm:$0xff] %vm1397_vm10, %v1334_v62  ;;  %v2872_v48 = vld [vmem:[#allocation3 + $0x8] sm:$0xff] }
 0x205   : > { %1639 = vst.msk [vmem:[#allocation4 + $0x210] sm:$0xff] %vm1622_vm11, %v1559_v33  ;;  %4147 = vmatprep.mubr.msk.f32.mxu0 %vm398_vm4, %v1975_v0  ;;  %2935 = vrot.lane.b32.xlu0 %v2871_v28, %s4699_s25  ;;  %v2889_v33 = vld [vmem:[#allocation3 + $0x90] sm:$0xff]  ;;  %v2891_v28 = vld [vmem:[#allocation3 + $0xa0] sm:$0xff] }
 0x206   : > { %1431 = vst.msk [vmem:[#allocation4 + $0x228] sm:$0xff] %vm1395_vm9, %v1334_v62  ;;  %v1752_v40 = vpop.permute.xlu1 %1751 }
 0x207   : > { %1832 = vst.msk [vmem:[#allocation4 + $0x210] sm:$0xff] %vm1815_vm12, %v1752_v40  ;;  %v1974_v27 = vld [vmem:[#allocation4 + $0x1f0] sm:$0xff]  ;;  %v1754_v13 = vpop.permute.xlu0 %1753  ;;  %v1996_v40 = vld [vmem:[#allocation4 + $0x2a0] sm:$0xff] }
 0x208   : > { %1781 = vrot.lane.b32.xlu1 %v1686_v25, %s4701_s27  ;;  %2562 = vmatmul.mubr.f32.gmra.mrb[30].mxu0 %v1974_v27  ;;  %v2890_v25 = vld [vmem:[#allocation3 + $0x98] sm:$0xff]  ;;  %v2893_v27 = vld [vmem:[#allocation3 + $0xb0] sm:$0xff] }
 0x209   : > { %4148 = vmatprep.mubr.msk.f32.mxu0 %vm398_vm4, %v1979_v52  ;;  %2939 = vrot.lane.b32.xlu0 %v2873_v57, %s4699_s25  ;;  %v2003_v57 = vld [vmem:[#allocation4 + $0x2d8] sm:$0xff] }
 0x20a   : > { %v1561_v2 = vpop.permute.xlu1 %1560  ;;  %v1977_v54 = vld [vmem:[#allocation4 + $0x208] sm:$0xff] }
 0x20b   : > { %1640 = vst.msk [vmem:[#allocation4 + $0x230] sm:$0xff] %vm1622_vm11, %v1561_v2  ;;  %2341 = vmatprep.mubr.f32.mxu1 %v1977_v54  ;;  %v1563_v45 = vpop.permute.xlu0 %1562  ;;  %v2892_v2 = vld [vmem:[#allocation3 + $0xa8] sm:$0xff] }
 0x20c   : > { %1833 = vst.msk [vmem:[#allocation4 + $0x230] sm:$0xff] %vm1815_vm12, %v1754_v13  ;;  %2342 = vmatmul.mubr.f32.gmra.mrb[32].mxu1 %v1976_v1  ;;  %2937 = vrot.lane.b32.xlu1 %v2872_v48, %s4699_s25 }
 0x20d   : > { %v1981_v35 = vld [vmem:[#allocation4 + $0x228] sm:$0xff]  ;;  %2943 = vrot.lane.b32.xlu0 %v2875_v56, %s4699_s25  ;;  %v2895_v56 = vld [vmem:[#allocation3 + $0xc0] sm:$0xff] }
 0x20e   : > { %2346 = vmatprep.mubr.f32.mxu1 %v1981_v35  ;;  %v1336_v36 = vpop.permute.xlu1 %1335  ;;  %v1978_v29 = vld [vmem:[#allocation4 + $0x210] sm:$0xff]  ;;  %v2894_v35 = vld [vmem:[#allocation3 + $0xb8] sm:$0xff] }
 0x20f   : > { %1433 = vst.msk [vmem:[#allocation4 + $0x248] sm:$0xff] %vm1395_vm9, %v1336_v36  ;;  %2567 = vmatmul.mubr.f32.gmra.mrb[32].mxu0 %v1978_v29  ;;  %v1756_v3 = vpop.permute.xlu0 %1755  ;;  %v2007_v29 = vld [vmem:[#allocation4 + $0x2f8] sm:$0xff] }
 0x210   : > { %1434 = vst.msk [vmem:[#allocation4 + $0x250] sm:$0xff] %vm1397_vm10, %v1336_v36  ;;  %2347 = vmatmul.mubr.f32.gmra.mrb[34].mxu1 %v1980_v42  ;;  %4149 = vmatprep.mubr.msk.f32.mxu0 %vm398_vm4, %v1983_v44  ;;  %v2000_v44 = vld [vmem:[#allocation4 + $0x2c0] sm:$0xff] }
 0x211   : > { %1641 = vst.msk [vmem:[#allocation4 + $0x250] sm:$0xff] %vm1622_vm11, %v1563_v45  ;;  %2941 = vrot.lane.b32.xlu1 %v2874_v41, %s4699_s25  ;;  %2947 = vrot.lane.b32.xlu0 %v2877_v4, %s4699_s25  ;;  %v2897_v41 = vld [vmem:[#allocation3 + $0xd0] sm:$0xff] }
 0x212   : > { %1834 = vst.msk [vmem:[#allocation4 + $0x250] sm:$0xff] %vm1815_vm12, %v1756_v3  ;;  %v1145_v30 = vpop.permute.xlu1 %1144  ;;  %v2896_v3 = vld [vmem:[#allocation3 + $0xc8] sm:$0xff] }
 0x213   : > { %1222 = vst.msk [vmem:[#allocation4 + $0x268] sm:$0xff] %vm1202_vm8, %v1145_v30  ;;  %v1982_v59 = vld [vmem:[#allocation4 + $0x230] sm:$0xff]  ;;  %v1565_v16 = vpop.permute.xlu0 %1564 }
 0x214   : > { %2572 = vmatmul.mubr.f32.gmra.mrb[34].mxu0 %v1982_v59 }
 0x215   : > { %4150 = vmatprep.mubr.msk.f32.mxu0 %vm398_vm4, %v1987_v12  ;;  %2945 = vrot.lane.b32.xlu1 %v2876_v10, %s4699_s25  ;;  %v2899_v12 = vld [vmem:[#allocation3 + $0xe0] sm:$0xff] }
 0x216   : > { %v1338_v39 = vpop.permute.xlu1 %1337  ;;  %v1985_v9 = vld [vmem:[#allocation4 + $0x248] sm:$0xff]  ;;  %2951 = vrot.lane.b32.xlu0 %v2879_v15, %s4699_s25  ;;  %v2004_v15 = vld [vmem:[#allocation4 + $0x2e0] sm:$0xff] }
 0x217   : > { %1435 = vst.msk [vmem:[#allocation4 + $0x268] sm:$0xff] %vm1395_vm9, %v1338_v39  ;;  %2351 = vmatprep.mubr.f32.mxu1 %v1985_v9  ;;  %v1758_v34 = vpop.permute.xlu0 %1757  ;;  %v2011_v9 = vld [vmem:[#allocation4 + $0x318] sm:$0xff] }
 0x218   : > { %1436 = vst.msk [vmem:[#allocation4 + $0x270] sm:$0xff] %vm1397_vm10, %v1338_v39  ;;  %2352 = vmatmul.mubr.f32.gmra.mrb[36].mxu1 %v1984_v6 }
 0x219   : > { %1642 = vst.msk [vmem:[#allocation4 + $0x270] sm:$0xff] %vm1622_vm11, %v1565_v16  ;;  %v1986_v18 = vld [vmem:[#allocation4 + $0x250] sm:$0xff]  ;;  %2949 = vrot.lane.b32.xlu1 %v2878_v58, %s4699_s25  ;;  %v2898_v16 = vld [vmem:[#allocation3 + $0xd8] sm:$0xff] }
 0x21a   : > { %1835 = vst.msk [vmem:[#allocation4 + $0x270] sm:$0xff] %vm1815_vm12, %v1758_v34  ;;  %2577 = vmatmul.mubr.f32.gmra.mrb[36].mxu0 %v1986_v18  ;;  %v1147_v7 = vpop.permute.xlu1 %1146  ;;  %2955 = vrot.lane.b32.xlu0 %v2881_v43, %s4699_s25  ;;  %v2901_v58 = vld [vmem:[#allocation3 + $0xf0] sm:$0xff] }
 0x21b   : > { %4151 = vmatprep.mubr.msk.f32.mxu0 %vm398_vm4, %v1991_v5  ;;  %1223 = vst.msk [vmem:[#allocation4 + $0x288] sm:$0xff] %vm1202_vm8, %v1147_v7  ;;  %v1567_v14 = vpop.permute.xlu0 %1566  ;;  %v2900_v5 = vld [vmem:[#allocation3 + $0xe8] sm:$0xff] }
 0x21d   : > { %2953 = vrot.lane.b32.xlu1 %v2880_v17, %s4699_s25  ;;  %v2902_v17 = vld [vmem:[#allocation3 + $0xf8] sm:$0xff] }
 0x21e   : > { %v1340_v21 = vpop.permute.xlu1 %1339  ;;  %v1989_v31 = vld [vmem:[#allocation4 + $0x268] sm:$0xff]  ;;  %2959 = vrot.lane.b32.xlu0 %v2883_v50, %s4699_s25 }
 0x21f   : > { %1437 = vst.msk [vmem:[#allocation4 + $0x288] sm:$0xff] %vm1395_vm9, %v1340_v21  ;;  %2356 = vmatprep.mubr.f32.mxu1 %v1989_v31  ;;  %v1760_v47 = vpop.permute.xlu0 %1759 }
 0x220   : > { %1438 = vst.msk [vmem:[#allocation4 + $0x290] sm:$0xff] %vm1397_vm10, %v1340_v21  ;;  %2357 = vmatmul.mubr.f32.gmra.mrb[38].mxu1 %v1988_v8  ;;  %v2015_v21 = vld [vmem:[#allocation4 + $0x338] sm:$0xff] }
 0x221   : > { %1643 = vst.msk [vmem:[#allocation4 + $0x290] sm:$0xff] %vm1622_vm11, %v1567_v14  ;;  %v1990_v61 = vld [vmem:[#allocation4 + $0x270] sm:$0xff]  ;;  %2957 = vrot.lane.b32.xlu1 %v2882_v51, %s4699_s25  ;;  %v2008_v14 = vld [vmem:[#allocation4 + $0x300] sm:$0xff] }
 0x222   : > { %1836 = vst.msk [vmem:[#allocation4 + $0x290] sm:$0xff] %vm1815_vm12, %v1760_v47  ;;  %2582 = vmatmul.mubr.f32.gmra.mrb[38].mxu0 %v1990_v61  ;;  %v1149_v11 = vpop.permute.xlu1 %1148  ;;  %2963 = vrot.lane.b32.xlu0 %v2885_v24, %s4699_s25  ;;  %v2012_v24 = vld [vmem:[#allocation4 + $0x320] sm:$0xff] }
 0x223   : > { %4152 = vmatprep.mubr.msk.f32.mxu0 %vm398_vm4, %v1995_v19  ;;  %1224 = vst.msk [vmem:[#allocation4 + $0x2a8] sm:$0xff] %vm1202_vm8, %v1149_v11  ;;  %v1569_v26 = vpop.permute.xlu0 %1568  ;;  %v2019_v11 = vld [vmem:[#allocation4 + $0x358] sm:$0xff] }
 0x225   : > { %2961 = vrot.lane.b32.xlu1 %v2884_v32, %s4699_s25 }
 0x226   : > { %v1342_v38 = vpop.permute.xlu1 %1341  ;;  %v1993_v37 = vld [vmem:[#allocation4 + $0x288] sm:$0xff]  ;;  %2967 = vrot.lane.b32.xlu0 %v2887_v20, %s4699_s25 }
 0x227   : > { %1439 = vst.msk [vmem:[#allocation4 + $0x2a8] sm:$0xff] %vm1395_vm9, %v1342_v38  ;;  %2361 = vmatprep.mubr.f32.mxu1 %v1993_v37  ;;  %v1762_v53 = vpop.permute.xlu0 %1761 }
 0x228   : > { %1440 = vst.msk [vmem:[#allocation4 + $0x2b0] sm:$0xff] %vm1397_vm10, %v1342_v38  ;;  %2362 = vmatmul.mubr.f32.gmra.mrb[40].mxu1 %v1992_v55 }
 0x229   : > { %1644 = vst.msk [vmem:[#allocation4 + $0x2b0] sm:$0xff] %vm1622_vm11, %v1569_v26  ;;  %v1994_v49 = vld [vmem:[#allocation4 + $0x290] sm:$0xff]  ;;  %2965 = vrot.lane.b32.xlu1 %v2886_v60, %s4699_s25  ;;  %v2016_v60 = vld [vmem:[#allocation4 + $0x340] sm:$0xff] }
 0x22a   : > { %1837 = vst.msk [vmem:[#allocation4 + $0x2b0] sm:$0xff] %vm1815_vm12, %v1762_v53  ;;  %2587 = vmatmul.mubr.f32.gmra.mrb[40].mxu0 %v1994_v49  ;;  %v1151_v22 = vpop.permute.xlu1 %1150  ;;  %2971 = vrot.lane.b32.xlu0 %v2889_v33, %s4699_s25  ;;  %v2023_v53 = vld [vmem:[#allocation4 + $0x378] sm:$0xff] }
 0x22b   : > { %4153 = vmatprep.mubr.msk.f32.mxu0 %vm398_vm4, %v1999_v46  ;;  %1225 = vst.msk [vmem:[#allocation4 + $0x2c8] sm:$0xff] %vm1202_vm8, %v1151_v22  ;;  %v1571_v0 = vpop.permute.xlu0 %1570 }
 0x22d   : > { %2969 = vrot.lane.b32.xlu1 %v2888_v23, %s4699_s25 }
 0x22e   : > { %v1344_v63 = vpop.permute.xlu1 %1343  ;;  %v1997_v62 = vld [vmem:[#allocation4 + $0x2a8] sm:$0xff]  ;;  %2975 = vrot.lane.b32.xlu0 %v2891_v28, %s4699_s25 }
 0x22f   : > { %1441 = vst.msk [vmem:[#allocation4 + $0x2c8] sm:$0xff] %vm1395_vm9, %v1344_v63  ;;  %2366 = vmatprep.mubr.f32.mxu1 %v1997_v62  ;;  %v1764_v52 = vpop.permute.xlu0 %1763 }
 0x230   : > { %1442 = vst.msk [vmem:[#allocation4 + $0x2d0] sm:$0xff] %vm1397_vm10, %v1344_v63  ;;  %2367 = vmatmul.mubr.f32.gmra.mrb[42].mxu1 %v1996_v40  ;;  %v2027_v63 = vld [vmem:[#allocation4 + $0x398] sm:$0xff] }
 0x231   : > { %1645 = vst.msk [vmem:[#allocation4 + $0x2d0] sm:$0xff] %vm1622_vm11, %v1571_v0  ;;  %v1998_v13 = vld [vmem:[#allocation4 + $0x2b0] sm:$0xff]  ;;  %2973 = vrot.lane.b32.xlu1 %v2890_v25, %s4699_s25  ;;  %v2020_v0 = vld [vmem:[#allocation4 + $0x360] sm:$0xff] }
 0x232   : > { %1838 = vst.msk [vmem:[#allocation4 + $0x2d0] sm:$0xff] %vm1815_vm12, %v1764_v52  ;;  %2592 = vmatmul.mubr.f32.gmra.mrb[42].mxu0 %v1998_v13  ;;  %v1153_v48 = vpop.permute.xlu1 %1152  ;;  %2979 = vrot.lane.b32.xlu0 %v2893_v27, %s4699_s25  ;;  %v2024_v27 = vld [vmem:[#allocation4 + $0x380] sm:$0xff] }
 0x233   : > { %4154 = vmatprep.mubr.msk.f32.mxu0 %vm398_vm4, %v2003_v57  ;;  %1226 = vst.msk [vmem:[#allocation4 + $0x2e8] sm:$0xff] %vm1202_vm8, %v1153_v48  ;;  %v1573_v54 = vpop.permute.xlu0 %1572  ;;  %v2031_v48 = vld [vmem:[#allocation4 + $0x3b8] sm:$0xff] }
 0x235   : > { %2977 = vrot.lane.b32.xlu1 %v2892_v2, %s4699_s25 }
 0x236   : > { %v1346_v1 = vpop.permute.xlu1 %1345  ;;  %v2001_v45 = vld [vmem:[#allocation4 + $0x2c8] sm:$0xff]  ;;  %2983 = vrot.lane.b32.xlu0 %v2895_v56, %s4699_s25 }
 0x237   : > { %1443 = vst.msk [vmem:[#allocation4 + $0x2e8] sm:$0xff] %vm1395_vm9, %v1346_v1  ;;  %2371 = vmatprep.mubr.f32.mxu1 %v2001_v45  ;;  %v1766_v36 = vpop.permute.xlu0 %1765 }
 0x238   : > { %1444 = vst.msk [vmem:[#allocation4 + $0x2f0] sm:$0xff] %vm1397_vm10, %v1346_v1  ;;  %2372 = vmatmul.mubr.f32.gmra.mrb[44].mxu1 %v2000_v44 }
 0x239   : > { %1646 = vst.msk [vmem:[#allocation4 + $0x2f0] sm:$0xff] %vm1622_vm11, %v1573_v54  ;;  %v2002_v4 = vld [vmem:[#allocation4 + $0x2d0] sm:$0xff]  ;;  %2981 = vrot.lane.b32.xlu1 %v2894_v35, %s4699_s25  ;;  %v2028_v35 = vld [vmem:[#allocation4 + $0x3a0] sm:$0xff] }
 0x23a   : > { %1839 = vst.msk [vmem:[#allocation4 + $0x2f0] sm:$0xff] %vm1815_vm12, %v1766_v36  ;;  %2597 = vmatmul.mubr.f32.gmra.mrb[44].mxu0 %v2002_v4  ;;  %v1155_v42 = vpop.permute.xlu1 %1154  ;;  %2987 = vrot.lane.b32.xlu0 %v2897_v41, %s4699_s25  ;;  %v2035_v36 = vld [vmem:[#allocation4 + $0x3d8] sm:$0xff] }
 0x23b   : > { %4155 = vmatprep.mubr.msk.f32.mxu0 %vm398_vm4, %v2007_v29  ;;  %1227 = vst.msk [vmem:[#allocation4 + $0x308] sm:$0xff] %vm1202_vm8, %v1155_v42  ;;  %v1575_v30 = vpop.permute.xlu0 %1574 }
 0x23d   : > { %2985 = vrot.lane.b32.xlu1 %v2896_v3, %s4699_s25 }
 0x23e   : > { %v1348_v10 = vpop.permute.xlu1 %1347  ;;  %v2005_v59 = vld [vmem:[#allocation4 + $0x2e8] sm:$0xff]  ;;  %2991 = vrot.lane.b32.xlu0 %v2899_v12, %s4699_s25  ;;  %v2039_v12 = vld [vmem:[#allocation4 + $0x3f8] sm:$0xff] }
 0x23f   : > { %1445 = vst.msk [vmem:[#allocation4 + $0x308] sm:$0xff] %vm1395_vm9, %v1348_v10  ;;  %2376 = vmatprep.mubr.f32.mxu1 %v2005_v59  ;;  %v1768_v39 = vpop.permute.xlu0 %1767 }
 0x240   : > { %1446 = vst.msk [vmem:[#allocation4 + $0x310] sm:$0xff] %vm1397_vm10, %v1348_v10  ;;  %2377 = vmatmul.mubr.f32.gmra.mrb[46].mxu1 %v2004_v15 }
 0x241   : > { %1647 = vst.msk [vmem:[#allocation4 + $0x310] sm:$0xff] %vm1622_vm11, %v1575_v30  ;;  %v2006_v6 = vld [vmem:[#allocation4 + $0x2f0] sm:$0xff]  ;;  %2989 = vrot.lane.b32.xlu1 %v2898_v16, %s4699_s25  ;;  %v2032_v30 = vld [vmem:[#allocation4 + $0x3c0] sm:$0xff] }
 0x242   : > { %1840 = vst.msk [vmem:[#allocation4 + $0x310] sm:$0xff] %vm1815_vm12, %v1768_v39  ;;  %2602 = vmatmul.mubr.f32.gmra.mrb[46].mxu0 %v2006_v6  ;;  %v1157_v34 = vpop.permute.xlu1 %1156  ;;  %2995 = vrot.lane.b32.xlu0 %v2901_v58, %s4699_s25  ;;  %v6156_v16 = vld [vmem:[%s7154_s2] ss:$0 sm:$0xff] }
 0x243   : > { %4156 = vmatprep.mubr.msk.f32.mxu0 %vm398_vm4, %v2011_v9  ;;  %1228 = vst.msk [vmem:[#allocation4 + $0x328] sm:$0xff] %vm1202_vm8, %v1157_v34  ;;  %v1577_v43 = vpop.permute.xlu0 %1576  ;;  %v2036_v9 = vld [vmem:[#allocation4 + $0x3e0] sm:$0xff] }
 0x245   : > { %2993 = vrot.lane.b32.xlu1 %v2900_v5, %s4699_s25 }
 0x246   : > { %v1350_v18 = vpop.permute.xlu1 %1349  ;;  %v2009_v7 = vld [vmem:[#allocation4 + $0x308] sm:$0xff] }
 0x247   : > { %1447 = vst.msk [vmem:[#allocation4 + $0x328] sm:$0xff] %vm1395_vm9, %v1350_v18  ;;  %2381 = vmatprep.mubr.f32.mxu1 %v2009_v7  ;;  %v1770_v50 = vpop.permute.xlu0 %1769 }
 0x248   : > { %1448 = vst.msk [vmem:[#allocation4 + $0x330] sm:$0xff] %vm1397_vm10, %v1350_v18  ;;  %2382 = vmatmul.mubr.f32.gmra.mrb[48].mxu1 %v2008_v14 }
 0x249   : > { %1648 = vst.msk [vmem:[#allocation4 + $0x330] sm:$0xff] %vm1622_vm11, %v1577_v43  ;;  %v2010_v31 = vld [vmem:[#allocation4 + $0x310] sm:$0xff]  ;;  %2997 = vrot.lane.b32.xlu1 %v2902_v17, %s4699_s25 }
 0x24a   : > { %1841 = vst.msk [vmem:[#allocation4 + $0x330] sm:$0xff] %vm1815_vm12, %v1770_v50  ;;  %2607 = vmatmul.mubr.f32.gmra.mrb[48].mxu0 %v2010_v31  ;;  %v1159_v51 = vpop.permute.xlu1 %1158 }
 0x24b   : > { %4157 = vmatprep.mubr.msk.f32.mxu0 %vm398_vm4, %v2015_v21  ;;  %1229 = vst.msk [vmem:[#allocation4 + $0x348] sm:$0xff] %vm1202_vm8, %v1159_v51  ;;  %v1579_v8 = vpop.permute.xlu0 %1578 }
 0x24e   : > { %v1352_v47 = vpop.permute.xlu1 %1351  ;;  %v2013_v19 = vld [vmem:[#allocation4 + $0x328] sm:$0xff] }
 0x24f   : > { %1449 = vst.msk [vmem:[#allocation4 + $0x348] sm:$0xff] %vm1395_vm9, %v1352_v47  ;;  %2386 = vmatprep.mubr.f32.mxu1 %v2013_v19  ;;  %v1772_v61 = vpop.permute.xlu0 %1771 }
 0x250   : > { %1450 = vst.msk [vmem:[#allocation4 + $0x350] sm:$0xff] %vm1397_vm10, %v1352_v47  ;;  %2387 = vmatmul.mubr.f32.gmra.mrb[50].mxu1 %v2012_v24 }
 0x251   : > { %1649 = vst.msk [vmem:[#allocation4 + $0x350] sm:$0xff] %vm1622_vm11, %v1579_v8  ;;  %v2014_v32 = vld [vmem:[#allocation4 + $0x330] sm:$0xff] }
 0x252   : > { %1842 = vst.msk [vmem:[#allocation4 + $0x350] sm:$0xff] %vm1815_vm12, %v1772_v61  ;;  %2612 = vmatmul.mubr.f32.gmra.mrb[50].mxu0 %v2014_v32  ;;  %v1161_v26 = vpop.permute.xlu1 %1160 }
 0x253   : > { %4158 = vmatprep.mubr.msk.f32.mxu0 %vm398_vm4, %v2019_v11  ;;  %1230 = vst.msk [vmem:[#allocation4 + $0x368] sm:$0xff] %vm1202_vm8, %v1161_v26  ;;  %v1581_v20 = vpop.permute.xlu0 %1580 }
 0x256   : > { %v1354_v38 = vpop.permute.xlu1 %1353  ;;  %v2017_v37 = vld [vmem:[#allocation4 + $0x348] sm:$0xff] }
 0x257   : > { %1451 = vst.msk [vmem:[#allocation4 + $0x368] sm:$0xff] %vm1395_vm9, %v1354_v38  ;;  %2391 = vmatprep.mubr.f32.mxu1 %v2017_v37  ;;  %v1774_v55 = vpop.permute.xlu0 %1773 }
 0x258   : > { %1452 = vst.msk [vmem:[#allocation4 + $0x370] sm:$0xff] %vm1397_vm10, %v1354_v38  ;;  %2392 = vmatmul.mubr.f32.gmra.mrb[52].mxu1 %v2016_v60 }
 0x259   : > { %1650 = vst.msk [vmem:[#allocation4 + $0x370] sm:$0xff] %vm1622_vm11, %v1581_v20  ;;  %v2018_v46 = vld [vmem:[#allocation4 + $0x350] sm:$0xff] }
 0x25a   : > { %1843 = vst.msk [vmem:[#allocation4 + $0x370] sm:$0xff] %vm1815_vm12, %v1774_v55  ;;  %2617 = vmatmul.mubr.f32.gmra.mrb[52].mxu0 %v2018_v46  ;;  %v1163_v33 = vpop.permute.xlu1 %1162 }
 0x25b   : > { %4159 = vmatprep.mubr.msk.f32.mxu0 %vm398_vm4, %v2023_v53  ;;  %1231 = vst.msk [vmem:[#allocation4 + $0x388] sm:$0xff] %vm1202_vm8, %v1163_v33  ;;  %v1583_v49 = vpop.permute.xlu0 %1582 }
 0x25e   : > { %v1356_v22 = vpop.permute.xlu1 %1355  ;;  %v2021_v23 = vld [vmem:[#allocation4 + $0x368] sm:$0xff] }
 0x25f   : > { %1453 = vst.msk [vmem:[#allocation4 + $0x388] sm:$0xff] %vm1395_vm9, %v1356_v22  ;;  %2396 = vmatprep.mubr.f32.mxu1 %v2021_v23  ;;  %v1776_v28 = vpop.permute.xlu0 %1775 }
 0x260   : > { %1454 = vst.msk [vmem:[#allocation4 + $0x390] sm:$0xff] %vm1397_vm10, %v1356_v22  ;;  %2397 = vmatmul.mubr.f32.gmra.mrb[54].mxu1 %v2020_v0 }
 0x261   : > { %1651 = vst.msk [vmem:[#allocation4 + $0x390] sm:$0xff] %vm1622_vm11, %v1583_v49  ;;  %v2022_v62 = vld [vmem:[#allocation4 + $0x370] sm:$0xff] }
 0x262   : > { %1844 = vst.msk [vmem:[#allocation4 + $0x390] sm:$0xff] %vm1815_vm12, %v1776_v28  ;;  %2622 = vmatmul.mubr.f32.gmra.mrb[54].mxu0 %v2022_v62  ;;  %v1165_v25 = vpop.permute.xlu1 %1164 }
 0x263   : > { %4160 = vmatprep.mubr.msk.f32.mxu0 %vm398_vm4, %v2027_v63  ;;  %1232 = vst.msk [vmem:[#allocation4 + $0x3a8] sm:$0xff] %vm1202_vm8, %v1165_v25  ;;  %v1585_v40 = vpop.permute.xlu0 %1584 }
 0x266   : > { %v1358_v52 = vpop.permute.xlu1 %1357  ;;  %v2025_v57 = vld [vmem:[#allocation4 + $0x388] sm:$0xff] }
 0x267   : > { %1455 = vst.msk [vmem:[#allocation4 + $0x3a8] sm:$0xff] %vm1395_vm9, %v1358_v52  ;;  %2401 = vmatprep.mubr.f32.mxu1 %v2025_v57  ;;  %v1778_v13 = vpop.permute.xlu0 %1777 }
 0x268   : > { %1456 = vst.msk [vmem:[#allocation4 + $0x3b0] sm:$0xff] %vm1397_vm10, %v1358_v52  ;;  %2402 = vmatmul.mubr.f32.gmra.mrb[56].mxu1 %v2024_v27 }
 0x269   : > { %1652 = vst.msk [vmem:[#allocation4 + $0x3b0] sm:$0xff] %vm1622_vm11, %v1585_v40  ;;  %v2026_v2 = vld [vmem:[#allocation4 + $0x390] sm:$0xff] }
 0x26a   : > { %1845 = vst.msk [vmem:[#allocation4 + $0x3b0] sm:$0xff] %vm1815_vm12, %v1778_v13  ;;  %2627 = vmatmul.mubr.f32.gmra.mrb[56].mxu0 %v2026_v2  ;;  %v1167_v54 = vpop.permute.xlu1 %1166 }
 0x26b   : > { %4161 = vmatprep.mubr.msk.f32.mxu0 %vm398_vm4, %v2031_v48  ;;  %1233 = vst.msk [vmem:[#allocation4 + $0x3c8] sm:$0xff] %vm1202_vm8, %v1167_v54  ;;  %v1587_v56 = vpop.permute.xlu0 %1586 }
 0x26e   : > { %v1360_v1 = vpop.permute.xlu1 %1359  ;;  %v2029_v45 = vld [vmem:[#allocation4 + $0x3a8] sm:$0xff] }
 0x26f   : > { %1457 = vst.msk [vmem:[#allocation4 + $0x3c8] sm:$0xff] %vm1395_vm9, %v1360_v1  ;;  %2406 = vmatprep.mubr.f32.mxu1 %v2029_v45  ;;  %v1780_v44 = vpop.permute.xlu0 %1779 }
 0x270   : > { %1458 = vst.msk [vmem:[#allocation4 + $0x3d0] sm:$0xff] %vm1397_vm10, %v1360_v1  ;;  %2407 = vmatmul.mubr.f32.gmra.mrb[58].mxu1 %v2028_v35 }
 0x271   : > { %1653 = vst.msk [vmem:[#allocation4 + $0x3d0] sm:$0xff] %vm1622_vm11, %v1587_v56  ;;  %v2030_v29 = vld [vmem:[#allocation4 + $0x3b0] sm:$0xff] }
 0x272   : > { %1846 = vst.msk [vmem:[#allocation4 + $0x3d0] sm:$0xff] %vm1815_vm12, %v1780_v44  ;;  %2632 = vmatmul.mubr.f32.gmra.mrb[58].mxu0 %v2030_v29  ;;  %v1169_v41 = vpop.permute.xlu1 %1168 }
 0x273   : > { %4162 = vmatprep.mubr.msk.f32.mxu0 %vm398_vm4, %v2035_v36  ;;  %1234 = vst.msk [vmem:[#allocation4 + $0x3e8] sm:$0xff] %vm1202_vm8, %v1169_v41  ;;  %v1589_v4 = vpop.permute.xlu0 %1588 }
 0x276   : > { %v1362_v42 = vpop.permute.xlu1 %1361  ;;  %v2033_v3 = vld [vmem:[#allocation4 + $0x3c8] sm:$0xff] }
 0x277   : > { %1459 = vst.msk [vmem:[#allocation4 + $0x3e8] sm:$0xff] %vm1395_vm9, %v1362_v42  ;;  %2411 = vmatprep.mubr.f32.mxu1 %v2033_v3 }
 0x278   : > { %1460 = vst.msk [vmem:[#allocation4 + $0x3f0] sm:$0xff] %vm1397_vm10, %v1362_v42  ;;  %2412 = vmatmul.mubr.f32.gmra.mrb[60].mxu1 %v2032_v30 }
 0x279   : > { %1654 = vst.msk [vmem:[#allocation4 + $0x3f0] sm:$0xff] %vm1622_vm11, %v1589_v4  ;;  %v2034_v10 = vld [vmem:[#allocation4 + $0x3d0] sm:$0xff] }
 0x27a   : > { %2637 = vmatmul.mubr.f32.gmra.mrb[60].mxu0 %v2034_v10  ;;  %v1782_v59 = vpop.permute.xlu1 %1781 }
 0x27b   : > { %4163 = vmatprep.mubr.msk.f32.mxu0 %vm398_vm4, %v2039_v12  ;;  %1847 = vst.msk [vmem:[#allocation4 + $0x3f0] sm:$0xff] %vm1815_vm12, %v1782_v59 }
 0x27e   : > { %v2037_v15 = vld [vmem:[#allocation4 + $0x3e8] sm:$0xff] }
 0x27f   : > { %v2263_v39 = vpop.f32.mrb[0].mxu1  ;;  %2416 = vmatprep.mubr.f32.mxu1 %v2037_v15 }
 0x280   : > { %v2264_v58 = vadd.f32 %v6156_v16, %v2263_v39  ;;  %v2265_v6 = vpop.f32.mrb[1].mxu1  ;;  %2417 = vmatmul.mubr.f32.gmra.mrb[62].mxu1 %v2036_v9 }
 0x282   : > { %v2488_v34 = vpop.f32.mrb[0].mxu0  ;;  %v2038_v5 = vld [vmem:[#allocation4 + $0x3f0] sm:$0xff] }
 0x283   : > { %v6159_v43 = vadd.f32 %v2488_v34, %v2264_v58  ;;  %v2268_v18 = vpop.f32.mrb[2].mxu1  ;;  %v2490_v7 = vpop.f32.mrb[1].mxu0  ;;  %2642 = vmatmul.mubr.f32.gmra.mrb[62].mxu0 %v2038_v5 }
 0x284   : > { %v2270_v17 = vpop.f32.mrb[3].mxu1  ;;  %v2269_v14 = vadd.f32 %v6156_v16, %v2268_v18 }
 0x285   : > { %4392 = vtanh.f32 %v6159_v43 }
 0x287   : > { %v2493_v50 = vpop.f32.mrb[2].mxu0 }
 0x288   : > { %v6163_v21 = vadd.f32 %v2493_v50, %v2269_v14  ;;  %v2495_v31 = vpop.f32.mrb[3].mxu0 }
 0x28a   : > { %4394 = vtanh.f32 %v6163_v21 }
 0x28b   : > { %v2273_v51 = vpop.f32.mrb[4].mxu1 }
 0x28c   : > { %v2274_v8 = vadd.f32 %v6156_v16, %v2273_v51  ;;  %v2275_v47 = vpop.f32.mrb[5].mxu1 }
 0x28e   : > { %v2498_v19 = vpop.f32.mrb[4].mxu0 }
 0x28f   : > { %v4393_v24 = vpop.eup %4392  ;;  %v6167_v61 = vadd.f32 %v2498_v19, %v2274_v8  ;;  %v2278_v11 = vpop.f32.mrb[6].mxu1 }
 0x290   : > { %v2500_v32 = vpop.f32.mrb[5].mxu0  ;;  %3095 = vrot.lane.b32.xlu0 %v4393_v24, %s4699_s25  ;;  %v2280_v26 = vpop.f32.mrb[7].mxu1  ;;  %v2279_v20 = vadd.f32 %v6156_v16, %v2278_v11 }
 0x291   : > { %4396 = vtanh.f32 %v6167_v61 }
 0x293   : > { %v2503_v38 = vpop.f32.mrb[6].mxu0 }
 0x294   : > { %v4395_v37 = vpop.eup %4394  ;;  %v6172_v60 = vadd.f32 %v2503_v38, %v2279_v20  ;;  %v2505_v55 = vpop.f32.mrb[7].mxu0 }
 0x295   : > { %3097 = vrot.lane.b32.xlu1 %v4395_v37, %s4699_s25 }
 0x296   : > { %4398 = vtanh.f32 %v6172_v60 }
 0x297   : > { %v2283_v53 = vpop.f32.mrb[8].mxu1 }
 0x298   : > { %v2284_v46 = vadd.f32 %v6156_v16, %v2283_v53  ;;  %v2285_v33 = vpop.f32.mrb[9].mxu1 }
 0x29a   : > { %v2508_v49 = vpop.f32.mrb[8].mxu0 }
 0x29b   : > { %v4397_v22 = vpop.eup %4396  ;;  %v6177_v23 = vadd.f32 %v2508_v49, %v2284_v46  ;;  %v2288_v0 = vpop.f32.mrb[10].mxu1 }
 0x29c   : > { %v2510_v28 = vpop.f32.mrb[9].mxu0  ;;  %v2290_v63 = vpop.f32.mrb[11].mxu1  ;;  %3099 = vrot.lane.b32.xlu0 %v4397_v22, %s4699_s25  ;;  %v2289_v62 = vadd.f32 %v6156_v16, %v2288_v0 }
 0x29d   : > { %4400 = vtanh.f32 %v6177_v23 }
 0x29f   : > { %v2513_v25 = vpop.f32.mrb[10].mxu0 }
 0x2a0   : > { %v4399_v40 = vpop.eup %4398  ;;  %v6182_v52 = vadd.f32 %v2513_v25, %v2289_v62  ;;  %v2515_v57 = vpop.f32.mrb[11].mxu0 }
 0x2a1   : > { %3101 = vrot.lane.b32.xlu1 %v4399_v40, %s4699_s25 }
 0x2a2   : > { %4402 = vtanh.f32 %v6182_v52 }
 0x2a3   : > { %v2293_v27 = vpop.f32.mrb[12].mxu1 }
 0x2a4   : > { %v2294_v13 = vadd.f32 %v6156_v16, %v2293_v27  ;;  %v2295_v48 = vpop.f32.mrb[13].mxu1 }
 0x2a6   : > { %v2518_v2 = vpop.f32.mrb[12].mxu0 }
 0x2a7   : > { %v4401_v54 = vpop.eup %4400  ;;  %v6187_v56 = vadd.f32 %v2518_v2, %v2294_v13  ;;  %v2298_v1 = vpop.f32.mrb[14].mxu1 }
 0x2a8   : > { %v2520_v45 = vpop.f32.mrb[13].mxu0  ;;  %v2300_v35 = vpop.f32.mrb[15].mxu1  ;;  %3103 = vrot.lane.b32.xlu0 %v4401_v54, %s4699_s25  ;;  %v2299_v44 = vadd.f32 %v6156_v16, %v2298_v1 }
 0x2a9   : > { %4404 = vtanh.f32 %v6187_v56 }
 0x2ab   : > { %v2523_v36 = vpop.f32.mrb[14].mxu0 }
 0x2ac   : > { %v4403_v29 = vpop.eup %4402  ;;  %v6192_v41 = vadd.f32 %v2523_v36, %v2299_v44  ;;  %v2525_v4 = vpop.f32.mrb[15].mxu0 }
 0x2ad   : > { %3105 = vrot.lane.b32.xlu1 %v4403_v29, %s4699_s25 }
 0x2ae   : > { %4406 = vtanh.f32 %v6192_v41 }
 0x2af   : > { %v2303_v42 = vpop.f32.mrb[16].mxu1 }
 0x2b0   : > { %v2304_v3 = vadd.f32 %v6156_v16, %v2303_v42  ;;  %v2305_v30 = vpop.f32.mrb[17].mxu1 }
 0x2b2   : > { %v2528_v12 = vpop.f32.mrb[16].mxu0 }
 0x2b3   : > { %v4405_v10 = vpop.eup %4404  ;;  %v6197_v59 = vadd.f32 %v2528_v12, %v2304_v3  ;;  %v2308_v15 = vpop.f32.mrb[18].mxu1 }
 0x2b4   : > { %v2530_v39 = vpop.f32.mrb[17].mxu0  ;;  %v2310_v9 = vpop.f32.mrb[19].mxu1  ;;  %3107 = vrot.lane.b32.xlu0 %v4405_v10, %s4699_s25  ;;  %v2309_v58 = vadd.f32 %v6156_v16, %v2308_v15 }
 0x2b5   : > { %4408 = vtanh.f32 %v6197_v59 }
 0x2b7   : > { %v2533_v6 = vpop.f32.mrb[18].mxu0 }
 0x2b8   : > { %v4407_v34 = vpop.eup %4406  ;;  %v6202_v5 = vadd.f32 %v2533_v6, %v2309_v58  ;;  %v2535_v18 = vpop.f32.mrb[19].mxu0 }
 0x2b9   : > { %3109 = vrot.lane.b32.xlu1 %v4407_v34, %s4699_s25 }
 0x2ba   : > { %4410 = vtanh.f32 %v6202_v5 }
 0x2bb   : > { %v2313_v7 = vpop.f32.mrb[20].mxu1 }
 0x2bc   : > { %v2314_v17 = vadd.f32 %v6156_v16, %v2313_v7  ;;  %v2315_v14 = vpop.f32.mrb[21].mxu1 }
 0x2be   : > { %v2538_v50 = vpop.f32.mrb[20].mxu0 }
 0x2bf   : > { %v4409_v31 = vpop.eup %4408  ;;  %v6207_v51 = vadd.f32 %v2538_v50, %v2314_v17  ;;  %v2318_v8 = vpop.f32.mrb[22].mxu1 }
 0x2c0   : > { %v2540_v47 = vpop.f32.mrb[21].mxu0  ;;  %v2320_v19 = vpop.f32.mrb[23].mxu1  ;;  %3111 = vrot.lane.b32.xlu0 %v4409_v31, %s4699_s25  ;;  %v2319_v24 = vadd.f32 %v6156_v16, %v2318_v8 }
 0x2c1   : > { %4412 = vtanh.f32 %v6207_v51 }
 0x2c3   : > { %v2543_v11 = vpop.f32.mrb[22].mxu0 }
 0x2c4   : > { %v4411_v32 = vpop.eup %4410  ;;  %v6212_v26 = vadd.f32 %v2543_v11, %v2319_v24  ;;  %v2545_v20 = vpop.f32.mrb[23].mxu0 }
 0x2c5   : > { %3113 = vrot.lane.b32.xlu1 %v4411_v32, %s4699_s25 }
 0x2c6   : > { %4414 = vtanh.f32 %v6212_v26 }
 0x2c7   : > { %v2323_v38 = vpop.f32.mrb[24].mxu1 }
 0x2c8   : > { %v2324_v37 = vadd.f32 %v6156_v16, %v2323_v38  ;;  %v2325_v55 = vpop.f32.mrb[25].mxu1 }
 0x2ca   : > { %v2548_v53 = vpop.f32.mrb[24].mxu0 }
 0x2cb   : > { %v4413_v46 = vpop.eup %4412  ;;  %v6217_v33 = vadd.f32 %v2548_v53, %v2324_v37  ;;  %v2328_v49 = vpop.f32.mrb[26].mxu1 }
 0x2cc   : > { %v2550_v22 = vpop.f32.mrb[25].mxu0  ;;  %v2330_v0 = vpop.f32.mrb[27].mxu1  ;;  %3115 = vrot.lane.b32.xlu0 %v4413_v46, %s4699_s25  ;;  %v2329_v28 = vadd.f32 %v6156_v16, %v2328_v49 }
 0x2cd   : > { %4416 = vtanh.f32 %v6217_v33 }
 0x2cf   : > { %v2553_v63 = vpop.f32.mrb[26].mxu0 }
 0x2d0   : > { %v4415_v62 = vpop.eup %4414  ;;  %v6222_v25 = vadd.f32 %v2553_v63, %v2329_v28  ;;  %v2555_v40 = vpop.f32.mrb[27].mxu0 }
 0x2d1   : > { %3117 = vrot.lane.b32.xlu1 %v4415_v62, %s4699_s25 }
 0x2d2   : > { %4418 = vtanh.f32 %v6222_v25 }
 0x2d3   : > { %v2333_v57 = vpop.f32.mrb[28].mxu1 }
 0x2d4   : > { %v2334_v27 = vadd.f32 %v6156_v16, %v2333_v57  ;;  %v2335_v13 = vpop.f32.mrb[29].mxu1 }
 0x2d6   : > { %v2558_v48 = vpop.f32.mrb[28].mxu0 }
 0x2d7   : > { %v4417_v2 = vpop.eup %4416  ;;  %v6227_v54 = vadd.f32 %v2558_v48, %v2334_v27  ;;  %v2338_v1 = vpop.f32.mrb[30].mxu1 }
 0x2d8   : > { %v2560_v45 = vpop.f32.mrb[29].mxu0  ;;  %v2340_v35 = vpop.f32.mrb[31].mxu1  ;;  %3119 = vrot.lane.b32.xlu0 %v4417_v2, %s4699_s25  ;;  %v2339_v44 = vadd.f32 %v6156_v16, %v2338_v1 }
 0x2d9   : > { %4420 = vtanh.f32 %v6227_v54  ;;  %v6261_v27 = vpop.permute.xlu0 %2935 }
 0x2db   : > { %v2563_v36 = vpop.f32.mrb[30].mxu0 }
 0x2dc   : > { %v4419_v29 = vpop.eup %4418  ;;  %v6232_v4 = vadd.f32 %v2563_v36, %v2339_v44  ;;  %v2565_v42 = vpop.f32.mrb[31].mxu0 }
 0x2dd   : > { %3121 = vrot.lane.b32.xlu1 %v4419_v29, %s4699_s25  ;;  %v6267_v44 = vpop.permute.xlu0 %2939  ;;  %v6270_v29 = vpop.permute.xlu1 %2937 }
 0x2de   : > { %4422 = vtanh.f32 %v6232_v4 }
 0x2df   : > { %v2343_v3 = vpop.f32.mrb[32].mxu1 }
 0x2e0   : > { %v2344_v30 = vadd.f32 %v6156_v16, %v2343_v3  ;;  %v2345_v12 = vpop.f32.mrb[33].mxu1 }
 0x2e1   : > { %v6272_v42 = vpop.permute.xlu0 %2943 }
 0x2e2   : > { %v2568_v10 = vpop.f32.mrb[32].mxu0 }
 0x2e3   : > { %v4421_v15 = vpop.eup %4420  ;;  %v6237_v39 = vadd.f32 %v2568_v10, %v2344_v30  ;;  %v2570_v9 = vpop.f32.mrb[33].mxu0 }
 0x2e4   : > { %v2348_v58 = vpop.f32.mrb[34].mxu1  ;;  %3123 = vrot.lane.b32.xlu0 %v4421_v15, %s4699_s25  ;;  %v6276_v9 = vpop.permute.xlu1 %2941 }
 0x2e5   : > { %v2350_v6 = vpop.f32.mrb[35].mxu1  ;;  %4424 = vtanh.f32 %v6237_v39  ;;  %v2349_v34 = vadd.f32 %v6156_v16, %v2348_v58 }
 0x2e6   : > { %v6280_v6 = vpop.permute.xlu0 %2947 }
 0x2e7   : > { %v2573_v18 = vpop.f32.mrb[34].mxu0 }
 0x2e8   : > { %v4423_v7 = vpop.eup %4422  ;;  %v6242_v17 = vadd.f32 %v2573_v18, %v2349_v34  ;;  %v2575_v14 = vpop.f32.mrb[35].mxu0 }
 0x2e9   : > { %3125 = vrot.lane.b32.xlu1 %v4423_v7, %s4699_s25  ;;  %v6283_v18 = vpop.permute.xlu1 %2945 }
 0x2ea   : > { %4426 = vtanh.f32 %v6242_v17  ;;  %v6285_v7 = vpop.permute.xlu0 %2951 }
 0x2eb   : > { %v2353_v50 = vpop.f32.mrb[36].mxu1 }
 0x2ec   : > { %v2354_v31 = vadd.f32 %v6156_v16, %v2353_v50  ;;  %v2355_v8 = vpop.f32.mrb[37].mxu1 }
 0x2ed   : > { %v2578_v47 = vpop.f32.mrb[36].mxu0 }
 0x2ee   : > { %v2580_v19 = vpop.f32.mrb[37].mxu0  ;;  %v6247_v24 = vadd.f32 %v2578_v47, %v2354_v31 }
 0x2ef   : > { %v4425_v11 = vpop.eup %4424 }
 0x2f0   : > { %4428 = vtanh.f32 %v6247_v24  ;;  %3127 = vrot.lane.b32.xlu0 %v4425_v11, %s4699_s25  ;;  %v6291_v11 = vpop.permute.xlu1 %2949 }
 0x2f3   : > { %v2358_v32 = vpop.f32.mrb[38].mxu1 }
 0x2f4   : > { %v4427_v20 = vpop.eup %4426  ;;  %v2359_v38 = vadd.f32 %v6156_v16, %v2358_v32  ;;  %v2360_v37 = vpop.f32.mrb[39].mxu1 }
 0x2f5   : > { %v2583_v55 = vpop.f32.mrb[38].mxu0  ;;  %3129 = vrot.lane.b32.xlu1 %v4427_v20, %s4699_s25  ;;  %v6293_v32 = vpop.permute.xlu0 %2955 }
 0x2f6   : > { %v2585_v53 = vpop.f32.mrb[39].mxu0  ;;  %v6253_v46 = vadd.f32 %v2583_v55, %v2359_v38  ;;  %v6296_v38 = vpop.permute.xlu1 %2953 }
 0x2f8   : > { %4430 = vtanh.f32 %v6253_v46 }
 0x2fa   : > { %v4429_v49 = vpop.eup %4428 }
 0x2fb   : > { %v2363_v22 = vpop.f32.mrb[40].mxu1  ;;  %3131 = vrot.lane.b32.xlu0 %v4429_v49, %s4699_s25 }
 0x2fc   : > { %v2364_v0 = vadd.f32 %v6156_v16, %v2363_v22  ;;  %v2365_v28 = vpop.f32.mrb[41].mxu1  ;;  %v6300_v22 = vpop.permute.xlu0 %2959 }
 0x2fd   : > { %v2588_v63 = vpop.f32.mrb[40].mxu0 }
 0x2fe   : > { %v2590_v62 = vpop.f32.mrb[41].mxu0  ;;  %v6258_v40 = vadd.f32 %v2588_v63, %v2364_v0  ;;  %v6305_v63 = vpop.permute.xlu1 %2957 }
 0x300   : > { %4432 = vtanh.f32 %v6258_v40 }
 0x302   : > { %v4431_v57 = vpop.eup %4430 }
 0x303   : > { %v2368_v13 = vpop.f32.mrb[42].mxu1  ;;  %3133 = vrot.lane.b32.xlu1 %v4431_v57, %s4699_s25  ;;  %v6307_v57 = vpop.permute.xlu0 %2963 }
 0x304   : > { %v2369_v48 = vadd.f32 %v6156_v16, %v2368_v13  ;;  %v2370_v2 = vpop.f32.mrb[43].mxu1 }
 0x305   : > { %v2593_v1 = vpop.f32.mrb[42].mxu0 }
 0x306   : > { %v2595_v45 = vpop.f32.mrb[43].mxu0  ;;  %v6265_v35 = vadd.f32 %v2593_v1, %v2369_v48 }
 0x308   : > { %4434 = vtanh.f32 %v6265_v35 }
 0x30a   : > { %v4433_v36 = vpop.eup %4432 }
 0x30b   : > { %v2373_v3 = vpop.f32.mrb[44].mxu1  ;;  %3135 = vrot.lane.b32.xlu0 %v4433_v36, %s4699_s25 }
 0x30c   : > { %v2374_v30 = vadd.f32 %v6156_v16, %v2373_v3  ;;  %v2375_v12 = vpop.f32.mrb[45].mxu1  ;;  %v6313_v3 = vpop.permute.xlu1 %2961 }
 0x30d   : > { %v2598_v10 = vpop.f32.mrb[44].mxu0 }
 0x30e   : > { %v2600_v15 = vpop.f32.mrb[45].mxu0  ;;  %v6278_v58 = vadd.f32 %v2598_v10, %v2374_v30  ;;  %v6316_v30 = vpop.permute.xlu0 %2967 }
 0x310   : > { %4436 = vtanh.f32 %v6278_v58 }
 0x312   : > { %v4435_v34 = vpop.eup %4434 }
 0x313   : > { %v2378_v14 = vpop.f32.mrb[46].mxu1  ;;  %3137 = vrot.lane.b32.xlu1 %v4435_v34, %s4699_s25 }
 0x314   : > { %v2379_v50 = vadd.f32 %v6156_v16, %v2378_v14  ;;  %v2380_v31 = vpop.f32.mrb[47].mxu1 }
 0x315   : > { %v2603_v8 = vpop.f32.mrb[46].mxu0 }
 0x316   : > { %v2605_v47 = vpop.f32.mrb[47].mxu0  ;;  %v6289_v19 = vadd.f32 %v2603_v8, %v2379_v50  ;;  %v6320_v50 = vpop.permute.xlu1 %2965 }
 0x317   : > { %v6324_v47 = vpop.permute.xlu0 %2971 }
 0x318   : > { %4438 = vtanh.f32 %v6289_v19 }
 0x31a   : > { %v4437_v20 = vpop.eup %4436 }
 0x31b   : > { %v2383_v37 = vpop.f32.mrb[48].mxu1  ;;  %3139 = vrot.lane.b32.xlu0 %v4437_v20, %s4699_s25 }
 0x31c   : > { %v2384_v55 = vadd.f32 %v6156_v16, %v2383_v37  ;;  %v2385_v53 = vpop.f32.mrb[49].mxu1  ;;  %v6327_v37 = vpop.permute.xlu1 %2969 }
 0x31d   : > { %v2608_v49 = vpop.f32.mrb[48].mxu0 }
 0x31e   : > { %v2610_v0 = vpop.f32.mrb[49].mxu0  ;;  %v6302_v28 = vadd.f32 %v2608_v49, %v2384_v55 }
 0x320   : > { %4440 = vtanh.f32 %v6302_v28 }
 0x322   : > { %v4439_v62 = vpop.eup %4438 }
 0x323   : > { %v2388_v13 = vpop.f32.mrb[50].mxu1  ;;  %3141 = vrot.lane.b32.xlu1 %v4439_v62, %s4699_s25  ;;  %v6331_v62 = vpop.permute.xlu0 %2975 }
 0x324   : > { %v2389_v48 = vadd.f32 %v6156_v16, %v2388_v13  ;;  %v2390_v2 = vpop.f32.mrb[51].mxu1 }
 0x325   : > { %v2613_v1 = vpop.f32.mrb[50].mxu0  ;;  %v6336_v2 = vpop.permute.xlu1 %2973 }
 0x326   : > { %v2615_v45 = vpop.f32.mrb[51].mxu0  ;;  %v6311_v36 = vadd.f32 %v2613_v1, %v2389_v48 }
 0x327   : > { %v4164_v45 = vmul.f32 -1.442695, %v6159_v43 }
 0x328   : > { %4442 = vtanh.f32 %v6311_v36 }
 0x32a   : > { %v4441_v12 = vpop.eup %4440 }
 0x32b   : > { %v2393_v10 = vpop.f32.mrb[52].mxu1  ;;  %3143 = vrot.lane.b32.xlu0 %v4441_v12, %s4699_s25  ;;  %v6339_v12 = vpop.permute.xlu0 %2979 }
 0x32c   : > { %v2394_v15 = vadd.f32 %v6156_v16, %v2393_v10  ;;  %v2395_v34 = vpop.f32.mrb[53].mxu1 }
 0x32d   : > { %v2618_v14 = vpop.f32.mrb[52].mxu0 }
 0x32e   : > { %v2620_v31 = vpop.f32.mrb[53].mxu0  ;;  %v6322_v8 = vadd.f32 %v2618_v14, %v2394_v15 }
 0x330   : > { %4444 = vtanh.f32 %v6322_v8 }
 0x332   : > { %v4443_v20 = vpop.eup %4442 }
 0x333   : > { %v2398_v55 = vpop.f32.mrb[54].mxu1  ;;  %3145 = vrot.lane.b32.xlu1 %v4443_v20, %s4699_s25 }
 0x334   : > { %v2399_v53 = vadd.f32 %v6156_v16, %v2398_v55  ;;  %v2400_v49 = vpop.f32.mrb[55].mxu1  ;;  %v6345_v55 = vpop.permute.xlu1 %2977 }
 0x335   : > { %v2623_v0 = vpop.f32.mrb[54].mxu0  ;;  %v4168_v49 = vmul.f32 -1.442695, %v6177_v23  ;;  %v4170_v23 = vmul.f32 -1.442695, %v6187_v56 }
 0x336   : > { %v2625_v13 = vpop.f32.mrb[55].mxu0  ;;  %v6333_v48 = vadd.f32 %v2623_v0, %v2399_v53  ;;  %v4166_v53 = vmul.f32 -1.442695, %v6167_v61  ;;  %v6350_v0 = vpop.permute.xlu0 %2983  ;;  %v4165_v61 = vmul.f32 -1.442695, %v6163_v21 }
 0x337   : > { %7167 = vst [vmem:[#allocation6_spill] sm:$0xff] %v6350_v0 }
 0x338   : > { %4446 = vtanh.f32 %v6333_v48 }
 0x339   : > { %4448 = vpow2.f32 %v4164_v45  ;;  %v6354_v45 = vpop.permute.xlu1 %2981 }
 0x33a   : > { %v4445_v1 = vpop.eup %4444  ;;  %7168 = vst [vmem:[#allocation5_spill] sm:$0xff] %v6354_v45 }
 0x33b   : > { %v2403_v10 = vpop.f32.mrb[56].mxu1  ;;  %3147 = vrot.lane.b32.xlu0 %v4445_v1, %s4699_s25 }
 0x33c   : > { %v2404_v15 = vadd.f32 %v6156_v16, %v2403_v10  ;;  %v2405_v34 = vpop.f32.mrb[57].mxu1 }
 0x33d   : > { %v2628_v14 = vpop.f32.mrb[56].mxu0  ;;  %v6365_v0 = vpop.permute.xlu1 %2985 }
 0x33e   : > { %v2630_v31 = vpop.f32.mrb[57].mxu0  ;;  %v6343_v20 = vadd.f32 %v2628_v14, %v2404_v15  ;;  %7170 = vst [vmem:[#allocation8_spill] sm:$0xff] %v6365_v0 }
 0x33f   : > { %v6360_v31 = vpop.permute.xlu0 %2987 }
 0x340   : > { %4450 = vtanh.f32 %v6343_v20  ;;  %7169 = vst [vmem:[#allocation7_spill] sm:$0xff] %v6360_v31 }
 0x341   : > { %4452 = vpow2.f32 %v4166_v53 }
 0x342   : > { %v4447_v43 = vpop.eup %4446  ;;  %4454 = vpow2.f32 %v4168_v49 }
 0x343   : > { %v2408_v13 = vpop.f32.mrb[58].mxu1  ;;  %3149 = vrot.lane.b32.xlu1 %v4447_v43, %s4699_s25  ;;  %v4449_v43 = vpop.eup %4448 }
 0x344   : > { %v2409_v1 = vadd.f32 %v6156_v16, %v2408_v13  ;;  %v2410_v10 = vpop.f32.mrb[59].mxu1  ;;  %v4167_v13 = vmul.f32 -1.442695, %v6172_v60  ;;  %v6370_v45 = vpop.permute.xlu0 %2991 }
 0x345   : > { %v2633_v15 = vpop.f32.mrb[58].mxu0  ;;  %v4172_v10 = vmul.f32 -1.442695, %v6197_v59  ;;  %7171 = vst [vmem:[#allocation9_spill] sm:$0xff] %v6370_v45  ;;  %v4174_v59 = vmul.f32 -1.442695, %v6207_v51 }
 0x346   : > { %v2635_v34 = vpop.f32.mrb[59].mxu0  ;;  %v6357_v14 = vadd.f32 %v2633_v15, %v2409_v1  ;;  %v2743_v1 = vadd.f32 1.0, %v4449_v43 }
 0x348   : > { %4456 = vtanh.f32 %v6357_v14  ;;  %v6381_v51 = vpop.permute.xlu0 %2995 }
 0x349   : > { %4458 = vpow2.f32 %v4165_v61  ;;  %v4169_v61 = vmul.f32 -1.442695, %v6182_v52  ;;  %7173 = vst [vmem:[#allocation11_spill] sm:$0xff] %v6381_v51 }
 0x34a   : > { %v4451_v53 = vpop.eup %4450  ;;  %4460 = vpow2.f32 %v4170_v23 }
 0x34b   : > { %v2413_v34 = vpop.f32.mrb[60].mxu1  ;;  %3151 = vrot.lane.b32.xlu0 %v4451_v53, %s4699_s25  ;;  %v4453_v31 = vpop.eup %4452  ;;  %4462 = vpow2.f32 %v4167_v13  ;;  %v4171_v13 = vmul.f32 -1.442695, %v6192_v41 }
 0x34c   : > { %v2414_v21 = vadd.f32 %v6156_v16, %v2413_v34  ;;  %v2415_v56 = vpop.f32.mrb[61].mxu1  ;;  %4464 = vpow2.f32 %v4172_v10  ;;  %v4455_v0 = vpop.eup %4454  ;;  %v2745_v23 = vadd.f32 1.0, %v4453_v31  ;;  %v4176_v10 = vmul.f32 -1.442695, %v6217_v33 }
 0x34d   : > { %v2638_v49 = vpop.f32.mrb[60].mxu0  ;;  %v6376_v53 = vpop.permute.xlu1 %2989  ;;  %v2747_v34 = vadd.f32 1.0, %v4455_v0  ;;  %v4178_v33 = vmul.f32 -1.442695, %v6227_v54 }
 0x34e   : > { %v2640_v15 = vpop.f32.mrb[61].mxu0  ;;  %v6372_v60 = vadd.f32 %v2638_v49, %v2414_v21  ;;  %7172 = vst [vmem:[#allocation10_spill] sm:$0xff] %v6376_v53 }
 0x350   : > { %4466 = vtanh.f32 %v6372_v60 }
 0x351   : > { %4468 = vrcp.f32 %v2743_v1  ;;  %v4173_v1 = vmul.f32 -1.442695, %v6202_v5  ;;  %v6385_v0 = vpop.permute.xlu1 %2993  ;;  %v4175_v5 = vmul.f32 -1.442695, %v6212_v26  ;;  %v4177_v26 = vmul.f32 -1.442695, %v6222_v25 }
 0x352   : > { %v4457_v43 = vpop.eup %4456  ;;  %4470 = vpow2.f32 %v4169_v61  ;;  %7174 = vst [vmem:[#allocation12_spill] sm:$0xff] %v6385_v0  ;;  %v4179_v25 = vmul.f32 -1.442695, %v6232_v4 }
 0x353   : > { %4472 = vpow2.f32 %v4174_v59  ;;  %v2418_v52 = vpop.f32.mrb[62].mxu1  ;;  %3153 = vrot.lane.b32.xlu1 %v4457_v43, %s4699_s25  ;;  %v4459_v21 = vpop.eup %4458 }
 0x354   : > { %v2419_v56 = vadd.f32 %v6156_v16, %v2418_v52  ;;  %v2420_v49 = vpop.f32.mrb[63].mxu1  ;;  %4474 = vrcp.f32 %v2745_v23  ;;  %v4461_v31 = vpop.eup %4460  ;;  %v2744_v41 = vadd.f32 1.0, %v4459_v21 }
 0x355   : > { %4476 = vpow2.f32 %v4171_v13  ;;  %v4463_v43 = vpop.eup %4462  ;;  %v2749_v16 = vadd.f32 1.0, %v4461_v31  ;;  %v3096_v13 = vpop.permute.xlu0 %3095 }
 0x356   : > { %v2643_v15 = vpop.f32.mrb[62].mxu0  ;;  %4478 = vrcp.f32 %v2747_v34  ;;  %v4465_v51 = vpop.eup %4464  ;;  %v2746_v34 = vadd.f32 1.0, %v4463_v43 }
 0x357   : > { %v6387_v61 = vadd.f32 %v2643_v15, %v2419_v56  ;;  %v2645_v59 = vpop.f32.mrb[63].mxu0  ;;  %4480 = vpow2.f32 %v4176_v10  ;;  %v4180_v10 = vmul.f32 -1.442695, %v6237_v39  ;;  %v2751_v56 = vadd.f32 1.0, %v4465_v51  ;;  %v6397_v31 = vpop.permute.xlu1 %2997 }
 0x358   : > { %7175 = vst [vmem:[#allocation13_spill] sm:$0xff] %v6397_v31  ;;  %v4182_v51 = vmul.f32 -1.442695, %v6247_v24 }
 0x359   : > { %4482 = vtanh.f32 %v6387_v61 }
 0x35a   : > { %v4467_v23 = vpop.eup %4466  ;;  %4484 = vpow2.f32 %v4173_v1  ;;  %v3100_v1 = vpop.permute.xlu0 %3099 }
 0x35b   : > { %v6392_v52 = vpop.eup %4468  ;;  %4486 = vrcp.f32 %v2744_v41  ;;  %3155 = vrot.lane.b32.xlu0 %v4467_v23, %s4699_s25 }
 0x35c   : > { %v4471_v21 = vpop.eup %4470  ;;  %4488 = vpow2.f32 %v4178_v33  ;;  %v3191_v49 = vmul.f32 %v6392_v52, %v3096_v13 }
 0x35d   : > { %v4473_v54 = vpop.eup %4472  ;;  %4490 = vrcp.f32 %v2749_v16  ;;  %v2748_v41 = vadd.f32 1.0, %v4471_v21 }
 0x35e   : > { %4492 = vpow2.f32 %v4175_v5  ;;  %v6400_v15 = vpop.eup %4474  ;;  %v2753_v43 = vadd.f32 1.0, %v4473_v54  ;;  %v3104_v23 = vpop.permute.xlu0 %3103 }
 0x35f   : > { %7176 = vst [vmem:[#allocation14_spill] sm:$0xff] %v6400_v15  ;;  %4494 = vrcp.f32 %v2746_v34  ;;  %3255 = vrot.lane.b32.xlu0 %v3191_v49, %s4699_s25  ;;  %v4477_v59 = vpop.eup %4476  ;;  %v3193_v33 = vmul.f32 %v6400_v15, %v3100_v1  ;;  %v3098_v34 = vpop.permute.xlu1 %3097  ;;  %v4181_v49 = vmul.f32 -1.442695, %v6242_v17 }
 0x360   : > { %4496 = vpow2.f32 %v4180_v10  ;;  %v6403_v39 = vpop.eup %4478  ;;  %v2750_v13 = vadd.f32 1.0, %v4477_v59  ;;  %v4184_v10 = vmul.f32 -1.442695, %v6258_v40 }
 0x361   : > { %4498 = vrcp.f32 %v2751_v56  ;;  %v4481_v16 = vpop.eup %4480  ;;  %v3195_v56 = vmul.f32 %v6403_v39, %v3104_v23 }
 0x362   : > { %4500 = vpow2.f32 %v4177_v26  ;;  %v2755_v54 = vadd.f32 1.0, %v4481_v16  ;;  %v3108_v1 = vpop.permute.xlu0 %3107 }
 0x363   : > { %v4483_v5 = vpop.eup %4482  ;;  %4502 = vrcp.f32 %v2748_v41  ;;  %3259 = vrot.lane.b32.xlu0 %v3193_v33, %s4699_s25  ;;  %v3102_v40 = vpop.permute.xlu1 %3101 }
 0x364   : > { %v4485_v21 = vpop.eup %4484  ;;  %4504 = vrcp.f32 %v2753_v43  ;;  %3157 = vrot.lane.b32.xlu1 %v4483_v5, %s4699_s25 }
 0x365   : > { %v6411_v24 = vpop.eup %4486  ;;  %4506 = vpow2.f32 %v4182_v51  ;;  %v2752_v59 = vadd.f32 1.0, %v4485_v21 }
 0x366   : > { %v4489_v4 = vpop.eup %4488  ;;  %4508 = vpow2.f32 %v4179_v25  ;;  %v3192_v26 = vmul.f32 %v6411_v24, %v3098_v34  ;;  %v4183_v25 = vmul.f32 -1.442695, %v6253_v46  ;;  %v3112_v5 = vpop.permute.xlu0 %3111 }
 0x367   : > { %v6416_v41 = vpop.eup %4490  ;;  %4510 = vrcp.f32 %v2750_v13  ;;  %3263 = vrot.lane.b32.xlu0 %v3195_v56, %s4699_s25  ;;  %v2757_v33 = vadd.f32 1.0, %v4489_v4  ;;  %v3106_v21 = vpop.permute.xlu1 %3105 }
 0x368   : > { %v4493_v43 = vpop.eup %4492  ;;  %4512 = vpow2.f32 %v4184_v10  ;;  %3257 = vrot.lane.b32.xlu1 %v3192_v26, %s4699_s25  ;;  %v3197_v17 = vmul.f32 %v6416_v41, %v3108_v1  ;;  %v4186_v26 = vmul.f32 -1.442695, %v6278_v58 }
 0x369   : > { %v6420_v51 = vpop.eup %4494  ;;  %4514 = vrcp.f32 %v2755_v54  ;;  %v2754_v34 = vadd.f32 1.0, %v4493_v43  ;;  %v4185_v54 = vmul.f32 -1.442695, %v6265_v35 }
 0x36a   : > { %v4497_v16 = vpop.eup %4496  ;;  %4516 = vpow2.f32 %v4181_v49  ;;  %v3194_v23 = vmul.f32 %v6420_v51, %v3102_v40 }
 0x36b   : > { %v6425_v13 = vpop.eup %4498  ;;  %4518 = vrcp.f32 %v2752_v59  ;;  %3267 = vrot.lane.b32.xlu0 %v3197_v17, %s4699_s25  ;;  %v2759_v4 = vadd.f32 1.0, %v4497_v16  ;;  %v3116_v59 = vpop.permute.xlu0 %3115 }
 0x36c   : > { %v4501_v10 = vpop.eup %4500  ;;  %3261 = vrot.lane.b32.xlu1 %v3194_v23, %s4699_s25  ;;  %4520 = vrcp.f32 %v2757_v33  ;;  %v3199_v46 = vmul.f32 %v6425_v13, %v3112_v5  ;;  %v3110_v35 = vpop.permute.xlu1 %3109 }
 0x36d   : > { %v6430_v56 = vpop.eup %4502  ;;  %4522 = vpow2.f32 %v4183_v25  ;;  %v2756_v43 = vadd.f32 1.0, %v4501_v10 }
 0x36e   : > { %v6433_v49 = vpop.eup %4504  ;;  %v3196_v1 = vmul.f32 %v6430_v56, %v3106_v21  ;;  %4524 = vrcp.f32 %v2754_v34 }
 0x36f   : > { %v4507_v40 = vpop.eup %4506  ;;  %3271 = vrot.lane.b32.xlu0 %v3199_v46, %s4699_s25  ;;  %4526 = vpow2.f32 %v4185_v54  ;;  %v3201_v16 = vmul.f32 %v6433_v49, %v3116_v59  ;;  %v3120_v5 = vpop.permute.xlu0 %3119 }
 0x370   : > { %v4509_v17 = vpop.eup %4508  ;;  %3265 = vrot.lane.b32.xlu1 %v3196_v1, %s4699_s25  ;;  %4528 = vrcp.f32 %v2759_v4  ;;  %v2761_v58 = vadd.f32 1.0, %v4507_v40  ;;  %v3114_v10 = vpop.permute.xlu1 %3113 }
 0x371   : > { %v6439_v33 = vpop.eup %4510  ;;  %4530 = vpow2.f32 %v4186_v26  ;;  %v2758_v21 = vadd.f32 1.0, %v4509_v17  ;;  %v4187_v26 = vmul.f32 -1.442695, %v6289_v19 }
 0x372   : > { %v4513_v25 = vpop.eup %4512  ;;  %v3198_v23 = vmul.f32 %v6439_v33, %v3110_v35  ;;  %4532 = vrcp.f32 %v2756_v43 }
 0x373   : > { %v6443_v34 = vpop.eup %4514  ;;  %3275 = vrot.lane.b32.xlu0 %v3201_v16, %s4699_s25  ;;  %v2763_v4 = vadd.f32 1.0, %v4513_v25  ;;  %4534 = vrcp.f32 %v2761_v58  ;;  %v3124_v40 = vpop.permute.xlu0 %3123 }
 0x374   : > { %v4517_v54 = vpop.eup %4516  ;;  %3269 = vrot.lane.b32.xlu1 %v3198_v23, %s4699_s25  ;;  %v3203_v1 = vmul.f32 %v6443_v34, %v3120_v5  ;;  %4536 = vrcp.f32 %v2758_v21  ;;  %v3118_v17 = vpop.permute.xlu1 %3117 }
 0x375   : > { %v6447_v46 = vpop.eup %4518  ;;  %v2760_v43 = vadd.f32 1.0, %v4517_v54  ;;  %4538 = vrcp.f32 %v2763_v4 }
 0x376   : > { %v3200_v59 = vmul.f32 %v6447_v46, %v3114_v10  ;;  %v6452_v35 = vpop.eup %4520  ;;  %4540 = vpow2.f32 %v4187_v26  ;;  %v4188_v26 = vmul.f32 -1.442695, %v6302_v28 }
 0x377   : > { %3279 = vrot.lane.b32.xlu0 %v3203_v1, %s4699_s25  ;;  %v4523_v16 = vpop.eup %4522  ;;  %v3205_v25 = vmul.f32 %v6452_v35, %v3124_v40  ;;  %v3128_v5 = vpop.permute.xlu0 %3127  ;;  %4542 = vrcp.f32 %v2760_v43 }
 0x378   : > { %3273 = vrot.lane.b32.xlu1 %v3200_v59, %s4699_s25  ;;  %v6456_v23 = vpop.eup %4524  ;;  %v2762_v21 = vadd.f32 1.0, %v4523_v16  ;;  %v3122_v54 = vpop.permute.xlu1 %3121 }
 0x379   : > { %v4527_v58 = vpop.eup %4526  ;;  %v3202_v19 = vmul.f32 %v6456_v23, %v3118_v17 }
 0x37a   : > { %v6460_v10 = vpop.eup %4528  ;;  %v2764_v4 = vadd.f32 1.0, %v4527_v58  ;;  %4544 = vrcp.f32 %v2762_v21 }
 0x37b   : > { %3283 = vrot.lane.b32.xlu0 %v3205_v25, %s4699_s25  ;;  %v4531_v1 = vpop.eup %4530  ;;  %v3207_v40 = vmul.f32 %v6460_v10, %v3128_v5  ;;  %v3132_v31 = vpop.permute.xlu0 %3131 }
 0x37c   : > { %3277 = vrot.lane.b32.xlu1 %v3202_v19, %s4699_s25  ;;  %v6464_v59 = vpop.eup %4532  ;;  %v2765_v0 = vadd.f32 1.0, %v4531_v1  ;;  %v3126_v43 = vpop.permute.xlu1 %3125  ;;  %4546 = vrcp.f32 %v2764_v4  ;;  %v4189_v4 = vmul.f32 -1.442695, %v6311_v36 }
 0x37d   : > { %v3204_v17 = vmul.f32 %v6464_v59, %v3122_v54  ;;  %v6470_v16 = vpop.eup %4534  ;;  %4548 = vpow2.f32 %v4188_v26 }
 0x37e   : > { %v6473_v25 = vpop.eup %4536  ;;  %v3209_v58 = vmul.f32 %v6470_v16, %v3132_v31  ;;  %4550 = vrcp.f32 %v2765_v0 }
 0x37f   : > { %3287 = vrot.lane.b32.xlu0 %v3207_v40, %s4699_s25  ;;  %v3206_v28 = vmul.f32 %v6473_v25, %v3126_v43  ;;  %v3136_v19 = vpop.permute.xlu0 %3135  ;;  %v6477_v5 = vpop.eup %4538  ;;  %4552 = vpow2.f32 %v4189_v4 }
 0x380   : > { %3281 = vrot.lane.b32.xlu1 %v3204_v17, %s4699_s25  ;;  %v3130_v21 = vpop.permute.xlu1 %3129  ;;  %v4541_v54 = vpop.eup %4540  ;;  %v3211_v40 = vmul.f32 %v6477_v5, %v3136_v19 }
 0x381   : > { %v6481_v1 = vpop.eup %4542  ;;  %v2766_v26 = vadd.f32 1.0, %v4541_v54  ;;  %v4190_v54 = vmul.f32 -1.442695, %v6322_v8 }
 0x382   : > { %7177 = vst [vmem:[#allocation15_spill] sm:$0xff] %v6481_v1  ;;  %v3208_v31 = vmul.f32 %v6481_v1, %v3130_v21 }
 0x383   : > { %3291 = vrot.lane.b32.xlu0 %v3209_v58, %s4699_s25  ;;  %4554 = vrcp.f32 %v2766_v26 }
 0x384   : > { %3285 = vrot.lane.b32.xlu1 %v3206_v28, %s4699_s25  ;;  %v3134_v17 = vpop.permute.xlu1 %3133  ;;  %v6488_v0 = vpop.eup %4544  ;;  %4556 = vpow2.f32 %v4190_v54  ;;  %v4192_v54 = vmul.f32 -1.442695, %v6343_v20 }
 0x385   : > { %v3210_v43 = vmul.f32 %v6488_v0, %v3134_v17 }
 0x386   : > { %v6491_v58 = vpop.eup %4546 }
 0x387   : > { %3295 = vrot.lane.b32.xlu0 %v3211_v40, %s4699_s25  ;;  %v4549_v19 = vpop.eup %4548 }
 0x388   : > { %3289 = vrot.lane.b32.xlu1 %v3208_v31, %s4699_s25  ;;  %v3138_v28 = vpop.permute.xlu1 %3137  ;;  %v6494_v36 = vpop.eup %4550  ;;  %v2767_v45 = vadd.f32 1.0, %v4549_v19 }
 0x389   : > { %v3212_v40 = vmul.f32 %v6491_v58, %v3138_v28  ;;  %v4553_v4 = vpop.eup %4552 }
 0x38a   : > { %4558 = vrcp.f32 %v2767_v45  ;;  %v2768_v8 = vadd.f32 1.0, %v4553_v4 }
 0x38c   : > { %3293 = vrot.lane.b32.xlu1 %v3210_v43, %s4699_s25  ;;  %v4191_v43 = vmul.f32 -1.442695, %v6333_v48 }
 0x38d   : > { %v3140_v21 = vpop.permute.xlu0 %3139  ;;  %v6501_v26 = vpop.eup %4554 }
 0x38e   : > { %v3213_v31 = vmul.f32 %v6494_v36, %v3140_v21  ;;  %4560 = vpow2.f32 %v4191_v43  ;;  %v4557_v28 = vpop.eup %4556 }
 0x38f   : > { %4562 = vrcp.f32 %v2768_v8 }
 0x390   : > { %3297 = vrot.lane.b32.xlu1 %v3212_v40, %s4699_s25  ;;  %3299 = vrot.lane.b32.xlu0 %v3213_v31, %s4699_s25  ;;  %v2769_v40 = vadd.f32 1.0, %v4557_v28  ;;  %4564 = vpow2.f32 %v4192_v54 }
 0x392   : > { %4566 = vrcp.f32 %v2769_v40 }
 0x394   : > { %v6506_v19 = vpop.eup %4558 }
 0x395   : > { %v3142_v17 = vpop.permute.xlu1 %3141 }
 0x396   : > { %v3214_v53 = vmul.f32 %v6501_v26, %v3142_v17 }
 0x398   : > { %3301 = vrot.lane.b32.xlu1 %v3214_v53, %s4699_s25  ;;  %v4561_v48 = vpop.eup %4560  ;;  %v4193_v53 = vmul.f32 -1.442695, %v6357_v14 }
 0x399   : > { %v6511_v31 = vpop.eup %4562  ;;  %v2770_v43 = vadd.f32 1.0, %v4561_v48 }
 0x39a   : > { %4568 = vpow2.f32 %v4193_v53  ;;  %v4565_v20 = vpop.eup %4564 }
 0x39b   : > { %4570 = vrcp.f32 %v2770_v43 }
 0x39c   : > { %v6516_v8 = vpop.eup %4566 }
 0x39d   : > { %v3144_v21 = vpop.permute.xlu0 %3143 }
 0x39e   : > { %v3215_v45 = vmul.f32 %v6506_v19, %v3144_v21  ;;  %v4194_v21 = vmul.f32 -1.442695, %v6372_v60 }
 0x3a0   : > { %3303 = vrot.lane.b32.xlu0 %v3215_v45, %s4699_s25  ;;  %v2771_v45 = vadd.f32 1.0, %v4565_v20  ;;  %4572 = vpow2.f32 %v4194_v21 }
 0x3a2   : > { %4574 = vrcp.f32 %v2771_v45 }
 0x3a4   : > { %v4569_v14 = vpop.eup %4568 }
 0x3a5   : > { %v3146_v4 = vpop.permute.xlu1 %3145  ;;  %v6521_v40 = vpop.eup %4570 }
 0x3a6   : > { %v3216_v17 = vmul.f32 %v6511_v31, %v3146_v4  ;;  %v2772_v4 = vadd.f32 1.0, %v4569_v14 }
 0x3a8   : > { %3305 = vrot.lane.b32.xlu1 %v3216_v17, %s4699_s25  ;;  %v4195_v17 = vmul.f32 -1.442695, %v6387_v61  ;;  %4576 = vrcp.f32 %v2772_v4 }
 0x3aa   : > { %4578 = vpow2.f32 %v4195_v17  ;;  %v4573_v60 = vpop.eup %4572 }
 0x3ab   : > { %v2773_v21 = vadd.f32 1.0, %v4573_v60  ;;  %v3031_v60 = vmul.f32 %v6392_v52, %v6261_v27  ;;  %v3035_v27 = vmul.f32 %v6403_v39, %v6272_v42  ;;  %v3034_v42 = vmul.f32 %v6420_v51, %v6276_v9 }
 0x3ac   : > { %v6526_v43 = vpop.eup %4574 }
 0x3ad   : > { %v3148_v28 = vpop.permute.xlu0 %3147  ;;  %4580 = vrcp.f32 %v2773_v21  ;;  %v3033_v21 = vmul.f32 %v6400_v15, %v6267_v44 }
 0x3ae   : > { %v3217_v54 = vmul.f32 %v6516_v8, %v3148_v28 }
 0x3b0   : > { %3307 = vrot.lane.b32.xlu0 %v3217_v54, %s4699_s25 }
 0x3b2   : > { %v6530_v54 = vpop.eup %4576 }
 0x3b4   : > { %v4579_v45 = vpop.eup %4578 }
 0x3b5   : > { %v3150_v48 = vpop.permute.xlu1 %3149 }
 0x3b6   : > { %v3218_v53 = vmul.f32 %v6521_v40, %v3150_v48  ;;  %v2774_v48 = vadd.f32 1.0, %v4579_v45 }
 0x3b7   : > { %v6534_v4 = vpop.eup %4580 }
 0x3b8   : > { %3309 = vrot.lane.b32.xlu1 %v3218_v53, %s4699_s25  ;;  %4582 = vrcp.f32 %v2774_v48 }
 0x3bd   : > { %v3152_v20 = vpop.permute.xlu0 %3151 }
 0x3be   : > { %v3219_v28 = vmul.f32 %v6526_v43, %v3152_v20 }
 0x3c0   : > { %3311 = vrot.lane.b32.xlu0 %v3219_v28, %s4699_s25 }
 0x3c5   : > { %v3154_v14 = vpop.permute.xlu1 %3153 }
 0x3c6   : > { %v3220_v61 = vmul.f32 %v6530_v54, %v3154_v14  ;;  %v6545_v14 = vpop.eup %4582 }
 0x3c8   : > { %3313 = vrot.lane.b32.xlu1 %v3220_v61, %s4699_s25 }
 0x3cd   : > { %v3156_v53 = vpop.permute.xlu0 %3155 }
 0x3ce   : > { %v3221_v17 = vmul.f32 %v6534_v4, %v3156_v53 }
 0x3d0   : > { %3315 = vrot.lane.b32.xlu0 %v3221_v17, %s4699_s25  ;;  %v3032_v17 = vmul.f32 %v6411_v24, %v6270_v29 }
 0x3d1   : > { %v3256_v20 = vpop.permute.xlu0 %3255 }
 0x3d2   : > { %v6540_v28 = vadd.f32 %v3256_v20, %v3031_v60 }
 0x3d4   : > { %4584 = vtanh.f32 %v6540_v28 }
 0x3d5   : > { %v3260_v45 = vpop.permute.xlu0 %3259 }
 0x3d6   : > { %v6547_v61 = vadd.f32 %v3260_v45, %v3033_v21  ;;  %v3158_v48 = vpop.permute.xlu1 %3157  ;;  %v3037_v21 = vmul.f32 %v6416_v41, %v6280_v6  ;;  %v3036_v6 = vmul.f32 %v6430_v56, %v6283_v18 }
 0x3d7   : > { %v3222_v53 = vmul.f32 %v6545_v14, %v3158_v48 }
 0x3d8   : > { %4586 = vtanh.f32 %v6547_v61 }
 0x3d9   : > { %3317 = vrot.lane.b32.xlu1 %v3222_v53, %s4699_s25  ;;  %v3264_v44 = vpop.permute.xlu0 %3263 }
 0x3da   : > { %v6556_v60 = vadd.f32 %v3264_v44, %v3035_v27  ;;  %v3258_v20 = vpop.permute.xlu1 %3257 }
 0x3db   : > { %v6558_v15 = vadd.f32 %v3258_v20, %v3032_v17  ;;  %v3039_v17 = vmul.f32 %v6425_v13, %v6285_v7  ;;  %v3038_v7 = vmul.f32 %v6439_v33, %v6291_v11  ;;  %v3040_v11 = vmul.f32 %v6447_v46, %v6296_v38 }
 0x3dc   : > { %4588 = vtanh.f32 %v6556_v60  ;;  %v3042_v38 = vmul.f32 %v6456_v23, %v6305_v63  ;;  %v3044_v63 = vmul.f32 %v6464_v59, %v6313_v3  ;;  %v3046_v3 = vmul.f32 %v6473_v25, %v6320_v50 }
 0x3dd   : > { %4590 = vtanh.f32 %v6558_v15  ;;  %v3268_v45 = vpop.permute.xlu0 %3267 }
 0x3de   : > { %v4585_v29 = vpop.eup %4584  ;;  %v6566_v48 = vadd.f32 %v3268_v45, %v3037_v21  ;;  %v3262_v53 = vpop.permute.xlu1 %3261 }
 0x3df   : > { %v6568_v27 = vadd.f32 %v3262_v53, %v3034_v42  ;;  %3447 = vrot.lane.b32.xlu0 %v4585_v29, %s4699_s25  ;;  %v3041_v42 = vmul.f32 %v6433_v49, %v6293_v32  ;;  %v3043_v32 = vmul.f32 %v6443_v34, %v6300_v22  ;;  %v3045_v22 = vmul.f32 %v6452_v35, %v6307_v57 }
 0x3e0   : > { %4592 = vtanh.f32 %v6566_v48  ;;  %v3047_v57 = vmul.f32 %v6460_v10, %v6316_v30  ;;  %v3049_v30 = vmul.f32 %v6470_v16, %v6324_v47  ;;  %v3048_v47 = vmul.f32 %v6481_v1, %v6327_v37 }
 0x3e1   : > { %4594 = vtanh.f32 %v6568_v27  ;;  %v3272_v9 = vpop.permute.xlu0 %3271  ;;  %v3050_v1 = vmul.f32 %v6488_v0, %v6336_v2 }
 0x3e2   : > { %v4587_v44 = vpop.eup %4586  ;;  %v6577_v20 = vadd.f32 %v3272_v9, %v3039_v17  ;;  %v3266_v21 = vpop.permute.xlu1 %3265 }
 0x3e3   : > { %v6579_v45 = vadd.f32 %v3266_v21, %v3036_v6  ;;  %3451 = vrot.lane.b32.xlu0 %v4587_v44, %s4699_s25 }
 0x3e4   : > { %4596 = vtanh.f32 %v6577_v20 }
 0x3e5   : > { %4598 = vtanh.f32 %v6579_v45  ;;  %v3276_v18 = vpop.permute.xlu0 %3275 }
 0x3e6   : > { %v4589_v29 = vpop.eup %4588  ;;  %v6588_v53 = vadd.f32 %v3276_v18, %v3041_v42  ;;  %v3270_v17 = vpop.permute.xlu1 %3269 }
 0x3e7   : > { %v4591_v9 = vpop.eup %4590  ;;  %v6590_v6 = vadd.f32 %v3270_v17, %v3038_v7  ;;  %3455 = vrot.lane.b32.xlu0 %v4589_v29, %s4699_s25 }
 0x3e8   : > { %4600 = vtanh.f32 %v6588_v53  ;;  %3449 = vrot.lane.b32.xlu1 %v4591_v9, %s4699_s25 }
 0x3e9   : > { %4602 = vtanh.f32 %v6590_v6  ;;  %v3280_v44 = vpop.permute.xlu0 %3279 }
 0x3ea   : > { %v4593_v21 = vpop.eup %4592  ;;  %v6600_v42 = vadd.f32 %v3280_v44, %v3043_v32  ;;  %v3274_v7 = vpop.permute.xlu1 %3273 }
 0x3eb   : > { %v4595_v18 = vpop.eup %4594  ;;  %v6602_v17 = vadd.f32 %v3274_v7, %v3040_v11  ;;  %3459 = vrot.lane.b32.xlu0 %v4593_v21, %s4699_s25 }
 0x3ec   : > { %4604 = vtanh.f32 %v6600_v42  ;;  %3453 = vrot.lane.b32.xlu1 %v4595_v18, %s4699_s25 }
 0x3ed   : > { %4606 = vtanh.f32 %v6602_v17  ;;  %v3284_v29 = vpop.permute.xlu0 %3283 }
 0x3ee   : > { %v4597_v9 = vpop.eup %4596  ;;  %v6612_v32 = vadd.f32 %v3284_v29, %v3045_v22  ;;  %v3278_v11 = vpop.permute.xlu1 %3277 }
 0x3ef   : > { %v4599_v44 = vpop.eup %4598  ;;  %v6614_v7 = vadd.f32 %v3278_v11, %v3042_v38  ;;  %3463 = vrot.lane.b32.xlu0 %v4597_v9, %s4699_s25 }
 0x3f0   : > { %4608 = vtanh.f32 %v6612_v32  ;;  %3457 = vrot.lane.b32.xlu1 %v4599_v44, %s4699_s25 }
 0x3f1   : > { %4610 = vtanh.f32 %v6614_v7  ;;  %v3288_v21 = vpop.permute.xlu0 %3287 }
 0x3f2   : > { %v4601_v18 = vpop.eup %4600  ;;  %v6624_v22 = vadd.f32 %v3288_v21, %v3047_v57  ;;  %v3282_v38 = vpop.permute.xlu1 %3281 }
 0x3f3   : > { %v4603_v29 = vpop.eup %4602  ;;  %v6626_v11 = vadd.f32 %v3282_v38, %v3044_v63  ;;  %3467 = vrot.lane.b32.xlu0 %v4601_v18, %s4699_s25 }
 0x3f4   : > { %4612 = vtanh.f32 %v6624_v22  ;;  %3461 = vrot.lane.b32.xlu1 %v4603_v29, %s4699_s25  ;;  %v3051_v29 = vmul.f32 %v6477_v5, %v6331_v62 }
 0x3f5   : > { %4614 = vtanh.f32 %v6626_v11  ;;  %v3292_v9 = vpop.permute.xlu0 %3291 }
 0x3f6   : > { %v4605_v44 = vpop.eup %4604  ;;  %v6636_v57 = vadd.f32 %v3292_v9, %v3049_v30  ;;  %v3286_v63 = vpop.permute.xlu1 %3285 }
 0x3f7   : > { %v4607_v21 = vpop.eup %4606  ;;  %v6638_v38 = vadd.f32 %v3286_v63, %v3046_v3  ;;  %3471 = vrot.lane.b32.xlu0 %v4605_v44, %s4699_s25 }
 0x3f8   : > { %4616 = vtanh.f32 %v6636_v57  ;;  %3465 = vrot.lane.b32.xlu1 %v4607_v21, %s4699_s25 }
 0x3f9   : > { %4618 = vtanh.f32 %v6638_v38  ;;  %v3296_v50 = vpop.permute.xlu0 %3295 }
 0x3fa   : > { %v4609_v18 = vpop.eup %4608  ;;  %v3290_v30 = vpop.permute.xlu1 %3289  ;;  %v6651_v44 = vadd.f32 %v3296_v50, %v3051_v29  ;;  %v3053_v50 = vmul.f32 %v6494_v36, %v6339_v12 }
 0x3fb   : > { %v4611_v9 = vpop.eup %4610  ;;  %v6648_v3 = vadd.f32 %v3290_v30, %v3048_v47  ;;  %3475 = vrot.lane.b32.xlu0 %v4609_v18, %s4699_s25 }
 0x3fc   : > { %3469 = vrot.lane.b32.xlu1 %v4611_v9, %s4699_s25 }
 0x3fd   : > { %4620 = vtanh.f32 %v6648_v3 }
 0x3fe   : > { %v4613_v37 = vpop.eup %4612  ;;  %v3294_v63 = vpop.permute.xlu1 %3293  ;;  %4622 = vtanh.f32 %v6651_v44 }
 0x3ff   : > { %v4615_v21 = vpop.eup %4614  ;;  %3479 = vrot.lane.b32.xlu0 %v4613_v37, %s4699_s25  ;;  %v6660_v62 = vadd.f32 %v3294_v63, %v3050_v1  ;;  %v3052_v1 = vmul.f32 %v6491_v58, %v6345_v55 }
 0x400   : > { %3473 = vrot.lane.b32.xlu1 %v4615_v21, %s4699_s25  ;;  %v7178_v21 = vld [vmem:[#allocation5_spill] sm:$0xff] }
 0x401   : > { %4624 = vtanh.f32 %v6660_v62  ;;  %v3054_v55 = vmul.f32 %v6501_v26, %v7178_v21 }
 0x402   : > { %v4617_v47 = vpop.eup %4616  ;;  %v3300_v18 = vpop.permute.xlu0 %3299 }
 0x403   : > { %v4619_v29 = vpop.eup %4618  ;;  %3483 = vrot.lane.b32.xlu0 %v4617_v47, %s4699_s25  ;;  %v6665_v30 = vadd.f32 %v3300_v18, %v3053_v50  ;;  %v3298_v2 = vpop.permute.xlu1 %3297  ;;  %v7179_v50 = vld [vmem:[#allocation6_spill] sm:$0xff] }
 0x404   : > { %3477 = vrot.lane.b32.xlu1 %v4619_v29, %s4699_s25  ;;  %v6675_v12 = vadd.f32 %v3298_v2, %v3052_v1  ;;  %v3055_v18 = vmul.f32 %v6506_v19, %v7179_v50 }
 0x405   : > { %4626 = vtanh.f32 %v6665_v30 }
 0x406   : > { %4628 = vtanh.f32 %v6675_v12 }
 0x407   : > { %v4621_v9 = vpop.eup %4620  ;;  %3607 = vrot.lane.b32.xlu0 %v6540_v28, %s4695_s4 }
 0x408   : > { %3481 = vrot.lane.b32.xlu1 %v4621_v9, %s4699_s25  ;;  %v4623_v37 = vpop.eup %4622  ;;  %v7180_v9 = vld [vmem:[#allocation8_spill] sm:$0xff] }
 0x409   : > { %v3056_v1 = vmul.f32 %v6511_v31, %v7180_v9 }
 0x40a   : > { %v3302_v63 = vpop.permute.xlu1 %3301 }
 0x40b   : > { %3487 = vrot.lane.b32.xlu0 %v4623_v37, %s4699_s25  ;;  %v4625_v47 = vpop.eup %4624  ;;  %v6685_v28 = vadd.f32 %v3302_v63, %v3054_v55 }
 0x40c   : > { %3609 = vrot.lane.b32.xlu1 %v6558_v15, %s4695_s4 }
 0x40d   : > { %4630 = vtanh.f32 %v6685_v28 }
 0x40f   : > { %3611 = vrot.lane.b32.xlu0 %v6547_v61, %s4695_s4  ;;  %v4627_v29 = vpop.eup %4626 }
 0x410   : > { %3485 = vrot.lane.b32.xlu1 %v4625_v47, %s4699_s25  ;;  %v4629_v61 = vpop.eup %4628 }
 0x412   : > { %v3304_v2 = vpop.permute.xlu0 %3303 }
 0x413   : > { %v6690_v15 = vadd.f32 %v3304_v2, %v3055_v18  ;;  %3491 = vrot.lane.b32.xlu0 %v4627_v29, %s4699_s25  ;;  %v7182_v18 = vld [vmem:[#allocation10_spill] sm:$0xff] }
 0x414   : > { %3613 = vrot.lane.b32.xlu1 %v6568_v27, %s4695_s4  ;;  %v3058_v29 = vmul.f32 %v6521_v40, %v7182_v18 }
 0x415   : > { %4632 = vtanh.f32 %v6690_v15 }
 0x417   : > { %3615 = vrot.lane.b32.xlu0 %v6556_v60, %s4695_s4  ;;  %v4631_v27 = vpop.eup %4630  ;;  %v7181_v60 = vld [vmem:[#allocation7_spill] sm:$0xff] }
 0x418   : > { %3489 = vrot.lane.b32.xlu1 %v4629_v61, %s4699_s25  ;;  %v3057_v55 = vmul.f32 %v6516_v8, %v7181_v60 }
 0x41a   : > { %v3306_v37 = vpop.permute.xlu1 %3305 }
 0x41b   : > { %v6702_v63 = vadd.f32 %v3306_v37, %v3056_v1 }
 0x41c   : > { %3617 = vrot.lane.b32.xlu1 %v6579_v45, %s4695_s4 }
 0x41d   : > { %4634 = vtanh.f32 %v6702_v63 }
 0x41f   : > { %v4633_v21 = vpop.eup %4632 }
 0x420   : > { %3493 = vrot.lane.b32.xlu1 %v4631_v27, %s4699_s25  ;;  %3495 = vrot.lane.b32.xlu0 %v4633_v21, %s4699_s25  ;;  %v7184_v21 = vld [vmem:[#allocation12_spill] sm:$0xff] }
 0x422   : > { %v3308_v47 = vpop.permute.xlu0 %3307 }
 0x423   : > { %v6711_v50 = vadd.f32 %v3308_v47, %v3057_v55 }
 0x424   : > { %3621 = vrot.lane.b32.xlu1 %v6590_v6, %s4695_s4  ;;  %3619 = vrot.lane.b32.xlu0 %v6566_v48, %s4695_s4  ;;  %v7183_v48 = vld [vmem:[#allocation9_spill] sm:$0xff] }
 0x425   : > { %4636 = vtanh.f32 %v6711_v50  ;;  %v3059_v9 = vmul.f32 %v6526_v43, %v7183_v48 }
 0x427   : > { %v4635_v45 = vpop.eup %4634 }
 0x428   : > { %3497 = vrot.lane.b32.xlu1 %v4635_v45, %s4699_s25  ;;  %v7185_v45 = vld [vmem:[#allocation11_spill] sm:$0xff] }
 0x429   : > { %v3061_v18 = vmul.f32 %v6534_v4, %v7185_v45 }
 0x42a   : > { %v3310_v2 = vpop.permute.xlu1 %3309 }
 0x42b   : > { %v6721_v61 = vadd.f32 %v3310_v2, %v3058_v29 }
 0x42c   : > { %3625 = vrot.lane.b32.xlu1 %v6602_v17, %s4695_s4  ;;  %v3060_v17 = vmul.f32 %v6530_v54, %v7184_v21 }
 0x42d   : > { %4638 = vtanh.f32 %v6721_v61 }
 0x42f   : > { %v4637_v6 = vpop.eup %4636 }
 0x430   : > { %3499 = vrot.lane.b32.xlu0 %v4637_v6, %s4699_s25  ;;  %v7186_v6 = vld [vmem:[#allocation13_spill] sm:$0xff] }
 0x431   : > { %v3062_v48 = vmul.f32 %v6545_v14, %v7186_v6 }
 0x432   : > { %v3312_v1 = vpop.permute.xlu0 %3311 }
 0x433   : > { %v3379_v37 = vadd.f32 %v3312_v1, %v3059_v9 }
 0x434   : > { %3623 = vrot.lane.b32.xlu0 %v6577_v20, %s4695_s4 }
 0x435   : > { %4640 = vtanh.f32 %v3379_v37 }
 0x437   : > { %v4639_v27 = vpop.eup %4638 }
 0x438   : > { %3501 = vrot.lane.b32.xlu1 %v4639_v27, %s4699_s25 }
 0x43a   : > { %v3314_v60 = vpop.permute.xlu1 %3313 }
 0x43b   : > { %v3380_v55 = vadd.f32 %v3314_v60, %v3060_v17 }
 0x43c   : > { %3629 = vrot.lane.b32.xlu1 %v6614_v7, %s4695_s4 }
 0x43d   : > { %4642 = vtanh.f32 %v3380_v55 }
 0x43f   : > { %v4641_v47 = vpop.eup %4640 }
 0x440   : > { %3503 = vrot.lane.b32.xlu0 %v4641_v47, %s4699_s25 }
 0x442   : > { %v3316_v20 = vpop.permute.xlu0 %3315 }
 0x443   : > { %v3381_v29 = vadd.f32 %v3316_v20, %v3061_v18 }
 0x444   : > { %3627 = vrot.lane.b32.xlu0 %v6588_v53, %s4695_s4 }
 0x445   : > { %4644 = vtanh.f32 %v3381_v29 }
 0x447   : > { %v4643_v2 = vpop.eup %4642 }
 0x448   : > { %3505 = vrot.lane.b32.xlu1 %v4643_v2, %s4699_s25 }
 0x44b   : > { %v3318_v7 = vpop.permute.xlu1 %3317 }
 0x44c   : > { %v3382_v9 = vadd.f32 %v3318_v7, %v3062_v48  ;;  %3633 = vrot.lane.b32.xlu1 %v6626_v11, %s4695_s4 }
 0x44e   : > { %4646 = vtanh.f32 %v3382_v9 }
 0x44f   : > { %v4645_v1 = vpop.eup %4644 }
 0x450   : > { %3507 = vrot.lane.b32.xlu0 %v4645_v1, %s4699_s25 }
 0x451   : > { %v3448_v27 = vpop.permute.xlu0 %3447 }
 0x454   : > { %3631 = vrot.lane.b32.xlu0 %v6600_v42, %s4695_s4 }
 0x455   : > { %v3452_v53 = vpop.permute.xlu0 %3451 }
 0x458   : > { %v4647_v21 = vpop.eup %4646  ;;  %3635 = vrot.lane.b32.xlu0 %v6612_v32, %s4695_s4 }
 0x459   : > { %3509 = vrot.lane.b32.xlu1 %v4647_v21, %s4699_s25  ;;  %v3456_v17 = vpop.permute.xlu0 %3455 }
 0x45a   : > { %v3450_v60 = vpop.permute.xlu1 %3449 }
 0x45c   : > { %3639 = vrot.lane.b32.xlu0 %v6624_v22, %s4695_s4 }
 0x45d   : > { %3637 = vrot.lane.b32.xlu1 %v6638_v38, %s4695_s4  ;;  %v3460_v11 = vpop.permute.xlu0 %3459 }
 0x45e   : > { %v3454_v47 = vpop.permute.xlu1 %3453  ;;  %v6813_v48 = vmul.f32 %v6416_v41, %v3460_v11 }
 0x45f   : > { %v6806_v6 = vmul.f32 %v6420_v51, %v3454_v47 }
 0x460   : > { %3643 = vrot.lane.b32.xlu0 %v6636_v57, %s4695_s4 }
 0x461   : > { %3641 = vrot.lane.b32.xlu1 %v6648_v3, %s4695_s4  ;;  %v3464_v42 = vpop.permute.xlu0 %3463 }
 0x462   : > { %v3458_v32 = vpop.permute.xlu1 %3457 }
 0x464   : > { %3647 = vrot.lane.b32.xlu0 %v6651_v44, %s4695_s4 }
 0x465   : > { %3645 = vrot.lane.b32.xlu1 %v6660_v62, %s4695_s4  ;;  %v3468_v22 = vpop.permute.xlu0 %3467 }
 0x466   : > { %v3462_v45 = vpop.permute.xlu1 %3461 }
 0x467   : > { %v6828_v1 = vmul.f32 %v6439_v33, %v3462_v45 }
 0x468   : > { %3651 = vrot.lane.b32.xlu0 %v6665_v30, %s4695_s4 }
 0x469   : > { %3649 = vrot.lane.b32.xlu1 %v6675_v12, %s4695_s4  ;;  %v3472_v57 = vpop.permute.xlu0 %3471 }
 0x46a   : > { %v3466_v38 = vpop.permute.xlu1 %3465 }
 0x46c   : > { %3655 = vrot.lane.b32.xlu0 %v6690_v15, %s4695_s4 }
 0x46d   : > { %3653 = vrot.lane.b32.xlu1 %v6685_v28, %s4695_s4  ;;  %v3476_v3 = vpop.permute.xlu0 %3475 }
 0x46e   : > { %v3470_v44 = vpop.permute.xlu1 %3469 }
 0x470   : > { %3659 = vrot.lane.b32.xlu0 %v6711_v50, %s4695_s4  ;;  %v6784_v50 = vmul.f32 %v6392_v52, %v3448_v27 }
 0x471   : > { %3657 = vrot.lane.b32.xlu1 %v6702_v63, %s4695_s4  ;;  %v3480_v62 = vpop.permute.xlu0 %3479 }
 0x472   : > { %v3474_v30 = vpop.permute.xlu1 %3473 }
 0x473   : > { %v6859_v11 = vmul.f32 %v6464_v59, %v3474_v30 }
 0x474   : > { %3663 = vrot.lane.b32.xlu0 %v3379_v37, %s4695_s4  ;;  %v7187_v37 = vld [vmem:[#allocation14_spill] sm:$0xff] }
 0x475   : > { %3661 = vrot.lane.b32.xlu1 %v6721_v61, %s4695_s4  ;;  %v6779_v12 = vpop.permute.xlu0 %3483  ;;  %v6791_v18 = vmul.f32 %v7187_v37, %v3452_v53  ;;  %v6838_v53 = vmul.f32 %v6447_v46, %v3466_v38  ;;  %v6856_v46 = vmul.f32 %v6452_v35, %v3476_v3 }
 0x476   : > { %v3478_v15 = vpop.permute.xlu1 %3477  ;;  %v6879_v59 = vmul.f32 %v6470_v16, %v6779_v12 }
 0x478   : > { %3667 = vrot.lane.b32.xlu0 %v3381_v29, %s4695_s4  ;;  %v6794_v29 = vmul.f32 %v6411_v24, %v3450_v60 }
 0x479   : > { %3665 = vrot.lane.b32.xlu1 %v3380_v55, %s4695_s4  ;;  %v3608_v28 = vpop.permute.xlu0 %3607  ;;  %v6802_v55 = vmul.f32 %v6403_v39, %v3456_v17  ;;  %v6816_v39 = vmul.f32 %v6430_v56, %v3458_v32  ;;  %v6835_v56 = vmul.f32 %v6433_v49, %v3468_v22  ;;  %v6849_v49 = vmul.f32 %v6456_v23, %v3470_v44 }
 0x47a   : > { %3703 = vst.msk [vmem:[#allocation3] sm:$0xff] %vm1397_vm10, %v3608_v28  ;;  %v3482_v63 = vpop.permute.xlu1 %3481  ;;  %v6871_v23 = vmul.f32 %v6473_v25, %v3478_v15 }
 0x47c   : > { %3767 = vrot.lane.b32.xlu0 %v6784_v50, %s4701_s27 }
 0x47d   : > { %3669 = vrot.lane.b32.xlu1 %v3382_v9, %s4695_s4  ;;  %v3488_v61 = vpop.permute.xlu0 %3487  ;;  %v6824_v9 = vmul.f32 %v6425_v13, %v3464_v42  ;;  %v6846_v13 = vmul.f32 %v6443_v34, %v3472_v57  ;;  %v6868_v34 = vmul.f32 %v6460_v10, %v3480_v62  ;;  %v7188_v42 = vld [vmem:[#allocation15_spill] sm:$0xff] }
 0x47e   : > { %v3610_v20 = vpop.permute.xlu1 %3609  ;;  %v6882_v32 = vmul.f32 %v7188_v42, %v3482_v63  ;;  %v6890_v10 = vmul.f32 %v6477_v5, %v3488_v61 }
 0x47f   : > { %3704 = vst.msk [vmem:[#allocation3 + $0x8] sm:$0xff] %vm1397_vm10, %v3610_v20 }
 0x480   : > { %3771 = vrot.lane.b32.xlu0 %v6791_v18, %s4701_s27 }
 0x481   : > { %3769 = vrot.lane.b32.xlu1 %v6794_v29, %s4701_s27  ;;  %v3612_v52 = vpop.permute.xlu0 %3611 }
 0x482   : > { %3705 = vst.msk [vmem:[#allocation3 + $0x10] sm:$0xff] %vm1397_vm10, %v3612_v52  ;;  %v3486_v2 = vpop.permute.xlu1 %3485 }
 0x483   : > { %v6893_v22 = vmul.f32 %v6488_v0, %v3486_v2 }
 0x484   : > { %3775 = vrot.lane.b32.xlu0 %v6802_v55, %s4701_s27 }
 0x485   : > { %3773 = vrot.lane.b32.xlu1 %v6806_v6, %s4701_s27  ;;  %v3492_v24 = vpop.permute.xlu0 %3491 }
 0x486   : > { %v3614_v7 = vpop.permute.xlu1 %3613  ;;  %v6900_v16 = vmul.f32 %v6494_v36, %v3492_v24 }
 0x487   : > { %3706 = vst.msk [vmem:[#allocation3 + $0x18] sm:$0xff] %vm1397_vm10, %v3614_v7 }
 0x488   : > { %3779 = vrot.lane.b32.xlu0 %v6813_v48, %s4701_s27 }
 0x489   : > { %3777 = vrot.lane.b32.xlu1 %v6816_v39, %s4701_s27  ;;  %v3616_v51 = vpop.permute.xlu0 %3615 }
 0x48a   : > { %3707 = vst.msk [vmem:[#allocation3 + $0x20] sm:$0xff] %vm1397_vm10, %v3616_v51  ;;  %v3490_v41 = vpop.permute.xlu1 %3489 }
 0x48b   : > { %v6903_v57 = vmul.f32 %v6491_v58, %v3490_v41 }
 0x48c   : > { %3783 = vrot.lane.b32.xlu0 %v6824_v9, %s4701_s27 }
 0x48d   : > { %3781 = vrot.lane.b32.xlu1 %v6828_v1, %s4701_s27 }
 0x48e   : > { %v3618_v27 = vpop.permute.xlu1 %3617 }
 0x48f   : > { %3708 = vst.msk [vmem:[#allocation3 + $0x28] sm:$0xff] %vm1397_vm10, %v3618_v27 }
 0x490   : > { %3787 = vrot.lane.b32.xlu0 %v6835_v56, %s4701_s27 }
 0x491   : > { %3785 = vrot.lane.b32.xlu1 %v6838_v53, %s4701_s27 }
 0x492   : > { %v3494_v33 = vpop.permute.xlu1 %3493  ;;  %v3496_v21 = vpop.permute.xlu0 %3495 }
 0x493   : > { %v6915_v0 = vmul.f32 %v6506_v19, %v3496_v21  ;;  %v6918_v36 = vmul.f32 %v6501_v26, %v3494_v33 }
 0x494   : > { %3791 = vrot.lane.b32.xlu0 %v6846_v13, %s4701_s27 }
 0x495   : > { %3789 = vrot.lane.b32.xlu1 %v6849_v49, %s4701_s27 }
 0x496   : > { %v3622_v17 = vpop.permute.xlu1 %3621  ;;  %v3620_v60 = vpop.permute.xlu0 %3619 }
 0x497   : > { %3710 = vst.msk [vmem:[#allocation3 + $0x38] sm:$0xff] %vm1397_vm10, %v3622_v17  ;;  %3709 = vst.msk [vmem:[#allocation3 + $0x30] sm:$0xff] %vm1397_vm10, %v3620_v60 }
 0x498   : > { %3795 = vrot.lane.b32.xlu0 %v6856_v46, %s4701_s27 }
 0x499   : > { %3793 = vrot.lane.b32.xlu1 %v6859_v11, %s4701_s27 }
 0x49a   : > { %v3498_v35 = vpop.permute.xlu1 %3497 }
 0x49b   : > { %v6933_v3 = vmul.f32 %v6511_v31, %v3498_v35 }
 0x49c   : > { %3799 = vrot.lane.b32.xlu0 %v6868_v34, %s4701_s27 }
 0x49d   : > { %3797 = vrot.lane.b32.xlu1 %v6871_v23, %s4701_s27 }
 0x49e   : > { %v3626_v47 = vpop.permute.xlu1 %3625 }
 0x49f   : > { %3712 = vst.msk [vmem:[#allocation3 + $0x48] sm:$0xff] %vm1397_vm10, %v3626_v47 }
 0x4a0   : > { %3803 = vrot.lane.b32.xlu0 %v6879_v59, %s4701_s27 }
 0x4a1   : > { %3801 = vrot.lane.b32.xlu1 %v6882_v32, %s4701_s27 }
 0x4a2   : > { %v3500_v25 = vpop.permute.xlu0 %3499 }
 0x4a3   : > { %v6930_v19 = vmul.f32 %v6516_v8, %v3500_v25 }
 0x4a4   : > { %3807 = vrot.lane.b32.xlu0 %v6890_v10, %s4701_s27 }
 0x4a5   : > { %3805 = vrot.lane.b32.xlu1 %v6893_v22, %s4701_s27 }
 0x4a6   : > { %v3624_v45 = vpop.permute.xlu0 %3623 }
 0x4a7   : > { %3711 = vst.msk [vmem:[#allocation3 + $0x40] sm:$0xff] %vm1397_vm10, %v3624_v45 }
 0x4a8   : > { %3811 = vrot.lane.b32.xlu0 %v6900_v16, %s4701_s27 }
 0x4a9   : > { %3809 = vrot.lane.b32.xlu1 %v6903_v57, %s4701_s27 }
 0x4aa   : > { %v3502_v5 = vpop.permute.xlu1 %3501 }
 0x4ab   : > { %v6948_v62 = vmul.f32 %v6521_v40, %v3502_v5 }
 0x4ac   : > { %3896 = vrot.lane.b32.xlu0 %v6784_v50, %s4698_s24 }
 0x4ad   : > { %3898 = vrot.lane.b32.xlu1 %v6794_v29, %s4698_s24 }
 0x4ae   : > { %v3630_v58 = vpop.permute.xlu1 %3629 }
 0x4af   : > { %3714 = vst.msk [vmem:[#allocation3 + $0x58] sm:$0xff] %vm1397_vm10, %v3630_v58 }
 0x4b0   : > { %3815 = vrot.lane.b32.xlu0 %v6915_v0, %s4701_s27 }
 0x4b1   : > { %3813 = vrot.lane.b32.xlu1 %v6918_v36, %s4701_s27 }
 0x4b2   : > { %v3504_v38 = vpop.permute.xlu0 %3503 }
 0x4b3   : > { %v6945_v8 = vmul.f32 %v6526_v43, %v3504_v38 }
 0x4b4   : > { %3900 = vrot.lane.b32.xlu0 %v6791_v18, %s4698_s24 }
 0x4b5   : > { %3902 = vrot.lane.b32.xlu1 %v6806_v6, %s4698_s24 }
 0x4b6   : > { %v3628_v26 = vpop.permute.xlu0 %3627 }
 0x4b7   : > { %3713 = vst.msk [vmem:[#allocation3 + $0x50] sm:$0xff] %vm1397_vm10, %v3628_v26 }
 0x4b8   : > { %3819 = vrot.lane.b32.xlu0 %v6930_v19, %s4701_s27 }
 0x4b9   : > { %3817 = vrot.lane.b32.xlu1 %v6933_v3, %s4701_s27 }
 0x4ba   : > { %v3506_v44 = vpop.permute.xlu1 %3505 }
 0x4bb   : > { %v6963_v12 = vmul.f32 %v6530_v54, %v3506_v44 }
 0x4bc   : > { %3904 = vrot.lane.b32.xlu0 %v6802_v55, %s4698_s24 }
 0x4bd   : > { %3906 = vrot.lane.b32.xlu1 %v6816_v39, %s4698_s24 }
 0x4be   : > { %v3634_v31 = vpop.permute.xlu1 %3633 }
 0x4bf   : > { %3716 = vst.msk [vmem:[#allocation3 + $0x68] sm:$0xff] %vm1397_vm10, %v3634_v31 }
 0x4c0   : > { %3823 = vrot.lane.b32.xlu0 %v6945_v8, %s4701_s27 }
 0x4c1   : > { %3821 = vrot.lane.b32.xlu1 %v6948_v62, %s4701_s27 }
 0x4c2   : > { %v3508_v30 = vpop.permute.xlu0 %3507 }
 0x4c3   : > { %v6960_v43 = vmul.f32 %v6534_v4, %v3508_v30 }
 0x4c4   : > { %3908 = vrot.lane.b32.xlu0 %v6813_v48, %s4698_s24 }
 0x4c5   : > { %3910 = vrot.lane.b32.xlu1 %v6828_v1, %s4698_s24 }
 0x4c6   : > { %v3632_v40 = vpop.permute.xlu0 %3631 }
 0x4c7   : > { %3715 = vst.msk [vmem:[#allocation3 + $0x60] sm:$0xff] %vm1397_vm10, %v3632_v40 }
 0x4c8   : > { %3827 = vrot.lane.b32.xlu0 %v6960_v43, %s4701_s27 }
 0x4c9   : > { %3825 = vrot.lane.b32.xlu1 %v6963_v12, %s4701_s27 }
 0x4ca   : > { %v3636_v15 = vpop.permute.xlu0 %3635 }
 0x4cb   : > { %3717 = vst.msk [vmem:[#allocation3 + $0x70] sm:$0xff] %vm1397_vm10, %v3636_v15  ;;  %v3510_v28 = vpop.permute.xlu1 %3509 }
 0x4cc   : > { %3912 = vrot.lane.b32.xlu0 %v6824_v9, %s4698_s24  ;;  %v6976_v4 = vmul.f32 %v6545_v14, %v3510_v28 }
 0x4cd   : > { %3914 = vrot.lane.b32.xlu1 %v6838_v53, %s4698_s24 }
 0x4ce   : > { %v3640_v54 = vpop.permute.xlu0 %3639 }
 0x4cf   : > { %3719 = vst.msk [vmem:[#allocation3 + $0x80] sm:$0xff] %vm1397_vm10, %v3640_v54  ;;  %v3638_v50 = vpop.permute.xlu1 %3637 }
 0x4d0   : > { %3718 = vst.msk [vmem:[#allocation3 + $0x78] sm:$0xff] %vm1397_vm10, %v3638_v50  ;;  %3916 = vrot.lane.b32.xlu0 %v6835_v56, %s4698_s24 }
 0x4d1   : > { %3829 = vrot.lane.b32.xlu1 %v6976_v4, %s4701_s27 }
 0x4d2   : > { %v3644_v63 = vpop.permute.xlu0 %3643 }
 0x4d3   : > { %3721 = vst.msk [vmem:[#allocation3 + $0x90] sm:$0xff] %vm1397_vm10, %v3644_v63  ;;  %v3642_v61 = vpop.permute.xlu1 %3641 }
 0x4d4   : > { %3720 = vst.msk [vmem:[#allocation3 + $0x88] sm:$0xff] %vm1397_vm10, %v3642_v61  ;;  %3920 = vrot.lane.b32.xlu0 %v6846_v13, %s4698_s24 }
 0x4d5   : > { %3918 = vrot.lane.b32.xlu1 %v6849_v49, %s4698_s24 }
 0x4d6   : > { %v3648_v14 = vpop.permute.xlu0 %3647 }
 0x4d7   : > { %3723 = vst.msk [vmem:[#allocation3 + $0xa0] sm:$0xff] %vm1397_vm10, %v3648_v14  ;;  %v3646_v37 = vpop.permute.xlu1 %3645 }
 0x4d8   : > { %3722 = vst.msk [vmem:[#allocation3 + $0x98] sm:$0xff] %vm1397_vm10, %v3646_v37  ;;  %3924 = vrot.lane.b32.xlu0 %v6856_v46, %s4698_s24 }
 0x4d9   : > { %3922 = vrot.lane.b32.xlu1 %v6859_v11, %s4698_s24 }
 0x4da   : > { %v3652_v18 = vpop.permute.xlu0 %3651 }
 0x4db   : > { %3725 = vst.msk [vmem:[#allocation3 + $0xb0] sm:$0xff] %vm1397_vm10, %v3652_v18  ;;  %v3650_v20 = vpop.permute.xlu1 %3649 }
 0x4dc   : > { %3724 = vst.msk [vmem:[#allocation3 + $0xa8] sm:$0xff] %vm1397_vm10, %v3650_v20  ;;  %3928 = vrot.lane.b32.xlu0 %v6868_v34, %s4698_s24 }
 0x4dd   : > { %3926 = vrot.lane.b32.xlu1 %v6871_v23, %s4698_s24 }
 0x4de   : > { %v3656_v29 = vpop.permute.xlu0 %3655 }
 0x4df   : > { %3727 = vst.msk [vmem:[#allocation3 + $0xc0] sm:$0xff] %vm1397_vm10, %v3656_v29  ;;  %v3654_v52 = vpop.permute.xlu1 %3653 }
 0x4e0   : > { %3726 = vst.msk [vmem:[#allocation3 + $0xb8] sm:$0xff] %vm1397_vm10, %v3654_v52  ;;  %3932 = vrot.lane.b32.xlu0 %v6879_v59, %s4698_s24 }
 0x4e1   : > { %3930 = vrot.lane.b32.xlu1 %v6882_v32, %s4698_s24 }
 0x4e2   : > { %v3660_v55 = vpop.permute.xlu0 %3659 }
 0x4e3   : > { %3729 = vst.msk [vmem:[#allocation3 + $0xd0] sm:$0xff] %vm1397_vm10, %v3660_v55  ;;  %v3658_v2 = vpop.permute.xlu1 %3657 }
 0x4e4   : > { %3728 = vst.msk [vmem:[#allocation3 + $0xc8] sm:$0xff] %vm1397_vm10, %v3658_v2  ;;  %3936 = vrot.lane.b32.xlu0 %v6890_v10, %s4698_s24 }
 0x4e5   : > { %3934 = vrot.lane.b32.xlu1 %v6893_v22, %s4698_s24 }
 0x4e6   : > { %v3664_v6 = vpop.permute.xlu0 %3663 }
 0x4e7   : > { %3731 = vst.msk [vmem:[#allocation3 + $0xe0] sm:$0xff] %vm1397_vm10, %v3664_v6  ;;  %v3662_v24 = vpop.permute.xlu1 %3661 }
 0x4e8   : > { %3730 = vst.msk [vmem:[#allocation3 + $0xd8] sm:$0xff] %vm1397_vm10, %v3662_v24  ;;  %3940 = vrot.lane.b32.xlu0 %v6900_v16, %s4698_s24 }
 0x4e9   : > { %3938 = vrot.lane.b32.xlu1 %v6903_v57, %s4698_s24 }
 0x4ea   : > { %v3668_v48 = vpop.permute.xlu0 %3667 }
 0x4eb   : > { %3733 = vst.msk [vmem:[#allocation3 + $0xf0] sm:$0xff] %vm1397_vm10, %v3668_v48  ;;  %v3666_v7 = vpop.permute.xlu1 %3665 }
 0x4ec   : > { %3732 = vst.msk [vmem:[#allocation3 + $0xe8] sm:$0xff] %vm1397_vm10, %v3666_v7  ;;  %3944 = vrot.lane.b32.xlu0 %v6915_v0, %s4698_s24 }
 0x4ed   : > { %3942 = vrot.lane.b32.xlu1 %v6918_v36, %s4698_s24 }
 0x4ee   : > { %v3768_v39 = vpop.permute.xlu0 %3767 }
 0x4ef   : > { %3864 = vst.msk [vmem:[#allocation2 + $0x19] sm:$0xff] %vm3863_vm13, %v3768_v39  ;;  %v3670_v51 = vpop.permute.xlu1 %3669 }
 0x4f0   : > { %3734 = vst.msk [vmem:[#allocation3 + $0xf8] sm:$0xff] %vm1397_vm10, %v3670_v51  ;;  %3948 = vrot.lane.b32.xlu0 %v6930_v19, %s4698_s24 }
 0x4f1   : > { %3946 = vrot.lane.b32.xlu1 %v6933_v3, %s4698_s24 }
 0x4f2   : > { %v3772_v9 = vpop.permute.xlu0 %3771 }
 0x4f3   : > { %3866 = vst.msk [vmem:[#allocation2 + $0x31] sm:$0xff] %vm3863_vm13, %v3772_v9  ;;  %v3770_v41 = vpop.permute.xlu1 %3769 }
 0x4f4   : > { %3865 = vst.msk [vmem:[#allocation2 + $0x21] sm:$0xff] %vm3863_vm13, %v3770_v41  ;;  %3952 = vrot.lane.b32.xlu0 %v6945_v8, %s4698_s24 }
 0x4f5   : > { %3950 = vrot.lane.b32.xlu1 %v6948_v62, %s4698_s24 }
 0x4f6   : > { %v3776_v1 = vpop.permute.xlu0 %3775 }
 0x4f7   : > { %3868 = vst.msk [vmem:[#allocation2 + $0x49] sm:$0xff] %vm3863_vm13, %v3776_v1  ;;  %v3774_v56 = vpop.permute.xlu1 %3773 }
 0x4f8   : > { %3867 = vst.msk [vmem:[#allocation2 + $0x39] sm:$0xff] %vm3863_vm13, %v3774_v56  ;;  %3956 = vrot.lane.b32.xlu0 %v6960_v43, %s4698_s24 }
 0x4f9   : > { %3954 = vrot.lane.b32.xlu1 %v6963_v12, %s4698_s24 }
 0x4fa   : > { %v3780_v27 = vpop.permute.xlu0 %3779 }
 0x4fb   : > { %3870 = vst.msk [vmem:[#allocation2 + $0x61] sm:$0xff] %vm3863_vm13, %v3780_v27  ;;  %v3778_v53 = vpop.permute.xlu1 %3777 }
 0x4fc   : > { %3869 = vst.msk [vmem:[#allocation2 + $0x51] sm:$0xff] %vm3863_vm13, %v3778_v53 }
 0x4fd   : > { %3958 = vrot.lane.b32.xlu1 %v6976_v4, %s4698_s24 }
 0x4fe   : > { %v3784_v13 = vpop.permute.xlu0 %3783 }
 0x4ff   : > { %3872 = vst.msk [vmem:[#allocation2 + $0x79] sm:$0xff] %vm3863_vm13, %v3784_v13  ;;  %v3782_v33 = vpop.permute.xlu1 %3781 }
 0x500   : > { %3871 = vst.msk [vmem:[#allocation2 + $0x69] sm:$0xff] %vm3863_vm13, %v3782_v33 }
 0x502   : > { %v3788_v21 = vpop.permute.xlu0 %3787 }
 0x503   : > { %3874 = vst.msk [vmem:[#allocation2 + $0x91] sm:$0xff] %vm3863_vm13, %v3788_v21  ;;  %v3786_v49 = vpop.permute.xlu1 %3785 }
 0x504   : > { %3873 = vst.msk [vmem:[#allocation2 + $0x81] sm:$0xff] %vm3863_vm13, %v3786_v49 }
 0x506   : > { %v3792_v46 = vpop.permute.xlu0 %3791 }
 0x507   : > { %3876 = vst.msk [vmem:[#allocation2 + $0xa9] sm:$0xff] %vm3863_vm13, %v3792_v46  ;;  %v3790_v17 = vpop.permute.xlu1 %3789 }
 0x508   : > { %3875 = vst.msk [vmem:[#allocation2 + $0x99] sm:$0xff] %vm3863_vm13, %v3790_v17 }
 0x50a   : > { %v3796_v60 = vpop.permute.xlu0 %3795 }
 0x50b   : > { %3878 = vst.msk [vmem:[#allocation2 + $0xc1] sm:$0xff] %vm3863_vm13, %v3796_v60  ;;  %v3794_v11 = vpop.permute.xlu1 %3793 }
 0x50c   : > { %3877 = vst.msk [vmem:[#allocation2 + $0xb1] sm:$0xff] %vm3863_vm13, %v3794_v11 }
 0x50e   : > { %v3800_v34 = vpop.permute.xlu0 %3799 }
 0x50f   : > { %3880 = vst.msk [vmem:[#allocation2 + $0xd9] sm:$0xff] %vm3863_vm13, %v3800_v34  ;;  %v3798_v35 = vpop.permute.xlu1 %3797 }
 0x510   : > { %3879 = vst.msk [vmem:[#allocation2 + $0xc9] sm:$0xff] %vm3863_vm13, %v3798_v35 }
 0x512   : > { %v3804_v23 = vpop.permute.xlu0 %3803 }
 0x513   : > { %3882 = vst.msk [vmem:[#allocation2 + $0xf1] sm:$0xff] %vm3863_vm13, %v3804_v23  ;;  %v3802_v59 = vpop.permute.xlu1 %3801 }
 0x514   : > { %3881 = vst.msk [vmem:[#allocation2 + $0xe1] sm:$0xff] %vm3863_vm13, %v3802_v59 }
 0x516   : > { %v3808_v47 = vpop.permute.xlu0 %3807 }
 0x517   : > { %3884 = vst.msk [vmem:[#allocation2 + $0x109] sm:$0xff] %vm3863_vm13, %v3808_v47  ;;  %v3806_v42 = vpop.permute.xlu1 %3805 }
 0x518   : > { %3883 = vst.msk [vmem:[#allocation2 + $0xf9] sm:$0xff] %vm3863_vm13, %v3806_v42 }
 0x51a   : > { %v3812_v32 = vpop.permute.xlu0 %3811 }
 0x51b   : > { %3886 = vst.msk [vmem:[#allocation2 + $0x121] sm:$0xff] %vm3863_vm13, %v3812_v32  ;;  %v3810_v10 = vpop.permute.xlu1 %3809 }
 0x51c   : > { %3885 = vst.msk [vmem:[#allocation2 + $0x111] sm:$0xff] %vm3863_vm13, %v3810_v10 }
 0x51e   : > { %v3897_v25 = vpop.permute.xlu0 %3896 }
 0x51f   : > { %3992 = vst.msk [vmem:[%s4760_s29] sm:$0xff] %vm1397_vm10, %v3897_v25  ;;  %v3899_v22 = vpop.permute.xlu1 %3898 }
 0x520   : > { %3993 = vst.msk [vmem:[%s4760_s29 + $0x8] sm:$0xff] %vm1397_vm10, %v3899_v22 }
 0x522   : > { %v3816_v16 = vpop.permute.xlu0 %3815 }
 0x523   : > { %3888 = vst.msk [vmem:[#allocation2 + $0x139] sm:$0xff] %vm3863_vm13, %v3816_v16  ;;  %v3814_v45 = vpop.permute.xlu1 %3813 }
 0x524   : > { %3887 = vst.msk [vmem:[#allocation2 + $0x129] sm:$0xff] %vm3863_vm13, %v3814_v45 }
 0x526   : > { %v3901_v57 = vpop.permute.xlu0 %3900 }
 0x527   : > { %3994 = vst.msk [vmem:[%s4760_s29 + $0x10] sm:$0xff] %vm1397_vm10, %v3901_v57  ;;  %v3903_v5 = vpop.permute.xlu1 %3902 }
 0x528   : > { %3995 = vst.msk [vmem:[%s4760_s29 + $0x18] sm:$0xff] %vm1397_vm10, %v3903_v5 }
 0x52a   : > { %v3820_v0 = vpop.permute.xlu0 %3819 }
 0x52b   : > { %3890 = vst.msk [vmem:[#allocation2 + $0x151] sm:$0xff] %vm3863_vm13, %v3820_v0  ;;  %v3818_v58 = vpop.permute.xlu1 %3817 }
 0x52c   : > { %3889 = vst.msk [vmem:[#allocation2 + $0x141] sm:$0xff] %vm3863_vm13, %v3818_v58 }
 0x52e   : > { %v3905_v36 = vpop.permute.xlu0 %3904 }
 0x52f   : > { %3996 = vst.msk [vmem:[%s4760_s29 + $0x20] sm:$0xff] %vm1397_vm10, %v3905_v36  ;;  %v3907_v38 = vpop.permute.xlu1 %3906 }
 0x530   : > { %3997 = vst.msk [vmem:[%s4760_s29 + $0x28] sm:$0xff] %vm1397_vm10, %v3907_v38 }
 0x532   : > { %v3824_v19 = vpop.permute.xlu0 %3823 }
 0x533   : > { %3892 = vst.msk [vmem:[#allocation2 + $0x169] sm:$0xff] %vm3863_vm13, %v3824_v19  ;;  %v3822_v26 = vpop.permute.xlu1 %3821 }
 0x534   : > { %3891 = vst.msk [vmem:[#allocation2 + $0x159] sm:$0xff] %vm3863_vm13, %v3822_v26 }
 0x536   : > { %v3909_v3 = vpop.permute.xlu0 %3908 }
 0x537   : > { %3998 = vst.msk [vmem:[%s4760_s29 + $0x30] sm:$0xff] %vm1397_vm10, %v3909_v3  ;;  %v3911_v44 = vpop.permute.xlu1 %3910 }
 0x538   : > { %3999 = vst.msk [vmem:[%s4760_s29 + $0x38] sm:$0xff] %vm1397_vm10, %v3911_v44 }
 0x53a   : > { %v3828_v8 = vpop.permute.xlu0 %3827 }
 0x53b   : > { %3894 = vst.msk [vmem:[#allocation2 + $0x181] sm:$0xff] %vm3863_vm13, %v3828_v8  ;;  %v3826_v31 = vpop.permute.xlu1 %3825 }
 0x53c   : > { %3893 = vst.msk [vmem:[#allocation2 + $0x171] sm:$0xff] %vm3863_vm13, %v3826_v31 }
 0x53e   : > { %v3913_v62 = vpop.permute.xlu0 %3912 }
 0x53f   : > { %4000 = vst.msk [vmem:[%s4760_s29 + $0x40] sm:$0xff] %vm1397_vm10, %v3913_v62  ;;  %v3915_v30 = vpop.permute.xlu1 %3914 }
 0x540   : > { %4001 = vst.msk [vmem:[%s4760_s29 + $0x48] sm:$0xff] %vm1397_vm10, %v3915_v30 }
 0x542   : > { %v3917_v43 = vpop.permute.xlu0 %3916 }
 0x543   : > { %4002 = vst.msk [vmem:[%s4760_s29 + $0x50] sm:$0xff] %vm1397_vm10, %v3917_v43  ;;  %v3830_v40 = vpop.permute.xlu1 %3829 }
 0x544   : > { %3895 = vst.msk [vmem:[#allocation2 + $0x189] sm:$0xff] %vm3863_vm13, %v3830_v40 }
 0x546   : > { %v3921_v12 = vpop.permute.xlu0 %3920 }
 0x547   : > { %4004 = vst.msk [vmem:[%s4760_s29 + $0x60] sm:$0xff] %vm1397_vm10, %v3921_v12  ;;  %v3919_v15 = vpop.permute.xlu1 %3918 }
 0x548   : > { %4003 = vst.msk [vmem:[%s4760_s29 + $0x58] sm:$0xff] %vm1397_vm10, %v3919_v15 }
 0x54a   : > { %v3925_v28 = vpop.permute.xlu0 %3924 }
 0x54b   : > { %4006 = vst.msk [vmem:[%s4760_s29 + $0x70] sm:$0xff] %vm1397_vm10, %v3925_v28  ;;  %v3923_v54 = vpop.permute.xlu1 %3922 }
 0x54c   : > { %4005 = vst.msk [vmem:[%s4760_s29 + $0x68] sm:$0xff] %vm1397_vm10, %v3923_v54 }
 0x54e   : > { %v3929_v4 = vpop.permute.xlu0 %3928 }
 0x54f   : > { %4008 = vst.msk [vmem:[%s4760_s29 + $0x80] sm:$0xff] %vm1397_vm10, %v3929_v4  ;;  %v3927_v50 = vpop.permute.xlu1 %3926 }
 0x550   : > { %4007 = vst.msk [vmem:[%s4760_s29 + $0x78] sm:$0xff] %vm1397_vm10, %v3927_v50 }
 0x552   : > { %v3933_v63 = vpop.permute.xlu0 %3932 }
 0x553   : > { %4010 = vst.msk [vmem:[%s4760_s29 + $0x90] sm:$0xff] %vm1397_vm10, %v3933_v63  ;;  %v3931_v61 = vpop.permute.xlu1 %3930 }
 0x554   : > { %4009 = vst.msk [vmem:[%s4760_s29 + $0x88] sm:$0xff] %vm1397_vm10, %v3931_v61 }
 0x556   : > { %v3937_v14 = vpop.permute.xlu0 %3936 }
 0x557   : > { %4012 = vst.msk [vmem:[%s4760_s29 + $0xa0] sm:$0xff] %vm1397_vm10, %v3937_v14  ;;  %v3935_v37 = vpop.permute.xlu1 %3934 }
 0x558   : > { %4011 = vst.msk [vmem:[%s4760_s29 + $0x98] sm:$0xff] %vm1397_vm10, %v3935_v37 }
 0x55a   : > { %v3941_v18 = vpop.permute.xlu0 %3940 }
 0x55b   : > { %4014 = vst.msk [vmem:[%s4760_s29 + $0xb0] sm:$0xff] %vm1397_vm10, %v3941_v18  ;;  %v3939_v20 = vpop.permute.xlu1 %3938 }
 0x55c   : > { %4013 = vst.msk [vmem:[%s4760_s29 + $0xa8] sm:$0xff] %vm1397_vm10, %v3939_v20 }
 0x55e   : > { %v3945_v29 = vpop.permute.xlu0 %3944 }
 0x55f   : > { %4016 = vst.msk [vmem:[%s4760_s29 + $0xc0] sm:$0xff] %vm1397_vm10, %v3945_v29  ;;  %v3943_v52 = vpop.permute.xlu1 %3942 }
 0x560   : > { %4015 = vst.msk [vmem:[%s4760_s29 + $0xb8] sm:$0xff] %vm1397_vm10, %v3943_v52 }
 0x562   : > { %v3949_v55 = vpop.permute.xlu0 %3948 }
 0x563   : > { %4018 = vst.msk [vmem:[%s4760_s29 + $0xd0] sm:$0xff] %vm1397_vm10, %v3949_v55  ;;  %v3947_v2 = vpop.permute.xlu1 %3946 }
 0x564   : > { %4017 = vst.msk [vmem:[%s4760_s29 + $0xc8] sm:$0xff] %vm1397_vm10, %v3947_v2 }
 0x566   : > { %v3953_v6 = vpop.permute.xlu0 %3952 }
 0x567   : > { %4020 = vst.msk [vmem:[%s4760_s29 + $0xe0] sm:$0xff] %vm1397_vm10, %v3953_v6  ;;  %v3951_v24 = vpop.permute.xlu1 %3950 }
 0x568   : > { %4019 = vst.msk [vmem:[%s4760_s29 + $0xd8] sm:$0xff] %vm1397_vm10, %v3951_v24 }
 0x56a   : > { %v3957_v48 = vpop.permute.xlu0 %3956 }
 0x56b   : > { %4022 = vst.msk [vmem:[%s4760_s29 + $0xf0] sm:$0xff] %vm1397_vm10, %v3957_v48  ;;  %v3955_v7 = vpop.permute.xlu1 %3954 }
 0x56c   : > { %4021 = vst.msk [vmem:[%s4760_s29 + $0xe8] sm:$0xff] %vm1397_vm10, %v3955_v7 }
 0x56f   : > { %v3959_v39 = vpop.permute.xlu1 %3958 }
 0x570   : > { %4023 = vst.msk [vmem:[%s4760_s29 + $0xf8] sm:$0xff] %vm1397_vm10, %v3959_v39 }
 0x571 PF: > { %s13_s16 = sadd.s32 1, %s4691_s16   ;;  %s7189_s12 = smov %s4683_s14 }
 0x572   : > { %p10_p8 = scmp.ge.s32.totalorder %s13_s16, 18   ;;  %s7190_s13 = smov %s4687_s15 }
 0x573   : > { %s7191_s14 = smov %s7194_s17  ;;  %s7192_s15 = smov %s7198_s18 }
 0x574   :  { %12 = sbr.rel (!%p10_p8) target bundleno = 3 (0x3), region = 68 }

</bundles_post_ra>
